<compile_context>
chip_gen: v7x
topology: tpu7x:2x2x1
jax: 0.10.0
libtpu: 0.0.40
codegen_flags: <defaults>
</compile_context>

<pallas_src>
import math
from functools import partial

import jax
import jax.numpy as jnp
from jax.experimental import pallas as pl
from jax.experimental.pallas import tpu as pltpu

MXU_DTYPE = jnp.bfloat16            # matmul operand dtype (f32 accumulation)
VMEM_LIMIT = 48 * 1024 * 1024       # safe across v5e/v6e (128 MiB) and v7x (64 MiB)
NEG_INF = -1e9

_SQRT_2_OVER_PI = math.sqrt(2.0 / math.pi)


# ----------------------------------------------------------------------------
# elementwise helpers (usable inside kernels)
# ----------------------------------------------------------------------------
def _gelu(x):
    # tanh-approximate GELU: tanh runs on the EUP slot (effectively free) instead of
    # the ~12-VALU-op erf chain.  Small (~1e-3) deviation from exact nn.GELU.
    return 0.5 * x * (1.0 + jnp.tanh(_SQRT_2_OVER_PI * (x + 0.044715 * (x * x * x))))


def _layernorm(x, g, b, eps=1e-6):   # module uses partial(nn.LayerNorm, eps=1e-06)
    mean = jnp.mean(x, axis=-1, keepdims=True)
    var = jnp.mean((x - mean) ** 2, axis=-1, keepdims=True)
    return (x - mean) * jax.lax.rsqrt(var + eps) * g + b


def _pick_block(total, target, min_grid=2):
    """Largest divisor of `total` <= target, preferring grid length >= min_grid."""
    best_pref = best_any = None
    for d in range(1, total + 1):
        if total % d:
            continue
        if d <= target:
            best_any = d
            if total // d >= min_grid:
                best_pref = d
    if best_pref is not None:
        return best_pref
    return best_any if best_any is not None else total


# ----------------------------------------------------------------------------
# Pallas kernels
# ----------------------------------------------------------------------------
def attn_kernel(x_ref, g_ref, b_ref, wqkv_ref, bqkv_ref, bias_ref, wo_ref, bo_ref,
                o_ref, *, num_heads, scale):
    """Fused: LN1 + fused QKV + windowed MHSA (block-diag mask + RPE) + proj + residual.

    x_ref: (SB, T, C) -- SB window-row strips of T = window_size * W tokens each,
    in NHWC token order.  bias_ref: (heads, T, T) additive mask+RPE.
    """
    SB, T, C = x_ref.shape
    hd = C // num_heads
    M = SB * T

    x = x_ref[...].astype(jnp.float32)
    xf = x.reshape(M, C)                                   # residual (pre-LN)
    xn = _layernorm(xf, g_ref[...], b_ref[...])

    # single fused QKV matmul: (M, C) @ (C, 3C)
    qkv = jnp.dot(xn.astype(wqkv_ref.dtype), wqkv_ref[...],
                  preferred_element_type=jnp.float32) + bqkv_ref[...]
    q = qkv[:, :C].reshape(SB, T, C)
    k = qkv[:, C:2 * C].reshape(SB, T, C)
    v = qkv[:, 2 * C:].reshape(SB, T, C)

    # per-head attention; heads are written contiguously along lanes so one
    # C-contraction matmul performs the whole output projection.
    # TODO(synk): for large head counts fold the head axis into the einsum batch dim.
    heads = []
    for h in range(num_heads):
        lo = h * hd
        qh = q[:, :, lo:lo + hd].astype(MXU_DTYPE)
        kh = k[:, :, lo:lo + hd].astype(MXU_DTYPE)
        vh = v[:, :, lo:lo + hd].astype(MXU_DTYPE)

        s = jnp.einsum("sqd,skd->sqk", qh, kh,
                       preferred_element_type=jnp.float32) * scale
        s = s + bias_ref[h]                                # block-diag window mask + RPE
        s = s - jnp.max(s, axis=-1, keepdims=True)
        p = jnp.exp(s)
        p = p * pl.reciprocal(jnp.sum(p, axis=-1, keepdims=True), approx=True)

        heads.append(jnp.einsum("sqk,skd->sqd", p.astype(MXU_DTYPE), vh,
                                preferred_element_type=jnp.float32))

    o_cat = jnp.concatenate(heads, axis=-1).reshape(M, C)   # (M, C), heads on lanes
    proj = jnp.dot(o_cat.astype(MXU_DTYPE), wo_ref[...],
                   preferred_element_type=jnp.float32) + bo_ref[...]

    y = xf + proj
    o_ref[...] = y.reshape(SB, T, C).astype(o_ref.dtype)


def mlp_kernel(x_ref, g_ref, b_ref, w1_ref, s1_ref, t1_ref, dw_ref, s2_ref, t2_ref,
               w2_ref, s3_ref, t3_ref, o_ref, pad_ref, *, H, W):
    """Fused MlpDWBN branch for one image:
       LN2 + fc1+BN1+GELU + dw3x3+BN2+GELU + fc2+BN3+GELU + residual,
       output stored already transposed to (C, H*W) (lane-dense, NCHW-ready).

    # TODO(synk): for large H / hidden (v7x 64 MiB VMEM) tile over row strips with a
    # 1-row halo instead of whole-image blocks.
    """
    C = x_ref.shape[-1]
    hidden = w1_ref.shape[-1]
    N = H * W

    x = x_ref[0].astype(jnp.float32)                       # (H, W, C)
    xf = x.reshape(N, C)                                   # residual (pre-LN2)
    xn = _layernorm(xf, g_ref[...], b_ref[...])

    # fc1 (1x1 conv == matmul) + folded BN1 + GELU
    h1 = jnp.dot(xn.astype(w1_ref.dtype), w1_ref[...],
                 preferred_element_type=jnp.float32)
    h1 = _gelu(h1 * s1_ref[...] + t1_ref[...]).reshape(H, W, hidden)

    # depthwise 3x3, pad=1: persistent VMEM halo scratch; only the 1-px ring is
    # re-zeroed each step (interior fully rewritten from h1 below).
    zrow = jnp.zeros((W + 2, hidden), jnp.float32)
    zcol = jnp.zeros((H + 2, hidden), jnp.float32)
    pad_ref[0] = zrow
    pad_ref[H + 1] = zrow
    pad_ref[:, 0, :] = zcol
    pad_ref[:, W + 1, :] = zcol
    pad_ref[pl.ds(1, H), pl.ds(1, W), :] = h1
    xp = pad_ref[...]                                      # (H+2, W+2, hidden)

    w = dw_ref[...].astype(jnp.float32)                    # (3, 3, hidden)
    # TODO(synk): dx taps via pltpu.roll (XLU) instead of shifted copies.
    cols = [xp[:, dx:dx + W, :] for dx in range(3)]        # 3 shifted copies
    acc = jnp.zeros((H, W, hidden), jnp.float32)
    for dy in range(3):
        for dx in range(3):
            acc = acc + cols[dx][dy:dy + H] * w[dy, dx, :]
    h2 = _gelu(acc * s2_ref[...] + t2_ref[...]).reshape(N, hidden)

    # fc2 (1x1) + folded BN3 + GELU + residual
    y = jnp.dot(h2.astype(w2_ref.dtype), w2_ref[...],
                preferred_element_type=jnp.float32)
    y = _gelu(y * s3_ref[...] + t3_ref[...])
    out = xf + y                                           # (N, C)

    # lane-dense store: (C, N) so the block output is NCHW-ready.
    o_ref[0] = jnp.transpose(out).astype(o_ref.dtype)


# ----------------------------------------------------------------------------
# pallas_call wrappers
# ----------------------------------------------------------------------------
def attention_stage(strips, pp, *, num_heads):
    """strips: (S, T, C) window-row strips -> strips + attn(LN1(strips))."""
    S, T, C = strips.shape
    hd = C // num_heads
    SB = _pick_block(S, max(1, 512 // T))                  # strips per grid step
    c2 = lambda i: (0, 0)
    c3 = lambda i: (0, 0, 0)

    return pl.pallas_call(
        partial(attn_kernel, num_heads=num_heads, scale=hd ** -0.5),
        grid=(S // SB,),
        in_specs=[
            pl.BlockSpec((SB, T, C), lambda i: (i, 0, 0)),
            pl.BlockSpec((1, C), c2), pl.BlockSpec((1, C), c2),          # ln1 g, b
            pl.BlockSpec((C, 3 * C), c2), pl.BlockSpec((1, 3 * C), c2),  # fused qkv
            pl.BlockSpec((num_heads, T, T), c3),                          # mask + rpe
            pl.BlockSpec((C, C), c2), pl.BlockSpec((1, C), c2),           # out proj
        ],
        out_specs=pl.BlockSpec((SB, T, C), lambda i: (i, 0, 0)),
        out_shape=jax.ShapeDtypeStruct((S, T, C), strips.dtype),
        compiler_params=pltpu.CompilerParams(
            dimension_semantics=("parallel",),
            vmem_limit_bytes=VMEM_LIMIT),
    )(strips, pp["ln1_g"], pp["ln1_b"], pp["wqkv"], pp["bqkv"],
      pp["attn_bias"], pp["wo"], pp["bo"])


def mlp_stage(x_nhwc, pp, *, H, W):
    """x_nhwc: (B, H, W, C) -> (B, C, H*W) = residual + MlpDWBN(LN2(x))."""
    B, _, _, C = x_nhwc.shape
    hidden = pp["w1"].shape[-1]
    N = H * W
    c2 = lambda b: (0, 0)
    c3 = lambda b: (0, 0, 0)

    return pl.pallas_call(
        partial(mlp_kernel, H=H, W=W),
        grid=(B,),
        in_specs=[
            pl.BlockSpec((1, H, W, C), lambda b: (b, 0, 0, 0)),
            pl.BlockSpec((1, C), c2), pl.BlockSpec((1, C), c2),           # ln2 g, b
            pl.BlockSpec((C, hidden), c2),                                 # fc1
            pl.BlockSpec((1, hidden), c2), pl.BlockSpec((1, hidden), c2),  # BN1 s, t
            pl.BlockSpec((3, 3, hidden), c3),                              # dw3x3
            pl.BlockSpec((1, hidden), c2), pl.BlockSpec((1, hidden), c2),  # BN2 s, t
            pl.BlockSpec((hidden, C), c2),                                 # fc2
            pl.BlockSpec((1, C), c2), pl.BlockSpec((1, C), c2),            # BN3 s, t
        ],
        out_specs=pl.BlockSpec((1, C, N), lambda b: (b, 0, 0)),
        out_shape=jax.ShapeDtypeStruct((B, C, N), x_nhwc.dtype),
        scratch_shapes=[pltpu.VMEM((H + 2, W + 2, hidden), jnp.float32)],
        compiler_params=pltpu.CompilerParams(
            dimension_semantics=("parallel",),
            vmem_limit_bytes=VMEM_LIMIT),
    )(x_nhwc, pp["ln2_g"], pp["ln2_b"], pp["w1"], pp["s1"], pp["t1"],
      pp["dw_w"], pp["s2"], pp["t2"], pp["w2"], pp["s3"], pp["t3"])


# ----------------------------------------------------------------------------
# parameters: init + one-time packing (hoisted casts / fusions / BN folding)
# ----------------------------------------------------------------------------
def init_params(key, C, num_heads, window_size, hidden):
    ks = jax.random.split(key, 21)
    n = lambda k, s, std=0.02: std * jax.random.normal(k, s, jnp.float32)
    p = {}
    p["ln1_g"] = 1.0 + n(ks[0], (C,)); p["ln1_b"] = n(ks[1], (C,))
    p["ln2_g"] = 1.0 + n(ks[2], (C,)); p["ln2_b"] = n(ks[3], (C,))
    p["qkv_w"] = n(ks[4], (C, 3 * C)); p["qkv_b"] = n(ks[5], (3 * C,))
    p["proj_w"] = n(ks[6], (C, C));    p["proj_b"] = n(ks[7], (C,))
    p["rpe_table"] = n(ks[8], ((2 * window_size - 1) ** 2, num_heads))
    p["fc1_w"] = n(ks[9], (C, hidden));   p["fc1_b"] = n(ks[10], (hidden,))
    p["bn1_g"] = 1.0 + n(ks[11], (hidden,)); p["bn1_b"] = n(ks[12], (hidden,))
    p["dw_w"] = n(ks[13], (3, 3, hidden)); p["dw_b"] = n(ks[14], (hidden,))
    p["bn2_g"] = 1.0 + n(ks[15], (hidden,)); p["bn2_b"] = n(ks[16], (hidden,))
    p["fc2_w"] = n(ks[17], (hidden, C));  p["fc2_b"] = n(ks[18], (C,))
    p["bn3_g"] = 1.0 + n(ks[19], (C,)); p["bn3_b"] = n(ks[20], (C,))
    return p


def build_attn_bias(rpe_table, window_size, W):
    """(heads, T, T) additive bias for one window-row strip of T = ws*W tokens:
    Swin-style relative position bias inside each window, NEG_INF across windows.
    # TODO(synk): InterlacedPoolAttention's exact MultiheadAttention-RPE source was
    # not provided; this is the standard HRFormer/Swin windowed formulation.
    """
    ws = window_size
    T = ws * W
    t = jnp.arange(T)
    row = t // W                        # local row within the window (strip height == ws)
    col = t % W
    win = col // ws                     # window index along the strip
    lcol = col % ws                     # local col within the window
    rel_r = row[:, None] - row[None, :] + (ws - 1)
    rel_c = lcol[:, None] - lcol[None, :] + (ws - 1)
    idx = rel_r * (2 * ws - 1) + rel_c                        # (T, T)
    bias = jnp.transpose(rpe_table[idx], (2, 0, 1))           # (heads, T, T)
    same = (win[:, None] == win[None, :])[None]
    return jnp.where(same, bias, NEG_INF).astype(jnp.float32)


def pack_params(p, *, window_size, W):
    """One-time weight packing: fused bf16 QKV, bf16 matmul weights, BN folded into
    per-channel scale/shift (eval mode, running_mean=0 / running_var=1), attention
    bias mask.  Hoisted out of the jitted forward (review item: no per-call casts)."""
    bn_eps = 1e-5

    def bn_fold(gamma, beta, conv_bias, mean=0.0, var=1.0):
        scale = gamma / jnp.sqrt(var + bn_eps)
        shift = beta + scale * (conv_bias - mean)
        return scale.reshape(1, -1), shift.reshape(1, -1)

    pp = {}
    pp["ln1_g"] = p["ln1_g"].reshape(1, -1); pp["ln1_b"] = p["ln1_b"].reshape(1, -1)
    pp["ln2_g"] = p["ln2_g"].reshape(1, -1); pp["ln2_b"] = p["ln2_b"].reshape(1, -1)
    pp["wqkv"] = p["qkv_w"].astype(MXU_DTYPE)               # (C, 3C) fused
    pp["bqkv"] = p["qkv_b"].reshape(1, -1)
    pp["wo"] = p["proj_w"].astype(MXU_DTYPE)
    pp["bo"] = p["proj_b"].reshape(1, -1)
    pp["attn_bias"] = build_attn_bias(p["rpe_table"], window_size, W)
    pp["w1"] = p["fc1_w"].astype(MXU_DTYPE)
    pp["s1"], pp["t1"] = bn_fold(p["bn1_g"], p["bn1_b"], p["fc1_b"])
    pp["dw_w"] = p["dw_w"]
    pp["s2"], pp["t2"] = bn_fold(p["bn2_g"], p["bn2_b"], p["dw_b"])
    pp["w2"] = p["fc2_w"].astype(MXU_DTYPE)
    pp["s3"], pp["t3"] = bn_fold(p["bn3_g"], p["bn3_b"], p["fc2_b"])
    return pp


# ----------------------------------------------------------------------------
# forward (GeneralTransformerBlock)
# ----------------------------------------------------------------------------
def general_transformer_block(x_nchw, pp, *, num_heads, window_size):
    B, C, H, W = x_nchw.shape
    ws = window_size
    assert H % ws == 0 and W % ws == 0 and C % num_heads == 0
    N = H * W
    T = ws * W
    S = B * (H // ws)                                 # number of window-row strips

    # single NCHW -> NHWC relayout; the window partition/reverse is folded into the
    # attention kernel's strip blocking + block-diagonal bias (no extra HBM passes),
    # and the MLP kernel emits NCHW directly (no trailing transpose).
    tokens = jnp.transpose(x_nchw, (0, 2, 3, 1))      # (B, H, W, C)
    strips = tokens.reshape(S, T, C)                  # free reshape

    # ---- attention branch: x + attn(norm1(x)) ----
    t1 = attention_stage(strips, pp, num_heads=num_heads)          # (S, T, C)

    # ---- MLP branch: x + MlpDWBN(norm2(x), H, W), fully fused per image ----
    out_cn = mlp_stage(t1.reshape(B, H, W, C), pp, H=H, W=W)       # (B, C, N)
    return out_cn.reshape(B, C, H, W)


# ----------------------------------------------------------------------------
if __name__ == "__main__":
    B, C, H, W = 2, 32, 16, 16          # inplanes = planes = 32
    num_heads, window_size, mlp_ratio = 2, 4, 4.0
    hidden = int(C * mlp_ratio)         # 128 -> lane-dense hidden activations

    key = jax.random.PRNGKey(0)
    kx, kp = jax.random.split(key)
    x = jax.random.normal(kx, (B, C, H, W), jnp.float32)
    params = init_params(kp, C, num_heads, window_size, hidden)
    packed = pack_params(params, window_size=window_size, W=W)     # one-time packing

    fwd = jax.jit(partial(general_transformer_block,
                          num_heads=num_heads, window_size=window_size))
    out = jax.block_until_ready(fwd(x, packed))

    assert out.shape == (B, C, H, W) and out.dtype == jnp.float32
    assert bool(jnp.all(jnp.isfinite(out)))
    print("KERNEL_OK")
</pallas_src>

<mosaic_0001>
module attributes {stable_mosaic.version = 11 : i64} {
  func.func @attn_kernel(%arg0: i32, %arg1: memref<4x64x32xf32, #tpu.memory_space<vmem>>, %arg2: memref<1x32xf32, #tpu.memory_space<vmem>>, %arg3: memref<1x32xf32, #tpu.memory_space<vmem>>, %arg4: memref<32x96xbf16, #tpu.memory_space<vmem>>, %arg5: memref<1x96xf32, #tpu.memory_space<vmem>>, %arg6: memref<2x64x64xf32, #tpu.memory_space<vmem>>, %arg7: memref<32x32xbf16, #tpu.memory_space<vmem>>, %arg8: memref<1x32xf32, #tpu.memory_space<vmem>>, %arg9: memref<4x64x32xf32, #tpu.memory_space<vmem>>) attributes {dimension_semantics = [#tpu.dimension_semantics<parallel>], iteration_bounds = array<i64: 2>, scalar_prefetch = 0 : i64, scratch_operands = 0 : i64, tpu.core_type = #tpu.core_type<tc>, window_params = [{transform_indices = @transform_0, window_bounds = array<i64: 4, 64, 32>}, {pipeline_mode = #tpu.pipeline_mode<synchronous>, transform_indices = @transform_1, window_bounds = array<i64: 1, 32>}, {pipeline_mode = #tpu.pipeline_mode<synchronous>, transform_indices = @transform_2, window_bounds = array<i64: 1, 32>}, {pipeline_mode = #tpu.pipeline_mode<synchronous>, transform_indices = @transform_3, window_bounds = array<i64: 32, 96>}, {pipeline_mode = #tpu.pipeline_mode<synchronous>, transform_indices = @transform_4, window_bounds = array<i64: 1, 96>}, {pipeline_mode = #tpu.pipeline_mode<synchronous>, transform_indices = @transform_5, window_bounds = array<i64: 2, 64, 64>}, {pipeline_mode = #tpu.pipeline_mode<synchronous>, transform_indices = @transform_6, window_bounds = array<i64: 32, 32>}, {pipeline_mode = #tpu.pipeline_mode<synchronous>, transform_indices = @transform_7, window_bounds = array<i64: 1, 32>}, {transform_indices = @transform_8, window_bounds = array<i64: 4, 64, 32>}]} {
    %c0 = arith.constant 0 : index
    %c0_0 = arith.constant 0 : index
    %c0_1 = arith.constant 0 : index
    %0 = vector.load %arg1[%c0, %c0_0, %c0_1] : memref<4x64x32xf32, #tpu.memory_space<vmem>>, vector<4x64x32xf32>
    %1 = vector.shape_cast %0 : vector<4x64x32xf32> to vector<256x32xf32>
    %c0_2 = arith.constant 0 : index
    %c0_3 = arith.constant 0 : index
    %2 = vector.load %arg2[%c0_2, %c0_3] : memref<1x32xf32, #tpu.memory_space<vmem>>, vector<1x32xf32>
    %c0_4 = arith.constant 0 : index
    %c0_5 = arith.constant 0 : index
    %3 = vector.load %arg3[%c0_4, %c0_5] : memref<1x32xf32, #tpu.memory_space<vmem>>, vector<1x32xf32>
    %cst = arith.constant dense<0.000000e+00> : vector<256xf32>
    %4 = vector.multi_reduction <add>, %1, %cst [1] : vector<256x32xf32> to vector<256xf32>
    %5 = vector.shape_cast %4 : vector<256xf32> to vector<256x1xf32>
    %cst_6 = arith.constant 3.200000e+01 : f32
    %6 = vector.broadcast %cst_6 : f32 to vector<256x1xf32>
    %7 = arith.divf %5, %6 : vector<256x1xf32>
    %8 = vector.broadcast %7 : vector<256x1xf32> to vector<256x32xf32>
    %9 = arith.subf %1, %8 : vector<256x32xf32>
    %10 = arith.mulf %9, %9 : vector<256x32xf32>
    %cst_7 = arith.constant dense<0.000000e+00> : vector<256xf32>
    %11 = vector.multi_reduction <add>, %10, %cst_7 [1] : vector<256x32xf32> to vector<256xf32>
    %12 = vector.shape_cast %11 : vector<256xf32> to vector<256x1xf32>
    %cst_8 = arith.constant 3.200000e+01 : f32
    %13 = vector.broadcast %cst_8 : f32 to vector<256x1xf32>
    %14 = arith.divf %12, %13 : vector<256x1xf32>
    %15 = vector.broadcast %7 : vector<256x1xf32> to vector<256x32xf32>
    %16 = arith.subf %1, %15 : vector<256x32xf32>
    %cst_9 = arith.constant 9.99999997E-7 : f32
    %17 = vector.broadcast %cst_9 : f32 to vector<256x1xf32>
    %18 = arith.addf %14, %17 : vector<256x1xf32>
    %19 = math.rsqrt %18 : vector<256x1xf32>
    %20 = vector.broadcast %19 : vector<256x1xf32> to vector<256x32xf32>
    %21 = arith.mulf %16, %20 : vector<256x32xf32>
    %22 = vector.broadcast %2 : vector<1x32xf32> to vector<256x32xf32>
    %23 = arith.mulf %21, %22 : vector<256x32xf32>
    %24 = vector.broadcast %3 : vector<1x32xf32> to vector<256x32xf32>
    %25 = arith.addf %23, %24 : vector<256x32xf32>
    %26 = arith.truncf %25 : vector<256x32xf32> to vector<256x32xbf16>
    %c0_10 = arith.constant 0 : index
    %c0_11 = arith.constant 0 : index
    %27 = vector.load %arg4[%c0_10, %c0_11] : memref<32x96xbf16, #tpu.memory_space<vmem>>, vector<32x96xbf16>
    %cst_12 = arith.constant dense<0.000000e+00> : vector<256x96xf32>
    %28 = tpu.matmul %26, %27, %cst_12 {dimension_numbers = #tpu.dot_dimension_numbers<[1], [0], [0], [1], [0, 0, 1, 1], [], []>} : vector<256x32xbf16>, vector<32x96xbf16>, vector<256x96xf32> -> vector<256x96xf32>
    %c0_13 = arith.constant 0 : index
    %c0_14 = arith.constant 0 : index
    %29 = vector.load %arg5[%c0_13, %c0_14] : memref<1x96xf32, #tpu.memory_space<vmem>>, vector<1x96xf32>
    %30 = vector.broadcast %29 : vector<1x96xf32> to vector<256x96xf32>
    %31 = arith.addf %28, %30 : vector<256x96xf32>
    %32 = vector.extract_strided_slice %31 {offsets = [0, 0], sizes = [256, 32], strides = [1, 1]} : vector<256x96xf32> to vector<256x32xf32>
    %33 = vector.shape_cast %32 : vector<256x32xf32> to vector<4x64x32xf32>
    %34 = vector.extract_strided_slice %31 {offsets = [0, 32], sizes = [256, 32], strides = [1, 1]} : vector<256x96xf32> to vector<256x32xf32>
    %35 = vector.shape_cast %34 : vector<256x32xf32> to vector<4x64x32xf32>
    %36 = vector.extract_strided_slice %31 {offsets = [0, 64], sizes = [256, 32], strides = [1, 1]} : vector<256x96xf32> to vector<256x32xf32>
    %37 = vector.shape_cast %36 : vector<256x32xf32> to vector<4x64x32xf32>
    %38 = vector.extract_strided_slice %33 {offsets = [0, 0, 0], sizes = [4, 64, 16], strides = [1, 1, 1]} : vector<4x64x32xf32> to vector<4x64x16xf32>
    %39 = arith.truncf %38 : vector<4x64x16xf32> to vector<4x64x16xbf16>
    %40 = vector.extract_strided_slice %35 {offsets = [0, 0, 0], sizes = [4, 64, 16], strides = [1, 1, 1]} : vector<4x64x32xf32> to vector<4x64x16xf32>
    %41 = arith.truncf %40 : vector<4x64x16xf32> to vector<4x64x16xbf16>
    %42 = vector.extract_strided_slice %37 {offsets = [0, 0, 0], sizes = [4, 64, 16], strides = [1, 1, 1]} : vector<4x64x32xf32> to vector<4x64x16xf32>
    %43 = arith.truncf %42 : vector<4x64x16xf32> to vector<4x64x16xbf16>
    "tpu.trace_start"() <{level = 10 : i32, message = "sqd,skd->sqk"}> : () -> ()
    %cst_15 = arith.constant dense<0.000000e+00> : vector<4x64x64xf32>
    %44 = tpu.matmul %39, %41, %cst_15 {dimension_numbers = #tpu.dot_dimension_numbers<[2], [2], [1], [1], [0, 0, 0, 1, 1, 1], [0], [0]>} : vector<4x64x16xbf16>, vector<4x64x16xbf16>, vector<4x64x64xf32> -> vector<4x64x64xf32>
    "tpu.trace_stop"() : () -> ()
    %cst_16 = arith.constant 2.500000e-01 : f32
    %45 = vector.broadcast %cst_16 : f32 to vector<4x64x64xf32>
    %46 = arith.mulf %44, %45 : vector<4x64x64xf32>
    %c0_17 = arith.constant 0 : index
    %c0_18 = arith.constant 0 : index
    %c0_19 = arith.constant 0 : index
    %47 = vector.load %arg6[%c0_17, %c0_18, %c0_19] : memref<2x64x64xf32, #tpu.memory_space<vmem>>, vector<1x64x64xf32>
    %48 = vector.shape_cast %47 : vector<1x64x64xf32> to vector<64x64xf32>
    %49 = vector.shape_cast %48 : vector<64x64xf32> to vector<1x64x64xf32>
    %50 = vector.broadcast %49 : vector<1x64x64xf32> to vector<4x64x64xf32>
    %51 = arith.addf %46, %50 : vector<4x64x64xf32>
    %cst_20 = arith.constant dense<0xFF800000> : vector<4x64xf32>
    %52 = vector.multi_reduction <maximumf>, %51, %cst_20 [2] : vector<4x64x64xf32> to vector<4x64xf32>
    %53 = vector.shape_cast %52 : vector<4x64xf32> to vector<4x64x1xf32>
    %54 = vector.broadcast %53 : vector<4x64x1xf32> to vector<4x64x64xf32>
    %55 = arith.subf %51, %54 : vector<4x64x64xf32>
    %56 = math.exp %55 : vector<4x64x64xf32>
    %cst_21 = arith.constant dense<0.000000e+00> : vector<4x64xf32>
    %57 = vector.multi_reduction <add>, %56, %cst_21 [2] : vector<4x64x64xf32> to vector<4x64xf32>
    %58 = vector.shape_cast %57 : vector<4x64xf32> to vector<4x64x1xf32>
    %59 = tpu.reciprocal %58 {approx = true} : vector<4x64x1xf32> -> vector<4x64x1xf32>
    %60 = vector.broadcast %59 : vector<4x64x1xf32> to vector<4x64x64xf32>
    %61 = arith.mulf %56, %60 : vector<4x64x64xf32>
    %62 = arith.truncf %61 : vector<4x64x64xf32> to vector<4x64x64xbf16>
    "tpu.trace_start"() <{level = 10 : i32, message = "sqk,skd->sqd"}> : () -> ()
    %cst_22 = arith.constant dense<0.000000e+00> : vector<4x64x16xf32>
    %63 = tpu.matmul %62, %43, %cst_22 {dimension_numbers = #tpu.dot_dimension_numbers<[2], [1], [1], [2], [0, 0, 0, 1, 1, 2], [0], [0]>} : vector<4x64x64xbf16>, vector<4x64x16xbf16>, vector<4x64x16xf32> -> vector<4x64x16xf32>
    "tpu.trace_stop"() : () -> ()
    %64 = vector.extract_strided_slice %33 {offsets = [0, 0, 16], sizes = [4, 64, 16], strides = [1, 1, 1]} : vector<4x64x32xf32> to vector<4x64x16xf32>
    %65 = arith.truncf %64 : vector<4x64x16xf32> to vector<4x64x16xbf16>
    %66 = vector.extract_strided_slice %35 {offsets = [0, 0, 16], sizes = [4, 64, 16], strides = [1, 1, 1]} : vector<4x64x32xf32> to vector<4x64x16xf32>
    %67 = arith.truncf %66 : vector<4x64x16xf32> to vector<4x64x16xbf16>
    %68 = vector.extract_strided_slice %37 {offsets = [0, 0, 16], sizes = [4, 64, 16], strides = [1, 1, 1]} : vector<4x64x32xf32> to vector<4x64x16xf32>
    %69 = arith.truncf %68 : vector<4x64x16xf32> to vector<4x64x16xbf16>
    "tpu.trace_start"() <{level = 10 : i32, message = "sqd,skd->sqk"}> : () -> ()
    %cst_23 = arith.constant dense<0.000000e+00> : vector<4x64x64xf32>
    %70 = tpu.matmul %65, %67, %cst_23 {dimension_numbers = #tpu.dot_dimension_numbers<[2], [2], [1], [1], [0, 0, 0, 1, 1, 1], [0], [0]>} : vector<4x64x16xbf16>, vector<4x64x16xbf16>, vector<4x64x64xf32> -> vector<4x64x64xf32>
    "tpu.trace_stop"() : () -> ()
    %cst_24 = arith.constant 2.500000e-01 : f32
    %71 = vector.broadcast %cst_24 : f32 to vector<4x64x64xf32>
    %72 = arith.mulf %70, %71 : vector<4x64x64xf32>
    %c1 = arith.constant 1 : index
    %c0_25 = arith.constant 0 : index
    %c0_26 = arith.constant 0 : index
    %73 = vector.load %arg6[%c1, %c0_25, %c0_26] : memref<2x64x64xf32, #tpu.memory_space<vmem>>, vector<1x64x64xf32>
    %74 = vector.shape_cast %73 : vector<1x64x64xf32> to vector<64x64xf32>
    %75 = vector.shape_cast %74 : vector<64x64xf32> to vector<1x64x64xf32>
    %76 = vector.broadcast %75 : vector<1x64x64xf32> to vector<4x64x64xf32>
    %77 = arith.addf %72, %76 : vector<4x64x64xf32>
    %cst_27 = arith.constant dense<0xFF800000> : vector<4x64xf32>
    %78 = vector.multi_reduction <maximumf>, %77, %cst_27 [2] : vector<4x64x64xf32> to vector<4x64xf32>
    %79 = vector.shape_cast %78 : vector<4x64xf32> to vector<4x64x1xf32>
    %80 = vector.broadcast %79 : vector<4x64x1xf32> to vector<4x64x64xf32>
    %81 = arith.subf %77, %80 : vector<4x64x64xf32>
    %82 = math.exp %81 : vector<4x64x64xf32>
    %cst_28 = arith.constant dense<0.000000e+00> : vector<4x64xf32>
    %83 = vector.multi_reduction <add>, %82, %cst_28 [2] : vector<4x64x64xf32> to vector<4x64xf32>
    %84 = vector.shape_cast %83 : vector<4x64xf32> to vector<4x64x1xf32>
    %85 = tpu.reciprocal %84 {approx = true} : vector<4x64x1xf32> -> vector<4x64x1xf32>
    %86 = vector.broadcast %85 : vector<4x64x1xf32> to vector<4x64x64xf32>
    %87 = arith.mulf %82, %86 : vector<4x64x64xf32>
    %88 = arith.truncf %87 : vector<4x64x64xf32> to vector<4x64x64xbf16>
    "tpu.trace_start"() <{level = 10 : i32, message = "sqk,skd->sqd"}> : () -> ()
    %cst_29 = arith.constant dense<0.000000e+00> : vector<4x64x16xf32>
    %89 = tpu.matmul %88, %69, %cst_29 {dimension_numbers = #tpu.dot_dimension_numbers<[2], [1], [1], [2], [0, 0, 0, 1, 1, 2], [0], [0]>} : vector<4x64x64xbf16>, vector<4x64x16xbf16>, vector<4x64x16xf32> -> vector<4x64x16xf32>
    "tpu.trace_stop"() : () -> ()
    %90 = tpu.concatenate %63, %89 in 2 : vector<4x64x16xf32>, vector<4x64x16xf32> -> vector<4x64x32xf32>
    %91 = vector.shape_cast %90 : vector<4x64x32xf32> to vector<256x32xf32>
    %92 = arith.truncf %91 : vector<256x32xf32> to vector<256x32xbf16>
    %c0_30 = arith.constant 0 : index
    %c0_31 = arith.constant 0 : index
    %93 = vector.load %arg7[%c0_30, %c0_31] : memref<32x32xbf16, #tpu.memory_space<vmem>>, vector<32x32xbf16>
    %cst_32 = arith.constant dense<0.000000e+00> : vector<256x32xf32>
    %94 = tpu.matmul %92, %93, %cst_32 {dimension_numbers = #tpu.dot_dimension_numbers<[1], [0], [0], [1], [0, 0, 1, 1], [], []>} : vector<256x32xbf16>, vector<32x32xbf16>, vector<256x32xf32> -> vector<256x32xf32>
    %c0_33 = arith.constant 0 : index
    %c0_34 = arith.constant 0 : index
    %95 = vector.load %arg8[%c0_33, %c0_34] : memref<1x32xf32, #tpu.memory_space<vmem>>, vector<1x32xf32>
    %96 = vector.broadcast %95 : vector<1x32xf32> to vector<256x32xf32>
    %97 = arith.addf %94, %96 : vector<256x32xf32>
    %98 = arith.addf %1, %97 : vector<256x32xf32>
    %99 = vector.shape_cast %98 : vector<256x32xf32> to vector<4x64x32xf32>
    %c0_35 = arith.constant 0 : index
    %c0_36 = arith.constant 0 : index
    %c0_37 = arith.constant 0 : index
    %100 = vector.load %arg9[%c0_35, %c0_36, %c0_37] : memref<4x64x32xf32, #tpu.memory_space<vmem>>, vector<4x64x32xf32>
    tpu.vector_store %arg9[%c0_35, %c0_36, %c0_37], %99 {strides = array<i32>} : memref<4x64x32xf32, #tpu.memory_space<vmem>>, vector<4x64x32xf32>,
    return
  }
  func.func @transform_0(%arg0: i32) -> (i32, i32, i32) {
    %c0_i32 = arith.constant 0 : i32
    %c0_i32_0 = arith.constant 0 : i32
    %c0_i32_1 = arith.constant 0 : i32
    return %arg0, %c0_i32, %c0_i32_0 : i32, i32, i32
  }
  func.func @transform_1(%arg0: i32) -> (i32, i32) {
    %c0_i32 = arith.constant 0 : i32
    %c0_i32_0 = arith.constant 0 : i32
    %c0_i32_1 = arith.constant 0 : i32
    return %c0_i32, %c0_i32_0 : i32, i32
  }
  func.func @transform_2(%arg0: i32) -> (i32, i32) {
    %c0_i32 = arith.constant 0 : i32
    %c0_i32_0 = arith.constant 0 : i32
    %c0_i32_1 = arith.constant 0 : i32
    return %c0_i32, %c0_i32_0 : i32, i32
  }
  func.func @transform_3(%arg0: i32) -> (i32, i32) {
    %c0_i32 = arith.constant 0 : i32
    %c0_i32_0 = arith.constant 0 : i32
    %c0_i32_1 = arith.constant 0 : i32
    return %c0_i32, %c0_i32_0 : i32, i32
  }
  func.func @transform_4(%arg0: i32) -> (i32, i32) {
    %c0_i32 = arith.constant 0 : i32
    %c0_i32_0 = arith.constant 0 : i32
    %c0_i32_1 = arith.constant 0 : i32
    return %c0_i32, %c0_i32_0 : i32, i32
  }
  func.func @transform_5(%arg0: i32) -> (i32, i32, i32) {
    %c0_i32 = arith.constant 0 : i32
    %c0_i32_0 = arith.constant 0 : i32
    %c0_i32_1 = arith.constant 0 : i32
    %c0_i32_2 = arith.constant 0 : i32
    return %c0_i32, %c0_i32_0, %c0_i32_1 : i32, i32, i32
  }
  func.func @transform_6(%arg0: i32) -> (i32, i32) {
    %c0_i32 = arith.constant 0 : i32
    %c0_i32_0 = arith.constant 0 : i32
    %c0_i32_1 = arith.constant 0 : i32
    return %c0_i32, %c0_i32_0 : i32, i32
  }
  func.func @transform_7(%arg0: i32) -> (i32, i32) {
    %c0_i32 = arith.constant 0 : i32
    %c0_i32_0 = arith.constant 0 : i32
    %c0_i32_1 = arith.constant 0 : i32
    return %c0_i32, %c0_i32_0 : i32, i32
  }
  func.func @transform_8(%arg0: i32) -> (i32, i32, i32) {
    %c0_i32 = arith.constant 0 : i32
    %c0_i32_0 = arith.constant 0 : i32
    %c0_i32_1 = arith.constant 0 : i32
    return %arg0, %c0_i32, %c0_i32_0 : i32, i32, i32
  }
}

module attributes {stable_mosaic.version = 11 : i64} {
  func.func @mlp_kernel(%arg0: i32, %arg1: memref<1x16x16x32xf32, #tpu.memory_space<vmem>>, %arg2: memref<1x32xf32, #tpu.memory_space<vmem>>, %arg3: memref<1x32xf32, #tpu.memory_space<vmem>>, %arg4: memref<32x128xbf16, #tpu.memory_space<vmem>>, %arg5: memref<1x128xf32, #tpu.memory_space<vmem>>, %arg6: memref<1x128xf32, #tpu.memory_space<vmem>>, %arg7: memref<3x3x128xf32, #tpu.memory_space<vmem>>, %arg8: memref<1x128xf32, #tpu.memory_space<vmem>>, %arg9: memref<1x128xf32, #tpu.memory_space<vmem>>, %arg10: memref<128x32xbf16, #tpu.memory_space<vmem>>, %arg11: memref<1x32xf32, #tpu.memory_space<vmem>>, %arg12: memref<1x32xf32, #tpu.memory_space<vmem>>, %arg13: memref<1x32x256xf32, #tpu.memory_space<vmem>>, %arg14: memref<18x18x128xf32, #tpu.memory_space<vmem>>) attributes {dimension_semantics = [#tpu.dimension_semantics<parallel>], iteration_bounds = array<i64: 2>, scalar_prefetch = 0 : i64, scratch_operands = 1 : i64, tpu.core_type = #tpu.core_type<tc>, window_params = [{transform_indices = @transform_0, window_bounds = array<i64: 1, 16, 16, 32>}, {pipeline_mode = #tpu.pipeline_mode<synchronous>, transform_indices = @transform_1, window_bounds = array<i64: 1, 32>}, {pipeline_mode = #tpu.pipeline_mode<synchronous>, transform_indices = @transform_2, window_bounds = array<i64: 1, 32>}, {pipeline_mode = #tpu.pipeline_mode<synchronous>, transform_indices = @transform_3, window_bounds = array<i64: 32, 128>}, {pipeline_mode = #tpu.pipeline_mode<synchronous>, transform_indices = @transform_4, window_bounds = array<i64: 1, 128>}, {pipeline_mode = #tpu.pipeline_mode<synchronous>, transform_indices = @transform_5, window_bounds = array<i64: 1, 128>}, {pipeline_mode = #tpu.pipeline_mode<synchronous>, transform_indices = @transform_6, window_bounds = array<i64: 3, 3, 128>}, {pipeline_mode = #tpu.pipeline_mode<synchronous>, transform_indices = @transform_7, window_bounds = array<i64: 1, 128>}, {pipeline_mode = #tpu.pipeline_mode<synchronous>, transform_indices = @transform_8, window_bounds = array<i64: 1, 128>}, {pipeline_mode = #tpu.pipeline_mode<synchronous>, transform_indices = @transform_9, window_bounds = array<i64: 128, 32>}, {pipeline_mode = #tpu.pipeline_mode<synchronous>, transform_indices = @transform_10, window_bounds = array<i64: 1, 32>}, {pipeline_mode = #tpu.pipeline_mode<synchronous>, transform_indices = @transform_11, window_bounds = array<i64: 1, 32>}, {transform_indices = @transform_12, window_bounds = array<i64: 1, 32, 256>}]} {
    %c0 = arith.constant 0 : index
    %c0_0 = arith.constant 0 : index
    %c0_1 = arith.constant 0 : index
    %c0_2 = arith.constant 0 : index
    %0 = vector.load %arg1[%c0, %c0_0, %c0_1, %c0_2] : memref<1x16x16x32xf32, #tpu.memory_space<vmem>>, vector<1x16x16x32xf32>
    %1 = vector.shape_cast %0 : vector<1x16x16x32xf32> to vector<16x16x32xf32>
    %2 = vector.shape_cast %1 : vector<16x16x32xf32> to vector<256x32xf32>
    %c0_3 = arith.constant 0 : index
    %c0_4 = arith.constant 0 : index
    %3 = vector.load %arg2[%c0_3, %c0_4] : memref<1x32xf32, #tpu.memory_space<vmem>>, vector<1x32xf32>
    %c0_5 = arith.constant 0 : index
    %c0_6 = arith.constant 0 : index
    %4 = vector.load %arg3[%c0_5, %c0_6] : memref<1x32xf32, #tpu.memory_space<vmem>>, vector<1x32xf32>
    %cst = arith.constant dense<0.000000e+00> : vector<256xf32>
    %5 = vector.multi_reduction <add>, %2, %cst [1] : vector<256x32xf32> to vector<256xf32>
    %6 = vector.shape_cast %5 : vector<256xf32> to vector<256x1xf32>
    %cst_7 = arith.constant 3.200000e+01 : f32
    %7 = vector.broadcast %cst_7 : f32 to vector<256x1xf32>
    %8 = arith.divf %6, %7 : vector<256x1xf32>
    %9 = vector.broadcast %8 : vector<256x1xf32> to vector<256x32xf32>
    %10 = arith.subf %2, %9 : vector<256x32xf32>
    %11 = arith.mulf %10, %10 : vector<256x32xf32>
    %cst_8 = arith.constant dense<0.000000e+00> : vector<256xf32>
    %12 = vector.multi_reduction <add>, %11, %cst_8 [1] : vector<256x32xf32> to vector<256xf32>
    %13 = vector.shape_cast %12 : vector<256xf32> to vector<256x1xf32>
    %cst_9 = arith.constant 3.200000e+01 : f32
    %14 = vector.broadcast %cst_9 : f32 to vector<256x1xf32>
    %15 = arith.divf %13, %14 : vector<256x1xf32>
    %16 = vector.broadcast %8 : vector<256x1xf32> to vector<256x32xf32>
    %17 = arith.subf %2, %16 : vector<256x32xf32>
    %cst_10 = arith.constant 9.99999997E-7 : f32
    %18 = vector.broadcast %cst_10 : f32 to vector<256x1xf32>
    %19 = arith.addf %15, %18 : vector<256x1xf32>
    %20 = math.rsqrt %19 : vector<256x1xf32>
    %21 = vector.broadcast %20 : vector<256x1xf32> to vector<256x32xf32>
    %22 = arith.mulf %17, %21 : vector<256x32xf32>
    %23 = vector.broadcast %3 : vector<1x32xf32> to vector<256x32xf32>
    %24 = arith.mulf %22, %23 : vector<256x32xf32>
    %25 = vector.broadcast %4 : vector<1x32xf32> to vector<256x32xf32>
    %26 = arith.addf %24, %25 : vector<256x32xf32>
    %27 = arith.truncf %26 : vector<256x32xf32> to vector<256x32xbf16>
    %c0_11 = arith.constant 0 : index
    %c0_12 = arith.constant 0 : index
    %28 = vector.load %arg4[%c0_11, %c0_12] : memref<32x128xbf16, #tpu.memory_space<vmem>>, vector<32x128xbf16>
    %cst_13 = arith.constant dense<0.000000e+00> : vector<256x128xf32>
    %29 = tpu.matmul %27, %28, %cst_13 {dimension_numbers = #tpu.dot_dimension_numbers<[1], [0], [0], [1], [0, 0, 1, 1], [], []>} : vector<256x32xbf16>, vector<32x128xbf16>, vector<256x128xf32> -> vector<256x128xf32>
    %c0_14 = arith.constant 0 : index
    %c0_15 = arith.constant 0 : index
    %30 = vector.load %arg5[%c0_14, %c0_15] : memref<1x128xf32, #tpu.memory_space<vmem>>, vector<1x128xf32>
    %31 = vector.broadcast %30 : vector<1x128xf32> to vector<256x128xf32>
    %32 = arith.mulf %29, %31 : vector<256x128xf32>
    %c0_16 = arith.constant 0 : index
    %c0_17 = arith.constant 0 : index
    %33 = vector.load %arg6[%c0_16, %c0_17] : memref<1x128xf32, #tpu.memory_space<vmem>>, vector<1x128xf32>
    %34 = vector.broadcast %33 : vector<1x128xf32> to vector<256x128xf32>
    %35 = arith.addf %32, %34 : vector<256x128xf32>
    %cst_18 = arith.constant 5.000000e-01 : f32
    %36 = vector.broadcast %cst_18 : f32 to vector<256x128xf32>
    %37 = arith.mulf %36, %35 : vector<256x128xf32>
    %38 = arith.mulf %35, %35 : vector<256x128xf32>
    %39 = arith.mulf %38, %35 : vector<256x128xf32>
    %cst_19 = arith.constant 4.471500e-02 : f32
    %40 = vector.broadcast %cst_19 : f32 to vector<256x128xf32>
    %41 = arith.mulf %40, %39 : vector<256x128xf32>
    %42 = arith.addf %35, %41 : vector<256x128xf32>
    %cst_20 = arith.constant 0.797884583 : f32
    %43 = vector.broadcast %cst_20 : f32 to vector<256x128xf32>
    %44 = arith.mulf %43, %42 : vector<256x128xf32>
    %45 = math.tanh %44 : vector<256x128xf32>
    %cst_21 = arith.constant 1.000000e+00 : f32
    %46 = vector.broadcast %cst_21 : f32 to vector<256x128xf32>
    %47 = arith.addf %46, %45 : vector<256x128xf32>
    %48 = arith.mulf %37, %47 : vector<256x128xf32>
    %49 = vector.shape_cast %48 : vector<256x128xf32> to vector<16x16x128xf32>
    %cst_22 = arith.constant 0.000000e+00 : f32
    %50 = vector.broadcast %cst_22 : f32 to vector<18x128xf32>
    %cst_23 = arith.constant 0.000000e+00 : f32
    %51 = vector.broadcast %cst_23 : f32 to vector<18x128xf32>
    %c0_24 = arith.constant 0 : index
    %c0_25 = arith.constant 0 : index
    %c0_26 = arith.constant 0 : index
    %52 = vector.load %arg14[%c0_24, %c0_25, %c0_26] : memref<18x18x128xf32, #tpu.memory_space<vmem>>, vector<1x18x128xf32>
    %53 = vector.shape_cast %52 : vector<1x18x128xf32> to vector<18x128xf32>
    %54 = vector.shape_cast %50 : vector<18x128xf32> to vector<1x18x128xf32>
    tpu.vector_store %arg14[%c0_24, %c0_25, %c0_26], %54 {strides = array<i32>} : memref<18x18x128xf32, #tpu.memory_space<vmem>>, vector<1x18x128xf32>,
    %c17 = arith.constant 17 : index
    %c0_27 = arith.constant 0 : index
    %c0_28 = arith.constant 0 : index
    %55 = vector.load %arg14[%c17, %c0_27, %c0_28] : memref<18x18x128xf32, #tpu.memory_space<vmem>>, vector<1x18x128xf32>
    %56 = vector.shape_cast %55 : vector<1x18x128xf32> to vector<18x128xf32>
    %57 = vector.shape_cast %50 : vector<18x128xf32> to vector<1x18x128xf32>
    tpu.vector_store %arg14[%c17, %c0_27, %c0_28], %57 {strides = array<i32>} : memref<18x18x128xf32, #tpu.memory_space<vmem>>, vector<1x18x128xf32>,
    %c0_29 = arith.constant 0 : index
    %c0_30 = arith.constant 0 : index
    %c0_31 = arith.constant 0 : index
    %58 = vector.load %arg14[%c0_29, %c0_30, %c0_31] : memref<18x18x128xf32, #tpu.memory_space<vmem>>, vector<18x1x128xf32>
    %59 = vector.shape_cast %58 : vector<18x1x128xf32> to vector<18x128xf32>
    %60 = vector.shape_cast %51 : vector<18x128xf32> to vector<18x1x128xf32>
    tpu.vector_store %arg14[%c0_29, %c0_30, %c0_31], %60 {strides = array<i32>} : memref<18x18x128xf32, #tpu.memory_space<vmem>>, vector<18x1x128xf32>,
    %c0_32 = arith.constant 0 : index
    %c17_33 = arith.constant 17 : index
    %c0_34 = arith.constant 0 : index
    %61 = vector.load %arg14[%c0_32, %c17_33, %c0_34] : memref<18x18x128xf32, #tpu.memory_space<vmem>>, vector<18x1x128xf32>
    %62 = vector.shape_cast %61 : vector<18x1x128xf32> to vector<18x128xf32>
    %63 = vector.shape_cast %51 : vector<18x128xf32> to vector<18x1x128xf32>
    tpu.vector_store %arg14[%c0_32, %c17_33, %c0_34], %63 {strides = array<i32>} : memref<18x18x128xf32, #tpu.memory_space<vmem>>, vector<18x1x128xf32>,
    %c1 = arith.constant 1 : index
    %c1_35 = arith.constant 1 : index
    %c0_36 = arith.constant 0 : index
    %64 = vector.load %arg14[%c1, %c1_35, %c0_36] : memref<18x18x128xf32, #tpu.memory_space<vmem>>, vector<16x16x128xf32>
    tpu.vector_store %arg14[%c1, %c1_35, %c0_36], %49 {strides = array<i32>} : memref<18x18x128xf32, #tpu.memory_space<vmem>>, vector<16x16x128xf32>,
    %c0_37 = arith.constant 0 : index
    %c0_38 = arith.constant 0 : index
    %c0_39 = arith.constant 0 : index
    %65 = vector.load %arg14[%c0_37, %c0_38, %c0_39] : memref<18x18x128xf32, #tpu.memory_space<vmem>>, vector<18x18x128xf32>
    %c0_40 = arith.constant 0 : index
    %c0_41 = arith.constant 0 : index
    %c0_42 = arith.constant 0 : index
    %66 = vector.load %arg7[%c0_40, %c0_41, %c0_42] : memref<3x3x128xf32, #tpu.memory_space<vmem>>, vector<3x3x128xf32>
    %67 = vector.extract_strided_slice %65 {offsets = [0, 0, 0], sizes = [18, 16, 128], strides = [1, 1, 1]} : vector<18x18x128xf32> to vector<18x16x128xf32>
    %68 = vector.extract_strided_slice %65 {offsets = [0, 1, 0], sizes = [18, 16, 128], strides = [1, 1, 1]} : vector<18x18x128xf32> to vector<18x16x128xf32>
    %69 = vector.extract_strided_slice %65 {offsets = [0, 2, 0], sizes = [18, 16, 128], strides = [1, 1, 1]} : vector<18x18x128xf32> to vector<18x16x128xf32>
    %cst_43 = arith.constant 0.000000e+00 : f32
    %70 = vector.broadcast %cst_43 : f32 to vector<16x16x128xf32>
    %71 = vector.extract_strided_slice %67 {offsets = [0, 0, 0], sizes = [16, 16, 128], strides = [1, 1, 1]} : vector<18x16x128xf32> to vector<16x16x128xf32>
    %72 = vector.extract_strided_slice %66 {offsets = [0, 0, 0], sizes = [1, 1, 128], strides = [1, 1, 1]} : vector<3x3x128xf32> to vector<1x1x128xf32>
    %73 = vector.shape_cast %72 : vector<1x1x128xf32> to vector<128xf32>
    %74 = vector.shape_cast %73 : vector<128xf32> to vector<1x1x128xf32>
    %75 = vector.broadcast %74 : vector<1x1x128xf32> to vector<16x16x128xf32>
    %76 = arith.mulf %71, %75 : vector<16x16x128xf32>
    %77 = arith.addf %70, %76 : vector<16x16x128xf32>
    %78 = vector.extract_strided_slice %68 {offsets = [0, 0, 0], sizes = [16, 16, 128], strides = [1, 1, 1]} : vector<18x16x128xf32> to vector<16x16x128xf32>
    %79 = vector.extract_strided_slice %66 {offsets = [0, 1, 0], sizes = [1, 1, 128], strides = [1, 1, 1]} : vector<3x3x128xf32> to vector<1x1x128xf32>
    %80 = vector.shape_cast %79 : vector<1x1x128xf32> to vector<128xf32>
    %81 = vector.shape_cast %80 : vector<128xf32> to vector<1x1x128xf32>
    %82 = vector.broadcast %81 : vector<1x1x128xf32> to vector<16x16x128xf32>
    %83 = arith.mulf %78, %82 : vector<16x16x128xf32>
    %84 = arith.addf %77, %83 : vector<16x16x128xf32>
    %85 = vector.extract_strided_slice %69 {offsets = [0, 0, 0], sizes = [16, 16, 128], strides = [1, 1, 1]} : vector<18x16x128xf32> to vector<16x16x128xf32>
    %86 = vector.extract_strided_slice %66 {offsets = [0, 2, 0], sizes = [1, 1, 128], strides = [1, 1, 1]} : vector<3x3x128xf32> to vector<1x1x128xf32>
    %87 = vector.shape_cast %86 : vector<1x1x128xf32> to vector<128xf32>
    %88 = vector.shape_cast %87 : vector<128xf32> to vector<1x1x128xf32>
    %89 = vector.broadcast %88 : vector<1x1x128xf32> to vector<16x16x128xf32>
    %90 = arith.mulf %85, %89 : vector<16x16x128xf32>
    %91 = arith.addf %84, %90 : vector<16x16x128xf32>
    %92 = vector.extract_strided_slice %67 {offsets = [1, 0, 0], sizes = [16, 16, 128], strides = [1, 1, 1]} : vector<18x16x128xf32> to vector<16x16x128xf32>
    %93 = vector.extract_strided_slice %66 {offsets = [1, 0, 0], sizes = [1, 1, 128], strides = [1, 1, 1]} : vector<3x3x128xf32> to vector<1x1x128xf32>
    %94 = vector.shape_cast %93 : vector<1x1x128xf32> to vector<128xf32>
    %95 = vector.shape_cast %94 : vector<128xf32> to vector<1x1x128xf32>
    %96 = vector.broadcast %95 : vector<1x1x128xf32> to vector<16x16x128xf32>
    %97 = arith.mulf %92, %96 : vector<16x16x128xf32>
    %98 = arith.addf %91, %97 : vector<16x16x128xf32>
    %99 = vector.extract_strided_slice %68 {offsets = [1, 0, 0], sizes = [16, 16, 128], strides = [1, 1, 1]} : vector<18x16x128xf32> to vector<16x16x128xf32>
    %100 = vector.extract_strided_slice %66 {offsets = [1, 1, 0], sizes = [1, 1, 128], strides = [1, 1, 1]} : vector<3x3x128xf32> to vector<1x1x128xf32>
    %101 = vector.shape_cast %100 : vector<1x1x128xf32> to vector<128xf32>
    %102 = vector.shape_cast %101 : vector<128xf32> to vector<1x1x128xf32>
    %103 = vector.broadcast %102 : vector<1x1x128xf32> to vector<16x16x128xf32>
    %104 = arith.mulf %99, %103 : vector<16x16x128xf32>
    %105 = arith.addf %98, %104 : vector<16x16x128xf32>
    %106 = vector.extract_strided_slice %69 {offsets = [1, 0, 0], sizes = [16, 16, 128], strides = [1, 1, 1]} : vector<18x16x128xf32> to vector<16x16x128xf32>
    %107 = vector.extract_strided_slice %66 {offsets = [1, 2, 0], sizes = [1, 1, 128], strides = [1, 1, 1]} : vector<3x3x128xf32> to vector<1x1x128xf32>
    %108 = vector.shape_cast %107 : vector<1x1x128xf32> to vector<128xf32>
    %109 = vector.shape_cast %108 : vector<128xf32> to vector<1x1x128xf32>
    %110 = vector.broadcast %109 : vector<1x1x128xf32> to vector<16x16x128xf32>
    %111 = arith.mulf %106, %110 : vector<16x16x128xf32>
    %112 = arith.addf %105, %111 : vector<16x16x128xf32>
    %113 = vector.extract_strided_slice %67 {offsets = [2, 0, 0], sizes = [16, 16, 128], strides = [1, 1, 1]} : vector<18x16x128xf32> to vector<16x16x128xf32>
    %114 = vector.extract_strided_slice %66 {offsets = [2, 0, 0], sizes = [1, 1, 128], strides = [1, 1, 1]} : vector<3x3x128xf32> to vector<1x1x128xf32>
    %115 = vector.shape_cast %114 : vector<1x1x128xf32> to vector<128xf32>
    %116 = vector.shape_cast %115 : vector<128xf32> to vector<1x1x128xf32>
    %117 = vector.broadcast %116 : vector<1x1x128xf32> to vector<16x16x128xf32>
    %118 = arith.mulf %113, %117 : vector<16x16x128xf32>
    %119 = arith.addf %112, %118 : vector<16x16x128xf32>
    %120 = vector.extract_strided_slice %68 {offsets = [2, 0, 0], sizes = [16, 16, 128], strides = [1, 1, 1]} : vector<18x16x128xf32> to vector<16x16x128xf32>
    %121 = vector.extract_strided_slice %66 {offsets = [2, 1, 0], sizes = [1, 1, 128], strides = [1, 1, 1]} : vector<3x3x128xf32> to vector<1x1x128xf32>
    %122 = vector.shape_cast %121 : vector<1x1x128xf32> to vector<128xf32>
    %123 = vector.shape_cast %122 : vector<128xf32> to vector<1x1x128xf32>
    %124 = vector.broadcast %123 : vector<1x1x128xf32> to vector<16x16x128xf32>
    %125 = arith.mulf %120, %124 : vector<16x16x128xf32>
    %126 = arith.addf %119, %125 : vector<16x16x128xf32>
    %127 = vector.extract_strided_slice %69 {offsets = [2, 0, 0], sizes = [16, 16, 128], strides = [1, 1, 1]} : vector<18x16x128xf32> to vector<16x16x128xf32>
    %128 = vector.extract_strided_slice %66 {offsets = [2, 2, 0], sizes = [1, 1, 128], strides = [1, 1, 1]} : vector<3x3x128xf32> to vector<1x1x128xf32>
    %129 = vector.shape_cast %128 : vector<1x1x128xf32> to vector<128xf32>
    %130 = vector.shape_cast %129 : vector<128xf32> to vector<1x1x128xf32>
    %131 = vector.broadcast %130 : vector<1x1x128xf32> to vector<16x16x128xf32>
    %132 = arith.mulf %127, %131 : vector<16x16x128xf32>
    %133 = arith.addf %126, %132 : vector<16x16x128xf32>
    %c0_44 = arith.constant 0 : index
    %c0_45 = arith.constant 0 : index
    %134 = vector.load %arg8[%c0_44, %c0_45] : memref<1x128xf32, #tpu.memory_space<vmem>>, vector<1x128xf32>
    %135 = vector.shape_cast %134 : vector<1x128xf32> to vector<1x1x128xf32>
    %136 = vector.broadcast %135 : vector<1x1x128xf32> to vector<16x16x128xf32>
    %137 = arith.mulf %133, %136 : vector<16x16x128xf32>
    %c0_46 = arith.constant 0 : index
    %c0_47 = arith.constant 0 : index
    %138 = vector.load %arg9[%c0_46, %c0_47] : memref<1x128xf32, #tpu.memory_space<vmem>>, vector<1x128xf32>
    %139 = vector.shape_cast %138 : vector<1x128xf32> to vector<1x1x128xf32>
    %140 = vector.broadcast %139 : vector<1x1x128xf32> to vector<16x16x128xf32>
    %141 = arith.addf %137, %140 : vector<16x16x128xf32>
    %cst_48 = arith.constant 5.000000e-01 : f32
    %142 = vector.broadcast %cst_48 : f32 to vector<16x16x128xf32>
    %143 = arith.mulf %142, %141 : vector<16x16x128xf32>
    %144 = arith.mulf %141, %141 : vector<16x16x128xf32>
    %145 = arith.mulf %144, %141 : vector<16x16x128xf32>
    %cst_49 = arith.constant 4.471500e-02 : f32
    %146 = vector.broadcast %cst_49 : f32 to vector<16x16x128xf32>
    %147 = arith.mulf %146, %145 : vector<16x16x128xf32>
    %148 = arith.addf %141, %147 : vector<16x16x128xf32>
    %cst_50 = arith.constant 0.797884583 : f32
    %149 = vector.broadcast %cst_50 : f32 to vector<16x16x128xf32>
    %150 = arith.mulf %149, %148 : vector<16x16x128xf32>
    %151 = math.tanh %150 : vector<16x16x128xf32>
    %cst_51 = arith.constant 1.000000e+00 : f32
    %152 = vector.broadcast %cst_51 : f32 to vector<16x16x128xf32>
    %153 = arith.addf %152, %151 : vector<16x16x128xf32>
    %154 = arith.mulf %143, %153 : vector<16x16x128xf32>
    %155 = vector.shape_cast %154 : vector<16x16x128xf32> to vector<256x128xf32>
    %156 = arith.truncf %155 : vector<256x128xf32> to vector<256x128xbf16>
    %c0_52 = arith.constant 0 : index
    %c0_53 = arith.constant 0 : index
    %157 = vector.load %arg10[%c0_52, %c0_53] : memref<128x32xbf16, #tpu.memory_space<vmem>>, vector<128x32xbf16>
    %cst_54 = arith.constant dense<0.000000e+00> : vector<256x32xf32>
    %158 = tpu.matmul %156, %157, %cst_54 {dimension_numbers = #tpu.dot_dimension_numbers<[1], [0], [0], [1], [0, 0, 1, 1], [], []>} : vector<256x128xbf16>, vector<128x32xbf16>, vector<256x32xf32> -> vector<256x32xf32>
    %c0_55 = arith.constant 0 : index
    %c0_56 = arith.constant 0 : index
    %159 = vector.load %arg11[%c0_55, %c0_56] : memref<1x32xf32, #tpu.memory_space<vmem>>, vector<1x32xf32>
    %160 = vector.broadcast %159 : vector<1x32xf32> to vector<256x32xf32>
    %161 = arith.mulf %158, %160 : vector<256x32xf32>
    %c0_57 = arith.constant 0 : index
    %c0_58 = arith.constant 0 : index
    %162 = vector.load %arg12[%c0_57, %c0_58] : memref<1x32xf32, #tpu.memory_space<vmem>>, vector<1x32xf32>
    %163 = vector.broadcast %162 : vector<1x32xf32> to vector<256x32xf32>
    %164 = arith.addf %161, %163 : vector<256x32xf32>
    %cst_59 = arith.constant 5.000000e-01 : f32
    %165 = vector.broadcast %cst_59 : f32 to vector<256x32xf32>
    %166 = arith.mulf %165, %164 : vector<256x32xf32>
    %167 = arith.mulf %164, %164 : vector<256x32xf32>
    %168 = arith.mulf %167, %164 : vector<256x32xf32>
    %cst_60 = arith.constant 4.471500e-02 : f32
    %169 = vector.broadcast %cst_60 : f32 to vector<256x32xf32>
    %170 = arith.mulf %169, %168 : vector<256x32xf32>
    %171 = arith.addf %164, %170 : vector<256x32xf32>
    %cst_61 = arith.constant 0.797884583 : f32
    %172 = vector.broadcast %cst_61 : f32 to vector<256x32xf32>
    %173 = arith.mulf %172, %171 : vector<256x32xf32>
    %174 = math.tanh %173 : vector<256x32xf32>
    %cst_62 = arith.constant 1.000000e+00 : f32
    %175 = vector.broadcast %cst_62 : f32 to vector<256x32xf32>
    %176 = arith.addf %175, %174 : vector<256x32xf32>
    %177 = arith.mulf %166, %176 : vector<256x32xf32>
    %178 = arith.addf %2, %177 : vector<256x32xf32>
    %179 = tpu.transpose %178, [1, 0] : vector<256x32xf32> -> vector<32x256xf32>
    %c0_63 = arith.constant 0 : index
    %c0_64 = arith.constant 0 : index
    %c0_65 = arith.constant 0 : index
    %180 = vector.load %arg13[%c0_63, %c0_64, %c0_65] : memref<1x32x256xf32, #tpu.memory_space<vmem>>, vector<1x32x256xf32>
    %181 = vector.shape_cast %180 : vector<1x32x256xf32> to vector<32x256xf32>
    %182 = vector.shape_cast %179 : vector<32x256xf32> to vector<1x32x256xf32>
    tpu.vector_store %arg13[%c0_63, %c0_64, %c0_65], %182 {strides = array<i32>} : memref<1x32x256xf32, #tpu.memory_space<vmem>>, vector<1x32x256xf32>,
    return
  }
  func.func @transform_0(%arg0: i32) -> (i32, i32, i32, i32) {
    %c0_i32 = arith.constant 0 : i32
    %c0_i32_0 = arith.constant 0 : i32
    %c0_i32_1 = arith.constant 0 : i32
    %c0_i32_2 = arith.constant 0 : i32
    return %arg0, %c0_i32, %c0_i32_0, %c0_i32_1 : i32, i32, i32, i32
  }
  func.func @transform_1(%arg0: i32) -> (i32, i32) {
    %c0_i32 = arith.constant 0 : i32
    %c0_i32_0 = arith.constant 0 : i32
    %c0_i32_1 = arith.constant 0 : i32
    return %c0_i32, %c0_i32_0 : i32, i32
  }
  func.func @transform_2(%arg0: i32) -> (i32, i32) {
    %c0_i32 = arith.constant 0 : i32
    %c0_i32_0 = arith.constant 0 : i32
    %c0_i32_1 = arith.constant 0 : i32
    return %c0_i32, %c0_i32_0 : i32, i32
  }
  func.func @transform_3(%arg0: i32) -> (i32, i32) {
    %c0_i32 = arith.constant 0 : i32
    %c0_i32_0 = arith.constant 0 : i32
    %c0_i32_1 = arith.constant 0 : i32
    return %c0_i32, %c0_i32_0 : i32, i32
  }
  func.func @transform_4(%arg0: i32) -> (i32, i32) {
    %c0_i32 = arith.constant 0 : i32
    %c0_i32_0 = arith.constant 0 : i32
    %c0_i32_1 = arith.constant 0 : i32
    return %c0_i32, %c0_i32_0 : i32, i32
  }
  func.func @transform_5(%arg0: i32) -> (i32, i32) {
    %c0_i32 = arith.constant 0 : i32
    %c0_i32_0 = arith.constant 0 : i32
    %c0_i32_1 = arith.constant 0 : i32
    return %c0_i32, %c0_i32_0 : i32, i32
  }
  func.func @transform_6(%arg0: i32) -> (i32, i32, i32) {
    %c0_i32 = arith.constant 0 : i32
    %c0_i32_0 = arith.constant 0 : i32
    %c0_i32_1 = arith.constant 0 : i32
    %c0_i32_2 = arith.constant 0 : i32
    return %c0_i32, %c0_i32_0, %c0_i32_1 : i32, i32, i32
  }
  func.func @transform_7(%arg0: i32) -> (i32, i32) {
    %c0_i32 = arith.constant 0 : i32
    %c0_i32_0 = arith.constant 0 : i32
    %c0_i32_1 = arith.constant 0 : i32
    return %c0_i32, %c0_i32_0 : i32, i32
  }
  func.func @transform_8(%arg0: i32) -> (i32, i32) {
    %c0_i32 = arith.constant 0 : i32
    %c0_i32_0 = arith.constant 0 : i32
    %c0_i32_1 = arith.constant 0 : i32
    return %c0_i32, %c0_i32_0 : i32, i32
  }
  func.func @transform_9(%arg0: i32) -> (i32, i32) {
    %c0_i32 = arith.constant 0 : i32
    %c0_i32_0 = arith.constant 0 : i32
    %c0_i32_1 = arith.constant 0 : i32
    return %c0_i32, %c0_i32_0 : i32, i32
  }
  func.func @transform_10(%arg0: i32) -> (i32, i32) {
    %c0_i32 = arith.constant 0 : i32
    %c0_i32_0 = arith.constant 0 : i32
    %c0_i32_1 = arith.constant 0 : i32
    return %c0_i32, %c0_i32_0 : i32, i32
  }
  func.func @transform_11(%arg0: i32) -> (i32, i32) {
    %c0_i32 = arith.constant 0 : i32
    %c0_i32_0 = arith.constant 0 : i32
    %c0_i32_1 = arith.constant 0 : i32
    return %c0_i32, %c0_i32_0 : i32, i32
  }
  func.func @transform_12(%arg0: i32) -> (i32, i32, i32) {
    %c0_i32 = arith.constant 0 : i32
    %c0_i32_0 = arith.constant 0 : i32
    %c0_i32_1 = arith.constant 0 : i32
    return %arg0, %c0_i32, %c0_i32_0 : i32, i32, i32
  }
}

</mosaic_0001>

<bundles_post_ra>
// kernel: general_transformer_block.2
= control target key start
LH: loop header
LB: loop body
LE: loop exit
PB: predicated region body
PF: predicated region fallthrough
CT: control target
= control target key end

     0   :  { %13 = vsyncpa [#allocation3], 0  ;;  %s7528_s0 = inlined_call_operand.hbm [shape: f32[8,64,32], index: 0, kind: input, shape index: {}]   ;;  %s7529_s1 = inlined_call_operand.vmem [shape: f32[1,32], index: 1, kind: input, shape index: {}]   ;;  %s7530_s2 = inlined_call_operand.vmem [shape: f32[1,32], index: 2, kind: input, shape index: {}]   ;;  %s7531_s3 = inlined_call_operand.vmem [shape: bf16[32,96], index: 3, kind: input, shape index: {}]   ;;  %s7532_s4 = inlined_call_operand.vmem [shape: f32[1,96], index: 4, kind: input, shape index: {}]   ;;  %s7533_s5 = inlined_call_operand.hbm [shape: f32[2,64,64], index: 5, kind: input, shape index: {}]   ;;  %s7534_s6 = inlined_call_operand.vmem [shape: bf16[32,32], index: 6, kind: input, shape index: {}]   ;;  %s7535_s7 = inlined_call_operand.vmem [shape: f32[1,32], index: 7, kind: input, shape index: {}]   ;;  %s7536_s8 = inlined_call_operand.vmem [shape: f32[8,64,32], index: 8, kind: output, shape index: {}]  }
   0x1   :  { %15 = vsyncpa [#allocation3 + $0x1], 0 }
   0x2   :  { %16 = vsyncpa [#allocation5], 0  ;;  %s5404_s27 = smov 0   ;;  %s5406_s28 = smov 0  }
   0x3   :  { %s5408_s29 = smov 0   ;;  %s5410_s30 = smov 0  }
   0x4 LB: > { %s4109_s9 = sadd.s32 4294967295, %s5347_s30   ;;  %p42_p0 = scmp.ne.s32.totalorder %s5339_s28, %s5335_s27  ;;  %s5347_s30 = sphi %s5410_s30, %s7649_s30   ;;  %s5343_s29 = sphi %s5408_s29, %s7648_s29   ;;  %s5339_s28 = sphi %s5406_s28, %s7647_s28   ;;  %s5335_s27 = sphi %s5404_s27, %s7646_s27  }
   0x5   : > { %p5426_p1 = scmp.eq.s32.totalorder %s4109_s9, 0  ;;  %p4111_p2 = scmp.ge.s32.totalorder %s5347_s30, 1 }
   0x6   : > { %p226_p3 = scmp.lt.s32.totalorder %s5347_s30, 3  ;;  %s5349_s13 = smov [#allocation4]  }
   0x7   : > { %s7558_s10 = scalar_select %p5426_p1, 1, 0 }
   0x8   : > { %p5434_p4 = por %p5426_p1, %p42_p0  ;;  %p5438_p5 = pnand %p4111_p2, %p226_p3 }
   0x9   : > { %s250_s14 = sshll.u32 %s5349_s13, 4  ;;  %s5451_s16 = sadd.s32 1, %s5347_s30   ;;  %s251_s14 = int_to_ptr.vmem [resolvable:$true] %s250_s14 }
   0xa   : > { %s7559_s11 = scalar_select %p5434_p4, 1, 0 }
   0xb   : > { %s7560_s12 = scalar_select %p5438_p5, 1, 0 }
   0xc   : > { %p4763_p6 = pneg %p5438_p5  ;;  %s29_s17 = sadd.s32 1, %s5343_s29 }
   0xd   : > { %s26_s18 = ssub.s32 %s5347_s30, %s5451_s16  ;;  %s5251_s21 = scalar_lea.hbm %s7533_s5, 2048 }
   0xe   : > { %p5446_p7 = pnand %p4763_p6, %p5426_p1  ;;  %p5252_p8 = scmp.ne.s32.totalorder %s7533_s5, %s5251_s21 }
   0xf   : > { %p5258_p12 = scmp.lt.u32.totalorder %s5251_s21, %s7533_s5 }
  0x10   : > { %p5253_p9 = pneg %p5446_p7 }
  0x12   : > { %p5254_p10 = pnand %p5253_p9, %p5252_p8 }
  0x14   : > { %p5255_p11 = pneg %p5254_p10 }
  0x16   : > { %p5260_p13 = pnand %p5258_p12, %p5255_p11 }
  0x18   : > { %5263 = shalt.err (!%p5260_p13)
}
  0x19   : > { %s5264_s26 = scalar_lea.vmem %s251_s14, 2048  ;;  %p5272_p6 = scmp.lt.s32.totalorder %s251_s14, %s251_s14 }
  0x1a   : > { %p5265_p0 = scmp.ne.s32.totalorder %s251_s14, %s5264_s26  ;;  %p5273_p1 = scmp.lt.s32.totalorder %s5264_s26, %s5264_s26 }
  0x1c   : > { %p5267_p2 = pnand %p5265_p0, %p5253_p9  ;;  %p5274_p4 = por %p5273_p1, %p5272_p6 }
  0x1e   : > { %p5268_p3 = pneg %p5267_p2 }
  0x20   : > { %p5275_p5 = pnand %p5274_p4, %p5268_p3 }
  0x22   : > { %5278 = shalt.err (!%p5275_p5)
}
  0x23   : > { %s5350_s27 = smov 128   ;;  %s5351_s13 = smov 8  }
  0x24   : > { %4766 = dma.hbm_to_vmem [thread:$0]  (!%p5446_p7), %s7533_s5, 2048, %s251_s14, [#allocation5], %s5350_s27, %s5350_s27, %s5351_s13  }
  0x25   : > { %p27_p1 = scmp.eq.s32.totalorder %s26_s18, 0  ;;  %p36_p4 = scmp.ne.s32.totalorder %s5343_s29, %s5339_s28 }
  0x26   : > { %p37_p5 = scmp.eq.s32.totalorder %s5347_s30, 0  ;;  %p4772_p8 = scmp.lt.s32.totalorder %s5347_s30, 2 }
  0x27   : > { %s5480_s21 = scalar_select %p27_p1, %s5343_s29, %s29_s17  }
  0x28   : > { %p38_p9 = por %p37_p5, %p36_p4  ;;  %s270_s22 = sand.u32 1, %s5343_s29  }
  0x29   : > { %s4114_s23 = sshll.u32 %s270_s22, 8  ;;  %s4231_s24 = sshll.u32 %s5347_s30, 12 }
  0x2a   : > { %s5487_s15 = scalar_lea.hbm %s7528_s0, %s4231_s24  ;;  %s274_s14 = scalar_lea.vmem [#allocation2], %s4114_s23 }
  0x2b   : > { %s282_s18 = sshll.u32 %s274_s14, 4  ;;  %p5491_p7 = pnand %p4772_p8, %p38_p9  ;;  %s5489_s18 = int_to_ptr.vmem [resolvable:$true] %s282_s18 }
  0x2c   : > { %s5495_s19 = scalar_lea.sflag [#allocation3], %s270_s22  ;;  %s5279_s20 = scalar_lea.hbm %s5487_s15, 4096 }
  0x2d   : > { %p5280_p10 = scmp.ne.s32.totalorder %s5487_s15, %s5279_s20  ;;  %p5281_p11 = pneg %p5491_p7 }
  0x2e   : > { %s5284_s25 = scalar_lea.hbm %s7528_s0, 8192  ;;  %p5285_p0 = scmp.lt.u32.totalorder %s5487_s15, %s7528_s0 }
  0x2f   : > { %p5282_p12 = pnand %p5281_p11, %p5280_p10  ;;  %p5286_p2 = scmp.lt.u32.totalorder %s5284_s25, %s5279_s20 }
  0x30   : > { %p5288_p6 = scmp.lt.u32.totalorder %s5279_s20, %s5487_s15 }
  0x31   : > { %p5283_p13 = pneg %p5282_p12  ;;  %p5287_p3 = por %p5286_p2, %p5285_p0 }
  0x33   : > { %p5289_p1 = por %p5288_p6, %p5287_p3 }
  0x35   : > { %p5290_p4 = pnand %p5289_p1, %p5283_p13 }
  0x37   : > { %5293 = shalt.err (!%p5290_p4)
}
  0x38   : > { %s5294_s22 = scalar_lea.vmem %s5489_s18, 4096  ;;  %s5352_s23 = smov [#allocation2]  }
  0x39   : > { %p5295_p5 = scmp.ne.s32.totalorder %s5489_s18, %s5294_s22  ;;  %s5299_s24 = sshll.u32 %s5352_s23, 4  ;;  %s5300_s24 = int_to_ptr.vmem [resolvable:$false] %s5299_s24 }
  0x3a   : > { %s5301_s26 = scalar_lea.vmem %s5300_s24, 8192  ;;  %p5302_p10 = scmp.lt.s32.totalorder %s5489_s18, %s5300_s24 }
  0x3b   : > { %p5297_p8 = pnand %p5295_p5, %p5281_p11  ;;  %p5303_p12 = scmp.lt.s32.totalorder %s5301_s26, %s5294_s22 }
  0x3d   : > { %p5298_p9 = pneg %p5297_p8  ;;  %p5304_p0 = por %p5303_p12, %p5302_p10 }
  0x3f   : > { %p5305_p2 = pnand %p5304_p0, %p5298_p9 }
  0x41   : > { %5308 = shalt.err (!%p5305_p2)
}
  0x42   : > { %4770 = dma.hbm_to_vmem [thread:$0]  (!%p5491_p7), %s5487_s15, 4096, %s5489_s18, %s5495_s19, %s5350_s27, %s5350_s27, %s5351_s13  }
  0x43   : > { %p7563_p11 = scmp.ne.s32.totalorder %s7560_s12, 0 }
  0x45   : > { %294 = sbr.rel (%p7563_p11) target bundleno = 2614 (0xa36), region = 52 }
  0x4c   : > { %s296_s20 = sand.u32 1, %s5339_s28   ;;  %p7564_p13 = scmp.ne.s32.totalorder %s7559_s11, 0 }
  0x4d   : > { %s4119_s25 = sshll.u32 %s296_s20, 8  ;;  %s297_s14 = scalar_lea.sflag [#allocation3], %s296_s20 }
  0x4e   : > { %s5529_s22 = scalar_lea.vmem [#allocation2], %s4119_s25 }
  0x4f   : > { %5326 = dma.done.wait (%p7564_p13), %s297_s14, 4096  }
  0x50   : > { %5328 = vsyncadd (%p7564_p13), %s297_s14, 4294963200  ;;  %p7565_p3 = scmp.ne.s32.totalorder %s7558_s10, 0 }
  0x52   : > { %5330 = dma.done.wait (%p7565_p3), [#allocation5], 2048  }
  0x53   : > { %5332 = vsyncadd (%p7565_p3), [#allocation5], 4294965248  ;;  %vm381_vm0 = vcmask 261120   ;;  %v5540_v0 = vld [vmem:[%s5529_s22] sm:$0xff]  ;;  %v5543_v1 = vld [vmem:[%s5529_s22 + $0x10] sm:$0xff]  ;;  %vm1151_vm1 = vcmask 130048  }
  0x54   : > { %v5546_v2 = vld [vmem:[%s5529_s22 + $0x8] sm:$0xff]  ;;  %v382_v3 = vsel %vm381_vm0, %v5540_v0, 0.0  ;;  %v388_v4 = vsel %vm381_vm0, %v5543_v1, 0.0  ;;  %v5553_v5 = vld [vmem:[%s5529_s22 + $0x18] sm:$0xff]  ;;  %v5560_v8 = vld [vmem:[%s5529_s22 + $0x20] sm:$0xff]  ;;  %s5353_s24 = smov 96  }
  0x55   : > { %383 = vadd.xlane.f32.xlu0 %v382_v3  ;;  %389 = vadd.xlane.f32.xlu1 %v388_v4  ;;  %v385_v6 = vsel %vm381_vm0, %v5546_v2, 0.0  ;;  %v391_v7 = vsel %vm381_vm0, %v5553_v5, 0.0  ;;  %v5563_v9 = vld [vmem:[%s5529_s22 + $0x28] sm:$0xff]  ;;  %v394_v10 = vsel %vm381_vm0, %v5560_v8, 0.0  ;;  %v5570_v12 = vld [vmem:[%s5529_s22 + $0x30] sm:$0xff]  ;;  %v5573_v13 = vld [vmem:[%s5529_s22 + $0x38] sm:$0xff] }
  0x56   : > { %v397_v11 = vsel %vm381_vm0, %v5563_v9, 0.0  ;;  %v400_v14 = vsel %vm381_vm0, %v5570_v12, 0.0  ;;  %v5578_v15 = vld [vmem:[%s5529_s22 + $0x40] sm:$0xff]  ;;  %v403_v16 = vsel %vm381_vm0, %v5573_v13, 0.0  ;;  %v5583_v17 = vld [vmem:[%s5529_s22 + $0x48] sm:$0xff]  ;;  %v5590_v20 = vld [vmem:[%s5529_s22 + $0x50] sm:$0xff] }
  0x57   : > { %v406_v18 = vsel %vm381_vm0, %v5578_v15, 0.0  ;;  %v409_v19 = vsel %vm381_vm0, %v5583_v17, 0.0  ;;  %v5593_v21 = vld [vmem:[%s5529_s22 + $0x58] sm:$0xff]  ;;  %v412_v22 = vsel %vm381_vm0, %v5590_v20, 0.0  ;;  %v5600_v24 = vld [vmem:[%s5529_s22 + $0x60] sm:$0xff]  ;;  %v5603_v25 = vld [vmem:[%s5529_s22 + $0x68] sm:$0xff] }
  0x58   : > { %v415_v23 = vsel %vm381_vm0, %v5593_v21, 0.0  ;;  %v418_v26 = vsel %vm381_vm0, %v5600_v24, 0.0  ;;  %v421_v27 = vsel %vm381_vm0, %v5603_v25, 0.0  ;;  %v5610_v28 = vld [vmem:[%s5529_s22 + $0x70] sm:$0xff]  ;;  %v5613_v29 = vld [vmem:[%s5529_s22 + $0x78] sm:$0xff]  ;;  %v5620_v32 = vld [vmem:[%s5529_s22 + $0x80] sm:$0xff] }
  0x59   : > { %386 = vadd.xlane.f32.xlu0 %v385_v6  ;;  %392 = vadd.xlane.f32.xlu1 %v391_v7  ;;  %v424_v30 = vsel %vm381_vm0, %v5610_v28, 0.0  ;;  %v427_v31 = vsel %vm381_vm0, %v5613_v29, 0.0  ;;  %v5623_v33 = vld [vmem:[%s5529_s22 + $0x88] sm:$0xff]  ;;  %v430_v34 = vsel %vm381_vm0, %v5620_v32, 0.0  ;;  %v5630_v36 = vld [vmem:[%s5529_s22 + $0x90] sm:$0xff]  ;;  %v5633_v37 = vld [vmem:[%s5529_s22 + $0x98] sm:$0xff] }
  0x5a   : > { %v433_v35 = vsel %vm381_vm0, %v5623_v33, 0.0  ;;  %v436_v38 = vsel %vm381_vm0, %v5630_v36, 0.0  ;;  %v439_v39 = vsel %vm381_vm0, %v5633_v37, 0.0  ;;  %v5640_v40 = vld [vmem:[%s5529_s22 + $0xa0] sm:$0xff]  ;;  %v5643_v41 = vld [vmem:[%s5529_s22 + $0xa8] sm:$0xff]  ;;  %v5650_v44 = vld [vmem:[%s5529_s22 + $0xb0] sm:$0xff] }
  0x5b   : > { %v442_v42 = vsel %vm381_vm0, %v5640_v40, 0.0  ;;  %v445_v43 = vsel %vm381_vm0, %v5643_v41, 0.0  ;;  %v5653_v45 = vld [vmem:[%s5529_s22 + $0xb8] sm:$0xff]  ;;  %v448_v46 = vsel %vm381_vm0, %v5650_v44, 0.0  ;;  %v5660_v48 = vld [vmem:[%s5529_s22 + $0xc0] sm:$0xff]  ;;  %v5663_v49 = vld [vmem:[%s5529_s22 + $0xc8] sm:$0xff] }
  0x5c   : > { %v451_v47 = vsel %vm381_vm0, %v5653_v45, 0.0  ;;  %v454_v50 = vsel %vm381_vm0, %v5660_v48, 0.0  ;;  %v457_v51 = vsel %vm381_vm0, %v5663_v49, 0.0  ;;  %v5670_v52 = vld [vmem:[%s5529_s22 + $0xd0] sm:$0xff]  ;;  %v5673_v53 = vld [vmem:[%s5529_s22 + $0xd8] sm:$0xff]  ;;  %v5680_v56 = vld [vmem:[%s5529_s22 + $0xe0] sm:$0xff] }
  0x5d   : > { %395 = vadd.xlane.f32.xlu0 %v394_v10  ;;  %398 = vadd.xlane.f32.xlu1 %v397_v11  ;;  %v460_v54 = vsel %vm381_vm0, %v5670_v52, 0.0  ;;  %v463_v55 = vsel %vm381_vm0, %v5673_v53, 0.0  ;;  %v5683_v57 = vld [vmem:[%s5529_s22 + $0xe8] sm:$0xff]  ;;  %v466_v58 = vsel %vm381_vm0, %v5680_v56, 0.0  ;;  %v5690_v60 = vld [vmem:[%s5529_s22 + $0xf0] sm:$0xff]  ;;  %v5693_v61 = vld [vmem:[%s5529_s22 + $0xf8] sm:$0xff] }
  0x5e   : > { %v469_v59 = vsel %vm381_vm0, %v5683_v57, 0.0  ;;  %v472_v62 = vsel %vm381_vm0, %v5690_v60, 0.0  ;;  %v475_v63 = vsel %vm381_vm0, %v5693_v61, 0.0  ;;  %s5354_s26 = smov 64   ;;  %s5355_s20 = smov 80   ;;  %vm1616_vm2 = vcmask 523264  }
  0x5f   : > { %s5356_s25 = smov 112   ;;  %s5357_s14 = smov 48  }
  0x60   : > { %s5358_s13 = smov 16   ;;  %s4121_s15 = sshll.u32 %s4109_s9, 2 }
  0x61   : > { %401 = vadd.xlane.f32.xlu0 %v400_v14  ;;  %404 = vadd.xlane.f32.xlu1 %v403_v16  ;;  %p340_p7 = scmp.lt.s32.totalorder %s4121_s15, 7 }
  0x63   : > { %s7651_s15 = smov (!%p340_p7, %s4121_s15), 7 }
  0x64   : > { %s4232_s19 = sshll.u32 %s7651_s15, 6 }
  0x65   : > { %407 = vadd.xlane.f32.xlu0 %v406_v18  ;;  %410 = vadd.xlane.f32.xlu1 %v409_v19  ;;  %s7386_s30 = scalar_lea.vmem %s7536_s8, %s4232_s19 }
  0x69   : > { %413 = vadd.xlane.f32.xlu0 %v412_v22  ;;  %416 = vadd.xlane.f32.xlu1 %v415_v23 }
  0x6d   : > { %419 = vadd.xlane.f32.xlu0 %v418_v26  ;;  %422 = vadd.xlane.f32.xlu1 %v421_v27 }
  0x71   : > { %425 = vadd.xlane.f32.xlu0 %v424_v30  ;;  %428 = vadd.xlane.f32.xlu1 %v427_v31 }
  0x75   : > { %431 = vadd.xlane.f32.xlu0 %v430_v34  ;;  %434 = vadd.xlane.f32.xlu1 %v433_v35 }
  0x79   : > { %437 = vadd.xlane.f32.xlu0 %v436_v38  ;;  %440 = vadd.xlane.f32.xlu1 %v439_v39 }
  0x7d   : > { %443 = vadd.xlane.f32.xlu0 %v442_v42  ;;  %446 = vadd.xlane.f32.xlu1 %v445_v43 }
  0x81   : > { %449 = vadd.xlane.f32.xlu0 %v448_v46  ;;  %452 = vadd.xlane.f32.xlu1 %v451_v47 }
  0x85   : > { %455 = vadd.xlane.f32.xlu0 %v454_v50  ;;  %458 = vadd.xlane.f32.xlu1 %v457_v51 }
  0x89   : > { %461 = vadd.xlane.f32.xlu0 %v460_v54  ;;  %464 = vadd.xlane.f32.xlu1 %v463_v55 }
  0x8d   : > { %467 = vadd.xlane.f32.xlu0 %v466_v58  ;;  %470 = vadd.xlane.f32.xlu1 %v469_v59 }
  0x91   : > { %473 = vadd.xlane.f32.xlu0 %v472_v62  ;;  %476 = vadd.xlane.f32.xlu1 %v475_v63 }
  0xe2   : > { %v384_v3 = vpop.xlane.xlu0 %383  ;;  %v390_v4 = vpop.xlane.xlu1 %389 }
  0xe3   : > { %v479_v6 = vmul.f32 0.03125, %v384_v3  ;;  %v481_v7 = vmul.f32 0.03125, %v390_v4 }
  0xe5   : > { %v5700_v10 = vsub.f32 %v5540_v0, %v479_v6  ;;  %v5703_v11 = vsub.f32 %v5543_v1, %v481_v7 }
  0xe6   : > { %v387_v14 = vpop.xlane.xlu0 %386  ;;  %v393_v16 = vpop.xlane.xlu1 %392 }
  0xe7   : > { %v480_v18 = vmul.f32 0.03125, %v387_v14  ;;  %v482_v19 = vmul.f32 0.03125, %v393_v16  ;;  %v543_v22 = vmul.f32 %v5700_v10, %v5700_v10  ;;  %v545_v23 = vmul.f32 %v5703_v11, %v5703_v11 }
  0xe9   : > { %v5710_v26 = vsub.f32 %v5546_v2, %v480_v18  ;;  %v5713_v27 = vsub.f32 %v5553_v5, %v482_v19  ;;  %v575_v0 = vsel %vm381_vm0, %v543_v22, 0.0  ;;  %v581_v31 = vsel %vm381_vm0, %v545_v23, 0.0 }
  0xea   : > { %576 = vadd.xlane.f32.xlu0 %v575_v0  ;;  %v396_v1 = vpop.xlane.xlu0 %395  ;;  %v399_v30 = vpop.xlane.xlu1 %398 }
  0xeb   : > { %v483_v34 = vmul.f32 0.03125, %v396_v1  ;;  %v484_v35 = vmul.f32 0.03125, %v399_v30  ;;  %v544_v38 = vmul.f32 %v5710_v26, %v5710_v26  ;;  %v546_v39 = vmul.f32 %v5713_v27, %v5713_v27 }
  0xed   : > { %v5722_v2 = vsub.f32 %v5560_v8, %v483_v34  ;;  %v5725_v5 = vsub.f32 %v5563_v9, %v484_v35  ;;  %v578_v42 = vsel %vm381_vm0, %v544_v38, 0.0  ;;  %v584_v47 = vsel %vm381_vm0, %v546_v39, 0.0 }
  0xee   : > { %582 = vadd.xlane.f32.xlu0 %v581_v31  ;;  %579 = vadd.xlane.f32.xlu1 %v578_v42  ;;  %v402_v43 = vpop.xlane.xlu0 %401  ;;  %v405_v46 = vpop.xlane.xlu1 %404 }
  0xef   : > { %v485_v50 = vmul.f32 0.03125, %v402_v43  ;;  %v486_v51 = vmul.f32 0.03125, %v405_v46  ;;  %v547_v54 = vmul.f32 %v5722_v2, %v5722_v2  ;;  %v548_v8 = vmul.f32 %v5725_v5, %v5725_v5 }
  0xf1   : > { %v5734_v55 = vsub.f32 %v5570_v12, %v485_v50  ;;  %v5737_v9 = vsub.f32 %v5573_v13, %v486_v51  ;;  %v587_v58 = vsel %vm381_vm0, %v547_v54, 0.0  ;;  %v590_v63 = vsel %vm381_vm0, %v548_v8, 0.0 }
  0xf2   : > { %585 = vadd.xlane.f32.xlu1 %v584_v47  ;;  %588 = vadd.xlane.f32.xlu0 %v587_v58  ;;  %v408_v59 = vpop.xlane.xlu0 %407  ;;  %v411_v62 = vpop.xlane.xlu1 %410 }
  0xf3   : > { %v487_v3 = vmul.f32 0.03125, %v408_v59  ;;  %v488_v4 = vmul.f32 0.03125, %v411_v62  ;;  %v549_v6 = vmul.f32 %v5734_v55, %v5734_v55  ;;  %v550_v12 = vmul.f32 %v5737_v9, %v5737_v9 }
  0xf5   : > { %v5746_v7 = vsub.f32 %v5578_v15, %v487_v3  ;;  %v5749_v13 = vsub.f32 %v5583_v17, %v488_v4  ;;  %v593_v14 = vsel %vm381_vm0, %v549_v6, 0.0  ;;  %v596_v19 = vsel %vm381_vm0, %v550_v12, 0.0 }
  0xf6   : > { %591 = vadd.xlane.f32.xlu1 %v590_v63  ;;  %594 = vadd.xlane.f32.xlu0 %v593_v14  ;;  %v414_v16 = vpop.xlane.xlu0 %413  ;;  %v417_v18 = vpop.xlane.xlu1 %416 }
  0xf7   : > { %v489_v22 = vmul.f32 0.03125, %v414_v16  ;;  %v490_v23 = vmul.f32 0.03125, %v417_v18  ;;  %v551_v0 = vmul.f32 %v5746_v7, %v5746_v7  ;;  %v552_v15 = vmul.f32 %v5749_v13, %v5749_v13 }
  0xf9   : > { %v5758_v1 = vsub.f32 %v5590_v20, %v489_v22  ;;  %v5761_v17 = vsub.f32 %v5593_v21, %v490_v23  ;;  %v599_v30 = vsel %vm381_vm0, %v551_v0, 0.0  ;;  %v602_v35 = vsel %vm381_vm0, %v552_v15, 0.0 }
  0xfa   : > { %597 = vadd.xlane.f32.xlu1 %v596_v19  ;;  %600 = vadd.xlane.f32.xlu0 %v599_v30  ;;  %v420_v31 = vpop.xlane.xlu0 %419  ;;  %v423_v34 = vpop.xlane.xlu1 %422 }
  0xfb   : > { %v491_v38 = vmul.f32 0.03125, %v420_v31  ;;  %v492_v39 = vmul.f32 0.03125, %v423_v34  ;;  %v553_v42 = vmul.f32 %v5758_v1, %v5758_v1  ;;  %v554_v20 = vmul.f32 %v5761_v17, %v5761_v17 }
  0xfd   : > { %v5770_v43 = vsub.f32 %v5600_v24, %v491_v38  ;;  %v5773_v21 = vsub.f32 %v5603_v25, %v492_v39  ;;  %v605_v46 = vsel %vm381_vm0, %v553_v42, 0.0  ;;  %v608_v51 = vsel %vm381_vm0, %v554_v20, 0.0 }
  0xfe   : > { %603 = vadd.xlane.f32.xlu1 %v602_v35  ;;  %606 = vadd.xlane.f32.xlu0 %v605_v46  ;;  %v426_v47 = vpop.xlane.xlu0 %425  ;;  %v429_v50 = vpop.xlane.xlu1 %428 }
  0xff   : > { %v493_v54 = vmul.f32 0.03125, %v426_v47  ;;  %v494_v8 = vmul.f32 0.03125, %v429_v50  ;;  %v555_v58 = vmul.f32 %v5770_v43, %v5770_v43  ;;  %v556_v24 = vmul.f32 %v5773_v21, %v5773_v21 }
 0x101   : > { %v5782_v59 = vsub.f32 %v5610_v28, %v493_v54  ;;  %v5785_v25 = vsub.f32 %v5613_v29, %v494_v8  ;;  %v611_v62 = vsel %vm381_vm0, %v555_v58, 0.0  ;;  %v614_v4 = vsel %vm381_vm0, %v556_v24, 0.0  ;;  %v4895_v58 = vld [vmem:[%s7531_s3] sm:$0xff]  }
 0x102   : > { %609 = vadd.xlane.f32.xlu1 %v608_v51  ;;  %612 = vadd.xlane.f32.xlu0 %v611_v62  ;;  %v432_v63 = vpop.xlane.xlu0 %431  ;;  %v435_v3 = vpop.xlane.xlu1 %434 }
 0x103   : > { %v495_v6 = vmul.f32 0.03125, %v432_v63  ;;  %v496_v12 = vmul.f32 0.03125, %v435_v3  ;;  %v557_v14 = vmul.f32 %v5782_v59, %v5782_v59  ;;  %v558_v28 = vmul.f32 %v5785_v25, %v5785_v25  ;;  %4397 = vmatprep.subr.bf16.mxu0 %v4895_v58 }
 0x104   : > { %4398 = vmatpush3.bf16.msra.mxu0 %v4895_v58 }
 0x105   : > { %v5794_v16 = vsub.f32 %v5620_v32, %v495_v6  ;;  %v5797_v29 = vsub.f32 %v5623_v33, %v496_v12  ;;  %v617_v18 = vsel %vm381_vm0, %v557_v14, 0.0  ;;  %v620_v23 = vsel %vm381_vm0, %v558_v28, 0.0  ;;  %v4896_v28 = vld [vmem:[%s7531_s3 + $0x8] sm:$0xff]  }
 0x106   : > { %615 = vadd.xlane.f32.xlu1 %v614_v4  ;;  %618 = vadd.xlane.f32.xlu0 %v617_v18  ;;  %v438_v19 = vpop.xlane.xlu0 %437  ;;  %v441_v22 = vpop.xlane.xlu1 %440 }
 0x107   : > { %v497_v0 = vmul.f32 0.03125, %v438_v19  ;;  %v498_v15 = vmul.f32 0.03125, %v441_v22  ;;  %v559_v30 = vmul.f32 %v5794_v16, %v5794_v16  ;;  %v560_v32 = vmul.f32 %v5797_v29, %v5797_v29  ;;  %4399 = vmatprep.subr.bf16.mxu0 %v4896_v28 }
 0x108   : > { %4400 = vmatpush3.bf16.msra.mxu0 %v4896_v28 }
 0x109   : > { %v5806_v31 = vsub.f32 %v5630_v36, %v497_v0  ;;  %v5809_v33 = vsub.f32 %v5633_v37, %v498_v15  ;;  %v623_v34 = vsel %vm381_vm0, %v559_v30, 0.0  ;;  %v626_v39 = vsel %vm381_vm0, %v560_v32, 0.0 }
 0x10a   : > { %621 = vadd.xlane.f32.xlu1 %v620_v23  ;;  %624 = vadd.xlane.f32.xlu0 %v623_v34  ;;  %v444_v35 = vpop.xlane.xlu0 %443  ;;  %v447_v38 = vpop.xlane.xlu1 %446 }
 0x10b   : > { %v499_v42 = vmul.f32 0.03125, %v444_v35  ;;  %v500_v20 = vmul.f32 0.03125, %v447_v38  ;;  %v561_v46 = vmul.f32 %v5806_v31, %v5806_v31  ;;  %v562_v36 = vmul.f32 %v5809_v33, %v5809_v33 }
 0x10d   : > { %v5818_v47 = vsub.f32 %v5640_v40, %v499_v42  ;;  %v5821_v37 = vsub.f32 %v5643_v41, %v500_v20  ;;  %v629_v50 = vsel %vm381_vm0, %v561_v46, 0.0  ;;  %v632_v8 = vsel %vm381_vm0, %v562_v36, 0.0 }
 0x10e   : > { %627 = vadd.xlane.f32.xlu1 %v626_v39  ;;  %630 = vadd.xlane.f32.xlu0 %v629_v50  ;;  %v450_v51 = vpop.xlane.xlu0 %449  ;;  %v453_v54 = vpop.xlane.xlu1 %452 }
 0x10f   : > { %v501_v24 = vmul.f32 0.03125, %v450_v51  ;;  %v502_v62 = vmul.f32 0.03125, %v453_v54  ;;  %v563_v40 = vmul.f32 %v5818_v47, %v5818_v47  ;;  %v564_v41 = vmul.f32 %v5821_v37, %v5821_v37 }
 0x111   : > { %v5833_v63 = vsub.f32 %v5650_v44, %v501_v24  ;;  %v5836_v3 = vsub.f32 %v5653_v45, %v502_v62  ;;  %v635_v4 = vsel %vm381_vm0, %v563_v40, 0.0  ;;  %v638_v14 = vsel %vm381_vm0, %v564_v41, 0.0 }
 0x112   : > { %633 = vadd.xlane.f32.xlu1 %v632_v8  ;;  %636 = vadd.xlane.f32.xlu0 %v635_v4  ;;  %v456_v6 = vpop.xlane.xlu0 %455  ;;  %v459_v12 = vpop.xlane.xlu1 %458 }
 0x113   : > { %v503_v18 = vmul.f32 0.03125, %v456_v6  ;;  %v504_v19 = vmul.f32 0.03125, %v459_v12  ;;  %v565_v44 = vmul.f32 %v5833_v63, %v5833_v63  ;;  %v566_v45 = vmul.f32 %v5836_v3, %v5836_v3 }
 0x115   : > { %v5848_v22 = vsub.f32 %v5660_v48, %v503_v18  ;;  %v5851_v23 = vsub.f32 %v5663_v49, %v504_v19  ;;  %v641_v0 = vsel %vm381_vm0, %v565_v44, 0.0  ;;  %v644_v32 = vsel %vm381_vm0, %v566_v45, 0.0 }
 0x116   : > { %639 = vadd.xlane.f32.xlu1 %v638_v14  ;;  %642 = vadd.xlane.f32.xlu0 %v641_v0  ;;  %v462_v15 = vpop.xlane.xlu0 %461  ;;  %v465_v30 = vpop.xlane.xlu1 %464 }
 0x117   : > { %v505_v34 = vmul.f32 0.03125, %v462_v15  ;;  %v506_v35 = vmul.f32 0.03125, %v465_v30  ;;  %v567_v38 = vmul.f32 %v5848_v22, %v5848_v22  ;;  %v568_v48 = vmul.f32 %v5851_v23, %v5851_v23 }
 0x119   : > { %v5860_v49 = vsub.f32 %v5670_v52, %v505_v34  ;;  %v5863_v39 = vsub.f32 %v5673_v53, %v506_v35  ;;  %v647_v42 = vsel %vm381_vm0, %v567_v38, 0.0  ;;  %v650_v36 = vsel %vm381_vm0, %v568_v48, 0.0 }
 0x11a   : > { %645 = vadd.xlane.f32.xlu1 %v644_v32  ;;  %648 = vadd.xlane.f32.xlu0 %v647_v42  ;;  %v468_v20 = vpop.xlane.xlu0 %467  ;;  %v471_v46 = vpop.xlane.xlu1 %470 }
 0x11b   : > { %v507_v50 = vmul.f32 0.03125, %v468_v20  ;;  %v508_v51 = vmul.f32 0.03125, %v471_v46  ;;  %v569_v54 = vmul.f32 %v5860_v49, %v5860_v49  ;;  %v570_v52 = vmul.f32 %v5863_v39, %v5863_v39 }
 0x11d   : > { %v5872_v8 = vsub.f32 %v5680_v56, %v507_v50  ;;  %v5875_v53 = vsub.f32 %v5683_v57, %v508_v51  ;;  %v653_v58 = vsel %vm381_vm0, %v569_v54, 0.0  ;;  %v656_v40 = vsel %vm381_vm0, %v570_v52, 0.0 }
 0x11e   : > { %651 = vadd.xlane.f32.xlu1 %v650_v36  ;;  %654 = vadd.xlane.f32.xlu0 %v653_v58  ;;  %v474_v24 = vpop.xlane.xlu0 %473  ;;  %v477_v62 = vpop.xlane.xlu1 %476 }
 0x11f   : > { %v509_v41 = vmul.f32 0.03125, %v474_v24  ;;  %v510_v4 = vmul.f32 0.03125, %v477_v62  ;;  %v571_v6 = vmul.f32 %v5872_v8, %v5872_v8  ;;  %v572_v56 = vmul.f32 %v5875_v53, %v5875_v53 }
 0x121   : > { %v5884_v12 = vsub.f32 %v5690_v60, %v509_v41  ;;  %v5887_v57 = vsub.f32 %v5693_v61, %v510_v4  ;;  %v659_v14 = vsel %vm381_vm0, %v571_v6, 0.0  ;;  %v662_v28 = vsel %vm381_vm0, %v572_v56, 0.0 }
 0x122   : > { %657 = vadd.xlane.f32.xlu1 %v656_v40  ;;  %660 = vadd.xlane.f32.xlu0 %v659_v14 }
 0x123   : > { %v573_v18 = vmul.f32 %v5884_v12, %v5884_v12  ;;  %v574_v19 = vmul.f32 %v5887_v57, %v5887_v57 }
 0x125   : > { %v665_v44 = vsel %vm381_vm0, %v573_v18, 0.0  ;;  %v668_v60 = vsel %vm381_vm0, %v574_v19, 0.0 }
 0x126   : > { %663 = vadd.xlane.f32.xlu1 %v662_v28  ;;  %666 = vadd.xlane.f32.xlu0 %v665_v44  ;;  %v5901_v28 = vld [vmem:[%s7529_s1] ss:$0 sm:$0xff] }
 0x12a   : > { %669 = vadd.xlane.f32.xlu1 %v668_v60 }
 0x177   : > { %v577_v61 = vpop.xlane.xlu0 %576 }
 0x178   : > { %v671_v45 = vmul.f32 0.03125, %v577_v61 }
 0x17a   : > { %v703_v0 = vadd.f32 1e-06, %v671_v45 }
 0x17b   : > { %v580_v15 = vpop.xlane.xlu1 %579  ;;  %v583_v30 = vpop.xlane.xlu0 %582 }
 0x17c   : > { %4899 = vrsqrt.f32 %v703_v0  ;;  %v672_v32 = vmul.f32 0.03125, %v580_v15  ;;  %v673_v34 = vmul.f32 0.03125, %v583_v30 }
 0x17e   : > { %v704_v35 = vadd.f32 1e-06, %v672_v32  ;;  %v705_v38 = vadd.f32 1e-06, %v673_v34  ;;  %v5908_v32 = vld [vmem:[%s7530_s2] ss:$0 sm:$0xff] }
 0x17f   : > { %v586_v48 = vpop.xlane.xlu1 %585  ;;  %v589_v42 = vpop.xlane.xlu0 %588 }
 0x180   : > { %4901 = vrsqrt.f32 %v704_v35  ;;  %v674_v20 = vmul.f32 0.03125, %v586_v48  ;;  %v675_v46 = vmul.f32 0.03125, %v589_v42 }
 0x181   : > { %4903 = vrsqrt.f32 %v705_v38 }
 0x182   : > { %v706_v36 = vadd.f32 1e-06, %v674_v20  ;;  %v707_v50 = vadd.f32 1e-06, %v675_v46 }
 0x183   : > { %v592_v51 = vpop.xlane.xlu1 %591  ;;  %v595_v54 = vpop.xlane.xlu0 %594 }
 0x184   : > { %4905 = vrsqrt.f32 %v706_v36  ;;  %v676_v52 = vmul.f32 0.03125, %v592_v51  ;;  %v677_v58 = vmul.f32 0.03125, %v595_v54 }
 0x185   : > { %4907 = vrsqrt.f32 %v707_v50 }
 0x186   : > { %v4900_v24 = vpop.eup %4899  ;;  %v708_v62 = vadd.f32 1e-06, %v676_v52  ;;  %v709_v40 = vadd.f32 1e-06, %v677_v58 }
 0x187   : > { %v598_v41 = vpop.xlane.xlu1 %597  ;;  %v601_v4 = vpop.xlane.xlu0 %600  ;;  %v767_v6 = vmul.f32 %v4900_v24, %v5700_v10 }
 0x188   : > { %4909 = vrsqrt.f32 %v708_v62  ;;  %v678_v56 = vmul.f32 0.03125, %v598_v41  ;;  %v679_v14 = vmul.f32 0.03125, %v601_v4 }
 0x189   : > { %4911 = vrsqrt.f32 %v709_v40  ;;  %v805_v15 = vmul.f32 %v5901_v28, %v767_v6 }
 0x18a   : > { %v4902_v18 = vpop.eup %4901  ;;  %v710_v19 = vadd.f32 1e-06, %v678_v56  ;;  %v711_v44 = vadd.f32 1e-06, %v679_v14 }
 0x18b   : > { %v4904_v60 = vpop.eup %4903  ;;  %v604_v61 = vpop.xlane.xlu1 %603  ;;  %v768_v0 = vmul.f32 %v4902_v18, %v5710_v26  ;;  %v843_v36 = vadd.f32 %v5908_v32, %v805_v15 }
 0x18c   : > { %v607_v45 = vpop.xlane.xlu0 %606  ;;  %4913 = vrsqrt.f32 %v710_v19  ;;  %v680_v10 = vmul.f32 0.03125, %v604_v61  ;;  %v769_v34 = vmul.f32 %v4904_v60, %v5703_v11 }
 0x18d   : > { %v681_v30 = vmul.f32 0.03125, %v607_v45  ;;  %4915 = vrsqrt.f32 %v711_v44  ;;  %v806_v35 = vmul.f32 %v5901_v28, %v768_v0 }
 0x18e   : > { %v4906_v38 = vpop.eup %4905  ;;  %v712_v48 = vadd.f32 1e-06, %v680_v10  ;;  %v807_v54 = vmul.f32 %v5901_v28, %v769_v34 }
 0x18f   : > { %v713_v42 = vadd.f32 1e-06, %v681_v30  ;;  %v4908_v20 = vpop.eup %4907  ;;  %v610_v26 = vpop.xlane.xlu1 %609  ;;  %v844_v50 = vadd.f32 %v5908_v32, %v806_v35  ;;  %v770_v51 = vmul.f32 %v4906_v38, %v5713_v27 }
 0x190   : > { %v613_v46 = vpop.xlane.xlu0 %612  ;;  %4917 = vrsqrt.f32 %v712_v48  ;;  %v682_v52 = vmul.f32 0.03125, %v610_v26  ;;  %v771_v62 = vmul.f32 %v4908_v20, %v5722_v2  ;;  %v845_v27 = vadd.f32 %v5908_v32, %v807_v54 }
 0x191   : > { %v683_v11 = vmul.f32 0.03125, %v613_v46  ;;  %4919 = vrsqrt.f32 %v713_v42  ;;  %v875_v58 = vpack.c.bf16 %v844_v50, %v843_v36  ;;  %v808_v24 = vmul.f32 %v5901_v28, %v770_v51 }
 0x192   : > { %v4910_v40 = vpop.eup %4909  ;;  %v714_v41 = vadd.f32 1e-06, %v682_v52  ;;  %v809_v44 = vmul.f32 %v5901_v28, %v771_v62 }
 0x193   : > { %v715_v4 = vadd.f32 1e-06, %v683_v11  ;;  %v4912_v6 = vpop.eup %4911  ;;  %v616_v56 = vpop.xlane.xlu1 %615  ;;  %4401 = vmatprep.mubr.msk.bf16.mxu0 %vm381_vm0, %v875_v58  ;;  %v846_v18 = vadd.f32 %v5908_v32, %v808_v24  ;;  %v772_v19 = vmul.f32 %v4910_v40, %v5725_v5 }
 0x194   : > { %v619_v14 = vpop.xlane.xlu0 %618  ;;  %4921 = vrsqrt.f32 %v714_v41  ;;  %v684_v60 = vmul.f32 0.03125, %v616_v56  ;;  %v773_v2 = vmul.f32 %v4912_v6, %v5734_v55  ;;  %v847_v5 = vadd.f32 %v5908_v32, %v809_v44 }
 0x195   : > { %v685_v61 = vmul.f32 0.03125, %v619_v14  ;;  %4923 = vrsqrt.f32 %v715_v4  ;;  %v876_v45 = vpack.c.bf16 %v846_v18, %v845_v27  ;;  %v810_v0 = vmul.f32 %v5901_v28, %v772_v19 }
 0x196   : > { %v4914_v15 = vpop.eup %4913  ;;  %v716_v10 = vadd.f32 1e-06, %v684_v60  ;;  %v811_v55 = vmul.f32 %v5901_v28, %v773_v2 }
 0x197   : > { %v717_v30 = vadd.f32 1e-06, %v685_v61  ;;  %v4916_v34 = vpop.eup %4915  ;;  %v622_v35 = vpop.xlane.xlu1 %621  ;;  %4402 = vmatmul.mubr.msk.bf16.vlgmr.msra.gmra.mrb[0].mxu0 %vm381_vm0, %v876_v45  ;;  %v848_v48 = vadd.f32 %v5908_v32, %v810_v0  ;;  %v774_v42 = vmul.f32 %v4914_v15, %v5737_v9 }
 0x198   : > { %v625_v38 = vpop.xlane.xlu0 %624  ;;  %4925 = vrsqrt.f32 %v716_v10  ;;  %v686_v20 = vmul.f32 0.03125, %v622_v35  ;;  %v775_v50 = vmul.f32 %v4916_v34, %v5746_v7  ;;  %v849_v9 = vadd.f32 %v5908_v32, %v811_v55 }
 0x199   : > { %v687_v26 = vmul.f32 0.03125, %v625_v38  ;;  %4927 = vrsqrt.f32 %v717_v30  ;;  %v877_v46 = vpack.c.bf16 %v848_v48, %v847_v5  ;;  %v812_v36 = vmul.f32 %v5901_v28, %v774_v42 }
 0x19a   : > { %v4918_v51 = vpop.eup %4917  ;;  %v718_v54 = vadd.f32 1e-06, %v686_v20  ;;  %v813_v41 = vmul.f32 %v5901_v28, %v775_v50 }
 0x19b   : > { %v719_v52 = vadd.f32 1e-06, %v687_v26  ;;  %v4920_v11 = vpop.eup %4919  ;;  %v628_v58 = vpop.xlane.xlu1 %627  ;;  %4405 = vmatprep.mubr.msk.bf16.mxu0 %vm381_vm0, %v877_v46  ;;  %v850_v62 = vadd.f32 %v5908_v32, %v812_v36  ;;  %v776_v40 = vmul.f32 %v4918_v51, %v5749_v13 }
 0x19c   : > { %v631_v24 = vpop.xlane.xlu0 %630  ;;  %4929 = vrsqrt.f32 %v718_v54  ;;  %v688_v4 = vmul.f32 0.03125, %v628_v58  ;;  %v777_v7 = vmul.f32 %v4920_v11, %v5758_v1  ;;  %v851_v13 = vadd.f32 %v5908_v32, %v813_v41 }
 0x19d   : > { %v689_v6 = vmul.f32 0.03125, %v631_v24  ;;  %4931 = vrsqrt.f32 %v719_v52  ;;  %v878_v56 = vpack.c.bf16 %v850_v62, %v849_v9  ;;  %v814_v14 = vmul.f32 %v5901_v28, %v776_v40 }
 0x19e   : > { %v4922_v27 = vpop.eup %4921  ;;  %v720_v18 = vadd.f32 1e-06, %v688_v4  ;;  %v815_v1 = vmul.f32 %v5901_v28, %v777_v7 }
 0x19f   : > { %v721_v19 = vadd.f32 1e-06, %v689_v6  ;;  %v4924_v44 = vpop.eup %4923  ;;  %v634_v60 = vpop.xlane.xlu1 %633  ;;  %4406 = vmatmul.mubr.msk.bf16.gmra.mrb[4].mxu0 %vm381_vm0, %v878_v56  ;;  %v852_v2 = vadd.f32 %v5908_v32, %v814_v14  ;;  %v778_v45 = vmul.f32 %v4922_v27, %v5761_v17 }
 0x1a0   : > { %v637_v61 = vpop.xlane.xlu0 %636  ;;  %4933 = vrsqrt.f32 %v720_v18  ;;  %v690_v0 = vmul.f32 0.03125, %v634_v60  ;;  %v779_v34 = vmul.f32 %v4924_v44, %v5770_v43  ;;  %v853_v17 = vadd.f32 %v5908_v32, %v815_v1 }
 0x1a1   : > { %v691_v15 = vmul.f32 0.03125, %v637_v61  ;;  %4935 = vrsqrt.f32 %v721_v19  ;;  %v879_v10 = vpack.c.bf16 %v852_v2, %v851_v13  ;;  %v816_v30 = vmul.f32 %v5901_v28, %v778_v45 }
 0x1a2   : > { %v4926_v35 = vpop.eup %4925  ;;  %v722_v38 = vadd.f32 1e-06, %v690_v0  ;;  %v817_v46 = vmul.f32 %v5901_v28, %v779_v34 }
 0x1a3   : > { %v723_v5 = vadd.f32 1e-06, %v691_v15  ;;  %v4928_v48 = vpop.eup %4927  ;;  %v640_v42 = vpop.xlane.xlu1 %639  ;;  %4409 = vmatprep.mubr.msk.bf16.mxu0 %vm381_vm0, %v879_v10  ;;  %v854_v20 = vadd.f32 %v5908_v32, %v816_v30  ;;  %v780_v26 = vmul.f32 %v4926_v35, %v5773_v21 }
 0x1a4   : > { %v643_v55 = vpop.xlane.xlu0 %642  ;;  %4937 = vrsqrt.f32 %v722_v38  ;;  %v692_v36 = vmul.f32 0.03125, %v640_v42  ;;  %v781_v43 = vmul.f32 %v4928_v48, %v5782_v59  ;;  %v855_v21 = vadd.f32 %v5908_v32, %v817_v46 }
 0x1a5   : > { %v693_v50 = vmul.f32 0.03125, %v643_v55  ;;  %4939 = vrsqrt.f32 %v723_v5  ;;  %v880_v51 = vpack.c.bf16 %v854_v20, %v853_v17  ;;  %v818_v54 = vmul.f32 %v5901_v28, %v780_v26 }
 0x1a6   : > { %v4930_v52 = vpop.eup %4929  ;;  %v724_v11 = vadd.f32 1e-06, %v692_v36  ;;  %v819_v59 = vmul.f32 %v5901_v28, %v781_v43 }
 0x1a7   : > { %v725_v58 = vadd.f32 1e-06, %v693_v50  ;;  %v4932_v24 = vpop.eup %4931  ;;  %v646_v9 = vpop.xlane.xlu1 %645  ;;  %4410 = vmatmul.mubr.msk.bf16.gmra.mrb[8].mxu0 %vm381_vm0, %v880_v51  ;;  %v856_v40 = vadd.f32 %v5908_v32, %v818_v54  ;;  %v782_v41 = vmul.f32 %v4930_v52, %v5785_v25 }
 0x1a8   : > { %v649_v62 = vpop.xlane.xlu0 %648  ;;  %4941 = vrsqrt.f32 %v724_v11  ;;  %v694_v4 = vmul.f32 0.03125, %v646_v9  ;;  %v783_v14 = vmul.f32 %v4932_v24, %v5794_v16  ;;  %v857_v25 = vadd.f32 %v5908_v32, %v819_v59 }
 0x1a9   : > { %v695_v6 = vmul.f32 0.03125, %v649_v62  ;;  %4943 = vrsqrt.f32 %v725_v58  ;;  %v881_v7 = vpack.c.bf16 %v856_v40, %v855_v21  ;;  %v820_v56 = vmul.f32 %v5901_v28, %v782_v41 }
 0x1aa   : > { %v4934_v27 = vpop.eup %4933  ;;  %v726_v18 = vadd.f32 1e-06, %v694_v4  ;;  %v821_v45 = vmul.f32 %v5901_v28, %v783_v14 }
 0x1ab   : > { %v727_v19 = vadd.f32 1e-06, %v695_v6  ;;  %v4936_v44 = vpop.eup %4935  ;;  %v652_v60 = vpop.xlane.xlu1 %651  ;;  %4413 = vmatprep.mubr.msk.bf16.mxu0 %vm381_vm0, %v881_v7  ;;  %v858_v13 = vadd.f32 %v5908_v32, %v820_v56  ;;  %v784_v2 = vmul.f32 %v4934_v27, %v5797_v29 }
 0x1ac   : > { %v655_v61 = vpop.xlane.xlu0 %654  ;;  %4945 = vrsqrt.f32 %v726_v18  ;;  %v696_v1 = vmul.f32 0.03125, %v652_v60  ;;  %v785_v16 = vmul.f32 %v4936_v44, %v5806_v31  ;;  %v859_v29 = vadd.f32 %v5908_v32, %v821_v45 }
 0x1ad   : > { %v697_v0 = vmul.f32 0.03125, %v655_v61  ;;  %4947 = vrsqrt.f32 %v727_v19  ;;  %v882_v15 = vpack.c.bf16 %v858_v13, %v857_v25  ;;  %v822_v10 = vmul.f32 %v5901_v28, %v784_v2 }
 0x1ae   : > { %v4938_v30 = vpop.eup %4937  ;;  %v728_v34 = vadd.f32 1e-06, %v696_v1  ;;  %v823_v31 = vmul.f32 %v5901_v28, %v785_v16 }
 0x1af   : > { %v729_v35 = vadd.f32 1e-06, %v697_v0  ;;  %v4940_v38 = vpop.eup %4939  ;;  %v658_v5 = vpop.xlane.xlu1 %657  ;;  %4414 = vmatmul.mubr.msk.bf16.gmra.mrb[12].mxu0 %vm381_vm0, %v882_v15  ;;  %v860_v42 = vadd.f32 %v5908_v32, %v822_v10  ;;  %v786_v55 = vmul.f32 %v4938_v30, %v5809_v33 }
 0x1b0   : > { %v661_v48 = vpop.xlane.xlu0 %660  ;;  %4949 = vrsqrt.f32 %v728_v34  ;;  %v698_v17 = vmul.f32 0.03125, %v658_v5  ;;  %v787_v36 = vmul.f32 %v4940_v38, %v5818_v47  ;;  %v861_v33 = vadd.f32 %v5908_v32, %v823_v31 }
 0x1b1   : > { %v699_v20 = vmul.f32 0.03125, %v661_v48  ;;  %4951 = vrsqrt.f32 %v729_v35  ;;  %v883_v26 = vpack.c.bf16 %v860_v42, %v859_v29  ;;  %v824_v46 = vmul.f32 %v5901_v28, %v786_v55 }
 0x1b2   : > { %v4942_v50 = vpop.eup %4941  ;;  %v730_v43 = vadd.f32 1e-06, %v698_v17  ;;  %v825_v9 = vmul.f32 %v5901_v28, %v787_v36 }
 0x1b3   : > { %v731_v51 = vadd.f32 1e-06, %v699_v20  ;;  %v4944_v54 = vpop.eup %4943  ;;  %v664_v52 = vpop.xlane.xlu1 %663  ;;  %4417 = vmatprep.mubr.msk.bf16.mxu0 %vm381_vm0, %v883_v26  ;;  %v862_v58 = vadd.f32 %v5908_v32, %v824_v46  ;;  %v788_v24 = vmul.f32 %v4942_v50, %v5821_v37 }
 0x1b4   : > { %v667_v11 = vpop.xlane.xlu0 %666  ;;  %4953 = vrsqrt.f32 %v730_v43  ;;  %v700_v62 = vmul.f32 0.03125, %v664_v52  ;;  %v789_v47 = vmul.f32 %v4944_v54, %v5833_v63  ;;  %v863_v37 = vadd.f32 %v5908_v32, %v825_v9 }
 0x1b5   : > { %v701_v21 = vmul.f32 0.03125, %v667_v11  ;;  %4955 = vrsqrt.f32 %v731_v51  ;;  %v884_v40 = vpack.c.bf16 %v862_v58, %v861_v33  ;;  %v826_v41 = vmul.f32 %v5901_v28, %v788_v24  ;;  %v6022_v33 = vld [vmem:[%s7532_s4] ss:$0 sm:$0xff] }
 0x1b6   : > { %v4946_v59 = vpop.eup %4945  ;;  %v732_v4 = vadd.f32 1e-06, %v700_v62  ;;  %v827_v18 = vmul.f32 %v5901_v28, %v789_v47 }
 0x1b7   : > { %v733_v6 = vadd.f32 1e-06, %v701_v21  ;;  %v4948_v7 = vpop.eup %4947  ;;  %v670_v56 = vpop.xlane.xlu1 %669  ;;  %4418 = vmatmul.mubr.msk.bf16.gmra.mrb[16].mxu0 %vm381_vm0, %v884_v40  ;;  %v864_v14 = vadd.f32 %v5908_v32, %v826_v41  ;;  %v790_v27 = vmul.f32 %v4946_v59, %v5836_v3 }
 0x1b8   : > { %4957 = vrsqrt.f32 %v732_v4  ;;  %v702_v63 = vmul.f32 0.03125, %v670_v56  ;;  %v791_v19 = vmul.f32 %v4948_v7, %v5848_v22  ;;  %v865_v2 = vadd.f32 %v5908_v32, %v827_v18 }
 0x1b9   : > { %4959 = vrsqrt.f32 %v733_v6  ;;  %v885_v44 = vpack.c.bf16 %v864_v14, %v863_v37  ;;  %v828_v60 = vmul.f32 %v5901_v28, %v790_v27 }
 0x1ba   : > { %v4950_v61 = vpop.eup %4949  ;;  %v734_v25 = vadd.f32 1e-06, %v702_v63  ;;  %v829_v1 = vmul.f32 %v5901_v28, %v791_v19 }
 0x1bb   : > { %v4952_v13 = vpop.eup %4951  ;;  %4421 = vmatprep.mubr.msk.bf16.mxu0 %vm381_vm0, %v885_v44  ;;  %v866_v45 = vadd.f32 %v5908_v32, %v828_v60  ;;  %v792_v3 = vmul.f32 %v4950_v61, %v5851_v23 }
 0x1bc   : > { %4961 = vrsqrt.f32 %v734_v25  ;;  %v793_v22 = vmul.f32 %v4952_v13, %v5860_v49  ;;  %v867_v30 = vadd.f32 %v5908_v32, %v829_v1 }
 0x1bd   : > { %v886_v0 = vpack.c.bf16 %v866_v45, %v865_v2  ;;  %v830_v16 = vmul.f32 %v5901_v28, %v792_v3 }
 0x1be   : > { %v4954_v15 = vpop.eup %4953  ;;  %v831_v23 = vmul.f32 %v5901_v28, %v793_v22 }
 0x1bf   : > { %v4956_v10 = vpop.eup %4955  ;;  %4422 = vmatmul.mubr.msk.bf16.gmra.mrb[20].mxu0 %vm381_vm0, %v886_v0  ;;  %v868_v34 = vadd.f32 %v5908_v32, %v830_v16  ;;  %v794_v35 = vmul.f32 %v4954_v15, %v5863_v39 }
 0x1c0   : > { %v795_v38 = vmul.f32 %v4956_v10, %v5872_v8  ;;  %v869_v42 = vadd.f32 %v5908_v32, %v831_v23 }
 0x1c1   : > { %v887_v5 = vpack.c.bf16 %v868_v34, %v867_v30  ;;  %v832_v49 = vmul.f32 %v5901_v28, %v794_v35 }
 0x1c2   : > { %v4958_v48 = vpop.eup %4957  ;;  %v833_v17 = vmul.f32 %v5901_v28, %v795_v38 }
 0x1c3   : > { %v4960_v29 = vpop.eup %4959  ;;  %4425 = vmatprep.mubr.msk.bf16.mxu0 %vm381_vm0, %v887_v5  ;;  %v870_v55 = vadd.f32 %v5908_v32, %v832_v49  ;;  %v796_v31 = vmul.f32 %v4958_v48, %v5875_v53 }
 0x1c4   : > { %v797_v39 = vmul.f32 %v4960_v29, %v5884_v12  ;;  %v871_v46 = vadd.f32 %v5908_v32, %v833_v17 }
 0x1c5   : > { %v888_v20 = vpack.c.bf16 %v870_v55, %v869_v42  ;;  %v834_v8 = vmul.f32 %v5901_v28, %v796_v31 }
 0x1c6   : > { %v4962_v26 = vpop.eup %4961  ;;  %v835_v43 = vmul.f32 %v5901_v28, %v797_v39 }
 0x1c7   : > { %4426 = vmatmul.mubr.msk.bf16.gmra.mrb[24].mxu0 %vm381_vm0, %v888_v20  ;;  %v872_v36 = vadd.f32 %v5908_v32, %v834_v8  ;;  %v798_v50 = vmul.f32 %v4962_v26, %v5887_v57 }
 0x1c8   : > { %v873_v12 = vadd.f32 %v5908_v32, %v835_v43 }
 0x1c9   : > { %v889_v51 = vpack.c.bf16 %v872_v36, %v871_v46  ;;  %v836_v53 = vmul.f32 %v5901_v28, %v798_v50 }
 0x1cb   : > { %4429 = vmatprep.mubr.msk.bf16.mxu0 %vm381_vm0, %v889_v51  ;;  %v874_v54 = vadd.f32 %v5908_v32, %v836_v53 }
 0x1cd   : > { %v890_v52 = vpack.c.bf16 %v874_v54, %v873_v12 }
 0x1cf   : > { %4430 = vmatmul.mubr.msk.bf16.gmra.mrb[28].mxu0 %vm381_vm0, %v890_v52 }
 0x26a   : > { %v4403_v11 = vpop.f32.mrb[0].mxu0 }
 0x26b   : > { %v996_v57 = vpop.f32.mrb[1].mxu0  ;;  %v1005_v24 = vadd.f32 %v4403_v11, %v6022_v33 }
 0x26c   : > { %v4404_v58 = vpop.f32.mrb[2].mxu0  ;;  %v997_v62 = vadd.f32 %v6022_v33, %v996_v57 }
 0x26d   : > { %v1008_v28 = vadd.f32 %v4404_v58, %v6022_v33  ;;  %v999_v9 = vpop.f32.mrb[3].mxu0 }
 0x26e   : > { %v1000_v32 = vadd.f32 %v6022_v33, %v999_v9 }
 0x26f   : > { %v6028_v21 = vpack.c.bf16 %v1008_v28, %v1005_v24 }
 0x270   : > { %v6030_v47 = vpack.c.bf16 %v1000_v32, %v997_v62 }
 0x271   : > { %1145 = vrot.lane.b32.xlu1 %v6028_v21, %s5353_s24 }
 0x272   : > { %7566 = vst [vmem:[#allocation8_spill] sm:$0xff] %v6030_v47  ;;  %1143 = vrot.lane.b32.xlu0 %v6030_v47, %s5353_s24  ;;  %v4407_v40 = vpop.f32.mrb[4].mxu0  ;;  %4441 = vmatprep.mubr.msk.bf16.mxu0 %vm1151_vm1, %v6030_v47 }
 0x273   : > { %v1012_v41 = vpop.f32.mrb[5].mxu0  ;;  %v1021_v4 = vadd.f32 %v4407_v40, %v6022_v33 }
 0x274   : > { %v4408_v59 = vpop.f32.mrb[6].mxu0  ;;  %v1013_v56 = vadd.f32 %v6022_v33, %v1012_v41 }
 0x275   : > { %v1024_v6 = vadd.f32 %v4408_v59, %v6022_v33  ;;  %v1015_v7 = vpop.f32.mrb[7].mxu0 }
 0x276   : > { %v1016_v37 = vadd.f32 %v6022_v33, %v1015_v7 }
 0x277   : > { %v6042_v14 = vpack.c.bf16 %v1024_v6, %v1021_v4 }
 0x278   : > { %v6044_v27 = vpack.c.bf16 %v1016_v37, %v1013_v56 }
 0x279   : > { %1149 = vrot.lane.b32.xlu0 %v6042_v14, %s5353_s24 }
 0x27a   : > { %7567 = vst [vmem:[#allocation9_spill] sm:$0xff] %v6044_v27  ;;  %1147 = vrot.lane.b32.xlu1 %v6044_v27, %s5353_s24  ;;  %v4411_v18 = vpop.f32.mrb[8].mxu0 }
 0x27b   : > { %v1028_v63 = vpop.f32.mrb[9].mxu0  ;;  %v1037_v44 = vadd.f32 %v4411_v18, %v6022_v33 }
 0x27c   : > { %v4412_v19 = vpop.f32.mrb[10].mxu0  ;;  %v1029_v25 = vadd.f32 %v6022_v33, %v1028_v63 }
 0x27d   : > { %v1040_v60 = vadd.f32 %v4412_v19, %v6022_v33  ;;  %v1031_v61 = vpop.f32.mrb[11].mxu0 }
 0x27e   : > { %v1032_v13 = vadd.f32 %v6022_v33, %v1031_v61 }
 0x27f   : > { %v6054_v2 = vpack.c.bf16 %v1040_v60, %v1037_v44 }
 0x280   : > { %v6056_v45 = vpack.c.bf16 %v1032_v13, %v1029_v25 }
 0x282   : > { %1245 = vrot.lane.b32.xlu1 %v6056_v45, %s5353_s24  ;;  %v4415_v3 = vpop.f32.mrb[12].mxu0  ;;  %4457 = vmatprep.mubr.msk.bf16.mxu1 %vm1151_vm1, %v6056_v45 }
 0x283   : > { %v1044_v1 = vpop.f32.mrb[13].mxu0  ;;  %v1053_v0 = vadd.f32 %v4415_v3, %v6022_v33 }
 0x284   : > { %v4416_v22 = vpop.f32.mrb[14].mxu0  ;;  %v1045_v10 = vadd.f32 %v6022_v33, %v1044_v1 }
 0x285   : > { %v1056_v16 = vadd.f32 %v4416_v22, %v6022_v33  ;;  %v1047_v15 = vpop.f32.mrb[15].mxu0 }
 0x286   : > { %v1048_v30 = vadd.f32 %v6022_v33, %v1047_v15  ;;  %1247 = vrot.lane.b32.xlu1 %v6054_v2, %s5353_s24 }
 0x287   : > { %v6068_v34 = vpack.c.bf16 %v1056_v16, %v1053_v0 }
 0x288   : > { %v6070_v35 = vpack.c.bf16 %v1048_v30, %v1045_v10 }
 0x28a   : > { %1249 = vrot.lane.b32.xlu0 %v6070_v35, %s5353_s24  ;;  %v4419_v23 = vpop.f32.mrb[16].mxu0 }
 0x28b   : > { %v1060_v38 = vpop.f32.mrb[17].mxu0  ;;  %v1069_v49 = vadd.f32 %v4419_v23, %v6022_v33 }
 0x28c   : > { %v4420_v5 = vpop.f32.mrb[18].mxu0  ;;  %v1061_v42 = vadd.f32 %v6022_v33, %v1060_v38 }
 0x28d   : > { %v1072_v48 = vadd.f32 %v4420_v5, %v6022_v33  ;;  %v1063_v29 = vpop.f32.mrb[19].mxu0 }
 0x28e   : > { %v1064_v55 = vadd.f32 %v6022_v33, %v1063_v29  ;;  %1251 = vrot.lane.b32.xlu0 %v6068_v34, %s5353_s24 }
 0x28f   : > { %v6080_v31 = vpack.c.bf16 %v1072_v48, %v1069_v49 }
 0x290   : > { %v6082_v17 = vpack.c.bf16 %v1064_v55, %v1061_v42 }
 0x292   : > { %1346 = vrot.lane.b32.xlu1 %v6082_v17, %s5353_s24  ;;  %v4423_v39 = vpop.f32.mrb[20].mxu0 }
 0x293   : > { %v1076_v20 = vpop.f32.mrb[21].mxu0  ;;  %v1085_v26 = vadd.f32 %v4423_v39, %v6022_v33 }
 0x294   : > { %v4424_v8 = vpop.f32.mrb[22].mxu0  ;;  %v1077_v50 = vadd.f32 %v6022_v33, %v1076_v20 }
 0x295   : > { %v1088_v46 = vadd.f32 %v4424_v8, %v6022_v33  ;;  %v1079_v36 = vpop.f32.mrb[23].mxu0 }
 0x296   : > { %v1080_v43 = vadd.f32 %v6022_v33, %v1079_v36  ;;  %1348 = vrot.lane.b32.xlu1 %v6080_v31, %s5353_s24 }
 0x297   : > { %v6092_v51 = vpack.c.bf16 %v1088_v46, %v1085_v26 }
 0x298   : > { %v6094_v53 = vpack.c.bf16 %v1080_v43, %v1077_v50 }
 0x29a   : > { %1350 = vrot.lane.b32.xlu0 %v6094_v53, %s5353_s24  ;;  %v4427_v12 = vpop.f32.mrb[24].mxu0 }
 0x29b   : > { %v1092_v54 = vpop.f32.mrb[25].mxu0  ;;  %v1101_v11 = vadd.f32 %v4427_v12, %v6022_v33 }
 0x29c   : > { %v4428_v52 = vpop.f32.mrb[26].mxu0  ;;  %v1093_v24 = vadd.f32 %v6022_v33, %v1092_v54 }
 0x29d   : > { %v1104_v57 = vadd.f32 %v4428_v52, %v6022_v33  ;;  %v1095_v58 = vpop.f32.mrb[27].mxu0 }
 0x29e   : > { %v1096_v28 = vadd.f32 %v6022_v33, %v1095_v58  ;;  %1352 = vrot.lane.b32.xlu0 %v6092_v51, %s5353_s24 }
 0x29f   : > { %v6104_v9 = vpack.c.bf16 %v1104_v57, %v1101_v11 }
 0x2a0   : > { %v6106_v62 = vpack.c.bf16 %v1096_v28, %v1093_v24 }
 0x2a1   : > { %7568 = vst [vmem:[#allocation10_spill] sm:$0xff] %v6104_v9 }
 0x2a2   : > { %1447 = vrot.lane.b32.xlu1 %v6106_v62, %s5353_s24  ;;  %v4431_v32 = vpop.f32.mrb[28].mxu0 }
 0x2a3   : > { %v1108_v40 = vpop.f32.mrb[29].mxu0  ;;  %v1117_v59 = vadd.f32 %v4431_v32, %v6022_v33 }
 0x2a4   : > { %v4432_v41 = vpop.f32.mrb[30].mxu0  ;;  %v1109_v7 = vadd.f32 %v6022_v33, %v1108_v40 }
 0x2a5   : > { %v1120_v4 = vadd.f32 %v4432_v41, %v6022_v33  ;;  %v1111_v6 = vpop.f32.mrb[31].mxu0 }
 0x2a6   : > { %v1112_v56 = vadd.f32 %v6022_v33, %v1111_v6  ;;  %1449 = vrot.lane.b32.xlu1 %v6104_v9, %s5353_s24 }
 0x2a7   : > { %v6116_v37 = vpack.c.bf16 %v1120_v4, %v1117_v59 }
 0x2a8   : > { %v6118_v18 = vpack.c.bf16 %v1112_v56, %v1109_v7  ;;  %v6231_v7 = vld [vmem:[#allocation4 + $0x10] sm:$0xff] }
 0x2a9   : > { %7569 = vst [vmem:[#allocation11_spill] sm:$0xff] %v6116_v37 }
 0x2aa   : > { %1453 = vrot.lane.b32.xlu1 %v6116_v37, %s5353_s24  ;;  %1451 = vrot.lane.b32.xlu0 %v6118_v18, %s5353_s24 }
 0x2ae   : > { %1987 = vrot.lane.b32.xlu1 %v6028_v21, %s5354_s26  ;;  %1985 = vrot.lane.b32.xlu0 %v6030_v47, %s5354_s26 }
 0x2b2   : > { %2074 = vrot.lane.b32.xlu1 %v6056_v45, %s5354_s26  ;;  %1989 = vrot.lane.b32.xlu0 %v6044_v27, %s5354_s26 }
 0x2b6   : > { %2163 = vrot.lane.b32.xlu1 %v6082_v17, %s5354_s26  ;;  %1991 = vrot.lane.b32.xlu0 %v6042_v14, %s5354_s26 }
 0x2ba   : > { %2078 = vrot.lane.b32.xlu1 %v6070_v35, %s5354_s26  ;;  %2076 = vrot.lane.b32.xlu0 %v6054_v2, %s5354_s26 }
 0x2be   : > { %2167 = vrot.lane.b32.xlu1 %v6094_v53, %s5354_s26  ;;  %2165 = vrot.lane.b32.xlu0 %v6080_v31, %s5354_s26 }
 0x2c2   : > { %2252 = vrot.lane.b32.xlu1 %v6106_v62, %s5354_s26  ;;  %2080 = vrot.lane.b32.xlu0 %v6068_v34, %s5354_s26 }
 0x2c6   : > { %2254 = vrot.lane.b32.xlu1 %v6104_v9, %s5354_s26  ;;  %2169 = vrot.lane.b32.xlu0 %v6092_v51, %s5354_s26 }
 0x2ca   : > { %2258 = vrot.lane.b32.xlu1 %v6116_v37, %s5354_s26  ;;  %2349 = vrot.lane.b32.xlu0 %v6030_v47, %s5355_s20 }
 0x2ce   : > { %2351 = vrot.lane.b32.xlu1 %v6028_v21, %s5355_s20  ;;  %2353 = vrot.lane.b32.xlu0 %v6044_v27, %s5355_s20 }
 0x2d2   : > { %2454 = vrot.lane.b32.xlu1 %v6056_v45, %s5355_s20  ;;  %2456 = vrot.lane.b32.xlu0 %v6054_v2, %s5355_s20 }
 0x2d6   : > { %2355 = vrot.lane.b32.xlu1 %v6042_v14, %s5355_s20  ;;  %2343 = vrot.lane.b32.xlu0 %v6028_v21, %s5356_s25 }
 0x2da   : > { %2341 = vrot.lane.b32.xlu1 %v6030_v47, %s5356_s25 }
 0x2de   : > { %2458 = vrot.lane.b32.xlu1 %v6070_v35, %s5355_s20 }
 0x2e2   : > { %2256 = vrot.lane.b32.xlu1 %v6118_v18, %s5354_s26 }
 0x2e3   : > { %v1146_v19 = vpop.permute.xlu1 %1145 }
 0x2e4   : > { %v1144_v33 = vpop.permute.xlu0 %1143  ;;  %v1168_v44 = vsel %vm1151_vm1, %v1146_v19, 0 }
 0x2e5   : > { %4725 = vmatprep.subr.msk.bf16.mxu0 %vm1151_vm1, %v1144_v33  ;;  %v1165_v63 = vsel %vm1151_vm1, %v1144_v33, 0 }
 0x2e6   : > { %4434 = vmatpush3.bf16.xpose.msra.mxu0 %v1165_v63 }
 0x2e7   : > { %4726 = vmatprep.subr.msk.bf16.mxu0 %vm1151_vm1, %v1146_v19  ;;  %v6233_v19 = vld [vmem:[#allocation4] sm:$0xff] }
 0x2eb   : > { %v1150_v3 = vpop.permute.xlu0 %1149 }
 0x2ec   : > { %v1148_v60 = vpop.permute.xlu1 %1147  ;;  %v1174_v22 = vsel %vm1151_vm1, %v1150_v3, 0 }
 0x2ed   : > { %v1171_v25 = vsel %vm1151_vm1, %v1148_v60, 0 }
 0x2ee   : > { %4436 = vmatpush3.bf16.xpose.msra.mxu0 %v1168_v44 }
 0x2ef   : > { %4727 = vmatprep.subr.msk.bf16.mxu0 %vm1151_vm1, %v1148_v60 }
 0x2f4   : > { %v1246_v61 = vpop.permute.xlu1 %1245 }
 0x2f5   : > { %4729 = vmatprep.subr.msk.bf16.mxu1 %vm1151_vm1, %v1246_v61  ;;  %v1266_v13 = vsel %vm1151_vm1, %v1246_v61, 0 }
 0x2f6   : > { %4438 = vmatpush3.bf16.xpose.msra.mxu0 %v1171_v25  ;;  %4450 = vmatpush3.bf16.xpose.msra.mxu1 %v1266_v13  ;;  %v6238_v25 = vld [vmem:[#allocation4 + $0x8] sm:$0xff] }
 0x2f7   : > { %4728 = vmatprep.subr.msk.bf16.mxu0 %vm1151_vm1, %v1150_v3 }
 0x2f8   : > { %v1248_v1 = vpop.permute.xlu1 %1247 }
 0x2f9   : > { %4730 = vmatprep.subr.msk.bf16.mxu1 %vm1151_vm1, %v1248_v1  ;;  %v1269_v0 = vsel %vm1151_vm1, %v1248_v1, 0 }
 0x2fc   : > { %v1250_v16 = vpop.permute.xlu0 %1249 }
 0x2fd   : > { %v1272_v10 = vsel %vm1151_vm1, %v1250_v16, 0 }
 0x2fe   : > { %4440 = vmatpush3.bf16.xpose.msra.mxu0 %v1174_v22  ;;  %4452 = vmatpush3.bf16.xpose.msra.mxu1 %v1269_v0  ;;  %v6245_v0 = vld [vmem:[#allocation4 + $0x18] sm:$0xff] }
 0x2ff   : > { %4731 = vmatprep.subr.msk.bf16.mxu1 %vm1151_vm1, %v1250_v16 }
 0x300   : > { %v1252_v23 = vpop.permute.xlu0 %1251 }
 0x301   : > { %v1275_v5 = vsel %vm1151_vm1, %v1252_v23, 0 }
 0x304   : > { %v1347_v15 = vpop.permute.xlu1 %1346 }
 0x305   : > { %4442 = vmatmul.mubr.msk.bf16.vlgmr.msra.gmra.mrb[32].mxu0 %vm1151_vm1, %v6028_v21  ;;  %4733 = vmatprep.subr.msk.bf16.mxu0 %vm1151_vm1, %v1347_v15  ;;  %v1367_v30 = vsel %vm1151_vm1, %v1347_v15, 0 }
 0x306   : > { %4445 = vmatprep.mubr.msk.bf16.mxu0 %vm1151_vm1, %v6044_v27  ;;  %4454 = vmatpush3.bf16.xpose.msra.mxu1 %v1272_v10 }
 0x307   : > { %4466 = vmatpush3.bf16.xpose.msra.mxu0 %v1367_v30  ;;  %4732 = vmatprep.subr.msk.bf16.mxu1 %vm1151_vm1, %v1252_v23 }
 0x308   : > { %v1349_v38 = vpop.permute.xlu1 %1348 }
 0x309   : > { %4734 = vmatprep.subr.msk.bf16.mxu0 %vm1151_vm1, %v1349_v38  ;;  %v1370_v49 = vsel %vm1151_vm1, %v1349_v38, 0 }
 0x30c   : > { %v1351_v48 = vpop.permute.xlu0 %1350 }
 0x30d   : > { %4446 = vmatmul.mubr.msk.bf16.gmra.mrb[36].mxu0 %vm1151_vm1, %v6042_v14  ;;  %v1373_v55 = vsel %vm1151_vm1, %v1351_v48, 0 }
 0x30e   : > { %4456 = vmatpush3.bf16.xpose.msra.mxu1 %v1275_v5  ;;  %4473 = vmatprep.mubr.msk.bf16.mxu0 %vm1151_vm1, %v6082_v17 }
 0x30f   : > { %4468 = vmatpush3.bf16.xpose.msra.mxu0 %v1370_v49  ;;  %v6257_v49 = vld [vmem:[#allocation4 + $0x30] sm:$0xff] }
 0x310   : > { %4735 = vmatprep.subr.msk.bf16.mxu0 %vm1151_vm1, %v1351_v48  ;;  %v1353_v39 = vpop.permute.xlu0 %1352 }
 0x311   : > { %v1376_v36 = vsel %vm1151_vm1, %v1353_v39, 0 }
 0x314   : > { %v1448_v29 = vpop.permute.xlu1 %1447 }
 0x315   : > { %4458 = vmatmul.mubr.msk.bf16.vlgmr.msra.gmra.mrb[0].mxu1 %vm1151_vm1, %v6054_v2  ;;  %4737 = vmatprep.subr.msk.bf16.mxu1 %vm1151_vm1, %v1448_v29  ;;  %v1468_v42 = vsel %vm1151_vm1, %v1448_v29, 0  ;;  %v6259_v29 = vld [vmem:[#allocation4 + $0x38] sm:$0xff] }
 0x316   : > { %4461 = vmatprep.mubr.msk.bf16.mxu1 %vm1151_vm1, %v6070_v35  ;;  %4482 = vmatpush3.bf16.xpose.msra.mxu1 %v1468_v42 }
 0x317   : > { %4470 = vmatpush3.bf16.xpose.msra.mxu0 %v1373_v55 }
 0x318   : > { %4736 = vmatprep.subr.msk.bf16.mxu0 %vm1151_vm1, %v1353_v39  ;;  %v1450_v20 = vpop.permute.xlu1 %1449 }
 0x319   : > { %4738 = vmatprep.subr.msk.bf16.mxu1 %vm1151_vm1, %v1450_v20  ;;  %v1471_v46 = vsel %vm1151_vm1, %v1450_v20, 0  ;;  %v6261_v20 = vld [vmem:[#allocation4 + $0x28] sm:$0xff] }
 0x31c   : > { %v1454_v8 = vpop.permute.xlu1 %1453  ;;  %v1452_v26 = vpop.permute.xlu0 %1451 }
 0x31d   : > { %4462 = vmatmul.mubr.msk.bf16.gmra.mrb[4].mxu1 %vm1151_vm1, %v6068_v34  ;;  %v1474_v54 = vsel %vm1151_vm1, %v1452_v26, 0  ;;  %v1477_v58 = vsel %vm1151_vm1, %v1454_v8, 0 }
 0x31e   : > { %4484 = vmatpush3.bf16.xpose.msra.mxu1 %v1471_v46  ;;  %4489 = vmatprep.mubr.msk.bf16.mxu1 %vm1151_vm1, %v6106_v62 }
 0x31f   : > { %4472 = vmatpush3.bf16.xpose.msra.mxu0 %v1376_v36  ;;  %4739 = vmatprep.subr.msk.bf16.mxu1 %vm1151_vm1, %v1452_v26 }
 0x320   : > { %v1986_v50 = vpop.permute.xlu0 %1985  ;;  %v1988_v43 = vpop.permute.xlu1 %1987 }
 0x321   : > { %4497 = vmatprep.subr.bf16.mxu0 %v1986_v50 }
 0x324   : > { %v1990_v12 = vpop.permute.xlu0 %1989  ;;  %v6208_v52 = vpop.permute.xlu1 %2074 }
 0x326   : > { %4474 = vmatmul.mubr.msk.bf16.vlgmr.msra.gmra.mrb[40].mxu0 %vm1151_vm1, %v6080_v31  ;;  %4486 = vmatpush3.bf16.xpose.msra.mxu1 %v1474_v54 }
 0x327   : > { %4477 = vmatprep.mubr.msk.bf16.mxu0 %vm1151_vm1, %v6094_v53  ;;  %4498 = vmatpush3.bf16.msra.mxu0 %v1986_v50  ;;  %v6271_v50 = vld [vmem:[#allocation4 + $0x20] sm:$0xff] }
 0x328   : > { %4740 = vmatprep.subr.msk.bf16.mxu1 %vm1151_vm1, %v1454_v8  ;;  %4499 = vmatprep.subr.bf16.mxu0 %v1988_v43  ;;  %v1992_v11 = vpop.permute.xlu0 %1991  ;;  %v2164_v24 = vpop.permute.xlu1 %2163 }
 0x32b   : > { %4500 = vmatpush3.bf16.msra.mxu0 %v1988_v43 }
 0x32c   : > { %4501 = vmatprep.subr.bf16.mxu0 %v1990_v12  ;;  %v6211_v57 = vpop.permute.xlu0 %2076  ;;  %v6216_v32 = vpop.permute.xlu1 %2078 }
 0x32e   : > { %4478 = vmatmul.mubr.msk.bf16.gmra.mrb[44].mxu0 %vm1151_vm1, %v6092_v51  ;;  %4488 = vmatpush3.bf16.xpose.msra.mxu1 %v1477_v58 }
 0x32f   : > { %4502 = vmatpush3.bf16.msra.mxu0 %v1990_v12  ;;  %4529 = vmatprep.subr.bf16.mxu1 %v2164_v24 }
 0x330   : > { %4503 = vmatprep.subr.bf16.mxu0 %v1992_v11  ;;  %v2166_v28 = vpop.permute.xlu0 %2165  ;;  %v2168_v41 = vpop.permute.xlu1 %2167 }
 0x333   : > { %4504 = vmatpush3.bf16.msra.mxu0 %v1992_v11 }
 0x334   : > { %4513 = vmatprep.subr.bf16.mxu0 %v6208_v52  ;;  %v6221_v40 = vpop.permute.xlu0 %2080 }
 0x335   : > { %4490 = vmatmul.mubr.msk.bf16.vlgmr.msra.gmra.mrb[8].mxu1 %vm1151_vm1, %v6104_v9 }
 0x336   : > { %4493 = vmatprep.mubr.msk.bf16.mxu1 %vm1151_vm1, %v6118_v18  ;;  %4530 = vmatpush3.bf16.msra.mxu1 %v2164_v24 }
 0x337   : > { %4531 = vmatprep.subr.bf16.mxu1 %v2166_v28 }
 0x338   : > { %v2170_v59 = vpop.permute.xlu0 %2169 }
 0x33a   : > { %4532 = vmatpush3.bf16.msra.mxu1 %v2166_v28 }
 0x33b   : > { %4533 = vmatprep.subr.bf16.mxu1 %v2168_v41 }
 0x33c   : > { %v6227_v4 = vpop.permute.xlu0 %2349 }
 0x33d   : > { %4494 = vmatmul.mubr.msk.bf16.gmra.mrb[12].mxu1 %vm1151_vm1, %v6116_v37  ;;  %7570 = vst [vmem:[#allocation12_spill] sm:$0xff] %v6227_v4 }
 0x33e   : > { %4534 = vmatpush3.bf16.msra.mxu1 %v2168_v41 }
 0x33f   : > { %4535 = vmatprep.subr.bf16.mxu1 %v2170_v59 }
 0x342   : > { %4536 = vmatpush3.bf16.msra.mxu1 %v2170_v59 }
 0x343   : > { %4741 = vmatprep.subr.msk.bf16.mxu1 %vm1151_vm1, %v6227_v4 }
 0x3d8   : > { %v4443_v6 = vpop.f32.mrb[32].mxu0 }
 0x3d9   : > { %v1546_v56 = vmul.f32 0.25, %v4443_v6  ;;  %v1210_v33 = vpop.f32.mrb[33].mxu0 }
 0x3da   : > { %v1544_v63 = vmul.f32 0.25, %v1210_v33  ;;  %v4444_v44 = vpop.f32.mrb[34].mxu0 }
 0x3db   : > { %v6236_v60 = vadd.f32 %v6231_v7, %v1546_v56  ;;  %v1213_v61 = vpop.f32.mrb[35].mxu0  ;;  %v1547_v1 = vmul.f32 0.25, %v4444_v44 }
 0x3dc   : > { %v1545_v13 = vmul.f32 0.25, %v1213_v61  ;;  %v6241_v3 = vadd.f32 %v6233_v19, %v1544_v63 }
 0x3dd   : > { %v1623_v22 = vsel %vm1616_vm2, %v6236_v60, -inf  ;;  %v6253_v30 = vadd.f32 %v6245_v0, %v1547_v1 }
 0x3de   : > { %v6248_v16 = vadd.f32 %v6238_v25, %v1545_v13  ;;  %1624 = vmax.xlane.f32.xlu0 %v1623_v22  ;;  %v1617_v5 = vsel %vm1616_vm2, %v6241_v3, -inf }
 0x3df   : > { %v1626_v36 = vsel %vm1616_vm2, %v6253_v30, -inf }
 0x3e0   : > { %v4447_v15 = vpop.f32.mrb[36].mxu0  ;;  %v1620_v10 = vsel %vm1616_vm2, %v6248_v16, -inf }
 0x3e1   : > { %v1550_v23 = vmul.f32 0.25, %v4447_v15  ;;  %1621 = vmax.xlane.f32.xlu1 %v1620_v10  ;;  %v1226_v38 = vpop.f32.mrb[37].mxu0 }
 0x3e2   : > { %1618 = vmax.xlane.f32.xlu0 %v1617_v5  ;;  %v4448_v48 = vpop.f32.mrb[38].mxu0  ;;  %v1548_v26 = vmul.f32 0.25, %v1226_v38 }
 0x3e3   : > { %v1551_v42 = vmul.f32 0.25, %v4448_v48  ;;  %v1229_v55 = vpop.f32.mrb[39].mxu0  ;;  %v6264_v8 = vadd.f32 %v6257_v49, %v1550_v23 }
 0x3e4   : > { %v1549_v39 = vmul.f32 0.25, %v1229_v55  ;;  %v6279_v11 = vadd.f32 %v6271_v50, %v1548_v26 }
 0x3e5   : > { %v6267_v46 = vadd.f32 %v6259_v29, %v1551_v42  ;;  %v1635_v28 = vsel %vm1616_vm2, %v6264_v8, -inf }
 0x3e6   : > { %1627 = vmax.xlane.f32.xlu0 %v1626_v36  ;;  %v6274_v43 = vadd.f32 %v6261_v20, %v1549_v39  ;;  %v1629_v13 = vsel %vm1616_vm2, %v6279_v11, -inf }
 0x3e7   : > { %v1638_v12 = vsel %vm1616_vm2, %v6267_v46, -inf }
 0x3e8   : > { %1639 = vmax.xlane.f32.xlu1 %v1638_v12  ;;  %v4459_v54 = vpop.f32.mrb[0].mxu1  ;;  %v1632_v56 = vsel %vm1616_vm2, %v6274_v43, -inf }
 0x3e9   : > { %v1554_v58 = vmul.f32 0.25, %v4459_v54  ;;  %v1311_v24 = vpop.f32.mrb[1].mxu1 }
 0x3ea   : > { %1636 = vmax.xlane.f32.xlu0 %v1635_v28  ;;  %v4460_v41 = vpop.f32.mrb[2].mxu1  ;;  %v1552_v44 = vmul.f32 0.25, %v1311_v24 }
 0x3eb   : > { %v1555_v59 = vmul.f32 0.25, %v4460_v41  ;;  %v1314_v6 = vpop.f32.mrb[3].mxu1  ;;  %v6286_v63 = vadd.f32 %v6231_v7, %v1554_v58 }
 0x3ec   : > { %v1553_v33 = vmul.f32 0.25, %v1314_v6  ;;  %1633 = vmax.xlane.f32.xlu1 %v1632_v56  ;;  %v6299_v10 = vadd.f32 %v6233_v19, %v1552_v44 }
 0x3ed   : > { %v6289_v61 = vadd.f32 %v6245_v0, %v1555_v59  ;;  %v1647_v5 = vsel %vm1616_vm2, %v6286_v63, -inf }
 0x3ee   : > { %1630 = vmax.xlane.f32.xlu0 %v1629_v13  ;;  %v6294_v1 = vadd.f32 %v6238_v25, %v1553_v33  ;;  %v1641_v58 = vsel %vm1616_vm2, %v6299_v10, -inf }
 0x3ef   : > { %v1650_v22 = vsel %vm1616_vm2, %v6289_v61, -inf }
 0x3f0   : > { %1651 = vmax.xlane.f32.xlu1 %v1650_v22  ;;  %v4463_v15 = vpop.f32.mrb[4].mxu1  ;;  %v1644_v39 = vsel %vm1616_vm2, %v6294_v1, -inf }
 0x3f1   : > { %v1558_v23 = vmul.f32 0.25, %v4463_v15  ;;  %v1327_v38 = vpop.f32.mrb[5].mxu1 }
 0x3f2   : > { %1648 = vmax.xlane.f32.xlu0 %v1647_v5  ;;  %v4464_v48 = vpop.f32.mrb[6].mxu1  ;;  %v1556_v12 = vmul.f32 0.25, %v1327_v38 }
 0x3f3   : > { %v1559_v42 = vmul.f32 0.25, %v4464_v48  ;;  %v1330_v55 = vpop.f32.mrb[7].mxu1  ;;  %v6306_v36 = vadd.f32 %v6257_v49, %v1558_v23 }
 0x3f4   : > { %v1557_v26 = vmul.f32 0.25, %v1330_v55  ;;  %1645 = vmax.xlane.f32.xlu1 %v1644_v39  ;;  %v6319_v41 = vadd.f32 %v6271_v50, %v1556_v12 }
 0x3f5   : > { %v6309_v54 = vadd.f32 %v6259_v29, %v1559_v42  ;;  %v1659_v6 = vsel %vm1616_vm2, %v6306_v36, -inf }
 0x3f6   : > { %1642 = vmax.xlane.f32.xlu0 %v1641_v58  ;;  %v6314_v24 = vadd.f32 %v6261_v20, %v1557_v26  ;;  %v1653_v48 = vsel %vm1616_vm2, %v6319_v41, -inf }
 0x3f7   : > { %v1662_v28 = vsel %vm1616_vm2, %v6309_v54, -inf }
 0x3f8   : > { %1663 = vmax.xlane.f32.xlu1 %v1662_v28  ;;  %v1656_v13 = vsel %vm1616_vm2, %v6314_v24, -inf }
 0x3f9   : > { %v4475_v59 = vpop.f32.mrb[40].mxu0 }
 0x3fa   : > { %v1562_v56 = vmul.f32 0.25, %v4475_v59  ;;  %v1412_v33 = vpop.f32.mrb[41].mxu0  ;;  %1660 = vmax.xlane.f32.xlu0 %v1659_v6 }
 0x3fb   : > { %v4476_v44 = vpop.f32.mrb[42].mxu0  ;;  %v1560_v38 = vmul.f32 0.25, %v1412_v33 }
 0x3fc   : > { %v1563_v22 = vmul.f32 0.25, %v4476_v44  ;;  %v1415_v15 = vpop.f32.mrb[43].mxu0  ;;  %1657 = vmax.xlane.f32.xlu1 %v1656_v13  ;;  %v6326_v23 = vadd.f32 %v6231_v7, %v1562_v56 }
 0x3fd   : > { %v1561_v5 = vmul.f32 0.25, %v1415_v15  ;;  %v6339_v26 = vadd.f32 %v6233_v19, %v1560_v38 }
 0x3fe   : > { %v6331_v42 = vadd.f32 %v6245_v0, %v1563_v22  ;;  %1654 = vmax.xlane.f32.xlu0 %v1653_v48  ;;  %v1671_v58 = vsel %vm1616_vm2, %v6326_v23, -inf }
 0x3ff   : > { %v6334_v55 = vadd.f32 %v6238_v25, %v1561_v5  ;;  %v1665_v38 = vsel %vm1616_vm2, %v6339_v26, -inf }
 0x400   : > { %v1674_v39 = vsel %vm1616_vm2, %v6331_v42, -inf }
 0x401   : > { %1675 = vmax.xlane.f32.xlu1 %v1674_v39  ;;  %v4479_v12 = vpop.f32.mrb[44].mxu0  ;;  %v1668_v44 = vsel %vm1616_vm2, %v6334_v55, -inf }
 0x402   : > { %v1566_v28 = vmul.f32 0.25, %v4479_v12  ;;  %v1428_v59 = vpop.f32.mrb[45].mxu0  ;;  %1672 = vmax.xlane.f32.xlu0 %v1671_v58 }
 0x403   : > { %v4480_v6 = vpop.f32.mrb[46].mxu0  ;;  %v1564_v22 = vmul.f32 0.25, %v1428_v59 }
 0x404   : > { %v1567_v56 = vmul.f32 0.25, %v4480_v6  ;;  %v1431_v33 = vpop.f32.mrb[47].mxu0  ;;  %v6346_v13 = vadd.f32 %v6257_v49, %v1566_v28 }
 0x405   : > { %v1565_v15 = vmul.f32 0.25, %v1431_v33  ;;  %1669 = vmax.xlane.f32.xlu1 %v1668_v44  ;;  %v6359_v58 = vadd.f32 %v6271_v50, %v1564_v22 }
 0x406   : > { %v6351_v5 = vadd.f32 %v6259_v29, %v1567_v56  ;;  %1666 = vmax.xlane.f32.xlu0 %v1665_v38  ;;  %v1683_v6 = vsel %vm1616_vm2, %v6346_v13, -inf }
 0x407   : > { %v6354_v48 = vadd.f32 %v6261_v20, %v1565_v15 }
 0x408   : > { %v1686_v39 = vsel %vm1616_vm2, %v6351_v5, -inf  ;;  %v4491_v12 = vpop.f32.mrb[8].mxu1 }
 0x409   : > { %1687 = vmax.xlane.f32.xlu1 %v1686_v39  ;;  %v1570_v28 = vmul.f32 0.25, %v4491_v12  ;;  %v1513_v59 = vpop.f32.mrb[9].mxu1  ;;  %v1680_v15 = vsel %vm1616_vm2, %v6354_v48, -inf  ;;  %v1677_v39 = vsel %vm1616_vm2, %v6359_v58, -inf }
 0x40a   : > { %1684 = vmax.xlane.f32.xlu0 %v1683_v6  ;;  %v4492_v56 = vpop.f32.mrb[10].mxu1  ;;  %v1568_v4 = vmul.f32 0.25, %v1513_v59 }
 0x40b   : > { %v1571_v33 = vmul.f32 0.25, %v4492_v56  ;;  %v1516_v44 = vpop.f32.mrb[11].mxu1  ;;  %v6366_v47 = vadd.f32 %v6231_v7, %v1570_v28 }
 0x40c   : > { %v1569_v38 = vmul.f32 0.25, %v1516_v44  ;;  %v6377_v56 = vadd.f32 %v6233_v19, %v1568_v4 }
 0x40d   : > { %v6369_v22 = vadd.f32 %v6245_v0, %v1571_v33  ;;  %1681 = vmax.xlane.f32.xlu1 %v1680_v15  ;;  %v1695_v7 = vsel %vm1616_vm2, %v6366_v47, -inf }
 0x40e   : > { %v6374_v12 = vadd.f32 %v6238_v25, %v1569_v38  ;;  %1678 = vmax.xlane.f32.xlu0 %v1677_v39  ;;  %v1689_v19 = vsel %vm1616_vm2, %v6377_v56, -inf }
 0x410   : > { %v4495_v6 = vpop.f32.mrb[12].mxu1 }
 0x411   : > { %v1574_v44 = vmul.f32 0.25, %v4495_v6  ;;  %v1529_v37 = vpop.f32.mrb[13].mxu1 }
 0x412   : > { %v1572_v28 = vmul.f32 0.25, %v1529_v37  ;;  %1696 = vmax.xlane.f32.xlu0 %v1695_v7  ;;  %v4496_v0 = vpop.f32.mrb[14].mxu1  ;;  %v6399_v37 = vpop.permute.xlu1 %2252 }
 0x413   : > { %v6382_v59 = vadd.f32 %v6257_v49, %v1574_v44  ;;  %v1575_v33 = vmul.f32 0.25, %v4496_v0  ;;  %v1532_v15 = vpop.f32.mrb[15].mxu1 }
 0x414   : > { %v6385_v25 = vadd.f32 %v6271_v50, %v1572_v28  ;;  %v1573_v38 = vmul.f32 0.25, %v1532_v15  ;;  %v1692_v50 = vsel %vm1616_vm2, %v6374_v12, -inf }
 0x415   : > { %v6388_v4 = vadd.f32 %v6259_v29, %v1575_v33  ;;  %v1698_v29 = vsel %vm1616_vm2, %v6369_v22, -inf  ;;  %v1707_v44 = vsel %vm1616_vm2, %v6382_v59, -inf }
 0x416   : > { %v6393_v39 = vadd.f32 %v6261_v20, %v1573_v38  ;;  %1690 = vmax.xlane.f32.xlu0 %v1689_v19  ;;  %v6401_v49 = vpop.permute.xlu1 %2254  ;;  %v1701_v0 = vsel %vm1616_vm2, %v6385_v25, -inf  ;;  %v6423_v38 = vpop.permute.xlu0 %2353 }
 0x417   : > { %7571 = vst [vmem:[#allocation13_spill] sm:$0xff] %v6401_v49  ;;  %v1710_v6 = vsel %vm1616_vm2, %v6388_v4, -inf  ;;  %7576 = vst [vmem:[#allocation18_spill] sm:$0xff] %v6423_v38 }
 0x418   : > { %v1704_v28 = vsel %vm1616_vm2, %v6393_v39, -inf }
 0x41a   : > { %v6407_v20 = vpop.permute.xlu1 %2258 }
 0x41b   : > { %7572 = vst [vmem:[#allocation14_spill] sm:$0xff] %v6407_v20 }
 0x41e   : > { %2345 = vrot.lane.b32.xlu1 %v6044_v27, %s5356_s25  ;;  %v6413_v7 = vpop.permute.xlu1 %2351 }
 0x41f   : > { %7573 = vst [vmem:[#allocation15_spill] sm:$0xff] %v6413_v7 }
 0x422   : > { %v6419_v33 = vpop.permute.xlu1 %2454 }
 0x423   : > { %7574 = vst [vmem:[#allocation16_spill] sm:$0xff] %v6419_v33 }
 0x426   : > { %v6421_v15 = vpop.permute.xlu1 %2355 }
 0x427   : > { %7575 = vst [vmem:[#allocation17_spill] sm:$0xff] %v6421_v15 }
 0x42a   : > { %v6425_v19 = vpop.permute.xlu1 %2341 }
 0x42b   : > { %7577 = vst [vmem:[#allocation19_spill] sm:$0xff] %v6425_v19 }
 0x42c   : > { %2559 = vrot.lane.b32.xlu0 %v6082_v17, %s5355_s20 }
 0x442   : > { %1699 = vmax.xlane.f32.xlu1 %v1698_v29  ;;  %v6427_v29 = vpop.permute.xlu0 %2456 }
 0x443   : > { %7578 = vst [vmem:[#allocation20_spill] sm:$0xff] %v6427_v29 }
 0x446   : > { %1693 = vmax.xlane.f32.xlu1 %v1692_v50  ;;  %v6429_v50 = vpop.permute.xlu1 %2458 }
 0x447   : > { %7579 = vst [vmem:[#allocation21_spill] sm:$0xff] %v6429_v50 }
 0x44a   : > { %1711 = vmax.xlane.f32.xlu1 %v1710_v6  ;;  %v6431_v6 = vpop.permute.xlu0 %2343 }
 0x44b   : > { %1708 = vmax.xlane.f32.xlu0 %v1707_v44  ;;  %7580 = vst [vmem:[#allocation22_spill] sm:$0xff] %v6431_v6  ;;  %v6433_v44 = vpop.permute.xlu1 %2256 }
 0x44c   : > { %7581 = vst [vmem:[#allocation23_spill] sm:$0xff] %v6433_v44 }
 0x44e   : > { %1705 = vmax.xlane.f32.xlu1 %v1704_v28 }
 0x44f   : > { %1702 = vmax.xlane.f32.xlu0 %v1701_v0 }
 0x46b   : > { %v1625_v28 = vpop.xlane.xlu0 %1624 }
 0x46c   : > { %v1715_v27 = vsub.f32 %v6236_v60, %v1625_v28 }
 0x46e   : > { %v1749_v0 = vmul.f32 1.442695, %v1715_v27  ;;  %v1622_v7 = vpop.xlane.xlu1 %1621 }
 0x46f   : > { %v1619_v33 = vpop.xlane.xlu0 %1618  ;;  %v1714_v38 = vsub.f32 %v6248_v16, %v1622_v7 }
 0x470   : > { %4963 = vpow2.f32 %v1749_v0  ;;  %v1713_v15 = vsub.f32 %v6241_v3, %v1619_v33 }
 0x471   : > { %v1747_v6 = vmul.f32 1.442695, %v1714_v38 }
 0x472   : > { %v1745_v19 = vmul.f32 1.442695, %v1713_v15 }
 0x473   : > { %v1628_v20 = vpop.xlane.xlu0 %1627 }
 0x474   : > { %4965 = vpow2.f32 %v1745_v19  ;;  %v1716_v50 = vsub.f32 %v6253_v30, %v1628_v20 }
 0x475   : > { %v1640_v29 = vpop.xlane.xlu1 %1639 }
 0x476   : > { %v1751_v49 = vmul.f32 1.442695, %v1716_v50  ;;  %v1720_v44 = vsub.f32 %v6267_v46, %v1640_v29 }
 0x477   : > { %v1637_v9 = vpop.xlane.xlu0 %1636 }
 0x478   : > { %4967 = vpow2.f32 %v1751_v49  ;;  %v1719_v27 = vsub.f32 %v6264_v8, %v1637_v9  ;;  %v1759_v3 = vmul.f32 1.442695, %v1720_v44 }
 0x479   : > { %v1634_v60 = vpop.xlane.xlu1 %1633  ;;  %4969 = vpow2.f32 %v1747_v6 }
 0x47a   : > { %v6441_v28 = vpop.eup %4963  ;;  %v1757_v16 = vmul.f32 1.442695, %v1719_v27  ;;  %v1718_v7 = vsub.f32 %v6274_v43, %v1634_v60 }
 0x47b   : > { %v1631_v33 = vpop.xlane.xlu0 %1630  ;;  %v1815_v30 = vsel %vm1616_vm2, %v6441_v28, 0.0 }
 0x47c   : > { %4971 = vpow2.f32 %v1757_v16  ;;  %v1717_v20 = vsub.f32 %v6279_v11, %v1631_v33  ;;  %1816 = vadd.xlane.f32.xlu0 %v1815_v30  ;;  %v1755_v9 = vmul.f32 1.442695, %v1718_v7 }
 0x47d   : > { %v1652_v46 = vpop.xlane.xlu1 %1651  ;;  %4973 = vpow2.f32 %v1759_v3 }
 0x47e   : > { %v6447_v49 = vpop.eup %4965  ;;  %v1753_v8 = vmul.f32 1.442695, %v1717_v20  ;;  %v1724_v27 = vsub.f32 %v6289_v61, %v1652_v46 }
 0x47f   : > { %v1649_v15 = vpop.xlane.xlu0 %1648  ;;  %v1809_v38 = vsel %vm1616_vm2, %v6447_v49, 0.0 }
 0x480   : > { %4975 = vpow2.f32 %v1753_v8  ;;  %v1723_v43 = vsub.f32 %v6286_v63, %v1649_v15  ;;  %1810 = vadd.xlane.f32.xlu0 %v1809_v38  ;;  %v1767_v61 = vmul.f32 1.442695, %v1724_v27 }
 0x481   : > { %v1646_v19 = vpop.xlane.xlu1 %1645  ;;  %4977 = vpow2.f32 %v1755_v9 }
 0x482   : > { %v6452_v29 = vpop.eup %4967  ;;  %v1765_v11 = vmul.f32 1.442695, %v1723_v43  ;;  %v1722_v8 = vsub.f32 %v6294_v1, %v1646_v19 }
 0x483   : > { %v1643_v50 = vpop.xlane.xlu0 %1642  ;;  %v1818_v6 = vsel %vm1616_vm2, %v6452_v29, 0.0  ;;  %v6456_v44 = vpop.eup %4969 }
 0x484   : > { %v1721_v0 = vsub.f32 %v6299_v10, %v1643_v50  ;;  %1819 = vadd.xlane.f32.xlu1 %v1818_v6  ;;  %4979 = vpow2.f32 %v1765_v11  ;;  %v1812_v33 = vsel %vm1616_vm2, %v6456_v44, 0.0  ;;  %v1763_v6 = vmul.f32 1.442695, %v1722_v8 }
 0x485   : > { %v1664_v60 = vpop.xlane.xlu1 %1663 }
 0x486   : > { %v6460_v3 = vpop.eup %4971  ;;  %v1761_v63 = vmul.f32 1.442695, %v1721_v0  ;;  %v1728_v16 = vsub.f32 %v6309_v54, %v1664_v60 }
 0x487   : > { %v1661_v7 = vpop.xlane.xlu0 %1660  ;;  %v1827_v30 = vsel %vm1616_vm2, %v6460_v3, 0.0  ;;  %v6467_v20 = vpop.eup %4973 }
 0x488   : > { %v1775_v10 = vmul.f32 1.442695, %v1728_v16  ;;  %1813 = vadd.xlane.f32.xlu1 %v1812_v33  ;;  %1828 = vadd.xlane.f32.xlu0 %v1827_v30  ;;  %4981 = vpow2.f32 %v1761_v63  ;;  %v1830_v38 = vsel %vm1616_vm2, %v6467_v20, 0.0  ;;  %v1727_v0 = vsub.f32 %v6306_v36, %v1661_v7 }
 0x489   : > { %v1658_v46 = vpop.xlane.xlu1 %1657 }
 0x48a   : > { %v6469_v9 = vpop.eup %4975  ;;  %4983 = vpow2.f32 %v1775_v10  ;;  %v1726_v54 = vsub.f32 %v6314_v24, %v1658_v46  ;;  %v1773_v60 = vmul.f32 1.442695, %v1727_v0 }
 0x48b   : > { %v1655_v15 = vpop.xlane.xlu0 %1654  ;;  %v1821_v43 = vsel %vm1616_vm2, %v6469_v9, 0.0  ;;  %v6477_v11 = vpop.eup %4977  ;;  %4985 = vpow2.f32 %v1767_v61 }
 0x48c   : > { %v1771_v50 = vmul.f32 1.442695, %v1726_v54  ;;  %1831 = vadd.xlane.f32.xlu1 %v1830_v38  ;;  %1822 = vadd.xlane.f32.xlu0 %v1821_v43  ;;  %v1824_v24 = vsel %vm1616_vm2, %v6477_v11, 0.0  ;;  %v1725_v63 = vsub.f32 %v6319_v41, %v1655_v15 }
 0x48e   : > { %4987 = vpow2.f32 %v1771_v50  ;;  %v1676_v1 = vpop.xlane.xlu1 %1675  ;;  %v6482_v27 = vpop.eup %4979  ;;  %v1769_v46 = vmul.f32 1.442695, %v1725_v63 }
 0x48f   : > { %v1673_v19 = vpop.xlane.xlu0 %1672  ;;  %4989 = vpow2.f32 %v1763_v6  ;;  %v1839_v36 = vsel %vm1616_vm2, %v6482_v27, 0.0  ;;  %v1732_v50 = vsub.f32 %v6331_v42, %v1676_v1 }
 0x490   : > { %1825 = vadd.xlane.f32.xlu1 %v1824_v24  ;;  %4991 = vpow2.f32 %v1773_v60  ;;  %v1731_v8 = vsub.f32 %v6326_v23, %v1673_v19 }
 0x492   : > { %v1670_v16 = vpop.xlane.xlu1 %1669  ;;  %v6485_v33 = vpop.eup %4981  ;;  %v1781_v6 = vmul.f32 1.442695, %v1731_v8 }
 0x493   : > { %v1667_v30 = vpop.xlane.xlu0 %1666  ;;  %v1833_v38 = vsel %vm1616_vm2, %v6485_v33, 0.0 }
 0x494   : > { %v6489_v7 = vpop.eup %4983  ;;  %v1729_v10 = vsub.f32 %v6339_v26, %v1667_v30  ;;  %1840 = vadd.xlane.f32.xlu1 %v1839_v36  ;;  %v1783_v30 = vmul.f32 1.442695, %v1732_v50  ;;  %v1730_v36 = vsub.f32 %v6334_v55, %v1670_v16 }
 0x495   : > { %v1854_v61 = vsel %vm1616_vm2, %v6489_v7, 0.0  ;;  %v6495_v15 = vpop.eup %4985 }
 0x496   : > { %v1777_v41 = vmul.f32 1.442695, %v1729_v10  ;;  %v1688_v54 = vpop.xlane.xlu1 %1687  ;;  %1855 = vadd.xlane.f32.xlu0 %v1854_v61  ;;  %v1842_v19 = vsel %vm1616_vm2, %v6495_v15, 0.0  ;;  %v1779_v10 = vmul.f32 1.442695, %v1730_v36 }
 0x497   : > { %v1685_v60 = vpop.xlane.xlu0 %1684 }
 0x498   : > { %v6499_v43 = vpop.eup %4987  ;;  %4993 = vpow2.f32 %v1777_v41  ;;  %1834 = vadd.xlane.f32.xlu1 %v1833_v38  ;;  %v1735_v61 = vsub.f32 %v6346_v13, %v1685_v60 }
 0x499   : > { %v1848_v26 = vsel %vm1616_vm2, %v6499_v43, 0.0  ;;  %4995 = vpow2.f32 %v1769_v46  ;;  %v6507_v24 = vpop.eup %4989 }
 0x49a   : > { %v1682_v23 = vpop.xlane.xlu1 %1681  ;;  %1849 = vadd.xlane.f32.xlu0 %v1848_v26  ;;  %4997 = vpow2.f32 %v1781_v6  ;;  %v1836_v42 = vsel %vm1616_vm2, %v6507_v24, 0.0  ;;  %v6512_v1 = vpop.eup %4991  ;;  %v1789_v41 = vmul.f32 1.442695, %v1735_v61 }
 0x49b   : > { %v1734_v0 = vsub.f32 %v6354_v48, %v1682_v23  ;;  %v1679_v46 = vpop.xlane.xlu0 %1678  ;;  %v1851_v8 = vsel %vm1616_vm2, %v6512_v1, 0.0  ;;  %v1736_v23 = vsub.f32 %v6351_v5, %v1688_v54 }
 0x49c   : > { %1843 = vadd.xlane.f32.xlu1 %v1842_v19  ;;  %v1733_v38 = vsub.f32 %v6359_v58, %v1679_v46 }
 0x49d   : > { %v1787_v63 = vmul.f32 1.442695, %v1734_v0 }
 0x49e   : > { %v1785_v0 = vmul.f32 1.442695, %v1733_v38 }
 0x49f   : > { %4999 = vpow2.f32 %v1787_v63  ;;  %v1697_v6 = vpop.xlane.xlu0 %1696  ;;  %v1791_v63 = vmul.f32 1.442695, %v1736_v23 }
 0x4a0   : > { %1837 = vadd.xlane.f32.xlu1 %v1836_v42  ;;  %5001 = vpow2.f32 %v1783_v30  ;;  %v1739_v30 = vsub.f32 %v6366_v47, %v1697_v6 }
 0x4a1   : > { %5003 = vpow2.f32 %v1779_v10 }
 0x4a2   : > { %v6514_v48 = vpop.eup %4993  ;;  %5005 = vpow2.f32 %v1789_v41  ;;  %v1797_v42 = vmul.f32 1.442695, %v1739_v30 }
 0x4a3   : > { %v1857_v55 = vsel %vm1616_vm2, %v6514_v48, 0.0  ;;  %v6521_v16 = vpop.eup %4995  ;;  %5007 = vpow2.f32 %v1785_v0  ;;  %v1691_v36 = vpop.xlane.xlu0 %1690 }
 0x4a4   : > { %1852 = vadd.xlane.f32.xlu1 %v1851_v8  ;;  %1858 = vadd.xlane.f32.xlu0 %v1857_v55  ;;  %v1845_v26 = vsel %vm1616_vm2, %v6521_v16, 0.0  ;;  %v6526_v50 = vpop.eup %4997  ;;  %5009 = vpow2.f32 %v1791_v63  ;;  %v1737_v10 = vsub.f32 %v6377_v56, %v1691_v36 }
 0x4a5   : > { %v1863_v58 = vsel %vm1616_vm2, %v6526_v50, 0.0  ;;  %5011 = vpow2.f32 %v1797_v42 }
 0x4a6   : > { %v1793_v8 = vmul.f32 1.442695, %v1737_v10 }
 0x4a8   : > { %1846 = vadd.xlane.f32.xlu1 %v1845_v26  ;;  %5013 = vpow2.f32 %v1793_v8 }
 0x4a9   : > { %v6528_v13 = vpop.eup %4999 }
 0x4aa   : > { %v1872_v19 = vsel %vm1616_vm2, %v6528_v13, 0.0  ;;  %v6535_v60 = vpop.eup %5001 }
 0x4ab   : > { %1873 = vadd.xlane.f32.xlu0 %v1872_v19  ;;  %v1866_v5 = vsel %vm1616_vm2, %v6535_v60, 0.0  ;;  %v6540_v54 = vpop.eup %5003  ;;  %v6565_v19 = vpop.permute.xlu1 %2345 }
 0x4ac   : > { %1864 = vadd.xlane.f32.xlu1 %v1863_v58  ;;  %v1860_v61 = vsel %vm1616_vm2, %v6540_v54, 0.0  ;;  %v6545_v46 = vpop.eup %5005 }
 0x4ad   : > { %v1875_v47 = vsel %vm1616_vm2, %v6545_v46, 0.0  ;;  %v6549_v55 = vpop.eup %5007 }
 0x4ae   : > { %v1869_v41 = vsel %vm1616_vm2, %v6549_v55, 0.0  ;;  %v6553_v38 = vpop.eup %5009 }
 0x4af   : > { %v1878_v56 = vsel %vm1616_vm2, %v6553_v38, 0.0  ;;  %v6557_v26 = vpop.eup %5011 }
 0x4b0   : > { %1867 = vadd.xlane.f32.xlu1 %v1866_v5  ;;  %v1887_v6 = vsel %vm1616_vm2, %v6557_v26, 0.0 }
 0x4b2   : > { %v6561_v23 = vpop.eup %5013 }
 0x4b3   : > { %v1881_v0 = vsel %vm1616_vm2, %v6561_v23, 0.0 }
 0x4b4   : > { %1861 = vadd.xlane.f32.xlu1 %v1860_v61  ;;  %v6573_v61 = vpop.permute.xlu0 %2559 }
 0x4b8   : > { %1876 = vadd.xlane.f32.xlu1 %v1875_v47 }
 0x4bc   : > { %1870 = vadd.xlane.f32.xlu1 %v1869_v41 }
 0x4c0   : > { %1879 = vadd.xlane.f32.xlu1 %v1878_v56 }
 0x4c4   : > { %1888 = vadd.xlane.f32.xlu1 %v1887_v6 }
 0x4c8   : > { %1882 = vadd.xlane.f32.xlu1 %v1881_v0 }
 0x4cf   : > { %v1700_v58 = vpop.xlane.xlu1 %1699 }
 0x4d0   : > { %v1740_v63 = vsub.f32 %v6369_v22, %v1700_v58 }
 0x4d2   : > { %v1799_v30 = vmul.f32 1.442695, %v1740_v63 }
 0x4d3   : > { %v1694_v36 = vpop.xlane.xlu1 %1693 }
 0x4d4   : > { %5015 = vpow2.f32 %v1799_v30  ;;  %v1738_v5 = vsub.f32 %v6374_v12, %v1694_v36 }
 0x4d6   : > { %v1795_v42 = vmul.f32 1.442695, %v1738_v5 }
 0x4d7   : > { %v1712_v58 = vpop.xlane.xlu1 %1711 }
 0x4d8   : > { %5017 = vpow2.f32 %v1795_v42  ;;  %v1709_v22 = vpop.xlane.xlu0 %1708  ;;  %v1744_v63 = vsub.f32 %v6388_v4, %v1712_v58 }
 0x4d9   : > { %2460 = vrot.lane.b32.xlu1 %v6068_v34, %s5355_s20  ;;  %v1743_v12 = vsub.f32 %v6382_v59, %v1709_v22 }
 0x4da   : > { %v1807_v36 = vmul.f32 1.442695, %v1744_v63 }
 0x4db   : > { %v1805_v6 = vmul.f32 1.442695, %v1743_v12 }
 0x4dc   : > { %v1703_v56 = vpop.xlane.xlu0 %1702 }
 0x4dd   : > { %v1741_v0 = vsub.f32 %v6385_v25, %v1703_v56  ;;  %5019 = vpow2.f32 %v1805_v6  ;;  %v1706_v25 = vpop.xlane.xlu1 %1705 }
 0x4de   : > { %v6571_v10 = vpop.eup %5015  ;;  %v1742_v22 = vsub.f32 %v6393_v39, %v1706_v25 }
 0x4df   : > { %v1890_v8 = vsel %vm1616_vm2, %v6571_v10, 0.0  ;;  %v1801_v30 = vmul.f32 1.442695, %v1741_v0 }
 0x4e0   : > { %1891 = vadd.xlane.f32.xlu0 %v1890_v8  ;;  %v1803_v12 = vmul.f32 1.442695, %v1742_v22 }
 0x4e1   : > { %5021 = vpow2.f32 %v1801_v30 }
 0x4e2   : > { %v6577_v47 = vpop.eup %5017  ;;  %5023 = vpow2.f32 %v1807_v36 }
 0x4e3   : > { %v1884_v41 = vsel %vm1616_vm2, %v6577_v47, 0.0  ;;  %5025 = vpow2.f32 %v1803_v12 }
 0x4e4   : > { %1885 = vadd.xlane.f32.xlu0 %v1884_v41 }
 0x4e7   : > { %v6584_v5 = vpop.eup %5019 }
 0x4e8   : > { %7582 = vst [vmem:[#allocation24_spill] sm:$0xff] %v6584_v5  ;;  %v1899_v59 = vsel %vm1616_vm2, %v6584_v5, 0.0 }
 0x4eb   : > { %v6590_v42 = vpop.eup %5021 }
 0x4ec   : > { %v1893_v4 = vsel %vm1616_vm2, %v6590_v42, 0.0  ;;  %v6594_v8 = vpop.eup %5023 }
 0x4ed   : > { %v1902_v41 = vsel %vm1616_vm2, %v6594_v8, 0.0  ;;  %v6599_v58 = vpop.eup %5025 }
 0x4ee   : > { %v1896_v39 = vsel %vm1616_vm2, %v6599_v58, 0.0 }
 0x4fa   : > { %2347 = vrot.lane.b32.xlu0 %v6042_v14, %s5356_s25 }
 0x4fd   : > { %1900 = vadd.xlane.f32.xlu1 %v1899_v59 }
 0x501   : > { %1894 = vadd.xlane.f32.xlu1 %v1893_v4 }
 0x505   : > { %1903 = vadd.xlane.f32.xlu1 %v1902_v41 }
 0x509   : > { %v1817_v56 = vpop.xlane.xlu0 %1816 }
 0x50d   : > { %v1811_v6 = vpop.xlane.xlu0 %1810 }
 0x511   : > { %v1820_v0 = vpop.xlane.xlu1 %1819 }
 0x512   : > { %5027 = vrcp.f32 %v1820_v0 }
 0x513   : > { %5029 = vrcp.f32 %v1811_v6 }
 0x514   : > { %5031 = vrcp.f32 %v1817_v56 }
 0x515   : > { %v1814_v63 = vpop.xlane.xlu1 %1813  ;;  %v1829_v30 = vpop.xlane.xlu0 %1828 }
 0x516   : > { %5033 = vrcp.f32 %v1814_v63  ;;  %2446 = vrot.lane.b32.xlu1 %v6056_v45, %s5356_s25 }
 0x519   : > { %1897 = vadd.xlane.f32.xlu0 %v1896_v39  ;;  %v1832_v36 = vpop.xlane.xlu1 %1831  ;;  %v1823_v59 = vpop.xlane.xlu0 %1822 }
 0x51a   : > { %2563 = vrot.lane.b32.xlu1 %v6094_v53, %s5355_s20  ;;  %5035 = vrcp.f32 %v1832_v36 }
 0x51b   : > { %5037 = vrcp.f32 %v1823_v59 }
 0x51c   : > { %v5028_v25 = vpop.eup %5027  ;;  %5039 = vrcp.f32 %v1829_v30 }
 0x51d   : > { %v1826_v4 = vpop.xlane.xlu1 %1825  ;;  %v5030_v22 = vpop.eup %5029  ;;  %v1940_v56 = vmul.f32 %v5028_v25, %v6452_v29 }
 0x51e   : > { %5041 = vrcp.f32 %v1826_v4  ;;  %2450 = vrot.lane.b32.xlu1 %v6070_v35, %s5356_s25  ;;  %v5032_v41 = vpop.eup %5031  ;;  %v1937_v0 = vmul.f32 %v5030_v22, %v6447_v49 }
 0x51f   : > { %v1939_v39 = vmul.f32 %v5032_v41, %v6441_v28 }
 0x520   : > { %v5034_v12 = vpop.eup %5033 }
 0x521   : > { %v1841_v6 = vpop.xlane.xlu1 %1840  ;;  %v1938_v63 = vmul.f32 %v5034_v12, %v6456_v44  ;;  %v1970_v36 = vpack.c.bf16 %v1940_v56, %v1939_v39 }
 0x522   : > { %2565 = vrot.lane.b32.xlu1 %v6092_v51, %s5355_s20 }
 0x523   : > { %v1969_v30 = vpack.c.bf16 %v1938_v63, %v1937_v0  ;;  %v1856_v12 = vpop.xlane.xlu0 %1855 }
 0x524   : > { %v5036_v59 = vpop.eup %5035 }
 0x525   : > { %v1835_v4 = vpop.xlane.xlu1 %1834  ;;  %4505 = vmatprep.mubr.msk.bf16.mxu0 %vm1616_vm2, %v1969_v30  ;;  %v5038_v5 = vpop.eup %5037  ;;  %v1944_v28 = vmul.f32 %v5036_v59, %v6467_v20 }
 0x526   : > { %2551 = vrot.lane.b32.xlu1 %v6082_v17, %s5356_s25  ;;  %4506 = vmatmul.mubr.msk.bf16.vlgmr.msra.gmra.mrb[48].mxu0 %vm1616_vm2, %v1970_v36  ;;  %v5040_v49 = vpop.eup %5039  ;;  %v1941_v25 = vmul.f32 %v5038_v5, %v6469_v9 }
 0x527   : > { %4514 = vmatpush3.bf16.msra.mxu0 %v6208_v52  ;;  %v1943_v41 = vmul.f32 %v5040_v49, %v6460_v3 }
 0x528   : > { %v5042_v29 = vpop.eup %5041  ;;  %4515 = vmatprep.subr.bf16.mxu0 %v6211_v57 }
 0x529   : > { %v1844_v44 = vpop.xlane.xlu1 %1843  ;;  %v1942_v22 = vmul.f32 %v5042_v29, %v6477_v11  ;;  %v1972_v56 = vpack.c.bf16 %v1944_v28, %v1943_v41  ;;  %v7585_v41 = vld [vmem:[#allocation23_spill] sm:$0xff] }
 0x52a   : > { %2668 = vrot.lane.b32.xlu1 %v6118_v18, %s5355_s20  ;;  %5043 = vrcp.f32 %v1844_v44 }
 0x52b   : > { %4516 = vmatpush3.bf16.msra.mxu0 %v6211_v57  ;;  %v1971_v52 = vpack.c.bf16 %v1942_v22, %v1941_v25  ;;  %5045 = vrcp.f32 %v1835_v4  ;;  %v1850_v57 = vpop.xlane.xlu0 %1849 }
 0x52c   : > { %4517 = vmatprep.subr.bf16.mxu0 %v6216_v32  ;;  %5047 = vrcp.f32 %v1841_v6 }
 0x52d   : > { %v1838_v20 = vpop.xlane.xlu1 %1837  ;;  %4509 = vmatprep.mubr.msk.bf16.mxu0 %vm1616_vm2, %v1971_v52 }
 0x52e   : > { %5049 = vrcp.f32 %v1838_v20  ;;  %2557 = vrot.lane.b32.xlu1 %v6092_v51, %s5356_s25  ;;  %4510 = vmatmul.mubr.msk.bf16.gmra.mrb[52].mxu0 %vm1616_vm2, %v1972_v56 }
 0x52f   : > { %2561 = vrot.lane.b32.xlu0 %v6080_v31, %s5355_s20  ;;  %4518 = vmatpush3.bf16.msra.mxu0 %v6216_v32 }
 0x530   : > { %4519 = vmatprep.subr.bf16.mxu0 %v6221_v40 }
 0x531   : > { %v1853_v3 = vpop.xlane.xlu1 %1852  ;;  %v1859_v49 = vpop.xlane.xlu0 %1858 }
 0x532   : > { %2656 = vrot.lane.b32.xlu1 %v6106_v62, %s5356_s25  ;;  %5051 = vrcp.f32 %v1853_v3  ;;  %v7588_v3 = vld [vmem:[#allocation16_spill] sm:$0xff] }
 0x533   : > { %2448 = vrot.lane.b32.xlu0 %v6054_v2, %s5356_s25  ;;  %4520 = vmatpush3.bf16.msra.mxu0 %v6221_v40  ;;  %5053 = vrcp.f32 %v1850_v57 }
 0x534   : > { %4545 = vmatprep.subr.bf16.mxu0 %v6399_v37  ;;  %v5044_v9 = vpop.eup %5043  ;;  %5055 = vrcp.f32 %v1856_v12 }
 0x535   : > { %v1847_v11 = vpop.xlane.xlu1 %1846  ;;  %v5046_v32 = vpop.eup %5045  ;;  %v1948_v0 = vmul.f32 %v5044_v9, %v6495_v15 }
 0x536   : > { %5057 = vrcp.f32 %v1847_v11  ;;  %2660 = vrot.lane.b32.xlu1 %v6118_v18, %s5356_s25  ;;  %v5048_v5 = vpop.eup %5047  ;;  %v1945_v40 = vmul.f32 %v5046_v32, %v6485_v33 }
 0x537   : > { %2664 = vrot.lane.b32.xlu0 %v6106_v62, %s5355_s20  ;;  %v1947_v30 = vmul.f32 %v5048_v5, %v6482_v27 }
 0x538   : > { %v5050_v6 = vpop.eup %5049  ;;  %v1874_v12 = vpop.xlane.xlu0 %1873 }
 0x539   : > { %v1865_v63 = vpop.xlane.xlu1 %1864  ;;  %v1946_v39 = vmul.f32 %v5050_v6, %v6507_v24  ;;  %v1974_v59 = vpack.c.bf16 %v1948_v0, %v1947_v30  ;;  %v7584_v24 = vld [vmem:[#allocation13_spill] sm:$0xff]  ;;  %v7589_v0 = vld [vmem:[#allocation12_spill] sm:$0xff] }
 0x53a   : > { %3204 = vrot.lane.b32.xlu1 %v6028_v21, %s5357_s14  ;;  %v7583_v21 = vld [vmem:[#allocation10_spill] sm:$0xff] }
 0x53b   : > { %2452 = vrot.lane.b32.xlu0 %v6068_v34, %s5356_s25  ;;  %v1973_v36 = vpack.c.bf16 %v1946_v39, %v1945_v40  ;;  %v7591_v39 = vld [vmem:[#allocation8_spill] sm:$0xff] }
 0x53c   : > { %v5052_v4 = vpop.eup %5051 }
 0x53d   : > { %v1868_v29 = vpop.xlane.xlu1 %1867  ;;  %4521 = vmatprep.mubr.msk.bf16.mxu0 %vm1616_vm2, %v1973_v36  ;;  %v5054_v15 = vpop.eup %5053  ;;  %v1951_v28 = vmul.f32 %v5052_v4, %v6512_v1 }
 0x53e   : > { %3291 = vrot.lane.b32.xlu1 %v6056_v45, %s5357_s14  ;;  %4522 = vmatmul.mubr.msk.bf16.vlgmr.msra.gmra.mrb[56].mxu0 %vm1616_vm2, %v1974_v59  ;;  %v5056_v27 = vpop.eup %5055  ;;  %5059 = vrcp.f32 %v1868_v29  ;;  %v1950_v45 = vmul.f32 %v5054_v15, %v6499_v43  ;;  %v7592_v29 = vld [vmem:[#allocation9_spill] sm:$0xff]  ;;  %v7594_v15 = vld [vmem:[#allocation19_spill] sm:$0xff] }
 0x53f   : > { %2666 = vrot.lane.b32.xlu0 %v7583_v21, %s5355_s20  ;;  %4546 = vmatpush3.bf16.msra.mxu0 %v6399_v37  ;;  %5061 = vrcp.f32 %v1859_v49  ;;  %v1952_v22 = vmul.f32 %v5056_v27, %v6489_v7 }
 0x540   : > { %v5058_v33 = vpop.eup %5057  ;;  %4547 = vmatprep.subr.bf16.mxu0 %v7584_v24  ;;  %5063 = vrcp.f32 %v1865_v63 }
 0x541   : > { %v1862_v44 = vpop.xlane.xlu1 %1861  ;;  %v1949_v25 = vmul.f32 %v5058_v33, %v6521_v16  ;;  %v1976_v1 = vpack.c.bf16 %v1952_v22, %v1951_v28  ;;  %v7596_v28 = vld [vmem:[#allocation22_spill] sm:$0xff] }
 0x542   : > { %5065 = vrcp.f32 %v1862_v44  ;;  %3293 = vrot.lane.b32.xlu1 %v6054_v2, %s5357_s14  ;;  %v7586_v2 = vld [vmem:[#allocation14_spill] sm:$0xff] }
 0x543   : > { %2553 = vrot.lane.b32.xlu0 %v6080_v31, %s5356_s25  ;;  %4548 = vmatpush3.bf16.msra.mxu0 %v7584_v24  ;;  %v1975_v37 = vpack.c.bf16 %v1950_v45, %v1949_v25  ;;  %5067 = vrcp.f32 %v1874_v12 }
 0x544   : > { %4549 = vmatprep.subr.bf16.mxu0 %v7585_v41 }
 0x545   : > { %v1877_v52 = vpop.xlane.xlu1 %1876  ;;  %4525 = vmatprep.mubr.msk.bf16.mxu0 %vm1616_vm2, %v1975_v37 }
 0x546   : > { %3297 = vrot.lane.b32.xlu1 %v6068_v34, %s5357_s14  ;;  %4526 = vmatmul.mubr.msk.bf16.gmra.mrb[60].mxu0 %vm1616_vm2, %v1976_v1  ;;  %v7587_v34 = vld [vmem:[#allocation11_spill] sm:$0xff] }
 0x547   : > { %2555 = vrot.lane.b32.xlu0 %v6094_v53, %s5356_s25  ;;  %4550 = vmatpush3.bf16.msra.mxu0 %v7585_v41 }
 0x548   : > { %4551 = vmatprep.subr.bf16.mxu0 %v7586_v2  ;;  %v5060_v7 = vpop.eup %5059 }
 0x549   : > { %v1871_v43 = vpop.xlane.xlu1 %1870  ;;  %v5062_v16 = vpop.eup %5061  ;;  %v1956_v57 = vmul.f32 %v5060_v7, %v6535_v60 }
 0x54a   : > { %5069 = vrcp.f32 %v1871_v43  ;;  %3382 = vrot.lane.b32.xlu1 %v6080_v31, %s5357_s14  ;;  %v5064_v56 = vpop.eup %5063  ;;  %v1953_v11 = vmul.f32 %v5062_v16, %v6514_v48  ;;  %v2370_v48 = vsel %vm1151_vm1, %v7589_v0, 0 }
 0x54b   : > { %2670 = vrot.lane.b32.xlu0 %v7587_v34, %s5355_s20  ;;  %4552 = vmatpush3.bf16.msra.mxu0 %v7586_v2  ;;  %5071 = vrcp.f32 %v1877_v52  ;;  %v1955_v31 = vmul.f32 %v5064_v56, %v6526_v50  ;;  %v7597_v2 = vld [vmem:[#allocation20_spill] sm:$0xff] }
 0x54c   : > { %v5066_v20 = vpop.eup %5065  ;;  %4745 = vmatprep.subr.msk.bf16.mxu0 %vm1151_vm1, %v7588_v3 }
 0x54d   : > { %v1880_v9 = vpop.xlane.xlu1 %1879  ;;  %v1954_v32 = vmul.f32 %v5066_v20, %v6540_v54  ;;  %v1978_v60 = vpack.c.bf16 %v1956_v57, %v1955_v31  ;;  %v5068_v6 = vpop.eup %5067  ;;  %v7590_v54 = vld [vmem:[#allocation15_spill] sm:$0xff] }
 0x54e   : > { %5073 = vrcp.f32 %v1880_v9  ;;  %3386 = vrot.lane.b32.xlu1 %v6092_v51, %s5357_s14  ;;  %v1958_v63 = vmul.f32 %v5068_v6, %v6528_v13  ;;  %v2373_v49 = vsel %vm1151_vm1, %v7590_v54, 0 }
 0x54f   : > { %2658 = vrot.lane.b32.xlu0 %v7583_v21, %s5356_s25  ;;  %v1977_v5 = vpack.c.bf16 %v1954_v32, %v1953_v11 }
 0x551   : > { %4537 = vmatprep.mubr.msk.bf16.mxu1 %vm1616_vm2, %v1977_v5  ;;  %v1889_v27 = vpop.xlane.xlu1 %1888 }
 0x552   : > { %4538 = vmatmul.mubr.msk.bf16.vlgmr.msra.gmra.mrb[16].mxu1 %vm1616_vm2, %v1978_v60 }
 0x553   : > { %2662 = vrot.lane.b32.xlu0 %v7587_v34, %s5356_s25  ;;  %4562 = vmatpush3.bf16.xpose.msra.mxu1 %v2370_v48 }
 0x554   : > { %v5070_v50 = vpop.eup %5069  ;;  %4742 = vmatprep.subr.msk.bf16.mxu1 %vm1151_vm1, %v7590_v54 }
 0x555   : > { %v1957_v51 = vmul.f32 %v5070_v50, %v6549_v55  ;;  %v5072_v40 = vpop.eup %5071  ;;  %v7593_v55 = vld [vmem:[#allocation18_spill] sm:$0xff] }
 0x556   : > { %v1959_v59 = vmul.f32 %v5072_v40, %v6545_v46  ;;  %v2376_v46 = vsel %vm1151_vm1, %v7593_v55, 0 }
 0x557   : > { %3202 = vrot.lane.b32.xlu0 %v7591_v39, %s5357_s14  ;;  %v1979_v30 = vpack.c.bf16 %v1958_v63, %v1957_v51 }
 0x558   : > { %v5074_v36 = vpop.eup %5073 }
 0x559   : > { %4541 = vmatprep.mubr.msk.bf16.mxu1 %vm1616_vm2, %v1979_v30  ;;  %v1960_v4 = vmul.f32 %v5074_v36, %v6553_v38  ;;  %v7595_v38 = vld [vmem:[#allocation17_spill] sm:$0xff]  ;;  %v7599_v30 = vld [vmem:[#allocation24_spill] sm:$0xff] }
 0x55a   : > { %v2379_v33 = vsel %vm1151_vm1, %v7595_v38, 0 }
 0x55b   : > { %3206 = vrot.lane.b32.xlu0 %v7592_v29, %s5357_s14  ;;  %4564 = vmatpush3.bf16.xpose.msra.mxu1 %v2373_v49  ;;  %v1980_v13 = vpack.c.bf16 %v1960_v4, %v1959_v59 }
 0x55c   : > { %4743 = vmatprep.subr.msk.bf16.mxu1 %vm1151_vm1, %v7593_v55 }
 0x55d   : > { %4542 = vmatmul.mubr.msk.bf16.gmra.mrb[20].mxu1 %vm1616_vm2, %v1980_v13 }
 0x55e   : > { %4569 = vmatprep.mubr.msk.bf16.mxu1 %vm1151_vm1, %v7594_v15 }
 0x55f   : > { %3208 = vrot.lane.b32.xlu0 %v6042_v14, %s5357_s14  ;;  %v1883_v14 = vpop.xlane.xlu1 %1882 }
 0x563   : > { %3295 = vrot.lane.b32.xlu0 %v6070_v35, %s5357_s14  ;;  %4566 = vmatpush3.bf16.xpose.msra.mxu1 %v2376_v46 }
 0x564   : > { %4744 = vmatprep.subr.msk.bf16.mxu1 %vm1151_vm1, %v7595_v38 }
 0x567   : > { %3380 = vrot.lane.b32.xlu0 %v6082_v17, %s5357_s14  ;;  %v2580_v17 = vsel %vm1151_vm1, %v6573_v61, 0 }
 0x56b   : > { %3384 = vrot.lane.b32.xlu0 %v6094_v53, %s5357_s14  ;;  %4568 = vmatpush3.bf16.xpose.msra.mxu1 %v2379_v33 }
 0x56c   : > { %4749 = vmatprep.subr.msk.bf16.mxu1 %vm1151_vm1, %v6573_v61 }
 0x56d   : > { %v1892_v35 = vpop.xlane.xlu0 %1891 }
 0x56e   : > { %5075 = vrcp.f32 %v1892_v35 }
 0x56f   : > { %5077 = vrcp.f32 %v1883_v14 }
 0x570   : > { %5079 = vrcp.f32 %v1889_v27 }
 0x571   : > { %v1886_v24 = vpop.xlane.xlu0 %1885 }
 0x572   : > { %5081 = vrcp.f32 %v1886_v24  ;;  %4570 = vmatmul.mubr.msk.bf16.vlgmr.msra.gmra.mrb[24].mxu1 %vm1151_vm1, %v7596_v28 }
 0x573   : > { %4573 = vmatprep.mubr.msk.bf16.mxu1 %vm1151_vm1, %v6565_v19  ;;  %4594 = vmatpush3.bf16.xpose.msra.mxu1 %v2580_v17  ;;  %v2475_v19 = vsel %vm1151_vm1, %v7588_v3, 0 }
 0x575   : > { %v2348_v44 = vpop.permute.xlu0 %2347 }
 0x578   : > { %v5076_v53 = vpop.eup %5075 }
 0x579   : > { %v5078_v25 = vpop.eup %5077  ;;  %v1964_v37 = vmul.f32 %v5076_v53, %v6571_v10  ;;  %v2461_v10 = vpop.permute.xlu1 %2460 }
 0x57a   : > { %4574 = vmatmul.mubr.msk.bf16.gmra.mrb[28].mxu1 %vm1151_vm1, %v2348_v44  ;;  %v5080_v45 = vpop.eup %5079  ;;  %v1961_v41 = vmul.f32 %v5078_v25, %v6561_v23  ;;  %v2478_v23 = vsel %vm1151_vm1, %v7597_v2, 0  ;;  %v2484_v20 = vsel %vm1151_vm1, %v2461_v10, 0 }
 0x57b   : > { %v1963_v12 = vmul.f32 %v5080_v45, %v6557_v26  ;;  %v7598_v26 = vld [vmem:[#allocation21_spill] sm:$0xff] }
 0x57c   : > { %v5082_v22 = vpop.eup %5081  ;;  %v2481_v43 = vsel %vm1151_vm1, %v7598_v26, 0 }
 0x57d   : > { %v1962_v1 = vmul.f32 %v5082_v22, %v6577_v47  ;;  %v1982_v52 = vpack.c.bf16 %v1964_v37, %v1963_v12 }
 0x57f   : > { %v1981_v61 = vpack.c.bf16 %v1962_v1, %v1961_v41 }
 0x581   : > { %4553 = vmatprep.mubr.msk.bf16.mxu0 %vm1616_vm2, %v1981_v61 }
 0x582   : > { %4554 = vmatmul.mubr.msk.bf16.vlgmr.msra.gmra.mrb[64].mxu0 %vm1616_vm2, %v1982_v52 }
 0x583   : > { %4578 = vmatpush3.bf16.xpose.msra.mxu0 %v2475_v19 }
 0x584   : > { %4746 = vmatprep.subr.msk.bf16.mxu0 %vm1151_vm1, %v7597_v2 }
 0x58a   : > { %v1901_v47 = vpop.xlane.xlu1 %1900 }
 0x58b   : > { %4580 = vmatpush3.bf16.xpose.msra.mxu0 %v2478_v23 }
 0x58c   : > { %4747 = vmatprep.subr.msk.bf16.mxu0 %vm1151_vm1, %v7598_v26 }
 0x58e   : > { %v1895_v7 = vpop.xlane.xlu1 %1894 }
 0x592   : > { %v1904_v16 = vpop.xlane.xlu1 %1903 }
 0x593   : > { %4582 = vmatpush3.bf16.xpose.msra.mxu0 %v2481_v43  ;;  %5083 = vrcp.f32 %v1904_v16 }
 0x594   : > { %4748 = vmatprep.subr.msk.bf16.mxu0 %vm1151_vm1, %v2461_v10  ;;  %5085 = vrcp.f32 %v1895_v7 }
 0x595   : > { %5087 = vrcp.f32 %v1901_v47 }
 0x596   : > { %v2447_v56 = vpop.permute.xlu1 %2446 }
 0x59a   : > { %v2564_v57 = vpop.permute.xlu1 %2563 }
 0x59b   : > { %4584 = vmatpush3.bf16.xpose.msra.mxu0 %v2484_v20  ;;  %v2586_v39 = vsel %vm1151_vm1, %v2564_v57, 0 }
 0x59d   : > { %v5084_v60 = vpop.eup %5083 }
 0x59e   : > { %v2451_v3 = vpop.permute.xlu1 %2450  ;;  %v5086_v0 = vpop.eup %5085  ;;  %v1968_v54 = vmul.f32 %v5084_v60, %v6594_v8 }
 0x59f   : > { %v5088_v48 = vpop.eup %5087  ;;  %v1965_v63 = vmul.f32 %v5086_v0, %v6590_v42 }
 0x5a0   : > { %v1967_v36 = vmul.f32 %v5088_v48, %v7599_v30 }
 0x5a2   : > { %v2566_v9 = vpop.permute.xlu1 %2565  ;;  %v1984_v4 = vpack.c.bf16 %v1968_v54, %v1967_v36 }
 0x5a6   : > { %v1898_v11 = vpop.xlane.xlu0 %1897  ;;  %v2552_v32 = vpop.permute.xlu1 %2551 }
 0x5a7   : > { %5089 = vrcp.f32 %v1898_v11  ;;  %4601 = vmatprep.mubr.msk.bf16.mxu1 %vm1151_vm1, %v2552_v32 }
 0x5aa   : > { %v2562_v31 = vpop.permute.xlu0 %2561  ;;  %v2669_v42 = vpop.permute.xlu1 %2668 }
 0x5ab   : > { %4750 = vmatprep.subr.msk.bf16.mxu1 %vm1151_vm1, %v2562_v31  ;;  %v2583_v5 = vsel %vm1151_vm1, %v2562_v31, 0  ;;  %v2691_v24 = vsel %vm1151_vm1, %v2669_v42, 0 }
 0x5ac   : > { %4596 = vmatpush3.bf16.xpose.msra.mxu1 %v2583_v5 }
 0x5ad   : > { %4751 = vmatprep.subr.msk.bf16.mxu1 %vm1151_vm1, %v2564_v57 }
 0x5ae   : > { %v2449_v6 = vpop.permute.xlu0 %2448  ;;  %v2558_v55 = vpop.permute.xlu1 %2557 }
 0x5b1   : > { %v5090_v50 = vpop.eup %5089 }
 0x5b2   : > { %v2665_v51 = vpop.permute.xlu0 %2664  ;;  %v1966_v40 = vmul.f32 %v5090_v50, %v6599_v58  ;;  %v2589_v58 = vsel %vm1151_vm1, %v2566_v9, 0  ;;  %v2657_v46 = vpop.permute.xlu1 %2656  ;;  %v6844_v50 = vld [vmem:[#allocation4 + $0x50] sm:$0xff] }
 0x5b3   : > { %4753 = vmatprep.subr.msk.bf16.mxu0 %vm1151_vm1, %v2665_v51  ;;  %v2685_v13 = vsel %vm1151_vm1, %v2665_v51, 0 }
 0x5b4   : > { %4598 = vmatpush3.bf16.xpose.msra.mxu1 %v2586_v39  ;;  %v1983_v59 = vpack.c.bf16 %v1966_v40, %v1965_v63  ;;  %v6846_v63 = vld [vmem:[#allocation4 + $0x40] sm:$0xff] }
 0x5b5   : > { %4752 = vmatprep.subr.msk.bf16.mxu1 %vm1151_vm1, %v2566_v9 }
 0x5b6   : > { %4557 = vmatprep.mubr.msk.bf16.mxu0 %vm1616_vm2, %v1983_v59  ;;  %v2453_v49 = vpop.permute.xlu0 %2452  ;;  %v2661_v14 = vpop.permute.xlu1 %2660  ;;  %v6851_v59 = vld [vmem:[#allocation4 + $0x58] sm:$0xff] }
 0x5b7   : > { %4558 = vmatmul.mubr.msk.bf16.gmra.mrb[68].mxu0 %vm1616_vm2, %v1984_v4 }
 0x5b8   : > { %4585 = vmatprep.mubr.msk.bf16.mxu0 %vm1151_vm1, %v2447_v56 }
 0x5ba   : > { %v2667_v8 = vpop.permute.xlu0 %2666  ;;  %v3205_v28 = vpop.permute.xlu1 %3204 }
 0x5bb   : > { %v2688_v27 = vsel %vm1151_vm1, %v2667_v8, 0 }
 0x5bc   : > { %4600 = vmatpush3.bf16.xpose.msra.mxu1 %v2589_v58 }
 0x5be   : > { %v2554_v29 = vpop.permute.xlu0 %2553  ;;  %v3292_v25 = vpop.permute.xlu1 %3291 }
 0x5bf   : > { %4586 = vmatmul.mubr.msk.bf16.vlgmr.msra.gmra.mrb[72].mxu0 %vm1151_vm1, %v2449_v6 }
 0x5c0   : > { %4610 = vmatpush3.bf16.xpose.msra.mxu0 %v2685_v13  ;;  %4589 = vmatprep.mubr.msk.bf16.mxu0 %vm1151_vm1, %v2451_v3 }
 0x5c1   : > { %4754 = vmatprep.subr.msk.bf16.mxu0 %vm1151_vm1, %v2667_v8 }
 0x5c2   : > { %v2556_v15 = vpop.permute.xlu0 %2555  ;;  %v3294_v37 = vpop.permute.xlu1 %3293 }
 0x5c3   : > { %4602 = vmatmul.mubr.msk.bf16.vlgmr.msra.gmra.mrb[32].mxu1 %vm1151_vm1, %v2554_v29 }
 0x5c4   : > { %4605 = vmatprep.mubr.msk.bf16.mxu1 %vm1151_vm1, %v2556_v15 }
 0x5c6   : > { %v2671_v38 = vpop.permute.xlu0 %2670  ;;  %v3298_v1 = vpop.permute.xlu1 %3297 }
 0x5c7   : > { %4590 = vmatmul.mubr.msk.bf16.gmra.mrb[76].mxu0 %vm1151_vm1, %v2453_v49  ;;  %v2694_v44 = vsel %vm1151_vm1, %v2671_v38, 0  ;;  %v6853_v49 = vld [vmem:[#allocation4 + $0x48] sm:$0xff] }
 0x5c8   : > { %4612 = vmatpush3.bf16.xpose.msra.mxu0 %v2688_v27  ;;  %4617 = vmatprep.mubr.msk.bf16.mxu0 %vm1151_vm1, %v2657_v46  ;;  %v6868_v46 = vld [vmem:[#allocation4 + $0x70] sm:$0xff] }
 0x5c9   : > { %4755 = vmatprep.subr.msk.bf16.mxu0 %vm1151_vm1, %v2669_v42 }
 0x5ca   : > { %v2659_v33 = vpop.permute.xlu0 %2658 }
 0x5cb   : > { %4606 = vmatmul.mubr.msk.bf16.gmra.mrb[36].mxu1 %vm1151_vm1, %v2558_v55 }
 0x5ce   : > { %v2663_v35 = vpop.permute.xlu0 %2662 }
 0x5d0   : > { %4614 = vmatpush3.bf16.xpose.msra.mxu0 %v2691_v24 }
 0x5d1   : > { %4756 = vmatprep.subr.msk.bf16.mxu0 %vm1151_vm1, %v2671_v38 }
 0x5d2   : > { %v3203_v17 = vpop.permute.xlu0 %3202 }
 0x5d3   : > { %4625 = vmatprep.subr.bf16.mxu1 %v3203_v17 }
 0x5d4   : > { %4626 = vmatpush3.bf16.msra.mxu1 %v3203_v17 }
 0x5d5   : > { %4627 = vmatprep.subr.bf16.mxu1 %v3205_v28 }
 0x5d6   : > { %v3207_v53 = vpop.permute.xlu0 %3206 }
 0x5d8   : > { %4616 = vmatpush3.bf16.xpose.msra.mxu0 %v2694_v44  ;;  %4628 = vmatpush3.bf16.msra.mxu1 %v3205_v28  ;;  %v6874_v28 = vld [vmem:[#allocation4 + $0x78] sm:$0xff] }
 0x5d9   : > { %4641 = vmatprep.subr.bf16.mxu0 %v3292_v25  ;;  %4629 = vmatprep.subr.bf16.mxu1 %v3207_v53 }
 0x5da   : > { %v3209_v45 = vpop.permute.xlu0 %3208 }
 0x5dc   : > { %4630 = vmatpush3.bf16.msra.mxu1 %v3207_v53 }
 0x5dd   : > { %4631 = vmatprep.subr.bf16.mxu1 %v3209_v45 }
 0x5de   : > { %v3296_v22 = vpop.permute.xlu0 %3295 }
 0x5df   : > { %4618 = vmatmul.mubr.msk.bf16.vlgmr.msra.gmra.mrb[80].mxu0 %vm1151_vm1, %v2659_v33 }
 0x5e0   : > { %4621 = vmatprep.mubr.msk.bf16.mxu0 %vm1151_vm1, %v2661_v14  ;;  %4642 = vmatpush3.bf16.msra.mxu0 %v3292_v25 }
 0x5e1   : > { %4632 = vmatpush3.bf16.msra.mxu1 %v3209_v45  ;;  %4643 = vmatprep.subr.bf16.mxu0 %v3294_v37 }
 0x5e2   : > { %v6792_v41 = vpop.permute.xlu0 %3380 }
 0x5e3   : > { %4657 = vmatprep.subr.bf16.mxu1 %v6792_v41 }
 0x5e4   : > { %4644 = vmatpush3.bf16.msra.mxu0 %v3294_v37 }
 0x5e5   : > { %4645 = vmatprep.subr.bf16.mxu0 %v3296_v22 }
 0x5e7   : > { %4622 = vmatmul.mubr.msk.bf16.gmra.mrb[84].mxu0 %vm1151_vm1, %v2663_v35  ;;  %v6872_v35 = vld [vmem:[#allocation4 + $0x60] sm:$0xff] }
 0x5e8   : > { %4646 = vmatpush3.bf16.msra.mxu0 %v3296_v22  ;;  %v6881_v22 = vld [vmem:[#allocation4 + $0x68] sm:$0xff] }
 0x5e9   : > { %4647 = vmatprep.subr.bf16.mxu0 %v3298_v1 }
 0x5ec   : > { %4648 = vmatpush3.bf16.msra.mxu0 %v3298_v1 }
 0x5f9   : > { %v6796_v12 = vpop.f32.mrb[48].mxu0 }
 0x5fa   : > { %v6798_v61 = vpop.f32.mrb[49].mxu0 }
 0x5fb   : > { %v6800_v52 = vpop.f32.mrb[50].mxu0 }
 0x5fc   : > { %v6802_v19 = vpop.f32.mrb[51].mxu0 }
 0x601   : > { %v6804_v2 = vpop.f32.mrb[52].mxu0 }
 0x602   : > { %v6806_v10 = vpop.f32.mrb[53].mxu0 }
 0x603   : > { %v6808_v23 = vpop.f32.mrb[54].mxu0 }
 0x604   : > { %v6810_v47 = vpop.f32.mrb[55].mxu0 }
 0x611   : > { %v6812_v26 = vpop.f32.mrb[56].mxu0 }
 0x612   : > { %7600 = vst [vmem:[#allocation10_spill] sm:$0xff] %v6812_v26  ;;  %v6814_v7 = vpop.f32.mrb[57].mxu0 }
 0x613   : > { %7601 = vst [vmem:[#allocation13_spill] sm:$0xff] %v6814_v7  ;;  %v6816_v43 = vpop.f32.mrb[58].mxu0 }
 0x614   : > { %v6818_v16 = vpop.f32.mrb[59].mxu0 }
 0x615   : > { %7602 = vst [vmem:[#allocation23_spill] sm:$0xff] %v6818_v16 }
 0x619   : > { %v6820_v56 = vpop.f32.mrb[60].mxu0 }
 0x61a   : > { %7603 = vst [vmem:[#allocation14_spill] sm:$0xff] %v6820_v56  ;;  %v6822_v20 = vpop.f32.mrb[61].mxu0 }
 0x61b   : > { %7604 = vst [vmem:[#allocation11_spill] sm:$0xff] %v6822_v20  ;;  %v6824_v57 = vpop.f32.mrb[62].mxu0 }
 0x61c   : > { %7605 = vst [vmem:[#allocation16_spill] sm:$0xff] %v6824_v57  ;;  %v6826_v3 = vpop.f32.mrb[63].mxu0 }
 0x61d   : > { %7606 = vst [vmem:[#allocation12_spill] sm:$0xff] %v6826_v3 }
 0x625   : > { %v6828_v9 = vpop.f32.mrb[16].mxu1 }
 0x626   : > { %7607 = vst [vmem:[#allocation15_spill] sm:$0xff] %v6828_v9  ;;  %v6830_v11 = vpop.f32.mrb[17].mxu1 }
 0x627   : > { %7608 = vst [vmem:[#allocation8_spill] sm:$0xff] %v6830_v11  ;;  %v6832_v32 = vpop.f32.mrb[18].mxu1 }
 0x628   : > { %7609 = vst [vmem:[#allocation9_spill] sm:$0xff] %v6832_v32  ;;  %v6834_v31 = vpop.f32.mrb[19].mxu1 }
 0x629   : > { %7610 = vst [vmem:[#allocation18_spill] sm:$0xff] %v6834_v31 }
 0x630   : > { %v6836_v5 = vpop.f32.mrb[20].mxu1 }
 0x631   : > { %7611 = vst [vmem:[#allocation19_spill] sm:$0xff] %v6836_v5  ;;  %v6838_v60 = vpop.f32.mrb[21].mxu1 }
 0x632   : > { %7612 = vst [vmem:[#allocation17_spill] sm:$0xff] %v6838_v60  ;;  %v6840_v6 = vpop.f32.mrb[22].mxu1 }
 0x633   : > { %7613 = vst [vmem:[#allocation22_spill] sm:$0xff] %v6840_v6  ;;  %v6842_v0 = vpop.f32.mrb[23].mxu1 }
 0x634   : > { %7614 = vst [vmem:[#allocation20_spill] sm:$0xff] %v6842_v0 }
 0x645   : > { %v4571_v48 = vpop.f32.mrb[24].mxu1 }
 0x646   : > { %v2763_v54 = vmul.f32 0.25, %v4571_v48  ;;  %v2415_v51 = vpop.f32.mrb[25].mxu1 }
 0x647   : > { %v2761_v40 = vmul.f32 0.25, %v2415_v51  ;;  %v4572_v39 = vpop.f32.mrb[26].mxu1 }
 0x648   : > { %v6849_v30 = vadd.f32 %v6844_v50, %v2763_v54  ;;  %v2764_v36 = vmul.f32 0.25, %v4572_v39  ;;  %v2418_v4 = vpop.f32.mrb[27].mxu1 }
 0x649   : > { %v6856_v42 = vadd.f32 %v6846_v63, %v2761_v40  ;;  %v2762_v8 = vmul.f32 0.25, %v2418_v4 }
 0x64a   : > { %v2840_v58 = vsel %vm1616_vm2, %v6849_v30, -inf  ;;  %v6861_v29 = vadd.f32 %v6851_v59, %v2764_v36 }
 0x64b   : > { %v6864_v13 = vadd.f32 %v6853_v49, %v2762_v8  ;;  %2841 = vmax.xlane.f32.xlu0 %v2840_v58  ;;  %v2834_v55 = vsel %vm1616_vm2, %v6856_v42, -inf }
 0x64c   : > { %2835 = vmax.xlane.f32.xlu1 %v2834_v55  ;;  %v2843_v17 = vsel %vm1616_vm2, %v6861_v29, -inf }
 0x64d   : > { %v4575_v15 = vpop.f32.mrb[28].mxu1  ;;  %v2837_v38 = vsel %vm1616_vm2, %v6864_v13, -inf }
 0x64e   : > { %v2767_v27 = vmul.f32 0.25, %v4575_v15  ;;  %v2431_v33 = vpop.f32.mrb[29].mxu1 }
 0x64f   : > { %v2765_v14 = vmul.f32 0.25, %v2431_v33  ;;  %2838 = vmax.xlane.f32.xlu0 %v2837_v38  ;;  %v4576_v24 = vpop.f32.mrb[30].mxu1 }
 0x650   : > { %v6879_v53 = vadd.f32 %v6868_v46, %v2767_v27  ;;  %v2768_v44 = vmul.f32 0.25, %v4576_v24  ;;  %2844 = vmax.xlane.f32.xlu1 %v2843_v17  ;;  %v2434_v25 = vpop.f32.mrb[31].mxu1 }
 0x651   : > { %v2766_v45 = vmul.f32 0.25, %v2434_v25  ;;  %v6884_v37 = vadd.f32 %v6872_v35, %v2765_v14 }
 0x652   : > { %v6887_v1 = vadd.f32 %v6874_v28, %v2768_v44  ;;  %v2852_v48 = vsel %vm1616_vm2, %v6879_v53, -inf }
 0x653   : > { %2853 = vmax.xlane.f32.xlu0 %v2852_v48  ;;  %v6892_v54 = vadd.f32 %v6881_v22, %v2766_v45  ;;  %v2846_v36 = vsel %vm1616_vm2, %v6884_v37, -inf }
 0x654   : > { %v2855_v51 = vsel %vm1616_vm2, %v6887_v1, -inf }
 0x655   : > { %v6896_v40 = vpop.f32.mrb[64].mxu0  ;;  %2856 = vmax.xlane.f32.xlu1 %v2855_v51  ;;  %v2849_v58 = vsel %vm1616_vm2, %v6892_v54, -inf }
 0x656   : > { %7615 = vst [vmem:[#allocation21_spill] sm:$0xff] %v6896_v40  ;;  %v6898_v39 = vpop.f32.mrb[65].mxu0 }
 0x657   : > { %7616 = vst [vmem:[#allocation24_spill] sm:$0xff] %v6898_v39  ;;  %v6902_v4 = vpop.f32.mrb[66].mxu0  ;;  %2847 = vmax.xlane.f32.xlu0 %v2846_v36 }
 0x658   : > { %7617 = vst [vmem:[#allocation25_spill] sm:$0xff] %v6902_v4  ;;  %v6904_v8 = vpop.f32.mrb[67].mxu0 }
 0x659   : > { %7618 = vst [vmem:[#allocation26_spill] sm:$0xff] %v6904_v8  ;;  %2850 = vmax.xlane.f32.xlu1 %v2849_v58 }
 0x68a   : > { %v6908_v55 = vpop.f32.mrb[68].mxu0 }
 0x68b   : > { %7619 = vst [vmem:[#allocation27_spill] sm:$0xff] %v6908_v55  ;;  %v6910_v15 = vpop.f32.mrb[69].mxu0 }
 0x68c   : > { %7620 = vst [vmem:[#allocation28_spill] sm:$0xff] %v6910_v15  ;;  %v6912_v38 = vpop.f32.mrb[70].mxu0 }
 0x68d   : > { %7621 = vst [vmem:[#allocation29_spill] sm:$0xff] %v6912_v38  ;;  %v6914_v27 = vpop.f32.mrb[71].mxu0 }
 0x68e   : > { %7622 = vst [vmem:[#allocation30_spill] sm:$0xff] %v6914_v27 }
 0x692   : > { %v4587_v33 = vpop.f32.mrb[72].mxu0 }
 0x693   : > { %v2771_v14 = vmul.f32 0.25, %v4587_v33  ;;  %v2520_v24 = vpop.f32.mrb[73].mxu0 }
 0x694   : > { %v2769_v17 = vmul.f32 0.25, %v2520_v24  ;;  %v4588_v44 = vpop.f32.mrb[74].mxu0 }
 0x695   : > { %v6917_v25 = vadd.f32 %v6844_v50, %v2771_v14  ;;  %v2772_v45 = vmul.f32 0.25, %v4588_v44  ;;  %v2523_v48 = vpop.f32.mrb[75].mxu0 }
 0x696   : > { %v2770_v51 = vmul.f32 0.25, %v2523_v48  ;;  %v4603_v36 = vpop.f32.mrb[32].mxu1  ;;  %v6920_v58 = vadd.f32 %v6846_v63, %v2769_v17 }
 0x697   : > { %v6923_v15 = vadd.f32 %v6851_v59, %v2772_v45  ;;  %v2625_v55 = vpop.f32.mrb[33].mxu1  ;;  %v2864_v33 = vsel %vm1616_vm2, %v6917_v25, -inf  ;;  %v2779_v0 = vmul.f32 0.25, %v4603_v36 }
 0x698   : > { %2865 = vmax.xlane.f32.xlu0 %v2864_v33  ;;  %v4604_v24 = vpop.f32.mrb[34].mxu1  ;;  %v6928_v27 = vadd.f32 %v6853_v49, %v2770_v51  ;;  %v2858_v45 = vsel %vm1616_vm2, %v6920_v58, -inf }
 0x699   : > { %v2628_v14 = vpop.f32.mrb[35].mxu1  ;;  %v2867_v44 = vsel %vm1616_vm2, %v6923_v15, -inf }
 0x69a   : > { %2868 = vmax.xlane.f32.xlu1 %v2867_v44  ;;  %v4591_v48 = vpop.f32.mrb[76].mxu0  ;;  %v2861_v4 = vsel %vm1616_vm2, %v6928_v27, -inf }
 0x69b   : > { %v2775_v17 = vmul.f32 0.25, %v4591_v48  ;;  %v2536_v38 = vpop.f32.mrb[77].mxu0 }
 0x69c   : > { %v2773_v39 = vmul.f32 0.25, %v2536_v38  ;;  %2859 = vmax.xlane.f32.xlu0 %v2858_v45  ;;  %v4592_v8 = vpop.f32.mrb[78].mxu0  ;;  %v2780_v45 = vmul.f32 0.25, %v4604_v24  ;;  %v2778_v24 = vmul.f32 0.25, %v2628_v14 }
 0x69d   : > { %v6935_v33 = vadd.f32 %v6868_v46, %v2775_v17  ;;  %v2776_v40 = vmul.f32 0.25, %v4592_v8  ;;  %v2539_v51 = vpop.f32.mrb[79].mxu0 }
 0x69e   : > { %v2774_v60 = vmul.f32 0.25, %v2539_v51  ;;  %2862 = vmax.xlane.f32.xlu1 %v2861_v4  ;;  %v4607_v44 = vpop.f32.mrb[36].mxu1  ;;  %v6940_v48 = vadd.f32 %v6872_v35, %v2773_v39  ;;  %v6953_v39 = vadd.f32 %v6844_v50, %v2779_v0 }
 0x69f   : > { %v6943_v5 = vadd.f32 %v6874_v28, %v2776_v40  ;;  %v2641_v38 = vpop.f32.mrb[37].mxu1  ;;  %v2876_v17 = vsel %vm1616_vm2, %v6935_v33, -inf  ;;  %v2777_v40 = vmul.f32 0.25, %v2625_v55  ;;  %v6968_v55 = vadd.f32 %v6853_v49, %v2778_v24 }
 0x6a0   : > { %2877 = vmax.xlane.f32.xlu0 %v2876_v17  ;;  %v4608_v8 = vpop.f32.mrb[38].mxu1  ;;  %v6948_v6 = vadd.f32 %v6881_v22, %v2774_v60  ;;  %v2870_v36 = vsel %vm1616_vm2, %v6940_v48, -inf  ;;  %v6958_v17 = vadd.f32 %v6851_v59, %v2780_v45  ;;  %v2888_v0 = vsel %vm1616_vm2, %v6953_v39, -inf }
 0x6a1   : > { %v2644_v51 = vpop.f32.mrb[39].mxu1  ;;  %v2879_v4 = vsel %vm1616_vm2, %v6943_v5, -inf  ;;  %v6963_v11 = vadd.f32 %v6846_v63, %v2777_v40  ;;  %v2885_v24 = vsel %vm1616_vm2, %v6968_v55, -inf }
 0x6a2   : > { %2880 = vmax.xlane.f32.xlu1 %v2879_v4  ;;  %v2873_v60 = vsel %vm1616_vm2, %v6948_v6, -inf  ;;  %v2783_v4 = vmul.f32 0.25, %v4607_v44  ;;  %v2891_v45 = vsel %vm1616_vm2, %v6958_v17, -inf }
 0x6a3   : > { %v2882_v40 = vsel %vm1616_vm2, %v6963_v11, -inf }
 0x6a4   : > { %2871 = vmax.xlane.f32.xlu0 %v2870_v36  ;;  %v2784_v36 = vmul.f32 0.25, %v4608_v8  ;;  %v6973_v14 = vadd.f32 %v6868_v46, %v2783_v4 }
 0x6a6   : > { %2874 = vmax.xlane.f32.xlu1 %v2873_v60  ;;  %v2781_v60 = vmul.f32 0.25, %v2641_v38  ;;  %v6978_v44 = vadd.f32 %v6874_v28, %v2784_v36  ;;  %v2900_v4 = vsel %vm1616_vm2, %v6973_v14, -inf }
 0x6a8   : > { %2889 = vmax.xlane.f32.xlu0 %v2888_v0  ;;  %v2782_v0 = vmul.f32 0.25, %v2644_v51  ;;  %v6983_v8 = vadd.f32 %v6872_v35, %v2781_v60 }
 0x6aa   : > { %2892 = vmax.xlane.f32.xlu1 %v2891_v45  ;;  %v6988_v38 = vadd.f32 %v6881_v22, %v2782_v0  ;;  %v2903_v45 = vsel %vm1616_vm2, %v6978_v44, -inf }
 0x6ac   : > { %2883 = vmax.xlane.f32.xlu0 %v2882_v40  ;;  %v2897_v0 = vsel %vm1616_vm2, %v6988_v38, -inf }
 0x6ae   : > { %2886 = vmax.xlane.f32.xlu1 %v2885_v24  ;;  %v2894_v24 = vsel %vm1616_vm2, %v6983_v8, -inf }
 0x6b0   : > { %2901 = vmax.xlane.f32.xlu0 %v2900_v4 }
 0x6b2   : > { %v4619_v36 = vpop.f32.mrb[80].mxu0  ;;  %2904 = vmax.xlane.f32.xlu1 %v2903_v45 }
 0x6b3   : > { %v2787_v51 = vmul.f32 0.25, %v4619_v36  ;;  %v2730_v40 = vpop.f32.mrb[81].mxu0 }
 0x6b4   : > { %v2785_v31 = vmul.f32 0.25, %v2730_v40  ;;  %v4620_v60 = vpop.f32.mrb[82].mxu0  ;;  %2895 = vmax.xlane.f32.xlu0 %v2894_v24 }
 0x6b5   : > { %v6995_v9 = vadd.f32 %v6844_v50, %v2787_v51  ;;  %v2788_v4 = vmul.f32 0.25, %v4620_v60  ;;  %v2733_v32 = vpop.f32.mrb[83].mxu0 }
 0x6b6   : > { %v2786_v20 = vmul.f32 0.25, %v2733_v32  ;;  %2898 = vmax.xlane.f32.xlu1 %v2897_v0  ;;  %v7000_v45 = vadd.f32 %v6846_v63, %v2785_v31 }
 0x6b7   : > { %v7003_v36 = vadd.f32 %v6851_v59, %v2788_v4  ;;  %v2912_v40 = vsel %vm1616_vm2, %v6995_v9, -inf }
 0x6b8   : > { %2913 = vmax.xlane.f32.xlu0 %v2912_v40  ;;  %v7008_v50 = vadd.f32 %v6853_v49, %v2786_v20  ;;  %v2906_v31 = vsel %vm1616_vm2, %v7000_v45, -inf }
 0x6b9   : > { %v2915_v51 = vsel %vm1616_vm2, %v7003_v36, -inf }
 0x6ba   : > { %v4623_v24 = vpop.f32.mrb[84].mxu0  ;;  %2916 = vmax.xlane.f32.xlu1 %v2915_v51  ;;  %v2909_v20 = vsel %vm1616_vm2, %v7008_v50, -inf }
 0x6bb   : > { %v2791_v32 = vmul.f32 0.25, %v4623_v24  ;;  %v2746_v60 = vpop.f32.mrb[85].mxu0 }
 0x6bc   : > { %v2789_v63 = vmul.f32 0.25, %v2746_v60  ;;  %v4624_v59 = vpop.f32.mrb[86].mxu0  ;;  %2907 = vmax.xlane.f32.xlu0 %v2906_v31 }
 0x6bd   : > { %v7015_v4 = vadd.f32 %v6868_v46, %v2791_v32  ;;  %v2792_v0 = vmul.f32 0.25, %v4624_v59  ;;  %v2749_v40 = vpop.f32.mrb[87].mxu0 }
 0x6be   : > { %v2790_v49 = vmul.f32 0.25, %v2749_v40  ;;  %2910 = vmax.xlane.f32.xlu1 %v2909_v20  ;;  %v7020_v51 = vadd.f32 %v6872_v35, %v2789_v63  ;;  %v7038_v63 = vpop.permute.xlu0 %3384 }
 0x6bf   : > { %v7023_v24 = vadd.f32 %v6874_v28, %v2792_v0  ;;  %v2924_v60 = vsel %vm1616_vm2, %v7015_v4, -inf  ;;  %v7036_v28 = vpop.permute.xlu1 %3382 }
 0x6c0   : > { %2925 = vmax.xlane.f32.xlu0 %v2924_v60  ;;  %v7028_v46 = vadd.f32 %v6881_v22, %v2790_v49  ;;  %v2918_v31 = vsel %vm1616_vm2, %v7020_v51, -inf }
 0x6c1   : > { %v2927_v32 = vsel %vm1616_vm2, %v7023_v24, -inf }
 0x6c2   : > { %2928 = vmax.xlane.f32.xlu1 %v2927_v32  ;;  %v2921_v35 = vsel %vm1616_vm2, %v7028_v46, -inf }
 0x6c3   : > { %v7042_v22 = vpop.permute.xlu1 %3386 }
 0x6c4   : > { %2919 = vmax.xlane.f32.xlu0 %v2918_v31 }
 0x6c6   : > { %2922 = vmax.xlane.f32.xlu1 %v2921_v35 }
 0x6d7   : > { %3471 = vrot.lane.b32.xlu1 %v7583_v21, %s5357_s14 }
 0x6d8   : > { %v2842_v59 = vpop.xlane.xlu0 %2841 }
 0x6d9   : > { %v2836_v0 = vpop.xlane.xlu1 %2835  ;;  %v2932_v49 = vsub.f32 %v6849_v30, %v2842_v59 }
 0x6da   : > { %3469 = vrot.lane.b32.xlu0 %v6106_v62, %s5357_s14  ;;  %v2930_v35 = vsub.f32 %v6856_v42, %v2836_v0 }
 0x6db   : > { %v2966_v31 = vmul.f32 1.442695, %v2932_v49 }
 0x6dc   : > { %v2839_v40 = vpop.xlane.xlu0 %2838  ;;  %v2962_v57 = vmul.f32 1.442695, %v2930_v35 }
 0x6dd   : > { %v2845_v20 = vpop.xlane.xlu1 %2844  ;;  %v2931_v21 = vsub.f32 %v6864_v13, %v2839_v40  ;;  %5091 = vpow2.f32 %v2966_v31 }
 0x6de   : > { %v2933_v60 = vsub.f32 %v6861_v29, %v2845_v20 }
 0x6df   : > { %v2964_v16 = vmul.f32 1.442695, %v2931_v21 }
 0x6e0   : > { %v2854_v32 = vpop.xlane.xlu0 %2853  ;;  %v2968_v56 = vmul.f32 1.442695, %v2933_v60 }
 0x6e1   : > { %v2936_v7 = vsub.f32 %v6879_v53, %v2854_v32 }
 0x6e2   : > { %v2857_v3 = vpop.xlane.xlu1 %2856  ;;  %5093 = vpow2.f32 %v2968_v56 }
 0x6e3   : > { %v2937_v26 = vsub.f32 %v6887_v1, %v2857_v3  ;;  %5095 = vpow2.f32 %v2962_v57  ;;  %v2974_v29 = vmul.f32 1.442695, %v2936_v7 }
 0x6e4   : > { %v2848_v62 = vpop.xlane.xlu0 %2847  ;;  %5097 = vpow2.f32 %v2964_v16 }
 0x6e5   : > { %v2934_v59 = vsub.f32 %v6884_v37, %v2848_v62  ;;  %v2976_v42 = vmul.f32 1.442695, %v2937_v26  ;;  %5099 = vpow2.f32 %v2974_v29 }
 0x6e6   : > { %v2851_v30 = vpop.xlane.xlu1 %2850 }
 0x6e7   : > { %v2935_v0 = vsub.f32 %v6892_v54, %v2851_v30  ;;  %v2970_v13 = vmul.f32 1.442695, %v2934_v59  ;;  %v7054_v40 = vpop.eup %5091  ;;  %5101 = vpow2.f32 %v2976_v42 }
 0x6e8   : > { %v3032_v56 = vsel %vm1616_vm2, %v7054_v40, 0.0 }
 0x6e9   : > { %v2972_v53 = vmul.f32 1.442695, %v2935_v0  ;;  %5103 = vpow2.f32 %v2970_v13 }
 0x6eb   : > { %5105 = vpow2.f32 %v2972_v53 }
 0x6ec   : > { %v7056_v20 = vpop.eup %5093 }
 0x6ed   : > { %v7060_v57 = vpop.eup %5095  ;;  %v3035_v26 = vsel %vm1616_vm2, %v7056_v20, 0.0 }
 0x6ee   : > { %v7064_v7 = vpop.eup %5097  ;;  %v3026_v16 = vsel %vm1616_vm2, %v7060_v57, 0.0 }
 0x6ef   : > { %v7068_v3 = vpop.eup %5099  ;;  %v3029_v37 = vsel %vm1616_vm2, %v7064_v7, 0.0 }
 0x6f0   : > { %v3044_v54 = vsel %vm1616_vm2, %v7068_v3, 0.0 }
 0x6f1   : > { %v7072_v1 = vpop.eup %5101 }
 0x6f2   : > { %v3047_v60 = vsel %vm1616_vm2, %v7072_v1, 0.0 }
 0x6f3   : > { %v7076_v49 = vpop.eup %5103 }
 0x6f4   : > { %v3038_v31 = vsel %vm1616_vm2, %v7076_v49, 0.0 }
 0x6f5   : > { %v7080_v32 = vpop.eup %5105 }
 0x6f6   : > { %v3041_v35 = vsel %vm1616_vm2, %v7080_v32, 0.0 }
 0x6f9   : > { %3033 = vadd.xlane.f32.xlu0 %v3032_v56 }
 0x6fb   : > { %3036 = vadd.xlane.f32.xlu1 %v3035_v26 }
 0x6fd   : > { %3027 = vadd.xlane.f32.xlu0 %v3026_v16 }
 0x6ff   : > { %3030 = vadd.xlane.f32.xlu1 %v3029_v37 }
 0x701   : > { %3045 = vadd.xlane.f32.xlu0 %v3044_v54 }
 0x703   : > { %3048 = vadd.xlane.f32.xlu1 %v3047_v60 }
 0x705   : > { %3039 = vadd.xlane.f32.xlu0 %v3038_v31 }
 0x707   : > { %3042 = vadd.xlane.f32.xlu1 %v3041_v35 }
 0x725   : > { %v2866_v21 = vpop.xlane.xlu0 %2865 }
 0x726   : > { %v2940_v62 = vsub.f32 %v6917_v25, %v2866_v21 }
 0x727   : > { %v2869_v30 = vpop.xlane.xlu1 %2868 }
 0x728   : > { %v2982_v29 = vmul.f32 1.442695, %v2940_v62  ;;  %v2941_v59 = vsub.f32 %v6923_v15, %v2869_v30 }
 0x729   : > { %v2860_v42 = vpop.xlane.xlu0 %2859 }
 0x72a   : > { %5107 = vpow2.f32 %v2982_v29  ;;  %v2938_v0 = vsub.f32 %v6920_v58, %v2860_v42  ;;  %v2984_v53 = vmul.f32 1.442695, %v2941_v59 }
 0x72b   : > { %v2863_v13 = vpop.xlane.xlu1 %2862 }
 0x72c   : > { %v2978_v56 = vmul.f32 1.442695, %v2938_v0  ;;  %v2939_v26 = vsub.f32 %v6928_v27, %v2863_v13 }
 0x72d   : > { %v2878_v16 = vpop.xlane.xlu0 %2877 }
 0x72e   : > { %5109 = vpow2.f32 %v2978_v56  ;;  %v2944_v37 = vsub.f32 %v6935_v33, %v2878_v16  ;;  %v2980_v25 = vmul.f32 1.442695, %v2939_v26 }
 0x72f   : > { %v2881_v54 = vpop.xlane.xlu1 %2880  ;;  %5111 = vpow2.f32 %v2984_v53 }
 0x730   : > { %v2990_v60 = vmul.f32 1.442695, %v2944_v37  ;;  %v2945_v31 = vsub.f32 %v6943_v5, %v2881_v54 }
 0x731   : > { %v2872_v15 = vpop.xlane.xlu0 %2871 }
 0x732   : > { %5113 = vpow2.f32 %v2990_v60  ;;  %v2942_v35 = vsub.f32 %v6940_v48, %v2872_v15  ;;  %v2992_v58 = vmul.f32 1.442695, %v2945_v31 }
 0x733   : > { %v2875_v21 = vpop.xlane.xlu1 %2874  ;;  %5115 = vpow2.f32 %v2980_v25 }
 0x734   : > { %v7093_v62 = vpop.eup %5107  ;;  %v2986_v27 = vmul.f32 1.442695, %v2942_v35  ;;  %v2943_v30 = vsub.f32 %v6948_v6, %v2875_v21 }
 0x735   : > { %v2890_v29 = vpop.xlane.xlu0 %2889  ;;  %v3056_v33 = vsel %vm1616_vm2, %v7093_v62, 0.0 }
 0x736   : > { %5117 = vpow2.f32 %v2986_v27  ;;  %v2988_v59 = vmul.f32 1.442695, %v2943_v30  ;;  %v2948_v5 = vsub.f32 %v6953_v39, %v2890_v29  ;;  %3057 = vadd.xlane.f32.xlu1 %v3056_v33 }
 0x737   : > { %5119 = vpow2.f32 %v2992_v58  ;;  %v2893_v42 = vpop.xlane.xlu1 %2892 }
 0x738   : > { %v7099_v48 = vpop.eup %5109  ;;  %5121 = vpow2.f32 %v2988_v59  ;;  %v2998_v0 = vmul.f32 1.442695, %v2948_v5  ;;  %v2949_v39 = vsub.f32 %v6958_v17, %v2893_v42 }
 0x739   : > { %v2884_v13 = vpop.xlane.xlu0 %2883  ;;  %v3050_v53 = vsel %vm1616_vm2, %v7099_v48, 0.0  ;;  %v7103_v6 = vpop.eup %5111 }
 0x73a   : > { %v2946_v56 = vsub.f32 %v6963_v11, %v2884_v13  ;;  %3051 = vadd.xlane.f32.xlu1 %v3050_v53  ;;  %5123 = vpow2.f32 %v2998_v0  ;;  %v3059_v60 = vsel %vm1616_vm2, %v7103_v6, 0.0  ;;  %v3000_v21 = vmul.f32 1.442695, %v2949_v39 }
 0x73b   : > { %v2887_v26 = vpop.xlane.xlu1 %2886 }
 0x73c   : > { %v7106_v16 = vpop.eup %5113  ;;  %v2994_v37 = vmul.f32 1.442695, %v2946_v56  ;;  %v2947_v54 = vsub.f32 %v6968_v55, %v2887_v26 }
 0x73d   : > { %v2902_v25 = vpop.xlane.xlu0 %2901  ;;  %v3068_v31 = vsel %vm1616_vm2, %v7106_v16, 0.0  ;;  %v7114_v15 = vpop.eup %5115 }
 0x73e   : > { %v2996_v11 = vmul.f32 1.442695, %v2947_v54  ;;  %v2952_v35 = vsub.f32 %v6973_v14, %v2902_v25  ;;  %3060 = vadd.xlane.f32.xlu1 %v3059_v60  ;;  %3069 = vadd.xlane.f32.xlu0 %v3068_v31  ;;  %5125 = vpow2.f32 %v2994_v37  ;;  %v3053_v33 = vsel %vm1616_vm2, %v7114_v15, 0.0 }
 0x73f   : > { %v2905_v58 = vpop.xlane.xlu1 %2904 }
 0x740   : > { %v7117_v17 = vpop.eup %5117  ;;  %5127 = vpow2.f32 %v2996_v11  ;;  %v3006_v55 = vmul.f32 1.442695, %v2952_v35  ;;  %v2953_v27 = vsub.f32 %v6978_v44, %v2905_v58 }
 0x741   : > { %v7120_v30 = vpop.eup %5119  ;;  %v2896_v29 = vpop.xlane.xlu0 %2895  ;;  %v3062_v14 = vsel %vm1616_vm2, %v7117_v17, 0.0 }
 0x742   : > { %v7126_v59 = vpop.eup %5121  ;;  %5129 = vpow2.f32 %v3006_v55  ;;  %v2950_v5 = vsub.f32 %v6983_v8, %v2896_v29  ;;  %3054 = vadd.xlane.f32.xlu1 %v3053_v33  ;;  %3063 = vadd.xlane.f32.xlu0 %v3062_v14  ;;  %v3008_v0 = vmul.f32 1.442695, %v2953_v27  ;;  %v3071_v26 = vsel %vm1616_vm2, %v7120_v30, 0.0 }
 0x743   : > { %v2899_v42 = vpop.xlane.xlu1 %2898  ;;  %5131 = vpow2.f32 %v3000_v21  ;;  %v3065_v56 = vsel %vm1616_vm2, %v7126_v59, 0.0 }
 0x744   : > { %v3002_v44 = vmul.f32 1.442695, %v2950_v5  ;;  %v2951_v13 = vsub.f32 %v6988_v38, %v2899_v42  ;;  %v7134_v39 = vpop.eup %5123 }
 0x745   : > { %v2914_v53 = vpop.xlane.xlu0 %2913  ;;  %v3080_v11 = vsel %vm1616_vm2, %v7134_v39, 0.0 }
 0x746   : > { %5133 = vpow2.f32 %v3002_v44  ;;  %v2956_v8 = vsub.f32 %v6995_v9, %v2914_v53  ;;  %3066 = vadd.xlane.f32.xlu1 %v3065_v56  ;;  %3072 = vadd.xlane.f32.xlu0 %v3071_v26  ;;  %v3004_v54 = vmul.f32 1.442695, %v2951_v13 }
 0x747   : > { %v2917_v37 = vpop.xlane.xlu1 %2916  ;;  %5135 = vpow2.f32 %v3008_v0 }
 0x748   : > { %v3014_v25 = vmul.f32 1.442695, %v2956_v8  ;;  %v2957_v38 = vsub.f32 %v7003_v36, %v2917_v37  ;;  %v7138_v60 = vpop.eup %5125 }
 0x749   : > { %v2908_v31 = vpop.xlane.xlu0 %2907  ;;  %v3074_v14 = vsel %vm1616_vm2, %v7138_v60, 0.0 }
 0x74a   : > { %v7142_v35 = vpop.eup %5127  ;;  %5137 = vpow2.f32 %v3014_v25  ;;  %v2954_v58 = vsub.f32 %v7000_v45, %v2908_v31  ;;  %3081 = vadd.xlane.f32.xlu0 %v3080_v11  ;;  %v3016_v36 = vmul.f32 1.442695, %v2957_v38 }
 0x74b   : > { %v2911_v9 = vpop.xlane.xlu1 %2910  ;;  %v3077_v21 = vsel %vm1616_vm2, %v7142_v35, 0.0  ;;  %5139 = vpow2.f32 %v3004_v54 }
 0x74c   : > { %v7147_v55 = vpop.eup %5129  ;;  %v3010_v27 = vmul.f32 1.442695, %v2954_v58  ;;  %v2955_v29 = vsub.f32 %v7008_v50, %v2911_v9  ;;  %3078 = vadd.xlane.f32.xlu1 %v3077_v21 }
 0x74d   : > { %v2926_v33 = vpop.xlane.xlu0 %2925  ;;  %v7152_v5 = vpop.eup %5131  ;;  %v3092_v0 = vsel %vm1616_vm2, %v7147_v55, 0.0 }
 0x74e   : > { %5141 = vpow2.f32 %v3010_v27  ;;  %v2960_v45 = vsub.f32 %v7015_v4, %v2926_v33  ;;  %3075 = vadd.xlane.f32.xlu0 %v3074_v14  ;;  %v3012_v13 = vmul.f32 1.442695, %v2955_v29  ;;  %v3083_v26 = vsel %vm1616_vm2, %v7152_v5, 0.0 }
 0x74f   : > { %v2929_v42 = vpop.xlane.xlu1 %2928  ;;  %5143 = vpow2.f32 %v3016_v36 }
 0x750   : > { %v7157_v44 = vpop.eup %5133  ;;  %v3022_v50 = vmul.f32 1.442695, %v2960_v45  ;;  %v2961_v53 = vsub.f32 %v7023_v24, %v2929_v42  ;;  %3093 = vadd.xlane.f32.xlu1 %v3092_v0 }
 0x751   : > { %v2920_v56 = vpop.xlane.xlu0 %2919  ;;  %v7162_v8 = vpop.eup %5135  ;;  %v3086_v54 = vsel %vm1616_vm2, %v7157_v44, 0.0 }
 0x752   : > { %5145 = vpow2.f32 %v3022_v50  ;;  %v2958_v4 = vsub.f32 %v7020_v51, %v2920_v56  ;;  %3084 = vadd.xlane.f32.xlu0 %v3083_v26  ;;  %v3024_v38 = vmul.f32 1.442695, %v2961_v53  ;;  %v3095_v58 = vsel %vm1616_vm2, %v7162_v8, 0.0 }
 0x753   : > { %v2923_v37 = vpop.xlane.xlu1 %2922  ;;  %5147 = vpow2.f32 %v3012_v13 }
 0x754   : > { %v7167_v25 = vpop.eup %5137  ;;  %v3018_v24 = vmul.f32 1.442695, %v2958_v4  ;;  %v2959_v31 = vsub.f32 %v7028_v46, %v2923_v37  ;;  %3087 = vadd.xlane.f32.xlu1 %v3086_v54 }
 0x755   : > { %v7170_v11 = vpop.permute.xlu0 %3469  ;;  %v7174_v9 = vpop.eup %5139  ;;  %v3104_v51 = vsel %vm1616_vm2, %v7167_v25, 0.0 }
 0x756   : > { %5149 = vpow2.f32 %v3018_v24  ;;  %3096 = vadd.xlane.f32.xlu0 %v3095_v58  ;;  %4673 = vmatprep.subr.bf16.mxu0 %v7170_v11  ;;  %v3020_v36 = vmul.f32 1.442695, %v2959_v31  ;;  %v3089_v46 = vsel %vm1616_vm2, %v7174_v9, 0.0 }
 0x757   : > { %5151 = vpow2.f32 %v3024_v38  ;;  %v7213_v37 = vpop.permute.xlu1 %3471 }
 0x758   : > { %v7179_v21 = vpop.eup %5141  ;;  %3105 = vadd.xlane.f32.xlu1 %v3104_v51  ;;  %5153 = vpow2.f32 %v3020_v36 }
 0x759   : > { %v7183_v27 = vpop.eup %5143  ;;  %v3098_v29 = vsel %vm1616_vm2, %v7179_v21, 0.0 }
 0x75a   : > { %3090 = vadd.xlane.f32.xlu0 %v3089_v46  ;;  %v3107_v14 = vsel %vm1616_vm2, %v7183_v27, 0.0 }
 0x75c   : > { %v7187_v33 = vpop.eup %5145  ;;  %3099 = vadd.xlane.f32.xlu1 %v3098_v29 }
 0x75d   : > { %v7191_v45 = vpop.eup %5147  ;;  %v3116_v42 = vsel %vm1616_vm2, %v7187_v33, 0.0 }
 0x75e   : > { %3108 = vadd.xlane.f32.xlu0 %v3107_v14  ;;  %v3101_v13 = vsel %vm1616_vm2, %v7191_v45, 0.0 }
 0x760   : > { %v7195_v0 = vpop.eup %5149  ;;  %3117 = vadd.xlane.f32.xlu1 %v3116_v42 }
 0x761   : > { %v7199_v50 = vpop.eup %5151  ;;  %v3110_v53 = vsel %vm1616_vm2, %v7195_v0, 0.0 }
 0x762   : > { %3102 = vadd.xlane.f32.xlu0 %v3101_v13  ;;  %v3119_v56 = vsel %vm1616_vm2, %v7199_v50, 0.0  ;;  %v7205_v26 = vpop.eup %5153 }
 0x763   : > { %v3113_v4 = vsel %vm1616_vm2, %v7205_v26, 0.0 }
 0x764   : > { %3111 = vadd.xlane.f32.xlu1 %v3110_v53 }
 0x766   : > { %3120 = vadd.xlane.f32.xlu0 %v3119_v56 }
 0x76a   : > { %3114 = vadd.xlane.f32.xlu0 %v3113_v4 }
 0x775   : > { %3473 = vrot.lane.b32.xlu1 %v6118_v18, %s5357_s14 }
 0x780   : > { %3475 = vrot.lane.b32.xlu0 %v7587_v34, %s5357_s14 }
 0x786   : > { %v3034_v54 = vpop.xlane.xlu0 %3033 }
 0x788   : > { %v3037_v38 = vpop.xlane.xlu1 %3036 }
 0x789   : > { %5155 = vrcp.f32 %v3037_v38 }
 0x78a   : > { %v3028_v24 = vpop.xlane.xlu0 %3027 }
 0x78b   : > { %5157 = vrcp.f32 %v3028_v24 }
 0x78c   : > { %5159 = vrcp.f32 %v3034_v54  ;;  %v3031_v31 = vpop.xlane.xlu1 %3030 }
 0x78d   : > { %5161 = vrcp.f32 %v3031_v31 }
 0x78e   : > { %v3046_v58 = vpop.xlane.xlu0 %3045 }
 0x790   : > { %v3049_v51 = vpop.xlane.xlu1 %3048 }
 0x791   : > { %5163 = vrcp.f32 %v3049_v51 }
 0x792   : > { %v3040_v36 = vpop.xlane.xlu0 %3039 }
 0x793   : > { %5165 = vrcp.f32 %v3040_v36  ;;  %v5156_v46 = vpop.eup %5155 }
 0x794   : > { %5167 = vrcp.f32 %v3046_v58  ;;  %v3043_v18 = vpop.xlane.xlu1 %3042  ;;  %v3157_v42 = vmul.f32 %v5156_v46, %v7056_v20 }
 0x795   : > { %v5158_v29 = vpop.eup %5157  ;;  %5169 = vrcp.f32 %v3043_v18 }
 0x796   : > { %v5160_v34 = vpop.eup %5159  ;;  %v3154_v13 = vmul.f32 %v5158_v29, %v7060_v57 }
 0x797   : > { %v5162_v14 = vpop.eup %5161  ;;  %v3156_v56 = vmul.f32 %v5160_v34, %v7054_v40 }
 0x798   : > { %v3155_v53 = vmul.f32 %v5162_v14, %v7064_v7 }
 0x799   : > { %v3187_v54 = vpack.c.bf16 %v3157_v42, %v3156_v56 }
 0x79a   : > { %v3186_v4 = vpack.c.bf16 %v3155_v53, %v3154_v13 }
 0x79b   : > { %v5164_v38 = vpop.eup %5163 }
 0x79c   : > { %4633 = vmatprep.mubr.msk.bf16.mxu1 %vm1616_vm2, %v3186_v4  ;;  %v3161_v20 = vmul.f32 %v5164_v38, %v7072_v1 }
 0x79d   : > { %v5166_v24 = vpop.eup %5165  ;;  %4634 = vmatmul.mubr.msk.bf16.vlgmr.msra.gmra.mrb[40].mxu1 %vm1616_vm2, %v3187_v54 }
 0x79e   : > { %v5168_v31 = vpop.eup %5167  ;;  %4658 = vmatpush3.bf16.msra.mxu1 %v6792_v41  ;;  %v3158_v57 = vmul.f32 %v5166_v24, %v7076_v49 }
 0x79f   : > { %v5170_v58 = vpop.eup %5169  ;;  %4659 = vmatprep.subr.bf16.mxu1 %v7036_v28  ;;  %v3160_v7 = vmul.f32 %v5168_v31, %v7068_v3 }
 0x7a0   : > { %v3159_v40 = vmul.f32 %v5170_v58, %v7080_v32 }
 0x7a1   : > { %v3189_v36 = vpack.c.bf16 %v3161_v20, %v3160_v7 }
 0x7a2   : > { %4660 = vmatpush3.bf16.msra.mxu1 %v7036_v28  ;;  %v3188_v51 = vpack.c.bf16 %v3159_v40, %v3158_v57 }
 0x7a3   : > { %4661 = vmatprep.subr.bf16.mxu1 %v7038_v63 }
 0x7a4   : > { %4637 = vmatprep.mubr.msk.bf16.mxu1 %vm1616_vm2, %v3188_v51 }
 0x7a5   : > { %4638 = vmatmul.mubr.msk.bf16.gmra.mrb[44].mxu1 %vm1616_vm2, %v3189_v36 }
 0x7a6   : > { %4662 = vmatpush3.bf16.msra.mxu1 %v7038_v63 }
 0x7a7   : > { %4663 = vmatprep.subr.bf16.mxu1 %v7042_v22 }
 0x7aa   : > { %4664 = vmatpush3.bf16.msra.mxu1 %v7042_v22 }
 0x7c3   : > { %v3058_v41 = vpop.xlane.xlu1 %3057 }
 0x7c7   : > { %v3052_v1 = vpop.xlane.xlu1 %3051 }
 0x7cb   : > { %v3061_v49 = vpop.xlane.xlu1 %3060  ;;  %v3070_v3 = vpop.xlane.xlu0 %3069 }
 0x7cc   : > { %5171 = vrcp.f32 %v3061_v49 }
 0x7cd   : > { %5173 = vrcp.f32 %v3052_v1 }
 0x7ce   : > { %5175 = vrcp.f32 %v3058_v41 }
 0x7cf   : > { %v3055_v28 = vpop.xlane.xlu1 %3054  ;;  %v3064_v32 = vpop.xlane.xlu0 %3063 }
 0x7d0   : > { %5177 = vrcp.f32 %v3055_v28 }
 0x7d1   : > { %5179 = vrcp.f32 %v3064_v32 }
 0x7d3   : > { %v3067_v46 = vpop.xlane.xlu1 %3066  ;;  %v3073_v18 = vpop.xlane.xlu0 %3072 }
 0x7d4   : > { %5181 = vrcp.f32 %v3067_v46 }
 0x7d5   : > { %5183 = vrcp.f32 %v3073_v18 }
 0x7d6   : > { %v5172_v63 = vpop.eup %5171  ;;  %5185 = vrcp.f32 %v3070_v3 }
 0x7d7   : > { %v3082_v29 = vpop.xlane.xlu0 %3081  ;;  %v5174_v34 = vpop.eup %5173  ;;  %v3165_v13 = vmul.f32 %v5172_v63, %v7103_v6 }
 0x7d8   : > { %v5176_v22 = vpop.eup %5175  ;;  %v3162_v56 = vmul.f32 %v5174_v34, %v7099_v48 }
 0x7d9   : > { %v3079_v14 = vpop.xlane.xlu1 %3078  ;;  %v3164_v38 = vmul.f32 %v5176_v22, %v7093_v62 }
 0x7da   : > { %v5178_v42 = vpop.eup %5177  ;;  %5187 = vrcp.f32 %v3079_v14 }
 0x7db   : > { %v3076_v53 = vpop.xlane.xlu0 %3075  ;;  %v3163_v4 = vmul.f32 %v5178_v42, %v7114_v15  ;;  %v5180_v54 = vpop.eup %5179  ;;  %v3191_v20 = vpack.c.bf16 %v3165_v13, %v3164_v38 }
 0x7dc   : > { %5189 = vrcp.f32 %v3076_v53  ;;  %v3166_v6 = vmul.f32 %v5180_v54, %v7117_v17 }
 0x7dd   : > { %v3094_v24 = vpop.xlane.xlu1 %3093  ;;  %v3190_v31 = vpack.c.bf16 %v3163_v4, %v3162_v56  ;;  %5191 = vrcp.f32 %v3082_v29 }
 0x7de   : > { %v5182_v58 = vpop.eup %5181 }
 0x7df   : > { %v5184_v57 = vpop.eup %5183  ;;  %4649 = vmatprep.mubr.msk.bf16.mxu0 %vm1616_vm2, %v3190_v31  ;;  %v3085_v40 = vpop.xlane.xlu0 %3084  ;;  %v3167_v7 = vmul.f32 %v5182_v58, %v7126_v59 }
 0x7e0   : > { %5193 = vrcp.f32 %v3085_v40  ;;  %4650 = vmatmul.mubr.msk.bf16.vlgmr.msra.gmra.mrb[88].mxu0 %vm1616_vm2, %v3191_v20  ;;  %v5186_v48 = vpop.eup %5185  ;;  %v3169_v51 = vmul.f32 %v5184_v57, %v7120_v30 }
 0x7e1   : > { %4674 = vmatpush3.bf16.msra.mxu0 %v7170_v11  ;;  %v3088_v62 = vpop.xlane.xlu1 %3087  ;;  %v3192_v15 = vpack.c.bf16 %v3167_v7, %v3166_v6  ;;  %v3168_v17 = vmul.f32 %v5186_v48, %v7106_v16 }
 0x7e2   : > { %4675 = vmatprep.subr.bf16.mxu0 %v7213_v37 }
 0x7e3   : > { %4653 = vmatprep.mubr.msk.bf16.mxu0 %vm1616_vm2, %v3192_v15  ;;  %v3097_v36 = vpop.xlane.xlu0 %3096  ;;  %v3193_v49 = vpack.c.bf16 %v3169_v51, %v3168_v17 }
 0x7e4   : > { %v5188_v41 = vpop.eup %5187  ;;  %5195 = vrcp.f32 %v3097_v36 }
 0x7e5   : > { %4676 = vmatpush3.bf16.msra.mxu0 %v7213_v37  ;;  %v3106_v59 = vpop.xlane.xlu1 %3105  ;;  %5197 = vrcp.f32 %v3088_v62  ;;  %v3171_v28 = vmul.f32 %v5188_v41, %v7142_v35 }
 0x7e6   : > { %v5190_v1 = vpop.eup %5189  ;;  %5199 = vrcp.f32 %v3094_v24 }
 0x7e7   : > { %v3091_v11 = vpop.xlane.xlu0 %3090  ;;  %v3170_v3 = vmul.f32 %v5190_v1, %v7138_v60  ;;  %v5192_v30 = vpop.eup %5191 }
 0x7e8   : > { %5201 = vrcp.f32 %v3091_v11  ;;  %4654 = vmatmul.mubr.msk.bf16.gmra.mrb[92].mxu0 %vm1616_vm2, %v3193_v49  ;;  %v3172_v18 = vmul.f32 %v5192_v30, %v7134_v39 }
 0x7e9   : > { %v3100_v32 = vpop.xlane.xlu1 %3099  ;;  %v3194_v46 = vpack.c.bf16 %v3171_v28, %v3170_v3 }
 0x7ea   : > { %v5194_v16 = vpop.eup %5193 }
 0x7eb   : > { %v3173_v37 = vmul.f32 %v5194_v16, %v7152_v5  ;;  %4665 = vmatprep.mubr.msk.bf16.mxu1 %vm1616_vm2, %v3194_v46  ;;  %v3109_v63 = vpop.xlane.xlu0 %3108 }
 0x7ec   : > { %5203 = vrcp.f32 %v3109_v63 }
 0x7ed   : > { %v3195_v29 = vpack.c.bf16 %v3173_v37, %v3172_v18  ;;  %v3118_v34 = vpop.xlane.xlu1 %3117  ;;  %5205 = vrcp.f32 %v3100_v32 }
 0x7ee   : > { %v5196_v60 = vpop.eup %5195  ;;  %5207 = vrcp.f32 %v3106_v59  ;;  %v4897_v59 = vld [vmem:[%s7534_s6] sm:$0xff]  }
 0x7ef   : > { %4666 = vmatmul.mubr.msk.bf16.vlgmr.msra.gmra.mrb[48].mxu1 %vm1616_vm2, %v3195_v29  ;;  %v3103_v35 = vpop.xlane.xlu0 %3102  ;;  %v5198_v22 = vpop.eup %5197  ;;  %v3177_v39 = vmul.f32 %v5196_v60, %v7162_v8  ;;  %4689 = vmatprep.subr.bf16.mxu1 %v4897_v59 }
 0x7f0   : > { %5209 = vrcp.f32 %v3103_v35  ;;  %v5200_v14 = vpop.eup %5199  ;;  %v3174_v53 = vmul.f32 %v5198_v22, %v7157_v44  ;;  %4690 = vmatpush3.bf16.msra.mxu1 %v4897_v59 }
 0x7f1   : > { %v3112_v42 = vpop.xlane.xlu1 %3111  ;;  %v3176_v4 = vmul.f32 %v5200_v14, %v7147_v55 }
 0x7f2   : > { %v5202_v13 = vpop.eup %5201 }
 0x7f3   : > { %v3121_v5 = vpop.xlane.xlu0 %3120  ;;  %v3175_v56 = vmul.f32 %v5202_v13, %v7174_v9  ;;  %v3197_v24 = vpack.c.bf16 %v3177_v39, %v3176_v4 }
 0x7f4   : > { %5211 = vrcp.f32 %v3121_v5 }
 0x7f5   : > { %v3474_v54 = vpop.permute.xlu1 %3473  ;;  %v3196_v38 = vpack.c.bf16 %v3175_v56, %v3174_v53  ;;  %5213 = vrcp.f32 %v3112_v42 }
 0x7f6   : > { %4677 = vmatprep.subr.bf16.mxu0 %v3474_v54  ;;  %v5204_v31 = vpop.eup %5203  ;;  %5215 = vrcp.f32 %v3118_v34 }
 0x7f7   : > { %4669 = vmatprep.mubr.msk.bf16.mxu1 %vm1616_vm2, %v3196_v38  ;;  %4678 = vmatpush3.bf16.msra.mxu0 %v3474_v54  ;;  %v3115_v58 = vpop.xlane.xlu0 %3114  ;;  %v5206_v8 = vpop.eup %5205  ;;  %v3181_v55 = vmul.f32 %v5204_v31, %v7183_v27 }
 0x7f8   : > { %5217 = vrcp.f32 %v3115_v58  ;;  %4670 = vmatmul.mubr.msk.bf16.gmra.mrb[52].mxu1 %vm1616_vm2, %v3197_v24  ;;  %v5208_v44 = vpop.eup %5207  ;;  %v3178_v57 = vmul.f32 %v5206_v8, %v7179_v21 }
 0x7f9   : > { %v3180_v6 = vmul.f32 %v5208_v44, %v7167_v25 }
 0x7fa   : > { %v5210_v9 = vpop.eup %5209 }
 0x7fb   : > { %v3476_v20 = vpop.permute.xlu0 %3475  ;;  %v3179_v40 = vmul.f32 %v5210_v9, %v7191_v45  ;;  %v3199_v48 = vpack.c.bf16 %v3181_v55, %v3180_v6 }
 0x7fc   : > { %4679 = vmatprep.subr.bf16.mxu0 %v3476_v20 }
 0x7fd   : > { %4680 = vmatpush3.bf16.msra.mxu0 %v3476_v20  ;;  %v3198_v7 = vpack.c.bf16 %v3179_v40, %v3178_v57 }
 0x7fe   : > { %v5212_v62 = vpop.eup %5211 }
 0x7ff   : > { %4681 = vmatprep.mubr.msk.bf16.mxu0 %vm1616_vm2, %v3198_v7  ;;  %v5214_v15 = vpop.eup %5213  ;;  %v3185_v27 = vmul.f32 %v5212_v62, %v7199_v50 }
 0x800   : > { %4682 = vmatmul.mubr.msk.bf16.vlgmr.msra.gmra.mrb[96].mxu0 %vm1616_vm2, %v3199_v48  ;;  %v5216_v51 = vpop.eup %5215  ;;  %v3182_v21 = vmul.f32 %v5214_v15, %v7195_v0  ;;  %v4898_v0 = vld [vmem:[%s7534_s6 + $0x8] sm:$0xff]  }
 0x801   : > { %v3184_v25 = vmul.f32 %v5216_v51, %v7187_v33  ;;  %4691 = vmatprep.subr.bf16.mxu1 %v4898_v0 }
 0x802   : > { %v5218_v36 = vpop.eup %5217  ;;  %4692 = vmatpush3.bf16.msra.mxu1 %v4898_v0 }
 0x803   : > { %v3183_v45 = vmul.f32 %v5218_v36, %v7205_v26  ;;  %v3201_v17 = vpack.c.bf16 %v3185_v27, %v3184_v25 }
 0x805   : > { %v3200_v41 = vpack.c.bf16 %v3183_v45, %v3182_v21 }
 0x807   : > { %4685 = vmatprep.mubr.msk.bf16.mxu0 %vm1616_vm2, %v3200_v41 }
 0x808   : > { %4686 = vmatmul.mubr.msk.bf16.gmra.mrb[100].mxu0 %vm1616_vm2, %v3201_v17 }
 0x870   : > { %v4635_v50 = vpop.f32.mrb[40].mxu1 }
 0x871   : > { %v3260_v33 = vpop.f32.mrb[41].mxu1 }
 0x872   : > { %v4636_v26 = vpop.f32.mrb[42].mxu1 }
 0x873   : > { %v4820_v1 = vpack.i.bf16 %v4636_v26, %v4635_v50  ;;  %v3263_v49 = vpop.f32.mrb[43].mxu1 }
 0x874   : > { %v4815_v11 = vpack.i.bf16 %v3263_v49, %v3260_v33 }
 0x875   : > { %4821 = vrot.lane.b32.xlu0 %v4820_v1, %s5358_s13 }
 0x876   : > { %4816 = vrot.lane.b32.xlu1 %v4815_v11, %s5358_s13 }
 0x878   : > { %v4639_v3 = vpop.f32.mrb[44].mxu1 }
 0x879   : > { %v3276_v28 = vpop.f32.mrb[45].mxu1 }
 0x87a   : > { %v4640_v30 = vpop.f32.mrb[46].mxu1 }
 0x87b   : > { %v4830_v32 = vpack.i.bf16 %v4640_v30, %v4639_v3  ;;  %v3279_v46 = vpop.f32.mrb[47].mxu1 }
 0x87c   : > { %v4825_v16 = vpack.i.bf16 %v3279_v46, %v3276_v28 }
 0x87d   : > { %4831 = vrot.lane.b32.xlu0 %v4830_v32, %s5358_s13 }
 0x87e   : > { %4826 = vrot.lane.b32.xlu1 %v4825_v16, %s5358_s13 }
 0x8b3   : > { %v4651_v18 = vpop.f32.mrb[88].mxu0 }
 0x8b4   : > { %v3349_v37 = vpop.f32.mrb[89].mxu0 }
 0x8b5   : > { %v4652_v63 = vpop.f32.mrb[90].mxu0 }
 0x8b6   : > { %v4840_v29 = vpack.i.bf16 %v4652_v63, %v4651_v18  ;;  %v3352_v34 = vpop.f32.mrb[91].mxu0 }
 0x8b7   : > { %v4835_v60 = vpack.i.bf16 %v3352_v34, %v3349_v37 }
 0x8b8   : > { %4841 = vrot.lane.b32.xlu0 %v4840_v29, %s5358_s13 }
 0x8b9   : > { %4836 = vrot.lane.b32.xlu1 %v4835_v60, %s5358_s13 }
 0x8bb   : > { %v4655_v35 = vpop.f32.mrb[92].mxu0 }
 0x8bc   : > { %v3365_v22 = vpop.f32.mrb[93].mxu0 }
 0x8bd   : > { %v4656_v14 = vpop.f32.mrb[94].mxu0 }
 0x8be   : > { %v4850_v42 = vpack.i.bf16 %v4656_v14, %v4655_v35  ;;  %v3368_v13 = vpop.f32.mrb[95].mxu0  ;;  %v7623_v35 = vld [vmem:[#allocation10_spill] sm:$0xff]  ;;  %v7624_v14 = vld [vmem:[#allocation23_spill] sm:$0xff] }
 0x8bf   : > { %v4845_v39 = vpack.i.bf16 %v3368_v13, %v3365_v22 }
 0x8c0   : > { %4851 = vrot.lane.b32.xlu0 %v4850_v42, %s5358_s13  ;;  %v7625_v42 = vld [vmem:[#allocation13_spill] sm:$0xff] }
 0x8c1   : > { %4846 = vrot.lane.b32.xlu1 %v4845_v39, %s5358_s13 }
 0x8c2   : > { %v4667_v5 = vpop.f32.mrb[48].mxu1 }
 0x8c3   : > { %v3438_v53 = vpop.f32.mrb[49].mxu1 }
 0x8c4   : > { %v4668_v56 = vpop.f32.mrb[50].mxu1 }
 0x8c5   : > { %v4860_v4 = vpack.i.bf16 %v4668_v56, %v4667_v5  ;;  %v3441_v54 = vpop.f32.mrb[51].mxu1 }
 0x8c6   : > { %v4855_v38 = vpack.i.bf16 %v3441_v54, %v3438_v53 }
 0x8c7   : > { %4861 = vrot.lane.b32.xlu0 %v4860_v4, %s5358_s13 }
 0x8c8   : > { %4856 = vrot.lane.b32.xlu1 %v4855_v38, %s5358_s13  ;;  %v7626_v38 = vld [vmem:[#allocation16_spill] sm:$0xff] }
 0x8cb   : > { %v4671_v24 = vpop.f32.mrb[52].mxu1 }
 0x8cc   : > { %v3454_v31 = vpop.f32.mrb[53].mxu1 }
 0x8cd   : > { %v4672_v58 = vpop.f32.mrb[54].mxu1 }
 0x8ce   : > { %v4870_v8 = vpack.i.bf16 %v4672_v58, %v4671_v24  ;;  %v3457_v44 = vpop.f32.mrb[55].mxu1 }
 0x8cf   : > { %v4865_v9 = vpack.i.bf16 %v3457_v44, %v3454_v31  ;;  %v7627_v31 = vld [vmem:[#allocation14_spill] sm:$0xff]  ;;  %v7628_v44 = vld [vmem:[#allocation12_spill] sm:$0xff] }
 0x8d0   : > { %4871 = vrot.lane.b32.xlu0 %v4870_v8, %s5358_s13 }
 0x8d1   : > { %4866 = vrot.lane.b32.xlu1 %v4865_v9, %s5358_s13 }
 0x8d3   : > { %v4683_v55 = vpop.f32.mrb[96].mxu0 }
 0x8d4   : > { %v3527_v20 = vpop.f32.mrb[97].mxu0 }
 0x8d5   : > { %v4684_v57 = vpop.f32.mrb[98].mxu0 }
 0x8d6   : > { %v4880_v40 = vpack.i.bf16 %v4684_v57, %v4683_v55  ;;  %v3530_v6 = vpop.f32.mrb[99].mxu0  ;;  %v7629_v55 = vld [vmem:[#allocation11_spill] sm:$0xff] }
 0x8d7   : > { %v4875_v7 = vpack.i.bf16 %v3530_v6, %v3527_v20 }
 0x8d8   : > { %4881 = vrot.lane.b32.xlu0 %v4880_v40, %s5358_s13 }
 0x8d9   : > { %4876 = vrot.lane.b32.xlu1 %v4875_v7, %s5358_s13 }
 0x8db   : > { %v4687_v48 = vpop.f32.mrb[100].mxu0 }
 0x8dc   : > { %v3543_v62 = vpop.f32.mrb[101].mxu0 }
 0x8dd   : > { %v4688_v15 = vpop.f32.mrb[102].mxu0 }
 0x8de   : > { %v4890_v51 = vpack.i.bf16 %v4688_v15, %v4687_v48  ;;  %v3546_v36 = vpop.f32.mrb[103].mxu0 }
 0x8df   : > { %v4885_v27 = vpack.i.bf16 %v3546_v36, %v3543_v62 }
 0x8e0   : > { %4891 = vrot.lane.b32.xlu0 %v4890_v51, %s5358_s13  ;;  %v7630_v51 = vld [vmem:[#allocation9_spill] sm:$0xff] }
 0x8e1   : > { %4886 = vrot.lane.b32.xlu1 %v4885_v27, %s5358_s13  ;;  %v7631_v27 = vld [vmem:[#allocation15_spill] sm:$0xff] }
 0x8e7   : > { %v4822_v21 = vpop.permute.xlu0 %4821 }
 0x8e8   : > { %v4824_v45 = vunpack.i.h.bf16 %v4822_v21  ;;  %v4823_v25 = vunpack.i.l.bf16 %v4822_v21  ;;  %v4817_v41 = vpop.permute.xlu1 %4816 }
 0x8e9   : > { %v4819_v17 = vunpack.i.h.bf16 %v4817_v41  ;;  %v4818_v59 = vunpack.i.l.bf16 %v4817_v41 }
 0x8ea   : > { %v3689_v0 = vsel %vm1151_vm1, %v6800_v52, %v4824_v45  ;;  %v3688_v50 = vsel %vm1151_vm1, %v6796_v12, %v4823_v25  ;;  %v7632_v25 = vld [vmem:[#allocation18_spill] sm:$0xff] }
 0x8eb   : > { %v3719_v33 = vpack.c.bf16 %v3689_v0, %v3688_v50  ;;  %v3687_v26 = vsel %vm1151_vm1, %v6802_v19, %v4819_v17  ;;  %v3686_v1 = vsel %vm1151_vm1, %v6798_v61, %v4818_v59  ;;  %v7633_v17 = vld [vmem:[#allocation8_spill] sm:$0xff] }
 0x8ec   : > { %v3718_v49 = vpack.c.bf16 %v3687_v26, %v3686_v1 }
 0x8ee   : > { %4693 = vmatprep.mubr.msk.bf16.mxu1 %vm381_vm0, %v3718_v49 }
 0x8ef   : > { %v4832_v11 = vpop.permute.xlu0 %4831  ;;  %4694 = vmatmul.mubr.msk.bf16.vlgmr.msra.gmra.mrb[56].mxu1 %vm381_vm0, %v3719_v33 }
 0x8f0   : > { %v4834_v3 = vunpack.i.h.bf16 %v4832_v11  ;;  %v4833_v28 = vunpack.i.l.bf16 %v4832_v11  ;;  %v4827_v30 = vpop.permute.xlu1 %4826 }
 0x8f1   : > { %v4829_v52 = vunpack.i.h.bf16 %v4827_v30  ;;  %v4828_v32 = vunpack.i.l.bf16 %v4827_v30  ;;  %v7635_v30 = vld [vmem:[#allocation19_spill] sm:$0xff] }
 0x8f2   : > { %v3693_v12 = vsel %vm1151_vm1, %v6808_v23, %v4834_v3  ;;  %v3692_v19 = vsel %vm1151_vm1, %v6804_v2, %v4833_v28  ;;  %v7634_v3 = vld [vmem:[#allocation22_spill] sm:$0xff] }
 0x8f3   : > { %v3721_v46 = vpack.c.bf16 %v3693_v12, %v3692_v19  ;;  %v3691_v61 = vsel %vm1151_vm1, %v6810_v47, %v4829_v52  ;;  %v3690_v16 = vsel %vm1151_vm1, %v6806_v10, %v4828_v32  ;;  %v7636_v12 = vld [vmem:[#allocation20_spill] sm:$0xff] }
 0x8f4   : > { %v3720_v18 = vpack.c.bf16 %v3691_v61, %v3690_v16 }
 0x8f6   : > { %4697 = vmatprep.mubr.msk.bf16.mxu1 %vm381_vm0, %v3720_v18 }
 0x8f7   : > { %4698 = vmatmul.mubr.msk.bf16.gmra.mrb[60].mxu1 %vm381_vm0, %v3721_v46  ;;  %v7637_v46 = vld [vmem:[#allocation17_spill] sm:$0xff] }
 0x92a   : > { %v4842_v37 = vpop.permute.xlu0 %4841 }
 0x92b   : > { %v4844_v63 = vunpack.i.h.bf16 %v4842_v37  ;;  %v4843_v29 = vunpack.i.l.bf16 %v4842_v37  ;;  %v4837_v34 = vpop.permute.xlu1 %4836 }
 0x92c   : > { %v4839_v23 = vunpack.i.h.bf16 %v4837_v34  ;;  %v4838_v60 = vunpack.i.l.bf16 %v4837_v34 }
 0x92d   : > { %v3697_v2 = vsel %vm1151_vm1, %v6816_v43, %v4844_v63  ;;  %v3696_v47 = vsel %vm1151_vm1, %v7623_v35, %v4843_v29  ;;  %v7639_v35 = vld [vmem:[#allocation21_spill] sm:$0xff] }
 0x92e   : > { %v3723_v22 = vpack.c.bf16 %v3697_v2, %v3696_v47  ;;  %v3695_v10 = vsel %vm1151_vm1, %v7624_v14, %v4839_v23  ;;  %v3694_v13 = vsel %vm1151_vm1, %v7625_v42, %v4838_v60  ;;  %v7638_v60 = vld [vmem:[#allocation25_spill] sm:$0xff]  ;;  %v7640_v14 = vld [vmem:[#allocation26_spill] sm:$0xff]  ;;  %v7641_v42 = vld [vmem:[#allocation24_spill] sm:$0xff] }
 0x92f   : > { %v3722_v39 = vpack.c.bf16 %v3695_v10, %v3694_v13 }
 0x931   : > { %4701 = vmatprep.mubr.msk.bf16.mxu1 %vm381_vm0, %v3722_v39 }
 0x932   : > { %v4852_v5 = vpop.permute.xlu0 %4851  ;;  %4702 = vmatmul.mubr.msk.bf16.gmra.mrb[64].mxu1 %vm381_vm0, %v3723_v22 }
 0x933   : > { %v4854_v53 = vunpack.i.h.bf16 %v4852_v5  ;;  %v4853_v56 = vunpack.i.l.bf16 %v4852_v5  ;;  %v4847_v4 = vpop.permute.xlu1 %4846 }
 0x934   : > { %v4849_v43 = vunpack.i.h.bf16 %v4847_v4  ;;  %v4848_v54 = vunpack.i.l.bf16 %v4847_v4 }
 0x935   : > { %v3701_v24 = vsel %vm1151_vm1, %v7626_v38, %v4854_v53  ;;  %v3700_v58 = vsel %vm1151_vm1, %v7627_v31, %v4853_v56  ;;  %v7642_v38 = vld [vmem:[#allocation29_spill] sm:$0xff]  ;;  %v7643_v31 = vld [vmem:[#allocation27_spill] sm:$0xff] }
 0x936   : > { %v3725_v8 = vpack.c.bf16 %v3701_v24, %v3700_v58  ;;  %v3699_v9 = vsel %vm1151_vm1, %v7628_v44, %v4849_v43  ;;  %v3698_v20 = vsel %vm1151_vm1, %v7629_v55, %v4848_v54  ;;  %v7644_v44 = vld [vmem:[#allocation30_spill] sm:$0xff]  ;;  %v7645_v55 = vld [vmem:[#allocation28_spill] sm:$0xff] }
 0x937   : > { %v3724_v57 = vpack.c.bf16 %v3699_v9, %v3698_v20 }
 0x939   : > { %v4862_v40 = vpop.permute.xlu0 %4861  ;;  %4705 = vmatprep.mubr.msk.bf16.mxu1 %vm381_vm0, %v3724_v57 }
 0x93a   : > { %v4864_v6 = vunpack.i.h.bf16 %v4862_v40  ;;  %v4863_v7 = vunpack.i.l.bf16 %v4862_v40  ;;  %v4857_v48 = vpop.permute.xlu1 %4856  ;;  %4706 = vmatmul.mubr.msk.bf16.gmra.mrb[68].mxu1 %vm381_vm0, %v3725_v8  ;;  %v7380_v40 = vld [vmem:[%s7535_s7] ss:$0 sm:$0xff] }
 0x93b   : > { %v4859_v62 = vunpack.i.h.bf16 %v4857_v48  ;;  %v4858_v15 = vunpack.i.l.bf16 %v4857_v48 }
 0x93c   : > { %v3705_v36 = vsel %vm1151_vm1, %v7630_v51, %v4864_v6  ;;  %v3704_v21 = vsel %vm1151_vm1, %v7631_v27, %v4863_v7  ;;  %v5219_v51 = vld [vmem:[%s5529_s22 + $0x10] sm:$0xff] }
 0x93d   : > { %v3727_v45 = vpack.c.bf16 %v3705_v36, %v3704_v21  ;;  %v3703_v41 = vsel %vm1151_vm1, %v7632_v25, %v4859_v62  ;;  %v3702_v59 = vsel %vm1151_vm1, %v7633_v17, %v4858_v15  ;;  %v5221_v17 = vld [vmem:[%s5529_s22 + $0x18] sm:$0xff] }
 0x93e   : > { %v3726_v0 = vpack.c.bf16 %v3703_v41, %v3702_v59 }
 0x940   : > { %4709 = vmatprep.mubr.msk.bf16.mxu1 %vm381_vm0, %v3726_v0  ;;  %v5222_v0 = vld [vmem:[%s5529_s22 + $0x8] sm:$0xff] }
 0x942   : > { %v4872_v50 = vpop.permute.xlu0 %4871  ;;  %4710 = vmatmul.mubr.msk.bf16.gmra.mrb[72].mxu1 %vm381_vm0, %v3727_v45  ;;  %v5220_v45 = vld [vmem:[%s5529_s22] sm:$0xff] }
 0x943   : > { %v4874_v33 = vunpack.i.h.bf16 %v4872_v50  ;;  %v4873_v26 = vunpack.i.l.bf16 %v4872_v50  ;;  %v4867_v1 = vpop.permute.xlu1 %4866 }
 0x944   : > { %v4869_v49 = vunpack.i.h.bf16 %v4867_v1  ;;  %v4868_v11 = vunpack.i.l.bf16 %v4867_v1 }
 0x945   : > { %v3709_v28 = vsel %vm1151_vm1, %v7634_v3, %v4874_v33  ;;  %v3708_v52 = vsel %vm1151_vm1, %v7635_v30, %v4873_v26  ;;  %v5223_v3 = vld [vmem:[%s5529_s22 + $0x30] sm:$0xff] }
 0x946   : > { %v3729_v32 = vpack.c.bf16 %v3709_v28, %v3708_v52  ;;  %v3707_v19 = vsel %vm1151_vm1, %v7636_v12, %v4869_v49  ;;  %v3706_v61 = vsel %vm1151_vm1, %v7637_v46, %v4868_v11  ;;  %v5225_v46 = vld [vmem:[%s5529_s22 + $0x38] sm:$0xff] }
 0x947   : > { %v3728_v16 = vpack.c.bf16 %v3707_v19, %v3706_v61 }
 0x949   : > { %4713 = vmatprep.mubr.msk.bf16.mxu1 %vm381_vm0, %v3728_v16  ;;  %v5226_v16 = vld [vmem:[%s5529_s22 + $0x28] sm:$0xff] }
 0x94a   : > { %v4882_v18 = vpop.permute.xlu0 %4881  ;;  %4714 = vmatmul.mubr.msk.bf16.gmra.mrb[76].mxu1 %vm381_vm0, %v3729_v32  ;;  %v5224_v32 = vld [vmem:[%s5529_s22 + $0x20] sm:$0xff] }
 0x94b   : > { %v4884_v37 = vunpack.i.h.bf16 %v4882_v18  ;;  %v4883_v63 = vunpack.i.l.bf16 %v4882_v18  ;;  %v4877_v29 = vpop.permute.xlu1 %4876 }
 0x94c   : > { %v4879_v34 = vunpack.i.h.bf16 %v4877_v29  ;;  %v4878_v23 = vunpack.i.l.bf16 %v4877_v29 }
 0x94d   : > { %v3713_v2 = vsel %vm1151_vm1, %v7638_v60, %v4884_v37  ;;  %v3712_v47 = vsel %vm1151_vm1, %v7639_v35, %v4883_v63  ;;  %v5227_v60 = vld [vmem:[%s5529_s22 + $0x50] sm:$0xff] }
 0x94e   : > { %v3731_v22 = vpack.c.bf16 %v3713_v2, %v3712_v47  ;;  %v3711_v10 = vsel %vm1151_vm1, %v7640_v14, %v4879_v34  ;;  %v3710_v13 = vsel %vm1151_vm1, %v7641_v42, %v4878_v23  ;;  %v5229_v42 = vld [vmem:[%s5529_s22 + $0x58] sm:$0xff] }
 0x94f   : > { %v3730_v39 = vpack.c.bf16 %v3711_v10, %v3710_v13 }
 0x951   : > { %4717 = vmatprep.mubr.msk.bf16.mxu1 %vm381_vm0, %v3730_v39  ;;  %v5230_v39 = vld [vmem:[%s5529_s22 + $0x48] sm:$0xff] }
 0x952   : > { %v4892_v5 = vpop.permute.xlu0 %4891  ;;  %4718 = vmatmul.mubr.msk.bf16.gmra.mrb[80].mxu1 %vm381_vm0, %v3731_v22  ;;  %v5228_v22 = vld [vmem:[%s5529_s22 + $0x40] sm:$0xff] }
 0x953   : > { %v4894_v53 = vunpack.i.h.bf16 %v4892_v5  ;;  %v4893_v56 = vunpack.i.l.bf16 %v4892_v5  ;;  %v4887_v4 = vpop.permute.xlu1 %4886 }
 0x954   : > { %v4889_v43 = vunpack.i.h.bf16 %v4887_v4  ;;  %v4888_v54 = vunpack.i.l.bf16 %v4887_v4 }
 0x955   : > { %v3717_v24 = vsel %vm1151_vm1, %v7642_v38, %v4894_v53  ;;  %v3716_v58 = vsel %vm1151_vm1, %v7643_v31, %v4893_v56  ;;  %v5231_v38 = vld [vmem:[%s5529_s22 + $0x70] sm:$0xff] }
 0x956   : > { %v3733_v8 = vpack.c.bf16 %v3717_v24, %v3716_v58  ;;  %v3715_v9 = vsel %vm1151_vm1, %v7644_v44, %v4889_v43  ;;  %v3714_v20 = vsel %vm1151_vm1, %v7645_v55, %v4888_v54  ;;  %v5233_v55 = vld [vmem:[%s5529_s22 + $0x78] sm:$0xff] }
 0x957   : > { %v3732_v57 = vpack.c.bf16 %v3715_v9, %v3714_v20 }
 0x959   : > { %4721 = vmatprep.mubr.msk.bf16.mxu1 %vm381_vm0, %v3732_v57  ;;  %v5234_v57 = vld [vmem:[%s5529_s22 + $0x68] sm:$0xff] }
 0x95a   : > { %4722 = vmatmul.mubr.msk.bf16.gmra.mrb[84].mxu1 %vm381_vm0, %v3733_v8  ;;  %v5232_v8 = vld [vmem:[%s5529_s22 + $0x60] sm:$0xff] }
 0x9c2   : > { %v4695_v6 = vpop.f32.mrb[56].mxu1 }
 0x9c3   : > { %v3848_v7 = vadd.f32 %v4695_v6, %v7380_v40  ;;  %v3839_v48 = vpop.f32.mrb[57].mxu1 }
 0x9c4   : > { %v3840_v62 = vadd.f32 %v7380_v40, %v3839_v48  ;;  %v4696_v15 = vpop.f32.mrb[58].mxu1 }
 0x9c5   : > { %v3968_v36 = vadd.f32 %v5219_v51, %v3848_v7  ;;  %v3851_v27 = vadd.f32 %v4696_v15, %v7380_v40  ;;  %v3842_v21 = vpop.f32.mrb[59].mxu1 }
 0x9c6   : > { %v3966_v25 = vadd.f32 %v5220_v45, %v3840_v62  ;;  %v3843_v41 = vadd.f32 %v7380_v40, %v3842_v21 }
 0x9c7   : > { %4000 = vst.msk [vmem:[%s7386_s30 + $0x10] sm:$0xff] %vm381_vm0, %v3968_v36  ;;  %v3969_v59 = vadd.f32 %v5221_v17, %v3851_v27  ;;  %v5235_v36 = vld [vmem:[%s5529_s22 + $0x90] sm:$0xff] }
 0x9c8   : > { %3998 = vst.msk [vmem:[%s7386_s30] sm:$0xff] %vm381_vm0, %v3966_v25  ;;  %v3967_v50 = vadd.f32 %v5222_v0, %v3843_v41  ;;  %v5236_v25 = vld [vmem:[%s5529_s22 + $0x80] sm:$0xff] }
 0x9c9   : > { %4001 = vst.msk [vmem:[%s7386_s30 + $0x18] sm:$0xff] %vm381_vm0, %v3969_v59  ;;  %v5237_v59 = vld [vmem:[%s5529_s22 + $0x98] sm:$0xff] }
 0x9ca   : > { %3999 = vst.msk [vmem:[%s7386_s30 + $0x8] sm:$0xff] %vm381_vm0, %v3967_v50  ;;  %v4699_v33 = vpop.f32.mrb[60].mxu1  ;;  %v5238_v50 = vld [vmem:[%s5529_s22 + $0x88] sm:$0xff] }
 0x9cb   : > { %v3864_v26 = vadd.f32 %v4699_v33, %v7380_v40  ;;  %v3855_v1 = vpop.f32.mrb[61].mxu1 }
 0x9cc   : > { %v3856_v49 = vadd.f32 %v7380_v40, %v3855_v1  ;;  %v4700_v11 = vpop.f32.mrb[62].mxu1 }
 0x9cd   : > { %v3972_v28 = vadd.f32 %v5223_v3, %v3864_v26  ;;  %v3867_v30 = vadd.f32 %v4700_v11, %v7380_v40  ;;  %v3858_v52 = vpop.f32.mrb[63].mxu1 }
 0x9ce   : > { %v3970_v12 = vadd.f32 %v5224_v32, %v3856_v49  ;;  %v3859_v19 = vadd.f32 %v7380_v40, %v3858_v52 }
 0x9cf   : > { %4004 = vst.msk [vmem:[%s7386_s30 + $0x30] sm:$0xff] %vm381_vm0, %v3972_v28  ;;  %v3973_v61 = vadd.f32 %v5225_v46, %v3867_v30  ;;  %v5239_v28 = vld [vmem:[%s5529_s22 + $0xb0] sm:$0xff] }
 0x9d0   : > { %4002 = vst.msk [vmem:[%s7386_s30 + $0x20] sm:$0xff] %vm381_vm0, %v3970_v12  ;;  %v3971_v18 = vadd.f32 %v5226_v16, %v3859_v19  ;;  %v5240_v12 = vld [vmem:[%s5529_s22 + $0xa0] sm:$0xff] }
 0x9d1   : > { %4005 = vst.msk [vmem:[%s7386_s30 + $0x38] sm:$0xff] %vm381_vm0, %v3973_v61  ;;  %v5241_v61 = vld [vmem:[%s5529_s22 + $0xb8] sm:$0xff] }
 0x9d2   : > { %4003 = vst.msk [vmem:[%s7386_s30 + $0x28] sm:$0xff] %vm381_vm0, %v3971_v18  ;;  %v5242_v18 = vld [vmem:[%s5529_s22 + $0xa8] sm:$0xff] }
 0xa05   : > { %v4703_v37 = vpop.f32.mrb[64].mxu1 }
 0xa06   : > { %v3880_v63 = vadd.f32 %v4703_v37, %v7380_v40  ;;  %v3871_v29 = vpop.f32.mrb[65].mxu1 }
 0xa07   : > { %v3872_v34 = vadd.f32 %v7380_v40, %v3871_v29  ;;  %v4704_v23 = vpop.f32.mrb[66].mxu1 }
 0xa08   : > { %v3976_v2 = vadd.f32 %v5227_v60, %v3880_v63  ;;  %v3883_v35 = vadd.f32 %v4704_v23, %v7380_v40  ;;  %v3874_v47 = vpop.f32.mrb[67].mxu1 }
 0xa09   : > { %v3974_v14 = vadd.f32 %v5228_v22, %v3872_v34  ;;  %v3875_v10 = vadd.f32 %v7380_v40, %v3874_v47 }
 0xa0a   : > { %4008 = vst.msk [vmem:[%s7386_s30 + $0x50] sm:$0xff] %vm381_vm0, %v3976_v2  ;;  %v3977_v13 = vadd.f32 %v5229_v42, %v3883_v35  ;;  %v5243_v2 = vld [vmem:[%s5529_s22 + $0xd0] sm:$0xff] }
 0xa0b   : > { %4006 = vst.msk [vmem:[%s7386_s30 + $0x40] sm:$0xff] %vm381_vm0, %v3974_v14  ;;  %v3975_v5 = vadd.f32 %v5230_v39, %v3875_v10  ;;  %v5244_v14 = vld [vmem:[%s5529_s22 + $0xc0] sm:$0xff] }
 0xa0c   : > { %4009 = vst.msk [vmem:[%s7386_s30 + $0x58] sm:$0xff] %vm381_vm0, %v3977_v13  ;;  %v5245_v13 = vld [vmem:[%s5529_s22 + $0xd8] sm:$0xff] }
 0xa0d   : > { %4007 = vst.msk [vmem:[%s7386_s30 + $0x48] sm:$0xff] %vm381_vm0, %v3975_v5  ;;  %v4707_v53 = vpop.f32.mrb[68].mxu1  ;;  %v5246_v5 = vld [vmem:[%s5529_s22 + $0xc8] sm:$0xff] }
 0xa0e   : > { %v3896_v56 = vadd.f32 %v4707_v53, %v7380_v40  ;;  %v3887_v4 = vpop.f32.mrb[69].mxu1 }
 0xa0f   : > { %v3888_v43 = vadd.f32 %v7380_v40, %v3887_v4  ;;  %v4708_v54 = vpop.f32.mrb[70].mxu1 }
 0xa10   : > { %v3980_v24 = vadd.f32 %v5231_v38, %v3896_v56  ;;  %v3899_v31 = vadd.f32 %v4708_v54, %v7380_v40  ;;  %v3890_v58 = vpop.f32.mrb[71].mxu1 }
 0xa11   : > { %v3978_v44 = vadd.f32 %v5232_v8, %v3888_v43  ;;  %v3891_v9 = vadd.f32 %v7380_v40, %v3890_v58 }
 0xa12   : > { %4012 = vst.msk [vmem:[%s7386_s30 + $0x70] sm:$0xff] %vm381_vm0, %v3980_v24  ;;  %v3981_v20 = vadd.f32 %v5233_v55, %v3899_v31  ;;  %v5247_v24 = vld [vmem:[%s5529_s22 + $0xf0] sm:$0xff] }
 0xa13   : > { %4010 = vst.msk [vmem:[%s7386_s30 + $0x60] sm:$0xff] %vm381_vm0, %v3978_v44  ;;  %v3979_v6 = vadd.f32 %v5234_v57, %v3891_v9  ;;  %v5248_v44 = vld [vmem:[%s5529_s22 + $0xe0] sm:$0xff] }
 0xa14   : > { %4013 = vst.msk [vmem:[%s7386_s30 + $0x78] sm:$0xff] %vm381_vm0, %v3981_v20  ;;  %v5249_v20 = vld [vmem:[%s5529_s22 + $0xf8] sm:$0xff] }
 0xa15   : > { %4011 = vst.msk [vmem:[%s7386_s30 + $0x68] sm:$0xff] %vm381_vm0, %v3979_v6  ;;  %v4711_v7 = vpop.f32.mrb[72].mxu1  ;;  %v5250_v6 = vld [vmem:[%s5529_s22 + $0xe8] sm:$0xff] }
 0xa16   : > { %v3912_v48 = vadd.f32 %v4711_v7, %v7380_v40  ;;  %v3903_v62 = vpop.f32.mrb[73].mxu1 }
 0xa17   : > { %v3904_v15 = vadd.f32 %v7380_v40, %v3903_v62  ;;  %v4712_v51 = vpop.f32.mrb[74].mxu1 }
 0xa18   : > { %v3984_v27 = vadd.f32 %v5235_v36, %v3912_v48  ;;  %v3915_v21 = vadd.f32 %v4712_v51, %v7380_v40  ;;  %v3906_v45 = vpop.f32.mrb[75].mxu1 }
 0xa19   : > { %v3982_v41 = vadd.f32 %v5236_v25, %v3904_v15  ;;  %v3907_v17 = vadd.f32 %v7380_v40, %v3906_v45 }
 0xa1a   : > { %4016 = vst.msk [vmem:[%s7386_s30 + $0x90] sm:$0xff] %vm381_vm0, %v3984_v27  ;;  %v3985_v0 = vadd.f32 %v5237_v59, %v3915_v21 }
 0xa1b   : > { %4014 = vst.msk [vmem:[%s7386_s30 + $0x80] sm:$0xff] %vm381_vm0, %v3982_v41  ;;  %v3983_v33 = vadd.f32 %v5238_v50, %v3907_v17 }
 0xa1c   : > { %4017 = vst.msk [vmem:[%s7386_s30 + $0x98] sm:$0xff] %vm381_vm0, %v3985_v0 }
 0xa1d   : > { %4015 = vst.msk [vmem:[%s7386_s30 + $0x88] sm:$0xff] %vm381_vm0, %v3983_v33  ;;  %v4715_v26 = vpop.f32.mrb[76].mxu1 }
 0xa1e   : > { %v3928_v1 = vadd.f32 %v4715_v26, %v7380_v40  ;;  %v3919_v49 = vpop.f32.mrb[77].mxu1 }
 0xa1f   : > { %v3920_v11 = vadd.f32 %v7380_v40, %v3919_v49  ;;  %v4716_v3 = vpop.f32.mrb[78].mxu1 }
 0xa20   : > { %v3988_v30 = vadd.f32 %v5239_v28, %v3928_v1  ;;  %v3931_v52 = vadd.f32 %v4716_v3, %v7380_v40  ;;  %v3922_v32 = vpop.f32.mrb[79].mxu1 }
 0xa21   : > { %v3986_v19 = vadd.f32 %v5240_v12, %v3920_v11  ;;  %v3923_v46 = vadd.f32 %v7380_v40, %v3922_v32 }
 0xa22   : > { %4020 = vst.msk [vmem:[%s7386_s30 + $0xb0] sm:$0xff] %vm381_vm0, %v3988_v30  ;;  %v3989_v16 = vadd.f32 %v5241_v61, %v3931_v52 }
 0xa23   : > { %4018 = vst.msk [vmem:[%s7386_s30 + $0xa0] sm:$0xff] %vm381_vm0, %v3986_v19  ;;  %v3987_v37 = vadd.f32 %v5242_v18, %v3923_v46 }
 0xa24   : > { %4021 = vst.msk [vmem:[%s7386_s30 + $0xb8] sm:$0xff] %vm381_vm0, %v3989_v16 }
 0xa25   : > { %4019 = vst.msk [vmem:[%s7386_s30 + $0xa8] sm:$0xff] %vm381_vm0, %v3987_v37  ;;  %v4719_v63 = vpop.f32.mrb[80].mxu1 }
 0xa26   : > { %v3944_v29 = vadd.f32 %v4719_v63, %v7380_v40  ;;  %v3935_v34 = vpop.f32.mrb[81].mxu1 }
 0xa27   : > { %v3936_v23 = vadd.f32 %v7380_v40, %v3935_v34  ;;  %v4720_v60 = vpop.f32.mrb[82].mxu1 }
 0xa28   : > { %v3992_v35 = vadd.f32 %v5243_v2, %v3944_v29  ;;  %v3947_v47 = vadd.f32 %v4720_v60, %v7380_v40  ;;  %v3938_v22 = vpop.f32.mrb[83].mxu1 }
 0xa29   : > { %v3990_v10 = vadd.f32 %v5244_v14, %v3936_v23  ;;  %v3939_v42 = vadd.f32 %v7380_v40, %v3938_v22 }
 0xa2a   : > { %4024 = vst.msk [vmem:[%s7386_s30 + $0xd0] sm:$0xff] %vm381_vm0, %v3992_v35  ;;  %v3993_v39 = vadd.f32 %v5245_v13, %v3947_v47 }
 0xa2b   : > { %4022 = vst.msk [vmem:[%s7386_s30 + $0xc0] sm:$0xff] %vm381_vm0, %v3990_v10  ;;  %v3991_v53 = vadd.f32 %v5246_v5, %v3939_v42 }
 0xa2c   : > { %4025 = vst.msk [vmem:[%s7386_s30 + $0xd8] sm:$0xff] %vm381_vm0, %v3993_v39 }
 0xa2d   : > { %4023 = vst.msk [vmem:[%s7386_s30 + $0xc8] sm:$0xff] %vm381_vm0, %v3991_v53  ;;  %v4723_v56 = vpop.f32.mrb[84].mxu1 }
 0xa2e   : > { %v3960_v4 = vadd.f32 %v4723_v56, %v7380_v40  ;;  %v3951_v43 = vpop.f32.mrb[85].mxu1 }
 0xa2f   : > { %v3952_v54 = vadd.f32 %v7380_v40, %v3951_v43  ;;  %v4724_v38 = vpop.f32.mrb[86].mxu1 }
 0xa30   : > { %v3996_v31 = vadd.f32 %v5247_v24, %v3960_v4  ;;  %v3963_v58 = vadd.f32 %v4724_v38, %v7380_v40  ;;  %v3954_v8 = vpop.f32.mrb[87].mxu1 }
 0xa31   : > { %v3994_v9 = vadd.f32 %v5248_v44, %v3952_v54  ;;  %v3955_v55 = vadd.f32 %v7380_v40, %v3954_v8 }
 0xa32   : > { %4028 = vst.msk [vmem:[%s7386_s30 + $0xf0] sm:$0xff] %vm381_vm0, %v3996_v31  ;;  %v3997_v57 = vadd.f32 %v5249_v20, %v3963_v58 }
 0xa33   : > { %4026 = vst.msk [vmem:[%s7386_s30 + $0xe0] sm:$0xff] %vm381_vm0, %v3994_v9  ;;  %v3995_v7 = vadd.f32 %v5250_v6, %v3955_v55 }
 0xa34   : > { %4029 = vst.msk [vmem:[%s7386_s30 + $0xf8] sm:$0xff] %vm381_vm0, %v3997_v57 }
 0xa35   : > { %4027 = vst.msk [vmem:[%s7386_s30 + $0xe8] sm:$0xff] %vm381_vm0, %v3995_v7 }
 0xa36 PF: > { %p19_p6 = scmp.ge.s32.totalorder %s5451_s16, 4   ;;  %s7646_s27 = smov %s5339_s28 }
 0xa37   : > { %s7647_s28 = smov %s5343_s29  ;;  %s7648_s29 = smov %s5480_s21 }
 0xa38   : > { %s7649_s30 = smov %s5451_s16  ;;  %21 = sbr.rel (!%p19_p6) target bundleno = 4 (0x4), region = 97 }
 0xa3f   :  { %4054 = vsyncpa [#allocation3], 1 }
 0xa40   :  { %4056 = vsyncpa [#allocation3 + $0x1], 1 }
 0xa41   :  { %4057 = vsyncpa [#allocation5], 1 }

// kernel: general_transformer_block.3
= control target key start
LH: loop header
LB: loop body
LE: loop exit
PB: predicated region body
PF: predicated region fallthrough
CT: control target
= control target key end

     0   :  { %s5060_s21 = smov 0   ;;  %s7350_s0 = inlined_call_operand.vmem [shape: f32[2,16,16,32], index: 0, kind: input, shape index: {}]   ;;  %s7351_s1 = inlined_call_operand.vmem [shape: f32[1,32], index: 1, kind: input, shape index: {}]   ;;  %s7352_s2 = inlined_call_operand.vmem [shape: f32[1,32], index: 2, kind: input, shape index: {}]   ;;  %s7353_s3 = inlined_call_operand.vmem [shape: bf16[32,128], index: 3, kind: input, shape index: {}]   ;;  %s7354_s4 = inlined_call_operand.vmem [shape: f32[1,128], index: 4, kind: input, shape index: {}]   ;;  %s7355_s5 = inlined_call_operand.vmem [shape: f32[1,128], index: 5, kind: input, shape index: {}]   ;;  %s7356_s6 = inlined_call_operand.vmem [shape: f32[3,3,128], index: 6, kind: input, shape index: {}]   ;;  %s7357_s7 = inlined_call_operand.vmem [shape: f32[1,128], index: 7, kind: input, shape index: {}]   ;;  %s7358_s8 = inlined_call_operand.vmem [shape: f32[1,128], index: 8, kind: input, shape index: {}]   ;;  %s7359_s9 = inlined_call_operand.vmem [shape: bf16[128,32], index: 9, kind: input, shape index: {}]   ;;  %s7360_s10 = inlined_call_operand.vmem [shape: f32[1,32], index: 10, kind: input, shape index: {}]   ;;  %s7361_s11 = inlined_call_operand.vmem [shape: f32[1,32], index: 11, kind: input, shape index: {}]   ;;  %s7362_s12 = inlined_call_operand.vmem [shape: f32[2,32,256], index: 12, kind: output, shape index: {}]  }
   0x1 LB: > { %s4485_s22 = sadd.s32 4294967295, %s4992_s21   ;;  %p4489_p0 = scmp.ge.s32.totalorder %s4992_s21, 1  ;;  %s4992_s21 = sphi %s5060_s21, %s22_s21  }
   0x2   : > { %p362_p1 = scmp.lt.s32.totalorder %s4992_s21, 3 }
   0x4   : > { %p363_p2 = pnand %p4489_p0, %p362_p1 }
   0x5   : > { %p404_p3 = scmp.lt.s32.totalorder (!%p363_p2), %s4485_s22, 1  ;;  %vm449_vm0 = vcmask (!%p363_p2), 261120   ;;  %vm1851_vm1 = vcmask (!%p363_p2), 1046528   ;;  %vm2096_vm2 = vcmask (!%p363_p2), 1045504  }
   0x6   : > { %366 = sbr.rel (%p363_p2) target bundleno = 1376 (0x560), region = 68 }
   0xd   : > { %s7364_s22 = smov (!%p404_p3, %s4485_s22), 1 }
   0xe   : > { %s4530_s23 = sshll.u32 %s7364_s22, 8  ;;  %s4531_s14 = sshll.u32 %s7364_s22, 6 }
   0xf   : > { %s5074_s26 = scalar_lea.vmem %s7350_s0, %s4530_s23  ;;  %s7321_s17 = scalar_lea.vmem %s7362_s12, %s4531_s14 }
  0x10   : > { %v5077_v0 = vld [vmem:[%s5074_s26] sm:$0xff]  ;;  %v5080_v1 = vld [vmem:[%s5074_s26 + $0x10] sm:$0xff]  ;;  %v5083_v2 = vld [vmem:[%s5074_s26 + $0x8] sm:$0xff] }
  0x11   : > { %v450_v3 = vsel %vm449_vm0, %v5077_v0, 0.0  ;;  %v456_v4 = vsel %vm449_vm0, %v5080_v1, 0.0  ;;  %v5090_v5 = vld [vmem:[%s5074_s26 + $0x18] sm:$0xff]  ;;  %v453_v6 = vsel %vm449_vm0, %v5083_v2, 0.0  ;;  %v5097_v8 = vld [vmem:[%s5074_s26 + $0x20] sm:$0xff]  ;;  %v5100_v9 = vld [vmem:[%s5074_s26 + $0x28] sm:$0xff] }
  0x12   : > { %451 = vadd.xlane.f32.xlu0 %v450_v3  ;;  %457 = vadd.xlane.f32.xlu1 %v456_v4  ;;  %v459_v7 = vsel %vm449_vm0, %v5090_v5, 0.0  ;;  %v462_v10 = vsel %vm449_vm0, %v5097_v8, 0.0  ;;  %v465_v11 = vsel %vm449_vm0, %v5100_v9, 0.0  ;;  %v5107_v12 = vld [vmem:[%s5074_s26 + $0x30] sm:$0xff]  ;;  %v5110_v13 = vld [vmem:[%s5074_s26 + $0x38] sm:$0xff]  ;;  %v5115_v15 = vld [vmem:[%s5074_s26 + $0x40] sm:$0xff] }
  0x13   : > { %v468_v14 = vsel %vm449_vm0, %v5107_v12, 0.0  ;;  %v471_v16 = vsel %vm449_vm0, %v5110_v13, 0.0  ;;  %v5120_v17 = vld [vmem:[%s5074_s26 + $0x48] sm:$0xff]  ;;  %v474_v18 = vsel %vm449_vm0, %v5115_v15, 0.0  ;;  %v5127_v20 = vld [vmem:[%s5074_s26 + $0x50] sm:$0xff]  ;;  %v5130_v21 = vld [vmem:[%s5074_s26 + $0x58] sm:$0xff] }
  0x14   : > { %v477_v19 = vsel %vm449_vm0, %v5120_v17, 0.0  ;;  %v480_v22 = vsel %vm449_vm0, %v5127_v20, 0.0  ;;  %v483_v23 = vsel %vm449_vm0, %v5130_v21, 0.0  ;;  %v5137_v24 = vld [vmem:[%s5074_s26 + $0x60] sm:$0xff]  ;;  %v5140_v25 = vld [vmem:[%s5074_s26 + $0x68] sm:$0xff]  ;;  %v5147_v28 = vld [vmem:[%s5074_s26 + $0x70] sm:$0xff] }
  0x15   : > { %v486_v26 = vsel %vm449_vm0, %v5137_v24, 0.0  ;;  %v489_v27 = vsel %vm449_vm0, %v5140_v25, 0.0  ;;  %v5150_v29 = vld [vmem:[%s5074_s26 + $0x78] sm:$0xff]  ;;  %v492_v30 = vsel %vm449_vm0, %v5147_v28, 0.0  ;;  %v5157_v32 = vld [vmem:[%s5074_s26 + $0x80] sm:$0xff]  ;;  %v5160_v33 = vld [vmem:[%s5074_s26 + $0x88] sm:$0xff] }
  0x16   : > { %454 = vadd.xlane.f32.xlu0 %v453_v6  ;;  %460 = vadd.xlane.f32.xlu1 %v459_v7  ;;  %v495_v31 = vsel %vm449_vm0, %v5150_v29, 0.0  ;;  %v498_v34 = vsel %vm449_vm0, %v5157_v32, 0.0  ;;  %v501_v35 = vsel %vm449_vm0, %v5160_v33, 0.0  ;;  %v5167_v36 = vld [vmem:[%s5074_s26 + $0x90] sm:$0xff]  ;;  %v5170_v37 = vld [vmem:[%s5074_s26 + $0x98] sm:$0xff]  ;;  %v5177_v40 = vld [vmem:[%s5074_s26 + $0xa0] sm:$0xff] }
  0x17   : > { %v504_v38 = vsel %vm449_vm0, %v5167_v36, 0.0  ;;  %v507_v39 = vsel %vm449_vm0, %v5170_v37, 0.0  ;;  %v5180_v41 = vld [vmem:[%s5074_s26 + $0xa8] sm:$0xff]  ;;  %v510_v42 = vsel %vm449_vm0, %v5177_v40, 0.0  ;;  %v5187_v44 = vld [vmem:[%s5074_s26 + $0xb0] sm:$0xff]  ;;  %v5190_v45 = vld [vmem:[%s5074_s26 + $0xb8] sm:$0xff] }
  0x18   : > { %v513_v43 = vsel %vm449_vm0, %v5180_v41, 0.0  ;;  %v516_v46 = vsel %vm449_vm0, %v5187_v44, 0.0  ;;  %v519_v47 = vsel %vm449_vm0, %v5190_v45, 0.0  ;;  %v5197_v48 = vld [vmem:[%s5074_s26 + $0xc0] sm:$0xff]  ;;  %v5200_v49 = vld [vmem:[%s5074_s26 + $0xc8] sm:$0xff]  ;;  %v5207_v52 = vld [vmem:[%s5074_s26 + $0xd0] sm:$0xff] }
  0x19   : > { %v522_v50 = vsel %vm449_vm0, %v5197_v48, 0.0  ;;  %v525_v51 = vsel %vm449_vm0, %v5200_v49, 0.0  ;;  %v5210_v53 = vld [vmem:[%s5074_s26 + $0xd8] sm:$0xff]  ;;  %v528_v54 = vsel %vm449_vm0, %v5207_v52, 0.0  ;;  %v5217_v56 = vld [vmem:[%s5074_s26 + $0xe0] sm:$0xff]  ;;  %v5220_v57 = vld [vmem:[%s5074_s26 + $0xe8] sm:$0xff] }
  0x1a   : > { %463 = vadd.xlane.f32.xlu0 %v462_v10  ;;  %466 = vadd.xlane.f32.xlu1 %v465_v11  ;;  %v531_v55 = vsel %vm449_vm0, %v5210_v53, 0.0  ;;  %v534_v58 = vsel %vm449_vm0, %v5217_v56, 0.0  ;;  %v537_v59 = vsel %vm449_vm0, %v5220_v57, 0.0  ;;  %v5227_v60 = vld [vmem:[%s5074_s26 + $0xf0] sm:$0xff]  ;;  %v5230_v61 = vld [vmem:[%s5074_s26 + $0xf8] sm:$0xff] }
  0x1b   : > { %v540_v62 = vsel %vm449_vm0, %v5227_v60, 0.0  ;;  %v543_v63 = vsel %vm449_vm0, %v5230_v61, 0.0 }
  0x1e   : > { %469 = vadd.xlane.f32.xlu0 %v468_v14  ;;  %472 = vadd.xlane.f32.xlu1 %v471_v16 }
  0x22   : > { %475 = vadd.xlane.f32.xlu0 %v474_v18  ;;  %478 = vadd.xlane.f32.xlu1 %v477_v19 }
  0x26   : > { %481 = vadd.xlane.f32.xlu0 %v480_v22  ;;  %484 = vadd.xlane.f32.xlu1 %v483_v23 }
  0x2a   : > { %487 = vadd.xlane.f32.xlu0 %v486_v26  ;;  %490 = vadd.xlane.f32.xlu1 %v489_v27 }
  0x2e   : > { %493 = vadd.xlane.f32.xlu0 %v492_v30  ;;  %496 = vadd.xlane.f32.xlu1 %v495_v31 }
  0x32   : > { %499 = vadd.xlane.f32.xlu0 %v498_v34  ;;  %502 = vadd.xlane.f32.xlu1 %v501_v35 }
  0x36   : > { %505 = vadd.xlane.f32.xlu0 %v504_v38  ;;  %508 = vadd.xlane.f32.xlu1 %v507_v39 }
  0x3a   : > { %511 = vadd.xlane.f32.xlu0 %v510_v42  ;;  %514 = vadd.xlane.f32.xlu1 %v513_v43 }
  0x3e   : > { %517 = vadd.xlane.f32.xlu0 %v516_v46  ;;  %520 = vadd.xlane.f32.xlu1 %v519_v47 }
  0x42   : > { %523 = vadd.xlane.f32.xlu0 %v522_v50  ;;  %526 = vadd.xlane.f32.xlu1 %v525_v51 }
  0x46   : > { %529 = vadd.xlane.f32.xlu0 %v528_v54  ;;  %532 = vadd.xlane.f32.xlu1 %v531_v55 }
  0x4a   : > { %535 = vadd.xlane.f32.xlu0 %v534_v58  ;;  %538 = vadd.xlane.f32.xlu1 %v537_v59 }
  0x4e   : > { %541 = vadd.xlane.f32.xlu0 %v540_v62  ;;  %544 = vadd.xlane.f32.xlu1 %v543_v63 }
  0x9f   : > { %v452_v3 = vpop.xlane.xlu0 %451  ;;  %v458_v4 = vpop.xlane.xlu1 %457 }
  0xa0   : > { %v547_v6 = vmul.f32 0.03125, %v452_v3  ;;  %v549_v7 = vmul.f32 0.03125, %v458_v4 }
  0xa2   : > { %v5237_v10 = vsub.f32 %v5077_v0, %v547_v6  ;;  %v5240_v11 = vsub.f32 %v5080_v1, %v549_v7 }
  0xa3   : > { %v455_v14 = vpop.xlane.xlu0 %454  ;;  %v461_v16 = vpop.xlane.xlu1 %460 }
  0xa4   : > { %v548_v18 = vmul.f32 0.03125, %v455_v14  ;;  %v550_v19 = vmul.f32 0.03125, %v461_v16  ;;  %v611_v22 = vmul.f32 %v5237_v10, %v5237_v10  ;;  %v613_v23 = vmul.f32 %v5240_v11, %v5240_v11 }
  0xa6   : > { %v5247_v26 = vsub.f32 %v5083_v2, %v548_v18  ;;  %v5250_v27 = vsub.f32 %v5090_v5, %v550_v19  ;;  %v643_v0 = vsel %vm449_vm0, %v611_v22, 0.0  ;;  %v649_v31 = vsel %vm449_vm0, %v613_v23, 0.0 }
  0xa7   : > { %644 = vadd.xlane.f32.xlu0 %v643_v0  ;;  %v464_v1 = vpop.xlane.xlu0 %463  ;;  %v467_v30 = vpop.xlane.xlu1 %466 }
  0xa8   : > { %v551_v34 = vmul.f32 0.03125, %v464_v1  ;;  %v552_v35 = vmul.f32 0.03125, %v467_v30  ;;  %v612_v38 = vmul.f32 %v5247_v26, %v5247_v26  ;;  %v614_v39 = vmul.f32 %v5250_v27, %v5250_v27 }
  0xaa   : > { %v5259_v2 = vsub.f32 %v5097_v8, %v551_v34  ;;  %v5262_v5 = vsub.f32 %v5100_v9, %v552_v35  ;;  %v646_v42 = vsel %vm449_vm0, %v612_v38, 0.0  ;;  %v652_v47 = vsel %vm449_vm0, %v614_v39, 0.0 }
  0xab   : > { %650 = vadd.xlane.f32.xlu0 %v649_v31  ;;  %647 = vadd.xlane.f32.xlu1 %v646_v42  ;;  %v470_v43 = vpop.xlane.xlu0 %469  ;;  %v473_v46 = vpop.xlane.xlu1 %472 }
  0xac   : > { %v553_v50 = vmul.f32 0.03125, %v470_v43  ;;  %v554_v51 = vmul.f32 0.03125, %v473_v46  ;;  %v615_v54 = vmul.f32 %v5259_v2, %v5259_v2  ;;  %v616_v8 = vmul.f32 %v5262_v5, %v5262_v5 }
  0xae   : > { %v5271_v55 = vsub.f32 %v5107_v12, %v553_v50  ;;  %v5274_v9 = vsub.f32 %v5110_v13, %v554_v51  ;;  %v655_v58 = vsel %vm449_vm0, %v615_v54, 0.0  ;;  %v658_v63 = vsel %vm449_vm0, %v616_v8, 0.0 }
  0xaf   : > { %653 = vadd.xlane.f32.xlu1 %v652_v47  ;;  %656 = vadd.xlane.f32.xlu0 %v655_v58  ;;  %v476_v59 = vpop.xlane.xlu0 %475  ;;  %v479_v62 = vpop.xlane.xlu1 %478 }
  0xb0   : > { %v555_v3 = vmul.f32 0.03125, %v476_v59  ;;  %v556_v4 = vmul.f32 0.03125, %v479_v62  ;;  %v617_v6 = vmul.f32 %v5271_v55, %v5271_v55  ;;  %v618_v12 = vmul.f32 %v5274_v9, %v5274_v9 }
  0xb2   : > { %v5283_v7 = vsub.f32 %v5115_v15, %v555_v3  ;;  %v5286_v13 = vsub.f32 %v5120_v17, %v556_v4  ;;  %v661_v14 = vsel %vm449_vm0, %v617_v6, 0.0  ;;  %v664_v19 = vsel %vm449_vm0, %v618_v12, 0.0 }
  0xb3   : > { %659 = vadd.xlane.f32.xlu1 %v658_v63  ;;  %662 = vadd.xlane.f32.xlu0 %v661_v14  ;;  %v482_v16 = vpop.xlane.xlu0 %481  ;;  %v485_v18 = vpop.xlane.xlu1 %484 }
  0xb4   : > { %v557_v22 = vmul.f32 0.03125, %v482_v16  ;;  %v558_v23 = vmul.f32 0.03125, %v485_v18  ;;  %v619_v0 = vmul.f32 %v5283_v7, %v5283_v7  ;;  %v620_v15 = vmul.f32 %v5286_v13, %v5286_v13 }
  0xb6   : > { %v5295_v1 = vsub.f32 %v5127_v20, %v557_v22  ;;  %v5298_v17 = vsub.f32 %v5130_v21, %v558_v23  ;;  %v667_v30 = vsel %vm449_vm0, %v619_v0, 0.0  ;;  %v670_v35 = vsel %vm449_vm0, %v620_v15, 0.0 }
  0xb7   : > { %665 = vadd.xlane.f32.xlu1 %v664_v19  ;;  %668 = vadd.xlane.f32.xlu0 %v667_v30  ;;  %v488_v31 = vpop.xlane.xlu0 %487  ;;  %v491_v34 = vpop.xlane.xlu1 %490 }
  0xb8   : > { %v559_v38 = vmul.f32 0.03125, %v488_v31  ;;  %v560_v39 = vmul.f32 0.03125, %v491_v34  ;;  %v621_v42 = vmul.f32 %v5295_v1, %v5295_v1  ;;  %v622_v20 = vmul.f32 %v5298_v17, %v5298_v17 }
  0xba   : > { %v5307_v43 = vsub.f32 %v5137_v24, %v559_v38  ;;  %v5310_v21 = vsub.f32 %v5140_v25, %v560_v39  ;;  %v673_v46 = vsel %vm449_vm0, %v621_v42, 0.0  ;;  %v676_v51 = vsel %vm449_vm0, %v622_v20, 0.0 }
  0xbb   : > { %671 = vadd.xlane.f32.xlu1 %v670_v35  ;;  %674 = vadd.xlane.f32.xlu0 %v673_v46  ;;  %v494_v47 = vpop.xlane.xlu0 %493  ;;  %v497_v50 = vpop.xlane.xlu1 %496 }
  0xbc   : > { %v561_v54 = vmul.f32 0.03125, %v494_v47  ;;  %v562_v8 = vmul.f32 0.03125, %v497_v50  ;;  %v623_v58 = vmul.f32 %v5307_v43, %v5307_v43  ;;  %v624_v24 = vmul.f32 %v5310_v21, %v5310_v21 }
  0xbe   : > { %v5319_v59 = vsub.f32 %v5147_v28, %v561_v54  ;;  %v5322_v25 = vsub.f32 %v5150_v29, %v562_v8  ;;  %v679_v62 = vsel %vm449_vm0, %v623_v58, 0.0  ;;  %v682_v4 = vsel %vm449_vm0, %v624_v24, 0.0  ;;  %v4683_v58 = vld [vmem:[%s7353_s3] sm:$0xff]  }
  0xbf   : > { %677 = vadd.xlane.f32.xlu1 %v676_v51  ;;  %680 = vadd.xlane.f32.xlu0 %v679_v62  ;;  %v500_v63 = vpop.xlane.xlu0 %499  ;;  %v503_v3 = vpop.xlane.xlu1 %502 }
  0xc0   : > { %v563_v6 = vmul.f32 0.03125, %v500_v63  ;;  %v564_v12 = vmul.f32 0.03125, %v503_v3  ;;  %v625_v14 = vmul.f32 %v5319_v59, %v5319_v59  ;;  %v626_v28 = vmul.f32 %v5322_v25, %v5322_v25  ;;  %4574 = vmatprep.subr.bf16.mxu0 %v4683_v58 }
  0xc1   : > { %4575 = vmatpush3.bf16.msra.mxu0 %v4683_v58 }
  0xc2   : > { %v5331_v16 = vsub.f32 %v5157_v32, %v563_v6  ;;  %v5334_v29 = vsub.f32 %v5160_v33, %v564_v12  ;;  %v685_v18 = vsel %vm449_vm0, %v625_v14, 0.0  ;;  %v688_v23 = vsel %vm449_vm0, %v626_v28, 0.0  ;;  %v4684_v28 = vld [vmem:[%s7353_s3 + $0x8] sm:$0xff]  }
  0xc3   : > { %683 = vadd.xlane.f32.xlu1 %v682_v4  ;;  %686 = vadd.xlane.f32.xlu0 %v685_v18  ;;  %v506_v19 = vpop.xlane.xlu0 %505  ;;  %v509_v22 = vpop.xlane.xlu1 %508 }
  0xc4   : > { %v565_v0 = vmul.f32 0.03125, %v506_v19  ;;  %v566_v15 = vmul.f32 0.03125, %v509_v22  ;;  %v627_v30 = vmul.f32 %v5331_v16, %v5331_v16  ;;  %v628_v32 = vmul.f32 %v5334_v29, %v5334_v29  ;;  %4576 = vmatprep.subr.bf16.mxu0 %v4684_v28 }
  0xc5   : > { %4577 = vmatpush3.bf16.msra.mxu0 %v4684_v28 }
  0xc6   : > { %v5343_v31 = vsub.f32 %v5167_v36, %v565_v0  ;;  %v5346_v33 = vsub.f32 %v5170_v37, %v566_v15  ;;  %v691_v34 = vsel %vm449_vm0, %v627_v30, 0.0  ;;  %v694_v39 = vsel %vm449_vm0, %v628_v32, 0.0 }
  0xc7   : > { %689 = vadd.xlane.f32.xlu1 %v688_v23  ;;  %692 = vadd.xlane.f32.xlu0 %v691_v34  ;;  %v512_v35 = vpop.xlane.xlu0 %511  ;;  %v515_v38 = vpop.xlane.xlu1 %514 }
  0xc8   : > { %v567_v42 = vmul.f32 0.03125, %v512_v35  ;;  %v568_v20 = vmul.f32 0.03125, %v515_v38  ;;  %v629_v46 = vmul.f32 %v5343_v31, %v5343_v31  ;;  %v630_v36 = vmul.f32 %v5346_v33, %v5346_v33 }
  0xca   : > { %v5355_v47 = vsub.f32 %v5177_v40, %v567_v42  ;;  %v5358_v37 = vsub.f32 %v5180_v41, %v568_v20  ;;  %v697_v50 = vsel %vm449_vm0, %v629_v46, 0.0  ;;  %v700_v8 = vsel %vm449_vm0, %v630_v36, 0.0 }
  0xcb   : > { %695 = vadd.xlane.f32.xlu1 %v694_v39  ;;  %698 = vadd.xlane.f32.xlu0 %v697_v50  ;;  %v518_v51 = vpop.xlane.xlu0 %517  ;;  %v521_v54 = vpop.xlane.xlu1 %520 }
  0xcc   : > { %v569_v24 = vmul.f32 0.03125, %v518_v51  ;;  %v570_v62 = vmul.f32 0.03125, %v521_v54  ;;  %v631_v40 = vmul.f32 %v5355_v47, %v5355_v47  ;;  %v632_v41 = vmul.f32 %v5358_v37, %v5358_v37 }
  0xce   : > { %v5370_v63 = vsub.f32 %v5187_v44, %v569_v24  ;;  %v5373_v3 = vsub.f32 %v5190_v45, %v570_v62  ;;  %v703_v4 = vsel %vm449_vm0, %v631_v40, 0.0  ;;  %v706_v14 = vsel %vm449_vm0, %v632_v41, 0.0 }
  0xcf   : > { %701 = vadd.xlane.f32.xlu1 %v700_v8  ;;  %704 = vadd.xlane.f32.xlu0 %v703_v4  ;;  %v524_v6 = vpop.xlane.xlu0 %523  ;;  %v527_v12 = vpop.xlane.xlu1 %526 }
  0xd0   : > { %v571_v18 = vmul.f32 0.03125, %v524_v6  ;;  %v572_v19 = vmul.f32 0.03125, %v527_v12  ;;  %v633_v44 = vmul.f32 %v5370_v63, %v5370_v63  ;;  %v634_v45 = vmul.f32 %v5373_v3, %v5373_v3 }
  0xd2   : > { %v5385_v22 = vsub.f32 %v5197_v48, %v571_v18  ;;  %v5388_v23 = vsub.f32 %v5200_v49, %v572_v19  ;;  %v709_v0 = vsel %vm449_vm0, %v633_v44, 0.0  ;;  %v712_v32 = vsel %vm449_vm0, %v634_v45, 0.0 }
  0xd3   : > { %707 = vadd.xlane.f32.xlu1 %v706_v14  ;;  %710 = vadd.xlane.f32.xlu0 %v709_v0  ;;  %v530_v15 = vpop.xlane.xlu0 %529  ;;  %v533_v30 = vpop.xlane.xlu1 %532 }
  0xd4   : > { %v573_v34 = vmul.f32 0.03125, %v530_v15  ;;  %v574_v35 = vmul.f32 0.03125, %v533_v30  ;;  %v635_v38 = vmul.f32 %v5385_v22, %v5385_v22  ;;  %v636_v48 = vmul.f32 %v5388_v23, %v5388_v23 }
  0xd6   : > { %v5397_v49 = vsub.f32 %v5207_v52, %v573_v34  ;;  %v5400_v39 = vsub.f32 %v5210_v53, %v574_v35  ;;  %v715_v42 = vsel %vm449_vm0, %v635_v38, 0.0  ;;  %v718_v36 = vsel %vm449_vm0, %v636_v48, 0.0 }
  0xd7   : > { %713 = vadd.xlane.f32.xlu1 %v712_v32  ;;  %716 = vadd.xlane.f32.xlu0 %v715_v42  ;;  %v536_v20 = vpop.xlane.xlu0 %535  ;;  %v539_v46 = vpop.xlane.xlu1 %538 }
  0xd8   : > { %v575_v50 = vmul.f32 0.03125, %v536_v20  ;;  %v576_v51 = vmul.f32 0.03125, %v539_v46  ;;  %v637_v54 = vmul.f32 %v5397_v49, %v5397_v49  ;;  %v638_v52 = vmul.f32 %v5400_v39, %v5400_v39 }
  0xda   : > { %v5409_v8 = vsub.f32 %v5217_v56, %v575_v50  ;;  %v5412_v53 = vsub.f32 %v5220_v57, %v576_v51  ;;  %v721_v58 = vsel %vm449_vm0, %v637_v54, 0.0  ;;  %v724_v40 = vsel %vm449_vm0, %v638_v52, 0.0 }
  0xdb   : > { %719 = vadd.xlane.f32.xlu1 %v718_v36  ;;  %722 = vadd.xlane.f32.xlu0 %v721_v58  ;;  %v542_v24 = vpop.xlane.xlu0 %541  ;;  %v545_v62 = vpop.xlane.xlu1 %544 }
  0xdc   : > { %v577_v41 = vmul.f32 0.03125, %v542_v24  ;;  %v578_v4 = vmul.f32 0.03125, %v545_v62  ;;  %v639_v6 = vmul.f32 %v5409_v8, %v5409_v8  ;;  %v640_v56 = vmul.f32 %v5412_v53, %v5412_v53 }
  0xde   : > { %v5421_v12 = vsub.f32 %v5227_v60, %v577_v41  ;;  %v5424_v57 = vsub.f32 %v5230_v61, %v578_v4  ;;  %v727_v14 = vsel %vm449_vm0, %v639_v6, 0.0  ;;  %v730_v28 = vsel %vm449_vm0, %v640_v56, 0.0 }
  0xdf   : > { %725 = vadd.xlane.f32.xlu1 %v724_v40  ;;  %728 = vadd.xlane.f32.xlu0 %v727_v14 }
  0xe0   : > { %v641_v18 = vmul.f32 %v5421_v12, %v5421_v12  ;;  %v642_v19 = vmul.f32 %v5424_v57, %v5424_v57 }
  0xe2   : > { %v733_v44 = vsel %vm449_vm0, %v641_v18, 0.0  ;;  %v736_v60 = vsel %vm449_vm0, %v642_v19, 0.0 }
  0xe3   : > { %731 = vadd.xlane.f32.xlu1 %v730_v28  ;;  %734 = vadd.xlane.f32.xlu0 %v733_v44  ;;  %v5438_v28 = vld [vmem:[%s7351_s1] ss:$0 sm:$0xff] }
  0xe7   : > { %737 = vadd.xlane.f32.xlu1 %v736_v60 }
 0x134   : > { %v645_v61 = vpop.xlane.xlu0 %644 }
 0x135   : > { %v739_v45 = vmul.f32 0.03125, %v645_v61 }
 0x137   : > { %v771_v0 = vadd.f32 1e-06, %v739_v45 }
 0x138   : > { %v648_v15 = vpop.xlane.xlu1 %647  ;;  %v651_v30 = vpop.xlane.xlu0 %650 }
 0x139   : > { %4693 = vrsqrt.f32 %v771_v0  ;;  %v740_v32 = vmul.f32 0.03125, %v648_v15  ;;  %v741_v34 = vmul.f32 0.03125, %v651_v30 }
 0x13b   : > { %v772_v35 = vadd.f32 1e-06, %v740_v32  ;;  %v773_v38 = vadd.f32 1e-06, %v741_v34  ;;  %v5446_v34 = vld [vmem:[%s7352_s2] ss:$0 sm:$0xff] }
 0x13c   : > { %v654_v48 = vpop.xlane.xlu1 %653  ;;  %v657_v42 = vpop.xlane.xlu0 %656 }
 0x13d   : > { %4695 = vrsqrt.f32 %v772_v35  ;;  %v742_v20 = vmul.f32 0.03125, %v654_v48  ;;  %v743_v46 = vmul.f32 0.03125, %v657_v42 }
 0x13e   : > { %4697 = vrsqrt.f32 %v773_v38 }
 0x13f   : > { %v774_v36 = vadd.f32 1e-06, %v742_v20  ;;  %v775_v50 = vadd.f32 1e-06, %v743_v46 }
 0x140   : > { %v660_v51 = vpop.xlane.xlu1 %659  ;;  %v663_v54 = vpop.xlane.xlu0 %662 }
 0x141   : > { %4699 = vrsqrt.f32 %v774_v36  ;;  %v744_v52 = vmul.f32 0.03125, %v660_v51  ;;  %v745_v58 = vmul.f32 0.03125, %v663_v54 }
 0x142   : > { %4701 = vrsqrt.f32 %v775_v50 }
 0x143   : > { %v4694_v24 = vpop.eup %4693  ;;  %v776_v62 = vadd.f32 1e-06, %v744_v52  ;;  %v777_v40 = vadd.f32 1e-06, %v745_v58 }
 0x144   : > { %v666_v41 = vpop.xlane.xlu1 %665  ;;  %v669_v4 = vpop.xlane.xlu0 %668  ;;  %v835_v6 = vmul.f32 %v4694_v24, %v5237_v10 }
 0x145   : > { %4703 = vrsqrt.f32 %v776_v62  ;;  %v746_v56 = vmul.f32 0.03125, %v666_v41  ;;  %v747_v14 = vmul.f32 0.03125, %v669_v4 }
 0x146   : > { %4705 = vrsqrt.f32 %v777_v40  ;;  %v873_v15 = vmul.f32 %v5438_v28, %v835_v6 }
 0x147   : > { %v4696_v18 = vpop.eup %4695  ;;  %v778_v19 = vadd.f32 1e-06, %v746_v56  ;;  %v779_v44 = vadd.f32 1e-06, %v747_v14 }
 0x148   : > { %v4698_v60 = vpop.eup %4697  ;;  %v672_v61 = vpop.xlane.xlu1 %671  ;;  %v836_v0 = vmul.f32 %v4696_v18, %v5247_v26 }
 0x149   : > { %v675_v45 = vpop.xlane.xlu0 %674  ;;  %v837_v10 = vmul.f32 %v4698_v60, %v5240_v11  ;;  %4707 = vrsqrt.f32 %v778_v19  ;;  %v748_v30 = vmul.f32 0.03125, %v672_v61  ;;  %v911_v11 = vadd.f32 %v5446_v34, %v873_v15 }
 0x14a   : > { %v749_v32 = vmul.f32 0.03125, %v675_v45  ;;  %4709 = vrsqrt.f32 %v779_v44  ;;  %v874_v35 = vmul.f32 %v5438_v28, %v836_v0 }
 0x14b   : > { %v4700_v38 = vpop.eup %4699  ;;  %v780_v48 = vadd.f32 1e-06, %v748_v30  ;;  %v875_v51 = vmul.f32 %v5438_v28, %v837_v10 }
 0x14c   : > { %v781_v42 = vadd.f32 1e-06, %v749_v32  ;;  %v4702_v20 = vpop.eup %4701  ;;  %v838_v26 = vmul.f32 %v4700_v38, %v5250_v27  ;;  %v678_v46 = vpop.xlane.xlu1 %677  ;;  %v912_v50 = vadd.f32 %v5446_v34, %v874_v35 }
 0x14d   : > { %v681_v36 = vpop.xlane.xlu0 %680  ;;  %v839_v54 = vmul.f32 %v4702_v20, %v5259_v2  ;;  %4711 = vrsqrt.f32 %v780_v48  ;;  %v750_v52 = vmul.f32 0.03125, %v678_v46  ;;  %v913_v18 = vadd.f32 %v5446_v34, %v875_v51 }
 0x14e   : > { %v751_v58 = vmul.f32 0.03125, %v681_v36  ;;  %4713 = vrsqrt.f32 %v781_v42  ;;  %v943_v24 = vpack.c.bf16 %v912_v50, %v911_v11  ;;  %v876_v62 = vmul.f32 %v5438_v28, %v838_v26 }
 0x14f   : > { %v4704_v40 = vpop.eup %4703  ;;  %v782_v41 = vadd.f32 1e-06, %v750_v52  ;;  %v877_v19 = vmul.f32 %v5438_v28, %v839_v54 }
 0x150   : > { %v783_v27 = vadd.f32 1e-06, %v751_v58  ;;  %v4706_v4 = vpop.eup %4705  ;;  %v840_v6 = vmul.f32 %v4704_v40, %v5262_v5  ;;  %v684_v56 = vpop.xlane.xlu1 %683  ;;  %4578 = vmatprep.mubr.msk.bf16.mxu0 %vm449_vm0, %v943_v24  ;;  %v914_v2 = vadd.f32 %v5446_v34, %v876_v62 }
 0x151   : > { %v687_v14 = vpop.xlane.xlu0 %686  ;;  %v841_v44 = vmul.f32 %v4706_v4, %v5271_v55  ;;  %4715 = vrsqrt.f32 %v782_v41  ;;  %v752_v60 = vmul.f32 0.03125, %v684_v56  ;;  %v915_v48 = vadd.f32 %v5446_v34, %v877_v19 }
 0x152   : > { %v753_v61 = vmul.f32 0.03125, %v687_v14  ;;  %4717 = vrsqrt.f32 %v783_v27  ;;  %v944_v45 = vpack.c.bf16 %v914_v2, %v913_v18  ;;  %v878_v0 = vmul.f32 %v5438_v28, %v840_v6 }
 0x153   : > { %v4708_v5 = vpop.eup %4707  ;;  %v784_v15 = vadd.f32 1e-06, %v752_v60  ;;  %v879_v42 = vmul.f32 %v5438_v28, %v841_v44 }
 0x154   : > { %v785_v10 = vadd.f32 1e-06, %v753_v61  ;;  %v4710_v30 = vpop.eup %4709  ;;  %v842_v32 = vmul.f32 %v4708_v5, %v5274_v9  ;;  %v690_v35 = vpop.xlane.xlu1 %689  ;;  %4579 = vmatmul.mubr.msk.bf16.vlgmr.msra.gmra.mrb[0].mxu0 %vm449_vm0, %v944_v45  ;;  %v916_v55 = vadd.f32 %v5446_v34, %v878_v0 }
 0x155   : > { %v693_v38 = vpop.xlane.xlu0 %692  ;;  %v843_v20 = vmul.f32 %v4710_v30, %v5283_v7  ;;  %4719 = vrsqrt.f32 %v784_v15  ;;  %v754_v26 = vmul.f32 0.03125, %v690_v35  ;;  %v917_v62 = vadd.f32 %v5446_v34, %v879_v42 }
 0x156   : > { %v755_v46 = vmul.f32 0.03125, %v693_v38  ;;  %4721 = vrsqrt.f32 %v785_v10  ;;  %v945_v36 = vpack.c.bf16 %v916_v55, %v915_v48  ;;  %v880_v11 = vmul.f32 %v5438_v28, %v842_v32 }
 0x157   : > { %v4712_v9 = vpop.eup %4711  ;;  %v786_v50 = vadd.f32 1e-06, %v754_v26  ;;  %v881_v40 = vmul.f32 %v5438_v28, %v843_v20 }
 0x158   : > { %v787_v51 = vadd.f32 1e-06, %v755_v46  ;;  %v4714_v54 = vpop.eup %4713  ;;  %v844_v52 = vmul.f32 %v4712_v9, %v5286_v13  ;;  %v696_v58 = vpop.xlane.xlu1 %695  ;;  %4582 = vmatprep.mubr.msk.bf16.mxu0 %vm449_vm0, %v945_v36  ;;  %v918_v7 = vadd.f32 %v5446_v34, %v880_v11 }
 0x159   : > { %v699_v24 = vpop.xlane.xlu0 %698  ;;  %v845_v41 = vmul.f32 %v4714_v54, %v5295_v1  ;;  %4723 = vrsqrt.f32 %v786_v50  ;;  %v756_v27 = vmul.f32 0.03125, %v696_v58  ;;  %v919_v61 = vadd.f32 %v5446_v34, %v881_v40 }
 0x15a   : > { %v757_v4 = vmul.f32 0.03125, %v699_v24  ;;  %4725 = vrsqrt.f32 %v787_v51  ;;  %v946_v6 = vpack.c.bf16 %v918_v7, %v917_v62  ;;  %v882_v56 = vmul.f32 %v5438_v28, %v844_v52 }
 0x15b   : > { %v4716_v13 = vpop.eup %4715  ;;  %v788_v14 = vadd.f32 1e-06, %v756_v27  ;;  %v883_v45 = vmul.f32 %v5438_v28, %v845_v41 }
 0x15c   : > { %v789_v18 = vadd.f32 1e-06, %v757_v4  ;;  %v4718_v2 = vpop.eup %4717  ;;  %v846_v19 = vmul.f32 %v4716_v13, %v5298_v17  ;;  %v702_v44 = vpop.xlane.xlu1 %701  ;;  %4583 = vmatmul.mubr.msk.bf16.gmra.mrb[4].mxu0 %vm449_vm0, %v946_v6  ;;  %v920_v1 = vadd.f32 %v5446_v34, %v882_v56 }
 0x15d   : > { %v705_v60 = vpop.xlane.xlu0 %704  ;;  %v847_v0 = vmul.f32 %v4718_v2, %v5307_v43  ;;  %4727 = vrsqrt.f32 %v788_v14  ;;  %v758_v5 = vmul.f32 0.03125, %v702_v44  ;;  %v921_v20 = vadd.f32 %v5446_v34, %v883_v45 }
 0x15e   : > { %v759_v15 = vmul.f32 0.03125, %v705_v60  ;;  %4729 = vrsqrt.f32 %v789_v18  ;;  %v947_v10 = vpack.c.bf16 %v920_v1, %v919_v61  ;;  %v884_v30 = vmul.f32 %v5438_v28, %v846_v19 }
 0x15f   : > { %v4720_v17 = vpop.eup %4719  ;;  %v790_v32 = vadd.f32 1e-06, %v758_v5  ;;  %v885_v26 = vmul.f32 %v5438_v28, %v847_v0 }
 0x160   : > { %v791_v35 = vadd.f32 1e-06, %v759_v15  ;;  %v4722_v38 = vpop.eup %4721  ;;  %v848_v48 = vmul.f32 %v4720_v17, %v5310_v21  ;;  %v708_v55 = vpop.xlane.xlu1 %707  ;;  %4586 = vmatprep.mubr.msk.bf16.mxu0 %vm449_vm0, %v947_v10  ;;  %v922_v43 = vadd.f32 %v5446_v34, %v884_v30 }
 0x161   : > { %v711_v42 = vpop.xlane.xlu0 %710  ;;  %v849_v46 = vmul.f32 %v4722_v38, %v5319_v59  ;;  %4731 = vrsqrt.f32 %v790_v32  ;;  %v760_v36 = vmul.f32 0.03125, %v708_v55  ;;  %v923_v7 = vadd.f32 %v5446_v34, %v885_v26 }
 0x162   : > { %v761_v11 = vmul.f32 0.03125, %v711_v42  ;;  %4733 = vrsqrt.f32 %v791_v35  ;;  %v948_v9 = vpack.c.bf16 %v922_v43, %v921_v20  ;;  %v886_v50 = vmul.f32 %v5438_v28, %v848_v48 }
 0x163   : > { %v4724_v21 = vpop.eup %4723  ;;  %v792_v51 = vadd.f32 1e-06, %v760_v36  ;;  %v887_v40 = vmul.f32 %v5438_v28, %v849_v46 }
 0x164   : > { %v793_v54 = vadd.f32 1e-06, %v761_v11  ;;  %v4726_v52 = vpop.eup %4725  ;;  %v850_v58 = vmul.f32 %v4724_v21, %v5322_v25  ;;  %v714_v24 = vpop.xlane.xlu1 %713  ;;  %4587 = vmatmul.mubr.msk.bf16.gmra.mrb[8].mxu0 %vm449_vm0, %v948_v9  ;;  %v924_v59 = vadd.f32 %v5446_v34, %v886_v50 }
 0x165   : > { %v717_v62 = vpop.xlane.xlu0 %716  ;;  %v851_v41 = vmul.f32 %v4726_v52, %v5331_v16  ;;  %4735 = vrsqrt.f32 %v792_v51  ;;  %v762_v27 = vmul.f32 0.03125, %v714_v24  ;;  %v925_v60 = vadd.f32 %v5446_v34, %v887_v40 }
 0x166   : > { %v763_v4 = vmul.f32 0.03125, %v717_v62  ;;  %4737 = vrsqrt.f32 %v793_v54  ;;  %v949_v6 = vpack.c.bf16 %v924_v59, %v923_v7  ;;  %v888_v56 = vmul.f32 %v5438_v28, %v850_v58 }
 0x167   : > { %v4728_v25 = vpop.eup %4727  ;;  %v794_v13 = vadd.f32 1e-06, %v762_v27  ;;  %v889_v61 = vmul.f32 %v5438_v28, %v851_v41 }
 0x168   : > { %v795_v14 = vadd.f32 1e-06, %v763_v4  ;;  %v4730_v18 = vpop.eup %4729  ;;  %v852_v2 = vmul.f32 %v4728_v25, %v5334_v29  ;;  %v720_v19 = vpop.xlane.xlu1 %719  ;;  %4590 = vmatprep.mubr.msk.bf16.mxu0 %vm449_vm0, %v949_v6  ;;  %v926_v16 = vadd.f32 %v5446_v34, %v888_v56 }
 0x169   : > { %v723_v44 = vpop.xlane.xlu0 %722  ;;  %v853_v1 = vmul.f32 %v4730_v18, %v5343_v31  ;;  %4739 = vrsqrt.f32 %v794_v13  ;;  %v764_v45 = vmul.f32 0.03125, %v720_v19  ;;  %v927_v48 = vadd.f32 %v5446_v34, %v889_v61 }
 0x16a   : > { %v765_v0 = vmul.f32 0.03125, %v723_v44  ;;  %4741 = vrsqrt.f32 %v795_v14  ;;  %v950_v5 = vpack.c.bf16 %v926_v16, %v925_v60  ;;  %v890_v15 = vmul.f32 %v5438_v28, %v852_v2 }
 0x16b   : > { %v4732_v29 = vpop.eup %4731  ;;  %v796_v10 = vadd.f32 1e-06, %v764_v45  ;;  %v891_v55 = vmul.f32 %v5438_v28, %v853_v1 }
 0x16c   : > { %v797_v30 = vadd.f32 1e-06, %v765_v0  ;;  %v4734_v17 = vpop.eup %4733  ;;  %v854_v32 = vmul.f32 %v4732_v29, %v5346_v33  ;;  %v726_v35 = vpop.xlane.xlu1 %725  ;;  %4591 = vmatmul.mubr.msk.bf16.gmra.mrb[12].mxu0 %vm449_vm0, %v950_v5  ;;  %v928_v31 = vadd.f32 %v5446_v34, %v890_v15 }
 0x16d   : > { %v729_v38 = vpop.xlane.xlu0 %728  ;;  %v855_v42 = vmul.f32 %v4734_v17, %v5355_v47  ;;  %4743 = vrsqrt.f32 %v796_v10  ;;  %v766_v20 = vmul.f32 0.03125, %v726_v35  ;;  %v929_v54 = vadd.f32 %v5446_v34, %v891_v55 }
 0x16e   : > { %v767_v43 = vmul.f32 0.03125, %v729_v38  ;;  %4745 = vrsqrt.f32 %v797_v30  ;;  %v951_v26 = vpack.c.bf16 %v928_v31, %v927_v48  ;;  %v892_v46 = vmul.f32 %v5438_v28, %v854_v32 }
 0x16f   : > { %v4736_v33 = vpop.eup %4735  ;;  %v798_v36 = vadd.f32 1e-06, %v766_v20  ;;  %v893_v52 = vmul.f32 %v5438_v28, %v855_v42 }
 0x170   : > { %v799_v11 = vadd.f32 1e-06, %v767_v43  ;;  %v4738_v9 = vpop.eup %4737  ;;  %v856_v50 = vmul.f32 %v4736_v33, %v5358_v37  ;;  %v732_v21 = vpop.xlane.xlu1 %731  ;;  %4594 = vmatprep.mubr.msk.bf16.mxu0 %vm449_vm0, %v951_v26  ;;  %v930_v47 = vadd.f32 %v5446_v34, %v892_v46 }
 0x171   : > { %v735_v51 = vpop.xlane.xlu0 %734  ;;  %v857_v58 = vmul.f32 %v4738_v9, %v5370_v63  ;;  %4747 = vrsqrt.f32 %v798_v36  ;;  %v768_v24 = vmul.f32 0.03125, %v732_v21  ;;  %v931_v56 = vadd.f32 %v5446_v34, %v893_v52  ;;  %v4687_v21 = vld [vmem:[%s7359_s9 + $0x10] sm:$0xff]  }
 0x172   : > { %v769_v62 = vmul.f32 0.03125, %v735_v51  ;;  %4749 = vrsqrt.f32 %v799_v11  ;;  %v952_v7 = vpack.c.bf16 %v930_v47, %v929_v54  ;;  %v894_v59 = vmul.f32 %v5438_v28, %v856_v50  ;;  %v4688_v51 = vld [vmem:[%s7359_s9 + $0x18] sm:$0xff]   ;;  %v4689_v54 = vld [vmem:[%s7359_s9 + $0x20] sm:$0xff]   ;;  %v4690_v47 = vld [vmem:[%s7359_s9 + $0x28] sm:$0xff]  }
 0x173   : > { %v4740_v37 = vpop.eup %4739  ;;  %v800_v40 = vadd.f32 1e-06, %v768_v24  ;;  %v895_v25 = vmul.f32 %v5438_v28, %v857_v58  ;;  %v1683_v52 = vlaneseq  ;;  %v4691_v58 = vld [vmem:[%s7359_s9 + $0x30] sm:$0xff]  }
 0x174   : > { %v801_v41 = vadd.f32 1e-06, %v769_v62  ;;  %v4742_v27 = vpop.eup %4741  ;;  %v858_v4 = vmul.f32 %v4740_v37, %v5373_v3  ;;  %v738_v6 = vpop.xlane.xlu1 %737  ;;  %4595 = vmatmul.mubr.msk.bf16.gmra.mrb[16].mxu0 %vm449_vm0, %v952_v7  ;;  %v932_v63 = vadd.f32 %v5446_v34, %v894_v59  ;;  %v1680_v7 = vld [vmem:[%s7356_s6] sm:$0x7] }
 0x175   : > { %v859_v13 = vmul.f32 %v4742_v27, %v5385_v22  ;;  %4751 = vrsqrt.f32 %v800_v40  ;;  %v770_v14 = vmul.f32 0.03125, %v738_v6  ;;  %v933_v16 = vadd.f32 %v5446_v34, %v895_v25 }
 0x176   : > { %4753 = vrsqrt.f32 %v801_v41  ;;  %v953_v18 = vpack.c.bf16 %v932_v63, %v931_v56  ;;  %v896_v2 = vmul.f32 %v5438_v28, %v858_v4  ;;  %v1684_v24 = vshrl.u32 %v1683_v52, 7 }
 0x177   : > { %v4744_v19 = vpop.eup %4743  ;;  %v802_v44 = vadd.f32 1e-06, %v770_v14  ;;  %v897_v1 = vmul.f32 %v5438_v28, %v859_v13 }
 0x178   : > { %v4746_v3 = vpop.eup %4745  ;;  %v860_v60 = vmul.f32 %v4744_v19, %v5388_v23  ;;  %4598 = vmatprep.mubr.msk.bf16.mxu0 %vm449_vm0, %v953_v18  ;;  %v934_v61 = vadd.f32 %v5446_v34, %v896_v2  ;;  %v1753_v62 = vsub.s32 1, %v1684_v24  ;;  %v1998_v37 = vsub.s32 2, %v1684_v24 }
 0x179   : > { %v861_v22 = vmul.f32 %v4746_v3, %v5397_v49  ;;  %4755 = vrsqrt.f32 %v802_v44  ;;  %v935_v23 = vadd.f32 %v5446_v34, %v897_v1  ;;  %v1685_v27 = vsub.s32 0, %v1684_v24 }
 0x17a   : > { %v954_v45 = vpack.c.bf16 %v934_v61, %v933_v16  ;;  %v898_v0 = vmul.f32 %v5438_v28, %v860_v60  ;;  %v5580_v59 = vrot.slane %v1680_v7, %v1753_v62  ;;  %v5584_v56 = vrot.slane %v1680_v7, %v1998_v37 }
 0x17b   : > { %v4748_v5 = vpop.eup %4747  ;;  %v899_v30 = vmul.f32 %v5438_v28, %v861_v22  ;;  %v5587_v25 = vrot.slane %v1680_v7, %v1685_v27  ;;  %v5598_v22 = vld [vmem:[%s7354_s4] ss:$0 sm:$0xff] }
 0x17c   : > { %v4750_v15 = vpop.eup %4749  ;;  %v862_v29 = vmul.f32 %v4748_v5, %v5400_v39  ;;  %4599 = vmatmul.mubr.msk.bf16.gmra.mrb[20].mxu0 %vm449_vm0, %v954_v45  ;;  %v936_v10 = vadd.f32 %v5446_v34, %v898_v0  ;;  %v1756_v6 = vmul.f32 0.0, %v5580_v59  ;;  %v2001_v2 = vmul.f32 0.0, %v5584_v56 }
 0x17d   : > { %v863_v17 = vmul.f32 %v4750_v15, %v5409_v8  ;;  %v937_v39 = vadd.f32 %v5446_v34, %v899_v30  ;;  %v1688_v60 = vmul.f32 0.0, %v5587_v25  ;;  %v5604_v15 = vld [vmem:[%s7355_s5] ss:$0 sm:$0xff]  ;;  %v1681_v30 = vld [vmem:[%s7356_s6 + $0x4] sm:$0x7] }
 0x17e   : > { %v955_v32 = vpack.c.bf16 %v936_v10, %v935_v23  ;;  %v900_v49 = vmul.f32 %v5438_v28, %v862_v29  ;;  %v1853_v14 = vrot.slane %v1756_v6, 1  ;;  %v2098_v1 = vrot.slane %v2001_v2, 2 }
 0x17f   : > { %v4752_v35 = vpop.eup %4751  ;;  %v901_v55 = vmul.f32 %v5438_v28, %v863_v17 }
 0x180   : > { %v4754_v38 = vpop.eup %4753  ;;  %v864_v48 = vmul.f32 %v4752_v35, %v5412_v53  ;;  %4602 = vmatprep.mubr.msk.bf16.mxu0 %vm449_vm0, %v955_v32  ;;  %v938_v31 = vadd.f32 %v5446_v34, %v900_v49 }
 0x181   : > { %v865_v42 = vmul.f32 %v4754_v38, %v5421_v12  ;;  %v939_v53 = vadd.f32 %v5446_v34, %v901_v55  ;;  %v1682_v55 = vld [vmem:[%s7356_s6 + $0x8] sm:$0x7] }
 0x182   : > { %v956_v20 = vpack.c.bf16 %v938_v31, %v937_v39  ;;  %v902_v8 = vmul.f32 %v5438_v28, %v864_v48 }
 0x183   : > { %v4756_v43 = vpop.eup %4755  ;;  %v903_v33 = vmul.f32 %v5438_v28, %v865_v42 }
 0x184   : > { %v866_v26 = vmul.f32 %v4756_v43, %v5424_v57  ;;  %4603 = vmatmul.mubr.msk.bf16.gmra.mrb[24].mxu0 %vm449_vm0, %v956_v20  ;;  %v940_v46 = vadd.f32 %v5446_v34, %v902_v8  ;;  %v4994_v57 = vmov 0.0   ;;  %v5622_v43 = vrot.slane %v1681_v30, %v1685_v27 }
 0x185   : > { %v941_v12 = vadd.f32 %v5446_v34, %v903_v33  ;;  %1559 = vst [vmem:[#allocation2 + $0x30] sm:$0x1] %v4994_v57  ;;  %1550 = vst [vmem:[#allocation2] sm:$0xff] %v4994_v57  ;;  %v5627_v33 = vrot.slane %v1681_v30, %v1753_v62 }
 0x186   : > { %v957_v36 = vpack.c.bf16 %v940_v46, %v939_v53  ;;  %v904_v11 = vmul.f32 %v5438_v28, %v866_v26  ;;  %1551 = vst [vmem:[#allocation2 + $0x8] sm:$0xff] %v4994_v57  ;;  %1552 = vst [vmem:[#allocation2 + $0x10] sm:$0x3] %v4994_v57  ;;  %v4685_v28 = vld [vmem:[%s7359_s9] sm:$0xff]  }
 0x187   : > { %1554 = vst [vmem:[#allocation2 + $0x198] sm:$0xff] %v4994_v57  ;;  %1556 = vst [vmem:[#allocation2 + $0x1a8] sm:$0x3] %v4994_v57  ;;  %4610 = vmatprep.subr.bf16.mxu0 %v4685_v28  ;;  %4658 = vmatprep.subr.bf16.mxu1 %v4685_v28 }
 0x188   : > { %4606 = vmatprep.mubr.msk.bf16.mxu0 %vm449_vm0, %v957_v36  ;;  %v942_v9 = vadd.f32 %v5446_v34, %v904_v11  ;;  %1558 = vst [vmem:[#allocation2 + $0x18] sm:$0x1] %v4994_v57  ;;  %1560 = vst [vmem:[#allocation2 + $0x48] sm:$0x1] %v4994_v57  ;;  %4611 = vmatpush3.bf16.msra.mxu0 %v4685_v28  ;;  %v4686_v34 = vld [vmem:[%s7359_s9 + $0x8] sm:$0xff]  }
 0x189   : > { %1561 = vst [vmem:[#allocation2 + $0x60] sm:$0x1] %v4994_v57  ;;  %1562 = vst [vmem:[#allocation2 + $0x78] sm:$0x1] %v4994_v57  ;;  %4666 = vmatpush3.bf16.msra.mxu1 %v4685_v28  ;;  %4612 = vmatprep.subr.bf16.mxu0 %v4686_v34  ;;  %v5634_v28 = vrot.slane %v1682_v55, %v1753_v62 }
 0x18a   : > { %v958_v50 = vpack.c.bf16 %v942_v9, %v941_v12  ;;  %1563 = vst [vmem:[#allocation2 + $0x90] sm:$0x1] %v4994_v57  ;;  %1564 = vst [vmem:[#allocation2 + $0xa8] sm:$0x1] %v4994_v57  ;;  %4659 = vmatprep.subr.bf16.mxu1 %v4686_v34  ;;  %v5630_v12 = vrot.slane %v1681_v30, %v1998_v37  ;;  %v5632_v9 = vrot.slane %v1682_v55, %v1685_v27 }
 0x18b   : > { %1565 = vst [vmem:[#allocation2 + $0xc0] sm:$0x1] %v4994_v57  ;;  %1566 = vst [vmem:[#allocation2 + $0xd8] sm:$0x1] %v4994_v57 }
 0x18c   : > { %4607 = vmatmul.mubr.msk.bf16.gmra.mrb[28].mxu0 %vm449_vm0, %v958_v50  ;;  %1567 = vst [vmem:[#allocation2 + $0xf0] sm:$0x1] %v4994_v57  ;;  %1568 = vst [vmem:[#allocation2 + $0x108] sm:$0x1] %v4994_v57 }
 0x18d   : > { %1569 = vst [vmem:[#allocation2 + $0x120] sm:$0x1] %v4994_v57  ;;  %1570 = vst [vmem:[#allocation2 + $0x138] sm:$0x1] %v4994_v57  ;;  %4613 = vmatpush3.bf16.msra.mxu0 %v4686_v34  ;;  %4667 = vmatpush3.bf16.msra.mxu1 %v4686_v34  ;;  %v5636_v34 = vrot.slane %v1682_v55, %v1998_v37 }
 0x18e   : > { %1571 = vst [vmem:[#allocation2 + $0x150] sm:$0x1] %v4994_v57  ;;  %1572 = vst [vmem:[#allocation2 + $0x168] sm:$0x1] %v4994_v57  ;;  %4614 = vmatprep.subr.bf16.mxu0 %v4687_v21  ;;  %4660 = vmatprep.subr.bf16.mxu1 %v4687_v21 }
 0x18f   : > { %1573 = vst [vmem:[#allocation2 + $0x180] sm:$0x1] %v4994_v57  ;;  %1576 = vst [vmem:[#allocation2 + $0x29] sm:$0x1] %v4994_v57 }
 0x190   : > { %1577 = vst [vmem:[#allocation2 + $0x41] sm:$0x1] %v4994_v57  ;;  %1578 = vst [vmem:[#allocation2 + $0x59] sm:$0x1] %v4994_v57 }
 0x191   : > { %1579 = vst [vmem:[#allocation2 + $0x71] sm:$0x1] %v4994_v57  ;;  %1580 = vst [vmem:[#allocation2 + $0x89] sm:$0x1] %v4994_v57  ;;  %4615 = vmatpush3.bf16.msra.mxu0 %v4687_v21  ;;  %4668 = vmatpush3.bf16.msra.mxu1 %v4687_v21 }
 0x192   : > { %1581 = vst [vmem:[#allocation2 + $0xa1] sm:$0x1] %v4994_v57  ;;  %1582 = vst [vmem:[#allocation2 + $0xb9] sm:$0x1] %v4994_v57  ;;  %4616 = vmatprep.subr.bf16.mxu0 %v4688_v51  ;;  %4661 = vmatprep.subr.bf16.mxu1 %v4688_v51 }
 0x193   : > { %1583 = vst [vmem:[#allocation2 + $0xd1] sm:$0x1] %v4994_v57  ;;  %1584 = vst [vmem:[#allocation2 + $0xe9] sm:$0x1] %v4994_v57 }
 0x194   : > { %1585 = vst [vmem:[#allocation2 + $0x101] sm:$0x1] %v4994_v57  ;;  %1586 = vst [vmem:[#allocation2 + $0x119] sm:$0x1] %v4994_v57 }
 0x195   : > { %1587 = vst [vmem:[#allocation2 + $0x131] sm:$0x1] %v4994_v57  ;;  %1588 = vst [vmem:[#allocation2 + $0x149] sm:$0x1] %v4994_v57  ;;  %4617 = vmatpush3.bf16.msra.mxu0 %v4688_v51  ;;  %4669 = vmatpush3.bf16.msra.mxu1 %v4688_v51 }
 0x196   : > { %1589 = vst [vmem:[#allocation2 + $0x161] sm:$0x1] %v4994_v57  ;;  %1590 = vst [vmem:[#allocation2 + $0x179] sm:$0x1] %v4994_v57  ;;  %4618 = vmatprep.subr.bf16.mxu0 %v4689_v54  ;;  %4662 = vmatprep.subr.bf16.mxu1 %v4689_v54 }
 0x197   : > { %1591 = vst [vmem:[#allocation2 + $0x191] sm:$0x1] %v4994_v57  ;;  %1557 = vst [vmem:[#allocation2] sm:$0x1] %v4994_v57 }
 0x198   : > { %1574 = vst [vmem:[#allocation2 + $0x198] sm:$0x1] %v4994_v57  ;;  %1575 = vst [vmem:[#allocation2 + $0x11] sm:$0x1] %v4994_v57 }
 0x199   : > { %1592 = vst [vmem:[#allocation2 + $0x1a9] sm:$0x1] %v4994_v57  ;;  %4619 = vmatpush3.bf16.msra.mxu0 %v4689_v54  ;;  %4670 = vmatpush3.bf16.msra.mxu1 %v4689_v54 }
 0x19a   : > { %4620 = vmatprep.subr.bf16.mxu0 %v4690_v47  ;;  %4663 = vmatprep.subr.bf16.mxu1 %v4690_v47 }
 0x19d   : > { %4621 = vmatpush3.bf16.msra.mxu0 %v4690_v47  ;;  %4671 = vmatpush3.bf16.msra.mxu1 %v4690_v47 }
 0x19e   : > { %4622 = vmatprep.subr.bf16.mxu0 %v4691_v58  ;;  %4664 = vmatprep.subr.bf16.mxu1 %v4691_v58  ;;  %v1626_v40 = vld [vmem:[#allocation2] sm:$0xff] }
 0x19f   : > { %v1628_v41 = vld [vmem:[#allocation2 + $0x10] sm:$0x3]  ;;  %v1755_v4 = vmul.f32 %v5580_v59, %v1626_v40  ;;  %v2000_v18 = vmul.f32 %v5584_v56, %v1626_v40  ;;  %v1687_v3 = vmul.f32 %v5587_v25, %v1626_v40 }
 0x1a0   : > { %v1757_v63 = vmul.f32 %v5580_v59, %v1628_v41  ;;  %v2002_v44 = vmul.f32 %v5584_v56, %v1628_v41 }
 0x1a1   : > { %4623 = vmatpush3.bf16.msra.mxu0 %v4691_v58  ;;  %4672 = vmatpush3.bf16.msra.mxu1 %v4691_v58  ;;  %v1852_v13 = vrot.slane %v1755_v4, 1  ;;  %v2097_v61 = vrot.slane %v2000_v18, 2 }
 0x1a2   : > { %v1855_v19 = vrot.slane %v1757_v63, 1  ;;  %v2100_v0 = vrot.slane %v2002_v44, 2 }
 0x1a3   : > { %v1854_v16 = vsel %vm1851_vm1, %v1852_v13, %v1853_v14  ;;  %v2099_v32 = vsel %vm2096_vm2, %v2097_v61, %v2098_v1 }
 0x1a4   : > { %v1856_v45 = vsel %vm1851_vm1, %v1853_v14, %v1855_v19  ;;  %v1964_v29 = vadd.f32 %v1854_v16, %v1687_v3  ;;  %v2101_v38 = vsel %vm2096_vm2, %v2098_v1, %v2100_v0  ;;  %v4692_v19 = vld [vmem:[%s7359_s9 + $0x38] sm:$0xff]  }
 0x1a5   : > { %v1965_v17 = vadd.f32 %v1856_v45, %v1688_v60  ;;  %4624 = vmatprep.subr.bf16.mxu0 %v4692_v19  ;;  %4665 = vmatprep.subr.bf16.mxu1 %v4692_v19 }
 0x1a6   : > { %v5620_v8 = vadd.f32 %v2099_v32, %v1964_v29  ;;  %4625 = vmatpush3.bf16.msra.mxu0 %v4692_v19  ;;  %4673 = vmatpush3.bf16.msra.mxu1 %v4692_v19 }
 0x1a7   : > { %v5625_v46 = vadd.f32 %v2101_v38, %v1965_v17 }
 0x227   : > { %v4580_v5 = vpop.f32.mrb[0].mxu0 }
 0x228   : > { %v1193_v23 = vmul.f32 %v4580_v5, %v5598_v22  ;;  %v1057_v10 = vpop.f32.mrb[1].mxu0 }
 0x229   : > { %v1191_v49 = vmul.f32 %v5598_v22, %v1057_v10  ;;  %v4581_v35 = vpop.f32.mrb[2].mxu0 }
 0x22a   : > { %v1232_v48 = vadd.f32 %v5604_v15, %v1193_v23  ;;  %v1194_v39 = vmul.f32 %v4581_v35, %v5598_v22  ;;  %v1060_v31 = vpop.f32.mrb[3].mxu0 }
 0x22b   : > { %v1230_v42 = vadd.f32 %v5604_v15, %v1191_v49  ;;  %v1192_v20 = vmul.f32 %v5598_v22, %v1060_v31 }
 0x22c   : > { %v1296_v26 = vmul.f32 %v1232_v48, %v1232_v48  ;;  %v1233_v53 = vadd.f32 %v5604_v15, %v1194_v39  ;;  %v5638_v21 = vmul.f32 0.5, %v1232_v48 }
 0x22d   : > { %v1294_v36 = vmul.f32 %v1230_v42, %v1230_v42  ;;  %v1231_v11 = vadd.f32 %v5604_v15, %v1192_v20  ;;  %v5640_v51 = vmul.f32 0.5, %v1230_v42 }
 0x22e   : > { %v1328_v50 = vmul.f32 %v1296_v26, %v1232_v48  ;;  %v1297_v57 = vmul.f32 %v1233_v53, %v1233_v53  ;;  %v5642_v24 = vmul.f32 0.5, %v1233_v53 }
 0x22f   : > { %v1326_v54 = vmul.f32 %v1294_v36, %v1230_v42  ;;  %v1295_v47 = vmul.f32 %v1231_v11, %v1231_v11  ;;  %v4584_v52 = vpop.f32.mrb[4].mxu0  ;;  %v5645_v4 = vmul.f32 0.5, %v1231_v11 }
 0x230   : > { %v1360_v58 = vmul.f32 0.044715, %v1328_v50  ;;  %v1329_v7 = vmul.f32 %v1297_v57, %v1233_v53  ;;  %v1197_v40 = vmul.f32 %v4584_v52, %v5598_v22  ;;  %v1073_v41 = vpop.f32.mrb[5].mxu0 }
 0x231   : > { %v1358_v27 = vmul.f32 0.044715, %v1326_v54  ;;  %v1327_v62 = vmul.f32 %v1295_v47, %v1231_v11  ;;  %v1195_v37 = vmul.f32 %v5598_v22, %v1073_v41  ;;  %v4585_v6 = vpop.f32.mrb[6].mxu0 }
 0x232   : > { %v1392_v63 = vadd.f32 %v1360_v58, %v1232_v48  ;;  %v1361_v13 = vmul.f32 0.044715, %v1329_v7  ;;  %v1236_v14 = vadd.f32 %v5604_v15, %v1197_v40  ;;  %v1198_v18 = vmul.f32 %v4585_v6, %v5598_v22  ;;  %v1076_v2 = vpop.f32.mrb[7].mxu0 }
 0x233   : > { %v1390_v44 = vadd.f32 %v1358_v27, %v1230_v42  ;;  %v1359_v3 = vmul.f32 0.044715, %v1327_v62  ;;  %v1234_v60 = vadd.f32 %v5604_v15, %v1195_v37  ;;  %v1196_v16 = vmul.f32 %v5598_v22, %v1076_v2 }
 0x234   : > { %v1424_v61 = vmul.f32 0.7978846, %v1392_v63  ;;  %v1393_v1 = vadd.f32 %v1361_v13, %v1233_v53  ;;  %v5655_v45 = vmul.f32 0.5, %v1236_v14  ;;  %v1300_v0 = vmul.f32 %v1236_v14, %v1236_v14 }
 0x235   : > { %v1422_v5 = vmul.f32 0.7978846, %v1390_v44  ;;  %v1391_v29 = vadd.f32 %v1359_v3, %v1231_v11  ;;  %v5657_v23 = vmul.f32 0.5, %v1234_v60  ;;  %v1298_v10 = vmul.f32 %v1234_v60, %v1234_v60 }
 0x236   : > { %4757 = vtanh.f32 %v1424_v61  ;;  %v1425_v30 = vmul.f32 0.7978846, %v1393_v1  ;;  %v1332_v17 = vmul.f32 %v1300_v0, %v1236_v14  ;;  %v1237_v32 = vadd.f32 %v5604_v15, %v1198_v18 }
 0x237   : > { %4759 = vtanh.f32 %v1422_v5  ;;  %v1423_v49 = vmul.f32 0.7978846, %v1391_v29  ;;  %v1330_v35 = vmul.f32 %v1298_v10, %v1234_v60  ;;  %v1235_v38 = vadd.f32 %v5604_v15, %v1196_v16  ;;  %v4588_v48 = vpop.f32.mrb[8].mxu0 }
 0x238   : > { %4761 = vtanh.f32 %v1425_v30  ;;  %v1364_v39 = vmul.f32 0.044715, %v1332_v17  ;;  %v5661_v31 = vmul.f32 0.5, %v1237_v32  ;;  %v1301_v55 = vmul.f32 %v1237_v32, %v1237_v32  ;;  %v1089_v42 = vpop.f32.mrb[9].mxu0 }
 0x239   : > { %4763 = vtanh.f32 %v1423_v49  ;;  %v1362_v20 = vmul.f32 0.044715, %v1330_v35  ;;  %v5663_v26 = vmul.f32 0.5, %v1235_v38  ;;  %v1299_v53 = vmul.f32 %v1235_v38, %v1235_v38  ;;  %v4589_v36 = vpop.f32.mrb[10].mxu0 }
 0x23a   : > { %v1396_v11 = vadd.f32 %v1364_v39, %v1236_v14  ;;  %v1333_v50 = vmul.f32 %v1301_v55, %v1237_v32  ;;  %v1201_v57 = vmul.f32 %v4588_v48, %v5598_v22  ;;  %v1199_v54 = vmul.f32 %v5598_v22, %v1089_v42  ;;  %v1092_v47 = vpop.f32.mrb[11].mxu0 }
 0x23b   : > { %v1394_v52 = vadd.f32 %v1362_v20, %v1234_v60  ;;  %v1331_v58 = vmul.f32 %v1299_v53, %v1235_v38  ;;  %v1202_v7 = vmul.f32 %v4589_v36, %v5598_v22  ;;  %v1200_v40 = vmul.f32 %v5598_v22, %v1092_v47 }
 0x23c   : > { %v1428_v41 = vmul.f32 0.7978846, %v1396_v11  ;;  %v1365_v27 = vmul.f32 0.044715, %v1333_v50  ;;  %v1240_v62 = vadd.f32 %v5604_v15, %v1201_v57  ;;  %v1238_v37 = vadd.f32 %v5604_v15, %v1199_v54 }
 0x23d   : > { %v1426_v6 = vmul.f32 0.7978846, %v1394_v52  ;;  %v1363_v63 = vmul.f32 0.044715, %v1331_v58  ;;  %v1241_v13 = vadd.f32 %v5604_v15, %v1202_v7  ;;  %v5673_v14 = vadd.f32 %v5604_v15, %v1200_v40 }
 0x23e   : > { %4765 = vtanh.f32 %v1428_v41  ;;  %v1397_v18 = vadd.f32 %v1365_v27, %v1237_v32  ;;  %v5675_v2 = vmul.f32 0.5, %v1240_v62  ;;  %v1304_v19 = vmul.f32 %v1240_v62, %v1240_v62 }
 0x23f   : > { %4767 = vtanh.f32 %v1426_v6  ;;  %v1395_v44 = vadd.f32 %v1363_v63, %v1235_v38  ;;  %v5677_v3 = vmul.f32 0.5, %v1238_v37  ;;  %v1302_v60 = vmul.f32 %v1238_v37, %v1238_v37  ;;  %v4592_v16 = vpop.f32.mrb[12].mxu0 }
 0x240   : > { %v4758_v61 = vpop.eup %4757  ;;  %v1429_v1 = vmul.f32 0.7978846, %v1397_v18  ;;  %v1336_v0 = vmul.f32 %v1304_v19, %v1240_v62  ;;  %v5679_v5 = vmul.f32 0.5, %v1241_v13  ;;  %v1305_v29 = vmul.f32 %v1241_v13, %v1241_v13  ;;  %v1105_v10 = vpop.f32.mrb[13].mxu0 }
 0x241   : > { %v4760_v30 = vpop.eup %4759  ;;  %v1488_v17 = vadd.f32 1.0, %v4758_v61  ;;  %v1427_v49 = vmul.f32 0.7978846, %v1395_v44  ;;  %v1334_v32 = vmul.f32 %v1302_v60, %v1238_v37  ;;  %v5682_v35 = vmul.f32 0.5, %v5673_v14  ;;  %v4593_v48 = vpop.f32.mrb[14].mxu0 }
 0x242   : > { %v4762_v38 = vpop.eup %4761  ;;  %v1486_v39 = vadd.f32 1.0, %v4760_v30  ;;  %4769 = vtanh.f32 %v1429_v1  ;;  %v1368_v55 = vmul.f32 0.044715, %v1336_v0  ;;  %v1337_v42 = vmul.f32 %v1305_v29, %v1241_v13  ;;  %v1108_v20 = vpop.f32.mrb[15].mxu0 }
 0x243   : > { %v4764_v53 = vpop.eup %4763  ;;  %v1520_v36 = vmul.f32 %v1488_v17, %v5638_v21  ;;  %v1489_v11 = vadd.f32 1.0, %v4762_v38  ;;  %4771 = vtanh.f32 %v1427_v49  ;;  %v1366_v50 = vmul.f32 0.044715, %v1334_v32 }
 0x244   : > { %v1518_v57 = vmul.f32 %v1486_v39, %v5640_v51  ;;  %v1487_v54 = vadd.f32 1.0, %v4764_v53  ;;  %v1400_v47 = vadd.f32 %v1368_v55, %v1240_v62  ;;  %v1369_v52 = vmul.f32 0.044715, %v1337_v42 }
 0x245   : > { %1596 = vst [vmem:[#allocation2 + $0x31] sm:$0xff] %v1520_v36  ;;  %v1521_v58 = vmul.f32 %v1489_v11, %v5642_v24  ;;  %v1398_v7 = vadd.f32 %v1366_v50, %v1238_v37  ;;  %v1303_v40 = vmul.f32 %v5673_v14, %v5673_v14  ;;  %v1205_v41 = vmul.f32 %v4592_v16, %v5598_v22 }
 0x246   : > { %1594 = vst [vmem:[#allocation2 + $0x19] sm:$0xff] %v1518_v57  ;;  %v1519_v21 = vmul.f32 %v1487_v54, %v5645_v4  ;;  %v1432_v27 = vmul.f32 0.7978846, %v1400_v47  ;;  %v1401_v6 = vadd.f32 %v1369_v52, %v1241_v13  ;;  %v1203_v63 = vmul.f32 %v5598_v22, %v1105_v10 }
 0x247   : > { %1597 = vst [vmem:[#allocation2 + $0x39] sm:$0xff] %v1521_v58  ;;  %v1430_v51 = vmul.f32 0.7978846, %v1398_v7  ;;  %v1335_v62 = vmul.f32 %v1303_v40, %v5673_v14  ;;  %v1244_v18 = vadd.f32 %v5604_v15, %v1205_v41  ;;  %v1206_v24 = vmul.f32 %v4593_v48, %v5598_v22  ;;  %v4596_v37 = vpop.f32.mrb[16].mxu0 }
 0x248   : > { %v4766_v19 = vpop.eup %4765  ;;  %1595 = vst [vmem:[#allocation2 + $0x21] sm:$0xff] %v1519_v21  ;;  %4773 = vtanh.f32 %v1432_v27  ;;  %v1433_v44 = vmul.f32 0.7978846, %v1401_v6  ;;  %v1242_v60 = vadd.f32 %v5604_v15, %v1203_v63  ;;  %v1204_v4 = vmul.f32 %v5598_v22, %v1108_v20  ;;  %v1121_v13 = vpop.f32.mrb[17].mxu0 }
 0x249   : > { %v4768_v16 = vpop.eup %4767  ;;  %v1492_v61 = vadd.f32 1.0, %v4766_v19  ;;  %4775 = vtanh.f32 %v1430_v51  ;;  %v1367_v1 = vmul.f32 0.044715, %v1335_v62  ;;  %v5697_v0 = vmul.f32 0.5, %v1244_v18  ;;  %v4597_v29 = vpop.f32.mrb[18].mxu0 }
 0x24a   : > { %v1490_v10 = vadd.f32 1.0, %v4768_v16  ;;  %4777 = vtanh.f32 %v1433_v44  ;;  %v1308_v30 = vmul.f32 %v1244_v18, %v1244_v18  ;;  %v5699_v17 = vmul.f32 0.5, %v1242_v60  ;;  %v5701_v49 = vpop.f32.mrb[19].mxu0 }
 0x24b   : > { %v1524_v32 = vmul.f32 %v1492_v61, %v5655_v45  ;;  %v1399_v48 = vadd.f32 %v1367_v1, %v5673_v14  ;;  %v1306_v38 = vmul.f32 %v1242_v60, %v1242_v60  ;;  %v1245_v39 = vadd.f32 %v5604_v15, %v1206_v24 }
 0x24c   : > { %v4770_v55 = vpop.eup %4769  ;;  %v1522_v42 = vmul.f32 %v1490_v10, %v5657_v23  ;;  %v1340_v20 = vmul.f32 %v1308_v30, %v1244_v18  ;;  %v1243_v53 = vadd.f32 %v5604_v15, %v1204_v4  ;;  %v1209_v36 = vmul.f32 %v4596_v37, %v5598_v22 }
 0x24d   : > { %v4772_v11 = vpop.eup %4771  ;;  %1600 = vst [vmem:[#allocation2 + $0x61] sm:$0xff] %v1524_v32  ;;  %v1493_v50 = vadd.f32 1.0, %v4770_v55  ;;  %v1431_v57 = vmul.f32 0.7978846, %v1399_v48  ;;  %v1338_v54 = vmul.f32 %v1306_v38, %v1242_v60  ;;  %v5709_v47 = vmul.f32 0.5, %v1245_v39 }
 0x24e   : > { %1598 = vst [vmem:[#allocation2 + $0x49] sm:$0xff] %v1522_v42  ;;  %v1491_v45 = vadd.f32 1.0, %v4772_v11  ;;  %v1372_v14 = vmul.f32 0.044715, %v1340_v20  ;;  %v1309_v52 = vmul.f32 %v1245_v39, %v1245_v39  ;;  %v5711_v58 = vmul.f32 0.5, %v1243_v53 }
 0x24f   : > { %v1525_v23 = vmul.f32 %v1493_v50, %v5661_v31  ;;  %4779 = vtanh.f32 %v1431_v57  ;;  %v1370_v7 = vmul.f32 0.044715, %v1338_v54  ;;  %v1307_v40 = vmul.f32 %v1243_v53, %v1243_v53  ;;  %v4600_v41 = vpop.f32.mrb[20].mxu0 }
 0x250   : > { %v1523_v21 = vmul.f32 %v1491_v45, %v5663_v26  ;;  %v1404_v27 = vadd.f32 %v1372_v14, %v1244_v18  ;;  %v1341_v6 = vmul.f32 %v1309_v52, %v1245_v39  ;;  %v1248_v63 = vadd.f32 %v5604_v15, %v1209_v36  ;;  %v1137_v51 = vpop.f32.mrb[21].mxu0 }
 0x251   : > { %1601 = vst [vmem:[#allocation2 + $0x69] sm:$0xff] %v1525_v23  ;;  %v1402_v62 = vadd.f32 %v1370_v7, %v1242_v60  ;;  %v1339_v24 = vmul.f32 %v1307_v40, %v1243_v53  ;;  %v1207_v37 = vmul.f32 %v5598_v22, %v1121_v13  ;;  %v1210_v19 = vmul.f32 %v4597_v29, %v5598_v22  ;;  %v4601_v44 = vpop.f32.mrb[22].mxu0 }
 0x252   : > { %v4774_v31 = vpop.eup %4773  ;;  %1599 = vst [vmem:[#allocation2 + $0x51] sm:$0xff] %v1523_v21  ;;  %v1436_v4 = vmul.f32 0.7978846, %v1404_v27  ;;  %v1373_v16 = vmul.f32 0.044715, %v1341_v6  ;;  %v5718_v61 = vmul.f32 0.5, %v1248_v63  ;;  %v1312_v26 = vmul.f32 %v1248_v63, %v1248_v63 }
 0x253   : > { %v1140_v18 = vpop.f32.mrb[23].mxu0  ;;  %v4776_v1 = vpop.eup %4775  ;;  %v1496_v10 = vadd.f32 1.0, %v4774_v31  ;;  %v1434_v30 = vmul.f32 0.7978846, %v1402_v62  ;;  %v1371_v32 = vmul.f32 0.044715, %v1339_v24  ;;  %v1246_v60 = vadd.f32 %v5604_v15, %v1207_v37 }
 0x254   : > { %v4778_v48 = vpop.eup %4777  ;;  %v1494_v38 = vadd.f32 1.0, %v4776_v1  ;;  %4781 = vtanh.f32 %v1436_v4  ;;  %v1405_v13 = vadd.f32 %v1373_v16, %v1245_v39  ;;  %v1344_v29 = vmul.f32 %v1312_v26, %v1248_v63 }
 0x255   : > { %v1528_v55 = vmul.f32 %v1496_v10, %v5675_v2  ;;  %v1497_v42 = vadd.f32 1.0, %v4778_v48  ;;  %4783 = vtanh.f32 %v1434_v30  ;;  %v1403_v20 = vadd.f32 %v1371_v32, %v1243_v53 }
 0x256   : > { %v1526_v36 = vmul.f32 %v1494_v38, %v5677_v3  ;;  %v1437_v11 = vmul.f32 0.7978846, %v1405_v13  ;;  %v1376_v50 = vmul.f32 0.044715, %v1344_v29  ;;  %v5723_v57 = vmul.f32 0.5, %v1246_v60 }
 0x257   : > { %1604 = vst [vmem:[#allocation2 + $0x91] sm:$0xff] %v1528_v55  ;;  %v1529_v54 = vmul.f32 %v1497_v42, %v5679_v5  ;;  %v1435_v45 = vmul.f32 0.7978846, %v1403_v20  ;;  %v1310_v14 = vmul.f32 %v1246_v60, %v1246_v60  ;;  %v1249_v52 = vadd.f32 %v5604_v15, %v1210_v19  ;;  %v5727_v39 = vpop.f32.mrb[24].mxu0 }
 0x258   : > { %1602 = vst [vmem:[#allocation2 + $0x79] sm:$0xff] %v1526_v36  ;;  %4785 = vtanh.f32 %v1437_v11  ;;  %v1408_v2 = vadd.f32 %v1376_v50, %v1248_v63  ;;  %v1208_v53 = vmul.f32 %v5598_v22, %v5701_v49  ;;  %v1213_v3 = vmul.f32 %v4600_v41, %v5598_v22  ;;  %v5732_v23 = vpop.f32.mrb[25].mxu0 }
 0x259   : > { %v4780_v7 = vpop.eup %4779  ;;  %1605 = vst [vmem:[#allocation2 + $0x99] sm:$0xff] %v1529_v54  ;;  %4787 = vtanh.f32 %v1435_v45  ;;  %v1342_v5 = vmul.f32 %v1310_v14, %v1246_v60  ;;  %v5734_v40 = vmul.f32 0.5, %v1249_v52  ;;  %v1313_v21 = vmul.f32 %v1249_v52, %v1249_v52  ;;  %v5736_v27 = vpop.f32.mrb[26].mxu0 }
 0x25a   : > { %v1495_v6 = vadd.f32 1.0, %v4780_v7  ;;  %v1440_v62 = vmul.f32 0.7978846, %v1408_v2  ;;  %v1247_v63 = vadd.f32 %v5604_v15, %v1208_v53  ;;  %v1252_v24 = vadd.f32 %v5604_v15, %v1213_v3  ;;  %v5740_v49 = vpop.f32.mrb[27].mxu0 }
 0x25b   : > { %v1374_v41 = vmul.f32 0.044715, %v1342_v5  ;;  %v1345_v37 = vmul.f32 %v1313_v21, %v1249_v52  ;;  %v1211_v19 = vmul.f32 %v5598_v22, %v1137_v51  ;;  %v1214_v31 = vmul.f32 %v4601_v44, %v5598_v22 }
 0x25c   : > { %v1527_v4 = vmul.f32 %v1495_v6, %v5682_v35  ;;  %4789 = vtanh.f32 %v1440_v62  ;;  %v5745_v16 = vmul.f32 0.5, %v1247_v63  ;;  %v1311_v26 = vmul.f32 %v1247_v63, %v1247_v63 }
 0x25d   : > { %v1406_v1 = vadd.f32 %v1374_v41, %v1246_v60  ;;  %v1377_v10 = vmul.f32 0.044715, %v1345_v37  ;;  %v5747_v30 = vmul.f32 0.5, %v1252_v24  ;;  %v1316_v32 = vmul.f32 %v1252_v24, %v1252_v24 }
 0x25e   : > { %v4782_v48 = vpop.eup %4781  ;;  %1603 = vst [vmem:[#allocation2 + $0x81] sm:$0xff] %v1527_v4  ;;  %v1343_v38 = vmul.f32 %v1311_v26, %v1247_v63  ;;  %v1250_v13 = vadd.f32 %v5604_v15, %v1211_v19  ;;  %v1253_v51 = vadd.f32 %v5604_v15, %v1214_v31  ;;  %v1212_v44 = vmul.f32 %v5598_v22, %v1140_v18 }
 0x25f   : > { %v4784_v29 = vpop.eup %4783  ;;  %v1500_v35 = vadd.f32 1.0, %v4782_v48  ;;  %v1438_v55 = vmul.f32 0.7978846, %v1406_v1  ;;  %v1409_v42 = vadd.f32 %v1377_v10, %v1249_v52  ;;  %v1348_v20 = vmul.f32 %v1316_v32, %v1252_v24  ;;  %v5752_v36 = vpop.f32.mrb[28].mxu0 }
 0x260   : > { %v1498_v60 = vadd.f32 1.0, %v4784_v29  ;;  %v1375_v11 = vmul.f32 0.044715, %v1343_v38  ;;  %v5754_v50 = vmul.f32 0.5, %v1250_v13  ;;  %v1314_v54 = vmul.f32 %v1250_v13, %v1250_v13  ;;  %v5756_v45 = vpop.f32.mrb[29].mxu0 }
 0x261   : > { %v1532_v14 = vmul.f32 %v1500_v35, %v5697_v0  ;;  %4791 = vtanh.f32 %v1438_v55  ;;  %v1441_v2 = vmul.f32 0.7978846, %v1409_v42  ;;  %v1380_v53 = vmul.f32 0.044715, %v1348_v20  ;;  %v5759_v18 = vpop.f32.mrb[30].mxu0 }
 0x262   : > { %v4786_v3 = vpop.eup %4785  ;;  %v1530_v52 = vmul.f32 %v1498_v60, %v5699_v17  ;;  %v1407_v7 = vadd.f32 %v1375_v11, %v1247_v63  ;;  %v1346_v5 = vmul.f32 %v1314_v54, %v1250_v13  ;;  %v5762_v21 = vmul.f32 0.5, %v1253_v51  ;;  %v5764_v6 = vpop.f32.mrb[31].mxu0 }
 0x263   : > { %v4788_v62 = vpop.eup %4787  ;;  %1608 = vst [vmem:[#allocation2 + $0xc1] sm:$0xff] %v1532_v14  ;;  %v1501_v41 = vadd.f32 1.0, %v4786_v3  ;;  %4793 = vtanh.f32 %v1441_v2  ;;  %v1412_v37 = vadd.f32 %v1380_v53, %v1252_v24  ;;  %v1317_v0 = vmul.f32 %v1253_v51, %v1253_v51 }
 0x264   : > { %1606 = vst [vmem:[#allocation2 + $0xa9] sm:$0xff] %v1530_v52  ;;  %v1499_v19 = vadd.f32 1.0, %v4788_v62  ;;  %v1439_v31 = vmul.f32 0.7978846, %v1407_v7  ;;  %v1378_v4 = vmul.f32 0.044715, %v1346_v5  ;;  %v1251_v26 = vadd.f32 %v5604_v15, %v1212_v44 }
 0x265   : > { %v1533_v17 = vmul.f32 %v1501_v41, %v5709_v47  ;;  %v1444_v63 = vmul.f32 0.7978846, %v1412_v37  ;;  %v1349_v1 = vmul.f32 %v1317_v0, %v1253_v51  ;;  %v1217_v10 = vmul.f32 %v5727_v39, %v5598_v22 }
 0x266   : > { %v4790_v32 = vpop.eup %4789  ;;  %v1531_v48 = vmul.f32 %v1499_v19, %v5711_v58  ;;  %4795 = vtanh.f32 %v1439_v31  ;;  %v1410_v38 = vadd.f32 %v1378_v4, %v1250_v13  ;;  %v5771_v24 = vmul.f32 0.5, %v1251_v26 }
 0x267   : > { %1609 = vst [vmem:[#allocation2 + $0xc9] sm:$0xff] %v1533_v17  ;;  %v1504_v29 = vadd.f32 1.0, %v4790_v32  ;;  %4797 = vtanh.f32 %v1444_v63  ;;  %v1381_v35 = vmul.f32 0.044715, %v1349_v1  ;;  %v1315_v55 = vmul.f32 %v1251_v26, %v1251_v26 }
 0x268   : > { %1607 = vst [vmem:[#allocation2 + $0xb1] sm:$0xff] %v1531_v48  ;;  %v1442_v44 = vmul.f32 0.7978846, %v1410_v38  ;;  %v1256_v47 = vadd.f32 %v5604_v15, %v1217_v10  ;;  %v1215_v42 = vmul.f32 %v5598_v22, %v5732_v23  ;;  %v1218_v39 = vmul.f32 %v5736_v27, %v5598_v22 }
 0x269   : > { %v1536_v58 = vmul.f32 %v1504_v29, %v5718_v61  ;;  %v1413_v13 = vadd.f32 %v1381_v35, %v1253_v51  ;;  %v1347_v20 = vmul.f32 %v1315_v55, %v1251_v26  ;;  %v1216_v60 = vmul.f32 %v5598_v22, %v5740_v49 }
 0x26a   : > { %4799 = vtanh.f32 %v1442_v44  ;;  %v5781_v11 = vmul.f32 0.5, %v1256_v47  ;;  %v1320_v54 = vmul.f32 %v1256_v47, %v1256_v47  ;;  %v1254_v14 = vadd.f32 %v5604_v15, %v1215_v42 }
 0x26b   : > { %v4792_v2 = vpop.eup %4791  ;;  %1612 = vst [vmem:[#allocation2 + $0xf1] sm:$0xff] %v1536_v58  ;;  %v1445_v53 = vmul.f32 0.7978846, %v1413_v13  ;;  %v1379_v23 = vmul.f32 0.044715, %v1347_v20  ;;  %v1257_v3 = vadd.f32 %v5604_v15, %v1218_v39  ;;  %v1255_v27 = vadd.f32 %v5604_v15, %v1216_v60 }
 0x26c   : > { %v1502_v61 = vadd.f32 1.0, %v4792_v2  ;;  %v1352_v51 = vmul.f32 %v1320_v54, %v1256_v47  ;;  %v5786_v52 = vmul.f32 0.5, %v1254_v14  ;;  %v1318_v7 = vmul.f32 %v1254_v14, %v1254_v14 }
 0x26d   : > { %v4794_v49 = vpop.eup %4793  ;;  %4801 = vtanh.f32 %v1445_v53  ;;  %v1411_v5 = vadd.f32 %v1379_v23, %v1251_v26  ;;  %v5788_v62 = vmul.f32 0.5, %v1257_v3  ;;  %v1321_v41 = vmul.f32 %v1257_v3, %v1257_v3 }
 0x26e   : > { %v1534_v37 = vmul.f32 %v1502_v61, %v5723_v57  ;;  %v1505_v0 = vadd.f32 1.0, %v4794_v49  ;;  %v1384_v19 = vmul.f32 0.044715, %v1352_v51  ;;  %v1350_v31 = vmul.f32 %v1318_v7, %v1254_v14 }
 0x26f   : > { %v1443_v4 = vmul.f32 0.7978846, %v1411_v5  ;;  %v1353_v17 = vmul.f32 %v1321_v41, %v1257_v3  ;;  %v5791_v63 = vmul.f32 0.5, %v1255_v27  ;;  %v1319_v1 = vmul.f32 %v1255_v27, %v1255_v27 }
 0x270   : > { %v4796_v10 = vpop.eup %4795  ;;  %1610 = vst [vmem:[#allocation2 + $0xd9] sm:$0xff] %v1534_v37  ;;  %v1537_v32 = vmul.f32 %v1505_v0, %v5734_v40  ;;  %v1416_v48 = vadd.f32 %v1384_v19, %v1256_v47  ;;  %v1382_v38 = vmul.f32 0.044715, %v1350_v31  ;;  %v1221_v26 = vmul.f32 %v5752_v36, %v5598_v22 }
 0x271   : > { %v4798_v29 = vpop.eup %4797  ;;  %v1503_v35 = vadd.f32 1.0, %v4796_v10  ;;  %4803 = vtanh.f32 %v1443_v4  ;;  %v1385_v57 = vmul.f32 0.044715, %v1353_v17  ;;  %v1351_v55 = vmul.f32 %v1319_v1, %v1255_v27  ;;  %v5822_v17 = vld [vmem:[#allocation2 + $0x18] sm:$0xff]  ;;  %v5824_v1 = vld [vmem:[#allocation2 + $0x20] sm:$0xff] }
 0x272   : > { %1613 = vst [vmem:[#allocation2 + $0xf9] sm:$0xff] %v1537_v32  ;;  %v1508_v44 = vadd.f32 1.0, %v4798_v29  ;;  %v1448_v42 = vmul.f32 0.7978846, %v1416_v48  ;;  %v1414_v39 = vadd.f32 %v1382_v38, %v1254_v14  ;;  %v1260_v58 = vadd.f32 %v5604_v15, %v1221_v26 }
 0x273   : > { %v1535_v13 = vmul.f32 %v1503_v35, %v5745_v16  ;;  %v1417_v20 = vadd.f32 %v1385_v57, %v1257_v3  ;;  %v1383_v40 = vmul.f32 0.044715, %v1351_v55  ;;  %v1219_v47 = vmul.f32 %v5598_v22, %v5756_v45 }
 0x274   : > { %v4800_v60 = vpop.eup %4799  ;;  %v1540_v36 = vmul.f32 %v1508_v44, %v5747_v30  ;;  %4805 = vtanh.f32 %v1448_v42  ;;  %v1446_v54 = vmul.f32 0.7978846, %v1414_v39  ;;  %v5801_v2 = vmul.f32 0.5, %v1260_v58  ;;  %v5808_v30 = vld [vmem:[#allocation2 + $0x28] sm:$0x3] }
 0x275   : > { %1611 = vst [vmem:[#allocation2 + $0xe1] sm:$0xff] %v1535_v13  ;;  %v1506_v53 = vadd.f32 1.0, %v4800_v60  ;;  %v1449_v23 = vmul.f32 0.7978846, %v1417_v20  ;;  %v1415_v14 = vadd.f32 %v1383_v40, %v1255_v27  ;;  %v1324_v61 = vmul.f32 %v1260_v58, %v1260_v58 }
 0x276   : > { %1616 = vst [vmem:[#allocation2 + $0x121] sm:$0xff] %v1540_v36  ;;  %4807 = vtanh.f32 %v1446_v54  ;;  %v1258_v16 = vadd.f32 %v5604_v15, %v1219_v47  ;;  %v1222_v3 = vmul.f32 %v5759_v18, %v5598_v22  ;;  %v1220_v45 = vmul.f32 %v5598_v22, %v5764_v6 }
 0x277   : > { %v4802_v51 = vpop.eup %4801  ;;  %v1538_v7 = vmul.f32 %v1506_v53, %v5754_v50  ;;  %4809 = vtanh.f32 %v1449_v23  ;;  %v1447_v49 = vmul.f32 0.7978846, %v1415_v14  ;;  %v1356_v5 = vmul.f32 %v1324_v61, %v1260_v58 }
 0x278   : > { %v1509_v27 = vadd.f32 1.0, %v4802_v51  ;;  %v5811_v41 = vmul.f32 0.5, %v1258_v16  ;;  %v1322_v37 = vmul.f32 %v1258_v16, %v1258_v16  ;;  %v1261_v0 = vadd.f32 %v5604_v15, %v1222_v3 }
 0x279   : > { %1614 = vst [vmem:[#allocation2 + $0x109] sm:$0xff] %v1538_v7  ;;  %4811 = vtanh.f32 %v1447_v49  ;;  %v1388_v18 = vmul.f32 0.044715, %v1356_v5  ;;  %v1259_v19 = vadd.f32 %v5604_v15, %v1220_v45  ;;  %v5817_v22 = vmul.f32 %v5580_v59, %v5808_v30 }
 0x27a   : > { %v1541_v50 = vmul.f32 %v1509_v27, %v5762_v21  ;;  %v1354_v6 = vmul.f32 %v1322_v37, %v1258_v16  ;;  %v5820_v31 = vmul.f32 0.5, %v1261_v0  ;;  %v1325_v4 = vmul.f32 %v1261_v0, %v1261_v0 }
 0x27b   : > { %v4804_v10 = vpop.eup %4803  ;;  %v1420_v32 = vadd.f32 %v1388_v18, %v1260_v58  ;;  %v5826_v48 = vmul.f32 0.5, %v1259_v19  ;;  %v1323_v38 = vmul.f32 %v1259_v19, %v1259_v19  ;;  %v1860_v15 = vrot.slane %v5817_v22, 1  ;;  %v5849_v18 = vld [vmem:[#allocation2 + $0x30] sm:$0xff] }
 0x27c   : > { %1617 = vst [vmem:[#allocation2 + $0x129] sm:$0xff] %v1541_v50  ;;  %v1507_v26 = vadd.f32 1.0, %v4804_v10  ;;  %v1386_v29 = vmul.f32 0.044715, %v1354_v6  ;;  %v1357_v35 = vmul.f32 %v1325_v4, %v1261_v0  ;;  %v5831_v21 = vmul.f32 %v5584_v56, %v5808_v30  ;;  %v5852_v6 = vld [vmem:[#allocation2 + $0x38] sm:$0xff] }
 0x27d   : > { %v1452_v57 = vmul.f32 0.7978846, %v1420_v32  ;;  %v1355_v55 = vmul.f32 %v1323_v38, %v1259_v19  ;;  %v2245_v44 = vmul.f32 %v5622_v43, %v5822_v17  ;;  %v2246_v42 = vmul.f32 %v5622_v43, %v5824_v1  ;;  %v5860_v38 = vld [vmem:[#allocation2 + $0x40] sm:$0x3] }
 0x27e   : > { %v4806_v39 = vpop.eup %4805  ;;  %v1539_v58 = vmul.f32 %v1507_v26, %v5771_v24  ;;  %v1418_v13 = vadd.f32 %v1386_v29, %v1258_v16  ;;  %v1389_v20 = vmul.f32 0.044715, %v1357_v35  ;;  %v2105_v40 = vrot.slane %v5831_v21, 2  ;;  %v5943_v21 = vld [vmem:[#allocation2 + $0x50] sm:$0xff] }
 0x27f   : > { %v1512_v47 = vadd.f32 1.0, %v4806_v39  ;;  %4813 = vtanh.f32 %v1452_v57  ;;  %v1387_v60 = vmul.f32 0.044715, %v1355_v55  ;;  %v2277_v36 = vadd.f32 %v2245_v44, %v5620_v8 }
 0x280   : > { %v4808_v54 = vpop.eup %4807  ;;  %1615 = vst [vmem:[#allocation2 + $0x111] sm:$0xff] %v1539_v58  ;;  %v1450_v53 = vmul.f32 0.7978846, %v1418_v13  ;;  %v1421_v23 = vadd.f32 %v1389_v20, %v1261_v0  ;;  %v2278_v14 = vadd.f32 %v2246_v42, %v5625_v46  ;;  %v2313_v61 = vmul.f32 %v5627_v33, %v5822_v17 }
 0x281   : > { %v4810_v3 = vpop.eup %4809  ;;  %v1544_v24 = vmul.f32 %v1512_v47, %v5781_v11  ;;  %v1510_v16 = vadd.f32 1.0, %v4808_v54  ;;  %v1419_v45 = vadd.f32 %v1387_v60, %v1259_v19  ;;  %v2314_v51 = vmul.f32 %v5627_v33, %v5824_v1 }
 0x282   : > { %v1513_v7 = vadd.f32 1.0, %v4810_v3  ;;  %4815 = vtanh.f32 %v1450_v53  ;;  %v1453_v8 = vmul.f32 0.7978846, %v1421_v23  ;;  %v2315_v49 = vmul.f32 %v5627_v33, %v5808_v30 }
 0x283   : > { %v4812_v5 = vpop.eup %4811  ;;  %1620 = vst [vmem:[#allocation2 + $0x151] sm:$0xff] %v1544_v24  ;;  %v1542_v46 = vmul.f32 %v1510_v16, %v5786_v52  ;;  %v1451_v27 = vmul.f32 0.7978846, %v1419_v45  ;;  %v2409_v37 = vrot.slane %v2313_v61, 1  ;;  %v2410_v0 = vrot.slane %v2314_v51, 1 }
 0x284   : > { %v1545_v11 = vmul.f32 %v1513_v7, %v5788_v62  ;;  %v1511_v19 = vadd.f32 1.0, %v4812_v5  ;;  %4817 = vtanh.f32 %v1453_v8  ;;  %v2412_v50 = vrot.slane %v2315_v49, 1 }
 0x285   : > { %1618 = vst [vmem:[#allocation2 + $0x139] sm:$0xff] %v1542_v46  ;;  %4819 = vtanh.f32 %v1451_v27  ;;  %v2411_v4 = vsel %vm1851_vm1, %v2409_v37, %v2410_v0  ;;  %v2557_v10 = vmul.f32 %v5630_v12, %v5822_v17  ;;  %v2558_v52 = vmul.f32 %v5630_v12, %v5824_v1 }
 0x286   : > { %1621 = vst [vmem:[#allocation2 + $0x159] sm:$0xff] %v1545_v11  ;;  %v1543_v32 = vmul.f32 %v1511_v19, %v5791_v63  ;;  %v2413_v62 = vsel %vm1851_vm1, %v2410_v0, %v2412_v50  ;;  %v2521_v26 = vadd.f32 %v2411_v4, %v2277_v36  ;;  %v2559_v29 = vmul.f32 %v5630_v12, %v5808_v30 }
 0x287   : > { %v2522_v35 = vadd.f32 %v2413_v62, %v2278_v14  ;;  %v2653_v57 = vrot.slane %v2557_v10, 2  ;;  %v2654_v55 = vrot.slane %v2558_v52, 2  ;;  %v2801_v44 = vmul.f32 %v5632_v9, %v5849_v18 }
 0x288   : > { %1619 = vst [vmem:[#allocation2 + $0x141] sm:$0xff] %v1543_v32  ;;  %v2656_v42 = vrot.slane %v2559_v29, 2  ;;  %v2802_v39 = vmul.f32 %v5632_v9, %v5852_v6  ;;  %v2869_v63 = vmul.f32 %v5634_v28, %v5849_v18  ;;  %v2870_v58 = vmul.f32 %v5634_v28, %v5852_v6  ;;  %v5893_v32 = vld [vmem:[%s7357_s7] ss:$0 sm:$0xff] }
 0x289   : > { %v4814_v13 = vpop.eup %4813  ;;  %v2655_v30 = vsel %vm2096_vm2, %v2653_v57, %v2654_v55  ;;  %v2871_v20 = vmul.f32 %v5634_v28, %v5860_v38  ;;  %v3113_v47 = vmul.f32 %v5636_v34, %v5849_v18  ;;  %v3114_v60 = vmul.f32 %v5636_v34, %v5852_v6 }
 0x28a   : > { %v1516_v36 = vadd.f32 1.0, %v4814_v13  ;;  %v2657_v54 = vsel %vm2096_vm2, %v2654_v55, %v2656_v42  ;;  %v2765_v53 = vadd.f32 %v2655_v30, %v2521_v26  ;;  %v2965_v23 = vrot.slane %v2869_v63, 1 }
 0x28b   : > { %v2766_v14 = vadd.f32 %v2657_v54, %v2522_v35  ;;  %v2966_v61 = vrot.slane %v2870_v58, 1  ;;  %v2968_v3 = vrot.slane %v2871_v20, 1  ;;  %v3115_v24 = vmul.f32 %v5636_v34, %v5860_v38 }
 0x28c   : > { %v4816_v16 = vpop.eup %4815  ;;  %v1548_v45 = vmul.f32 %v1516_v36, %v5801_v2  ;;  %v2833_v51 = vadd.f32 %v2801_v44, %v2765_v53  ;;  %v3209_v7 = vrot.slane %v3113_v47, 2  ;;  %v3210_v8 = vrot.slane %v3114_v60, 2  ;;  %v5904_v44 = vld [vmem:[%s7358_s8] ss:$0 sm:$0xff] }
 0x28d   : > { %v1514_v49 = vadd.f32 1.0, %v4816_v16  ;;  %v2834_v5 = vadd.f32 %v2802_v39, %v2766_v14  ;;  %v2967_v46 = vsel %vm1851_vm1, %v2965_v23, %v2966_v61  ;;  %v2969_v27 = vsel %vm1851_vm1, %v2966_v61, %v2968_v3 }
 0x28e   : > { %v4818_v37 = vpop.eup %4817  ;;  %1624 = vst [vmem:[#allocation2 + $0x181] sm:$0xff] %v1548_v45  ;;  %v3077_v0 = vadd.f32 %v2967_v46, %v2833_v51  ;;  %v3211_v11 = vsel %vm2096_vm2, %v3209_v7, %v3210_v8  ;;  %v3212_v19 = vrot.slane %v3115_v24, 2  ;;  %v1689_v50 = vmul.f32 %v5587_v25, %v5822_v17 }
 0x28f   : > { %v4820_v4 = vpop.eup %4819  ;;  %v1546_v2 = vmul.f32 %v1514_v49, %v5811_v41  ;;  %v1517_v10 = vadd.f32 1.0, %v4818_v37  ;;  %v3078_v52 = vadd.f32 %v2969_v27, %v2834_v5  ;;  %v1690_v62 = vmul.f32 %v5587_v25, %v5824_v1 }
 0x290   : > { %v1515_v26 = vadd.f32 1.0, %v4820_v4  ;;  %v3213_v29 = vsel %vm2096_vm2, %v3210_v8, %v3212_v19  ;;  %v3321_v35 = vadd.f32 %v3211_v11, %v3077_v0  ;;  %v1758_v57 = vmul.f32 %v5580_v59, %v5822_v17 }
 0x291   : > { %1622 = vst [vmem:[#allocation2 + $0x169] sm:$0xff] %v1546_v2  ;;  %v1549_v41 = vmul.f32 %v1517_v10, %v5820_v31  ;;  %v3322_v55 = vadd.f32 %v3213_v29, %v3078_v52  ;;  %v1759_v42 = vmul.f32 %v5580_v59, %v5824_v1  ;;  %v2003_v39 = vmul.f32 %v5584_v56, %v5822_v17  ;;  %v5941_v2 = vld [vmem:[#allocation2 + $0x48] sm:$0xff] }
 0x292   : > { %v1547_v63 = vmul.f32 %v1515_v26, %v5826_v48  ;;  %v3360_v58 = vmul.f32 %v5893_v32, %v3321_v35  ;;  %v1857_v13 = vrot.slane %v1758_v57, 1  ;;  %v2004_v31 = vmul.f32 %v5584_v56, %v5824_v1 }
 0x293   : > { %1625 = vst [vmem:[#allocation2 + $0x189] sm:$0xff] %v1549_v41  ;;  %v3361_v30 = vmul.f32 %v5893_v32, %v3322_v55  ;;  %v1858_v20 = vrot.slane %v1759_v42, 1  ;;  %v2102_v47 = vrot.slane %v2003_v39, 2  ;;  %v2247_v60 = vmul.f32 %v5622_v43, %v5849_v18  ;;  %v5951_v55 = vld [vmem:[#allocation2 + $0x58] sm:$0x3] }
 0x294   : > { %1623 = vst [vmem:[#allocation2 + $0x171] sm:$0xff] %v1547_v63  ;;  %v3399_v36 = vadd.f32 %v5904_v44, %v3360_v58  ;;  %v2103_v17 = vrot.slane %v2004_v31, 2  ;;  %v2248_v48 = vmul.f32 %v5622_v43, %v5852_v6  ;;  %v2316_v54 = vmul.f32 %v5627_v33, %v5849_v18 }
 0x295   : > { %v3400_v1 = vadd.f32 %v5904_v44, %v3361_v30  ;;  %v1859_v53 = vsel %vm1851_vm1, %v1857_v13, %v1858_v20  ;;  %v1861_v23 = vsel %vm1851_vm1, %v1858_v20, %v1860_v15  ;;  %v2317_v14 = vmul.f32 %v5627_v33, %v5852_v6 }
 0x296   : > { %v5929_v61 = vmul.f32 0.5, %v3399_v36  ;;  %v3463_v3 = vmul.f32 %v3399_v36, %v3399_v36  ;;  %v1966_v24 = vadd.f32 %v1859_v53, %v1689_v50  ;;  %v1967_v16 = vadd.f32 %v1861_v23, %v1690_v62 }
 0x297   : > { %v5931_v45 = vmul.f32 0.5, %v3400_v1  ;;  %v3464_v51 = vmul.f32 %v3400_v1, %v3400_v1  ;;  %v2104_v7 = vsel %vm2096_vm2, %v2102_v47, %v2103_v17  ;;  %v2106_v8 = vsel %vm2096_vm2, %v2103_v17, %v2105_v40 }
 0x298   : > { %v3495_v22 = vmul.f32 %v3463_v3, %v3399_v36  ;;  %v2211_v49 = vadd.f32 %v2104_v7, %v1966_v24  ;;  %v2212_v15 = vadd.f32 %v2106_v8, %v1967_v16  ;;  %v2318_v5 = vmul.f32 %v5627_v33, %v5860_v38 }
 0x299   : > { %v3496_v46 = vmul.f32 %v3464_v51, %v3400_v1  ;;  %v2414_v27 = vrot.slane %v2316_v54, 1  ;;  %v2415_v37 = vrot.slane %v2317_v14, 1  ;;  %v2560_v0 = vmul.f32 %v5630_v12, %v5849_v18 }
 0x29a   : > { %v3527_v11 = vmul.f32 0.044715, %v3495_v22  ;;  %v2279_v19 = vadd.f32 %v2247_v60, %v2211_v49  ;;  %v2280_v50 = vadd.f32 %v2248_v48, %v2212_v15  ;;  %v2417_v4 = vrot.slane %v2318_v5, 1 }
 0x29b   : > { %v3528_v40 = vmul.f32 0.044715, %v3496_v46  ;;  %v2416_v10 = vsel %vm1851_vm1, %v2414_v27, %v2415_v37  ;;  %v2561_v52 = vmul.f32 %v5630_v12, %v5852_v6  ;;  %v2562_v62 = vmul.f32 %v5630_v12, %v5860_v38 }
 0x29c   : > { %v3559_v26 = vadd.f32 %v3527_v11, %v3399_v36  ;;  %v2418_v29 = vsel %vm1851_vm1, %v2415_v37, %v2417_v4  ;;  %v2523_v35 = vadd.f32 %v2416_v10, %v2279_v19  ;;  %v2658_v57 = vrot.slane %v2560_v0, 2 }
 0x29d   : > { %v3560_v41 = vadd.f32 %v3528_v40, %v3400_v1  ;;  %v2524_v42 = vadd.f32 %v2418_v29, %v2280_v50  ;;  %v2659_v39 = vrot.slane %v2561_v52, 2  ;;  %v2661_v63 = vrot.slane %v2562_v62, 2 }
 0x29e   : > { %v3591_v58 = vmul.f32 0.7978846, %v3559_v26  ;;  %v2803_v13 = vmul.f32 %v5632_v9, %v5941_v2  ;;  %v2804_v31 = vmul.f32 %v5632_v9, %v5943_v21  ;;  %v2872_v30 = vmul.f32 %v5634_v28, %v5941_v2 }
 0x29f   : > { %v3592_v20 = vmul.f32 0.7978846, %v3560_v41  ;;  %v2660_v47 = vsel %vm2096_vm2, %v2658_v57, %v2659_v39  ;;  %v2662_v60 = vsel %vm2096_vm2, %v2659_v39, %v2661_v63  ;;  %v2873_v36 = vmul.f32 %v5634_v28, %v5943_v21 }
 0x2a0   : > { %4821 = vtanh.f32 %v3591_v58  ;;  %v2767_v17 = vadd.f32 %v2660_v47, %v2523_v35  ;;  %v2768_v48 = vadd.f32 %v2662_v60, %v2524_v42  ;;  %v2874_v54 = vmul.f32 %v5634_v28, %v5951_v55 }
 0x2a1   : > { %4823 = vtanh.f32 %v3592_v20  ;;  %v2970_v1 = vrot.slane %v2872_v30, 1  ;;  %v2971_v53 = vrot.slane %v2873_v36, 1  ;;  %v3116_v23 = vmul.f32 %v5636_v34, %v5941_v2 }
 0x2a2   : > { %v2835_v14 = vadd.f32 %v2803_v13, %v2767_v17  ;;  %v2836_v3 = vadd.f32 %v2804_v31, %v2768_v48  ;;  %v2973_v24 = vrot.slane %v2874_v54, 1  ;;  %v3117_v16 = vmul.f32 %v5636_v34, %v5943_v21 }
 0x2a3   : > { %v2972_v51 = vsel %vm1851_vm1, %v2970_v1, %v2971_v53  ;;  %v3118_v7 = vmul.f32 %v5636_v34, %v5951_v55  ;;  %v3214_v8 = vrot.slane %v3116_v23, 2  ;;  %v1691_v22 = vmul.f32 %v5587_v25, %v5849_v18 }
 0x2a4   : > { %v2974_v49 = vsel %vm1851_vm1, %v2971_v53, %v2973_v24  ;;  %v3079_v15 = vadd.f32 %v2972_v51, %v2835_v14  ;;  %v3215_v5 = vrot.slane %v3117_v16, 2  ;;  %v1692_v46 = vmul.f32 %v5587_v25, %v5852_v6 }
 0x2a5   : > { %v3080_v27 = vadd.f32 %v2974_v49, %v2836_v3  ;;  %v3217_v37 = vrot.slane %v3118_v7, 2  ;;  %v1761_v0 = vmul.f32 %v5580_v59, %v5849_v18  ;;  %v1762_v11 = vmul.f32 %v5580_v59, %v5852_v6 }
 0x2a6   : > { %v3216_v19 = vsel %vm2096_vm2, %v3214_v8, %v3215_v5  ;;  %v1763_v50 = vmul.f32 %v5580_v59, %v5860_v38  ;;  %v2006_v4 = vmul.f32 %v5584_v56, %v5849_v18  ;;  %v2007_v40 = vmul.f32 %v5584_v56, %v5852_v6 }
 0x2a7   : > { %v3218_v10 = vsel %vm2096_vm2, %v3215_v5, %v3217_v37  ;;  %v3323_v52 = vadd.f32 %v3216_v19, %v3079_v15  ;;  %v1862_v62 = vrot.slane %v1761_v0, 1  ;;  %v1863_v26 = vrot.slane %v1762_v11, 1 }
 0x2a8   : > { %v3324_v29 = vadd.f32 %v3218_v10, %v3080_v27  ;;  %v1865_v35 = vrot.slane %v1763_v50, 1  ;;  %v2008_v57 = vmul.f32 %v5584_v56, %v5860_v38  ;;  %v2107_v41 = vrot.slane %v2006_v4, 2  ;;  %v6019_v4 = vld [vmem:[#allocation2 + $0x68] sm:$0xff] }
 0x2a9   : > { %v3362_v42 = vmul.f32 %v5893_v32, %v3323_v52  ;;  %v1864_v39 = vsel %vm1851_vm1, %v1862_v62, %v1863_v26  ;;  %v2108_v63 = vrot.slane %v2007_v40, 2  ;;  %v2249_v18 = vmul.f32 %v5622_v43, %v5941_v2 }
 0x2aa   : > { %v4822_v6 = vpop.eup %4821  ;;  %v3363_v58 = vmul.f32 %v5893_v32, %v3324_v29  ;;  %v1866_v13 = vsel %vm1851_vm1, %v1863_v26, %v1865_v35  ;;  %v1968_v31 = vadd.f32 %v1864_v39, %v1691_v22  ;;  %v2110_v30 = vrot.slane %v2008_v57, 2 }
 0x2ab   : > { %v4824_v20 = vpop.eup %4823  ;;  %v3655_v47 = vadd.f32 1.0, %v4822_v6  ;;  %v3401_v38 = vadd.f32 %v5904_v44, %v3362_v42  ;;  %v1969_v60 = vadd.f32 %v1866_v13, %v1692_v46  ;;  %v2109_v36 = vsel %vm2096_vm2, %v2107_v41, %v2108_v63  ;;  %v6013_v46 = vld [vmem:[#allocation2 + $0x60] sm:$0xff]  ;;  %v6028_v41 = vld [vmem:[#allocation2 + $0x70] sm:$0x3] }
 0x2ac   : > { %v3656_v17 = vadd.f32 1.0, %v4824_v20  ;;  %v3402_v48 = vadd.f32 %v5904_v44, %v3363_v58  ;;  %v2111_v54 = vsel %vm2096_vm2, %v2108_v63, %v2110_v30  ;;  %v2213_v1 = vadd.f32 %v2109_v36, %v1968_v31 }
 0x2ad   : > { %v3687_v53 = vmul.f32 %v3655_v47, %v5929_v61  ;;  %v6002_v23 = vmul.f32 0.5, %v3401_v38  ;;  %v3465_v14 = vmul.f32 %v3401_v38, %v3401_v38  ;;  %v2214_v3 = vadd.f32 %v2111_v54, %v1969_v60 }
 0x2ae   : > { %v3688_v24 = vmul.f32 %v3656_v17, %v5931_v45  ;;  %v6005_v16 = vmul.f32 0.5, %v3402_v48  ;;  %v3466_v51 = vmul.f32 %v3402_v48, %v3402_v48  ;;  %v2250_v7 = vmul.f32 %v5622_v43, %v5943_v21 }
 0x2af   : > { %v3497_v8 = vmul.f32 %v3465_v14, %v3401_v38  ;;  %v2281_v22 = vadd.f32 %v2249_v18, %v2213_v1  ;;  %v2319_v49 = vmul.f32 %v5627_v33, %v5941_v2  ;;  %v2320_v61 = vmul.f32 %v5627_v33, %v5943_v21 }
 0x2b0   : > { %v3719_v15 = vpack.c.bf16 %v3688_v24, %v3687_v53  ;;  %v3498_v5 = vmul.f32 %v3466_v51, %v3402_v48  ;;  %v2282_v27 = vadd.f32 %v2250_v7, %v2214_v3  ;;  %v2321_v45 = vmul.f32 %v5627_v33, %v5951_v55 }
 0x2b1   : > { %v3529_v37 = vmul.f32 0.044715, %v3497_v8  ;;  %v2419_v0 = vrot.slane %v2319_v49, 1  ;;  %v2420_v11 = vrot.slane %v2320_v61, 1  ;;  %v2563_v19 = vmul.f32 %v5630_v12, %v5941_v2 }
 0x2b2   : > { %4626 = vmatprep.mubr.bf16.mxu0 %v3719_v15  ;;  %v3530_v50 = vmul.f32 0.044715, %v3498_v5  ;;  %v2422_v40 = vrot.slane %v2321_v45, 1  ;;  %v2564_v10 = vmul.f32 %v5630_v12, %v5943_v21  ;;  %v2565_v52 = vmul.f32 %v5630_v12, %v5951_v55 }
 0x2b3   : > { %v3561_v62 = vadd.f32 %v3529_v37, %v3401_v38  ;;  %v2421_v26 = vsel %vm1851_vm1, %v2419_v0, %v2420_v11  ;;  %v2663_v29 = vrot.slane %v2563_v19, 2  ;;  %v2805_v35 = vmul.f32 %v5632_v9, %v6013_v46 }
 0x2b4   : > { %v3562_v57 = vadd.f32 %v3530_v50, %v3402_v48  ;;  %v2423_v42 = vsel %vm1851_vm1, %v2420_v11, %v2422_v40  ;;  %v2525_v39 = vadd.f32 %v2421_v26, %v2281_v22  ;;  %v2664_v63 = vrot.slane %v2564_v10, 2 }
 0x2b5   : > { %v3593_v18 = vmul.f32 0.7978846, %v3561_v62  ;;  %v2526_v6 = vadd.f32 %v2423_v42, %v2282_v27  ;;  %v2666_v58 = vrot.slane %v2565_v52, 2  ;;  %v2806_v13 = vmul.f32 %v5632_v9, %v6019_v4 }
 0x2b6   : > { %v3594_v31 = vmul.f32 0.7978846, %v3562_v57  ;;  %v2665_v30 = vsel %vm2096_vm2, %v2663_v29, %v2664_v63  ;;  %v2875_v20 = vmul.f32 %v5634_v28, %v6013_v46  ;;  %v2876_v47 = vmul.f32 %v5634_v28, %v6019_v4 }
 0x2b7   : > { %4825 = vtanh.f32 %v3593_v18  ;;  %v2667_v38 = vsel %vm2096_vm2, %v2664_v63, %v2666_v58  ;;  %v2769_v60 = vadd.f32 %v2665_v30, %v2525_v39  ;;  %v2877_v36 = vmul.f32 %v5634_v28, %v6028_v41 }
 0x2b8   : > { %4827 = vtanh.f32 %v3594_v31  ;;  %v2770_v17 = vadd.f32 %v2667_v38, %v2526_v6  ;;  %v2975_v48 = vrot.slane %v2875_v20, 1  ;;  %v2976_v54 = vrot.slane %v2876_v47, 1 }
 0x2b9   : > { %v2837_v1 = vadd.f32 %v2805_v35, %v2769_v60  ;;  %v2978_v53 = vrot.slane %v2877_v36, 1  ;;  %v3119_v14 = vmul.f32 %v5636_v34, %v6013_v46  ;;  %v3120_v3 = vmul.f32 %v5636_v34, %v6019_v4 }
 0x2ba   : > { %v2838_v24 = vadd.f32 %v2806_v13, %v2770_v17  ;;  %v2977_v51 = vsel %vm1851_vm1, %v2975_v48, %v2976_v54  ;;  %v3121_v7 = vmul.f32 %v5636_v34, %v6028_v41  ;;  %v1693_v8 = vmul.f32 %v5587_v25, %v5941_v2 }
 0x2bb   : > { %v2979_v22 = vsel %vm1851_vm1, %v2976_v54, %v2978_v53  ;;  %v3081_v49 = vadd.f32 %v2977_v51, %v2837_v1  ;;  %v3219_v61 = vrot.slane %v3119_v14, 2  ;;  %v3220_v15 = vrot.slane %v3120_v3, 2 }
 0x2bc   : > { %v3082_v5 = vadd.f32 %v2979_v22, %v2838_v24  ;;  %v3222_v27 = vrot.slane %v3121_v7, 2  ;;  %v1694_v45 = vmul.f32 %v5587_v25, %v5943_v21  ;;  %v1764_v37 = vmul.f32 %v5580_v59, %v5941_v2 }
 0x2bd   : > { %v3221_v0 = vsel %vm2096_vm2, %v3219_v61, %v3220_v15  ;;  %v1765_v11 = vmul.f32 %v5580_v59, %v5943_v21  ;;  %v1766_v19 = vmul.f32 %v5580_v59, %v5951_v55  ;;  %v2009_v50 = vmul.f32 %v5584_v56, %v5941_v2  ;;  %v6087_v61 = vld [vmem:[#allocation2 + $0x78] sm:$0xff] }
 0x2be   : > { %v3223_v40 = vsel %vm2096_vm2, %v3220_v15, %v3222_v27  ;;  %v3325_v10 = vadd.f32 %v3221_v0, %v3081_v49  ;;  %v1867_v52 = vrot.slane %v1764_v37, 1  ;;  %v2010_v62 = vmul.f32 %v5584_v56, %v5943_v21 }
 0x2bf   : > { %v3326_v26 = vadd.f32 %v3223_v40, %v3082_v5  ;;  %v1868_v29 = vrot.slane %v1765_v11, 1  ;;  %v1870_v35 = vrot.slane %v1766_v19, 1  ;;  %v2011_v57 = vmul.f32 %v5584_v56, %v5951_v55 }
 0x2c0   : > { %v3364_v42 = vmul.f32 %v5893_v32, %v3325_v10  ;;  %v2112_v39 = vrot.slane %v2009_v50, 2  ;;  %v2113_v63 = vrot.slane %v2010_v62, 2  ;;  %v2251_v2 = vmul.f32 %v5622_v43, %v6013_v46  ;;  %v6097_v10 = vld [vmem:[#allocation2 + $0x80] sm:$0xff] }
 0x2c1   : > { %v4826_v18 = vpop.eup %4825  ;;  %v3365_v6 = vmul.f32 %v5893_v32, %v3326_v26  ;;  %v1869_v58 = vsel %vm1851_vm1, %v1867_v52, %v1868_v29  ;;  %v1871_v21 = vsel %vm1851_vm1, %v1868_v29, %v1870_v35  ;;  %v2115_v13 = vrot.slane %v2011_v57, 2 }
 0x2c2   : > { %v4828_v31 = vpop.eup %4827  ;;  %v3657_v30 = vadd.f32 1.0, %v4826_v18  ;;  %v3403_v20 = vadd.f32 %v5904_v44, %v3364_v42  ;;  %v1970_v55 = vadd.f32 %v1869_v58, %v1693_v8  ;;  %v1971_v47 = vadd.f32 %v1871_v21, %v1694_v45 }
 0x2c3   : > { %v3658_v38 = vadd.f32 1.0, %v4828_v31  ;;  %v3404_v60 = vadd.f32 %v5904_v44, %v3365_v6  ;;  %v2114_v36 = vsel %vm2096_vm2, %v2112_v39, %v2113_v63  ;;  %v2116_v17 = vsel %vm2096_vm2, %v2113_v63, %v2115_v13 }
 0x2c4   : > { %v3689_v48 = vmul.f32 %v3657_v30, %v6002_v23  ;;  %v6078_v54 = vmul.f32 0.5, %v3403_v20  ;;  %v3467_v1 = vmul.f32 %v3403_v20, %v3403_v20  ;;  %v2215_v53 = vadd.f32 %v2114_v36, %v1970_v55 }
 0x2c5   : > { %v3690_v14 = vmul.f32 %v3658_v38, %v6005_v16  ;;  %v6081_v3 = vmul.f32 0.5, %v3404_v60  ;;  %v3468_v24 = vmul.f32 %v3404_v60, %v3404_v60  ;;  %v2216_v51 = vadd.f32 %v2116_v17, %v1971_v47 }
 0x2c6   : > { %v3499_v7 = vmul.f32 %v3467_v1, %v3403_v20  ;;  %v2252_v8 = vmul.f32 %v5622_v43, %v6019_v4  ;;  %v2283_v22 = vadd.f32 %v2251_v2, %v2215_v53  ;;  %v2322_v49 = vmul.f32 %v5627_v33, %v6013_v46  ;;  %v6105_v2 = vld [vmem:[#allocation2 + $0x88] sm:$0x3] }
 0x2c7   : > { %v3720_v23 = vpack.c.bf16 %v3690_v14, %v3689_v48  ;;  %v3500_v15 = vmul.f32 %v3468_v24, %v3404_v60  ;;  %v2323_v5 = vmul.f32 %v5627_v33, %v6019_v4  ;;  %v2324_v16 = vmul.f32 %v5627_v33, %v6028_v41 }
 0x2c8   : > { %v3531_v27 = vmul.f32 0.044715, %v3499_v7  ;;  %v2284_v45 = vadd.f32 %v2252_v8, %v2216_v51  ;;  %v2424_v37 = vrot.slane %v2322_v49, 1  ;;  %v2566_v0 = vmul.f32 %v5630_v12, %v6013_v46 }
 0x2c9   : > { %4627 = vmatmul.mubr.bf16.vlgmr.msra.gmra.mrb[32].mxu0 %v3720_v23  ;;  %v3532_v11 = vmul.f32 0.044715, %v3500_v15  ;;  %v2425_v19 = vrot.slane %v2323_v5, 1  ;;  %v2427_v50 = vrot.slane %v2324_v16, 1  ;;  %v2567_v40 = vmul.f32 %v5630_v12, %v6019_v4 }
 0x2ca   : > { %v3563_v52 = vadd.f32 %v3531_v27, %v3403_v20  ;;  %v2568_v62 = vmul.f32 %v5630_v12, %v6028_v41  ;;  %v2668_v26 = vrot.slane %v2566_v0, 2  ;;  %v2807_v29 = vmul.f32 %v5632_v9, %v6087_v61 }
 0x2cb   : > { %v3564_v35 = vadd.f32 %v3532_v11, %v3404_v60  ;;  %v2426_v57 = vsel %vm1851_vm1, %v2424_v37, %v2425_v19  ;;  %v2428_v42 = vsel %vm1851_vm1, %v2425_v19, %v2427_v50  ;;  %v2669_v39 = vrot.slane %v2567_v40, 2 }
 0x2cc   : > { %v3595_v63 = vmul.f32 0.7978846, %v3563_v52  ;;  %v2527_v18 = vadd.f32 %v2426_v57, %v2283_v22  ;;  %v2528_v6 = vadd.f32 %v2428_v42, %v2284_v45  ;;  %v2671_v58 = vrot.slane %v2568_v62, 2 }
 0x2cd   : > { %v3596_v21 = vmul.f32 0.7978846, %v3564_v35  ;;  %v2670_v13 = vsel %vm2096_vm2, %v2668_v26, %v2669_v39  ;;  %v2808_v31 = vmul.f32 %v5632_v9, %v6097_v10  ;;  %v2878_v30 = vmul.f32 %v5634_v28, %v6087_v61 }
 0x2ce   : > { %4829 = vtanh.f32 %v3595_v63  ;;  %v2672_v20 = vsel %vm2096_vm2, %v2669_v39, %v2671_v58  ;;  %v2771_v55 = vadd.f32 %v2670_v13, %v2527_v18  ;;  %v2879_v47 = vmul.f32 %v5634_v28, %v6097_v10 }
 0x2cf   : > { %4831 = vtanh.f32 %v3596_v21  ;;  %v2772_v38 = vadd.f32 %v2672_v20, %v2528_v6  ;;  %v2880_v60 = vmul.f32 %v5634_v28, %v6105_v2  ;;  %v2980_v36 = vrot.slane %v2878_v30, 1 }
 0x2d0   : > { %v2839_v17 = vadd.f32 %v2807_v29, %v2771_v55  ;;  %v2981_v48 = vrot.slane %v2879_v47, 1  ;;  %v3122_v1 = vmul.f32 %v5636_v34, %v6087_v61  ;;  %v3123_v53 = vmul.f32 %v5636_v34, %v6097_v10 }
 0x2d1   : > { %v2840_v14 = vadd.f32 %v2808_v31, %v2772_v38  ;;  %v2983_v24 = vrot.slane %v2880_v60, 1  ;;  %v3124_v51 = vmul.f32 %v5636_v34, %v6105_v2  ;;  %v1695_v7 = vmul.f32 %v5587_v25, %v6013_v46 }
 0x2d2   : > { %v2982_v8 = vsel %vm1851_vm1, %v2980_v36, %v2981_v48  ;;  %v3224_v22 = vrot.slane %v3122_v1, 2  ;;  %v3225_v49 = vrot.slane %v3123_v53, 2  ;;  %v1696_v23 = vmul.f32 %v5587_v25, %v6019_v4 }
 0x2d3   : > { %v2984_v15 = vsel %vm1851_vm1, %v2981_v48, %v2983_v24  ;;  %v3083_v5 = vadd.f32 %v2982_v8, %v2839_v17  ;;  %v3227_v16 = vrot.slane %v3124_v51, 2  ;;  %v1767_v27 = vmul.f32 %v5580_v59, %v6013_v46 }
 0x2d4   : > { %v3084_v45 = vadd.f32 %v2984_v15, %v2840_v14  ;;  %v3226_v37 = vsel %vm2096_vm2, %v3224_v22, %v3225_v49  ;;  %v1768_v0 = vmul.f32 %v5580_v59, %v6019_v4  ;;  %v1769_v11 = vmul.f32 %v5580_v59, %v6028_v41 }
 0x2d5   : > { %v3228_v19 = vsel %vm2096_vm2, %v3225_v49, %v3227_v16  ;;  %v3327_v50 = vadd.f32 %v3226_v37, %v3083_v5  ;;  %v1872_v40 = vrot.slane %v1767_v27, 1  ;;  %v2012_v52 = vmul.f32 %v5584_v56, %v6013_v46 }
 0x2d6   : > { %v3328_v62 = vadd.f32 %v3228_v19, %v3084_v45  ;;  %v1873_v26 = vrot.slane %v1768_v0, 1  ;;  %v1875_v29 = vrot.slane %v1769_v11, 1  ;;  %v2013_v35 = vmul.f32 %v5584_v56, %v6019_v4 }
 0x2d7   : > { %v3366_v57 = vmul.f32 %v5893_v32, %v3327_v50  ;;  %v2014_v42 = vmul.f32 %v5584_v56, %v6028_v41  ;;  %v2117_v39 = vrot.slane %v2012_v52, 2  ;;  %v2253_v63 = vmul.f32 %v5622_v43, %v6087_v61  ;;  %v6173_v50 = vld [vmem:[#allocation2 + $0x98] sm:$0xff] }
 0x2d8   : > { %v4830_v18 = vpop.eup %4829  ;;  %v3367_v6 = vmul.f32 %v5893_v32, %v3328_v62  ;;  %v1874_v46 = vsel %vm1851_vm1, %v1872_v40, %v1873_v26  ;;  %v1876_v58 = vsel %vm1851_vm1, %v1873_v26, %v1875_v29  ;;  %v2118_v21 = vrot.slane %v2013_v35, 2 }
 0x2d9   : > { %v4832_v13 = vpop.eup %4831  ;;  %v3659_v31 = vadd.f32 1.0, %v4830_v18  ;;  %v3405_v4 = vadd.f32 %v5904_v44, %v3366_v57  ;;  %v1972_v30 = vadd.f32 %v1874_v46, %v1695_v7  ;;  %v1973_v20 = vadd.f32 %v1876_v58, %v1696_v23 }
 0x2da   : > { %v3660_v55 = vadd.f32 1.0, %v4832_v13  ;;  %v3406_v41 = vadd.f32 %v5904_v44, %v3367_v6  ;;  %v2119_v47 = vsel %vm2096_vm2, %v2117_v39, %v2118_v21  ;;  %v2120_v38 = vrot.slane %v2014_v42, 2 }
 0x2db   : > { %v3691_v60 = vmul.f32 %v3659_v31, %v6078_v54  ;;  %v6153_v36 = vmul.f32 0.5, %v3405_v4  ;;  %v3469_v17 = vmul.f32 %v3405_v4, %v3405_v4  ;;  %v2217_v48 = vadd.f32 %v2119_v47, %v1972_v30 }
 0x2dc   : > { %v3692_v1 = vmul.f32 %v3660_v55, %v6081_v3  ;;  %v6156_v53 = vmul.f32 0.5, %v3406_v41  ;;  %v3470_v14 = vmul.f32 %v3406_v41, %v3406_v41  ;;  %v2121_v24 = vsel %vm2096_vm2, %v2118_v21, %v2120_v38  ;;  %v6165_v3 = vld [vmem:[#allocation2 + $0x90] sm:$0xff] }
 0x2dd   : > { %v3501_v51 = vmul.f32 %v3469_v17, %v3405_v4  ;;  %v2218_v7 = vadd.f32 %v2121_v24, %v1973_v20  ;;  %v2254_v8 = vmul.f32 %v5622_v43, %v6097_v10  ;;  %v2285_v22 = vadd.f32 %v2253_v63, %v2217_v48  ;;  %v6180_v63 = vld [vmem:[#allocation2 + $0xa0] sm:$0x3] }
 0x2de   : > { %v3721_v49 = vpack.c.bf16 %v3692_v1, %v3691_v60  ;;  %v3502_v23 = vmul.f32 %v3470_v14, %v3406_v41  ;;  %v2325_v54 = vmul.f32 %v5627_v33, %v6087_v61  ;;  %v2326_v15 = vmul.f32 %v5627_v33, %v6097_v10 }
 0x2df   : > { %v3533_v5 = vmul.f32 0.044715, %v3501_v51  ;;  %v2286_v16 = vadd.f32 %v2254_v8, %v2218_v7  ;;  %v2327_v27 = vmul.f32 %v5627_v33, %v6105_v2  ;;  %v2569_v45 = vmul.f32 %v5630_v12, %v6087_v61 }
 0x2e0   : > { %4630 = vmatprep.mubr.bf16.mxu1 %v3721_v49  ;;  %v3534_v37 = vmul.f32 0.044715, %v3502_v23  ;;  %v2429_v0 = vrot.slane %v2325_v54, 1  ;;  %v2430_v11 = vrot.slane %v2326_v15, 1  ;;  %v2570_v19 = vmul.f32 %v5630_v12, %v6097_v10 }
 0x2e1   : > { %v3565_v40 = vadd.f32 %v3533_v5, %v3405_v4  ;;  %v2432_v52 = vrot.slane %v2327_v27, 1  ;;  %v2571_v62 = vmul.f32 %v5630_v12, %v6105_v2  ;;  %v2673_v26 = vrot.slane %v2569_v45, 2 }
 0x2e2   : > { %v3566_v29 = vadd.f32 %v3534_v37, %v3406_v41  ;;  %v2431_v35 = vsel %vm1851_vm1, %v2429_v0, %v2430_v11  ;;  %v2674_v57 = vrot.slane %v2570_v19, 2  ;;  %v2809_v42 = vmul.f32 %v5632_v9, %v6165_v3 }
 0x2e3   : > { %v3597_v39 = vmul.f32 0.7978846, %v3565_v40  ;;  %v2433_v18 = vsel %vm1851_vm1, %v2430_v11, %v2432_v52  ;;  %v2529_v6 = vadd.f32 %v2431_v35, %v2285_v22  ;;  %v2676_v46 = vrot.slane %v2571_v62, 2 }
 0x2e4   : > { %v3598_v58 = vmul.f32 0.7978846, %v3566_v29  ;;  %v2530_v21 = vadd.f32 %v2433_v18, %v2286_v16  ;;  %v2675_v13 = vsel %vm2096_vm2, %v2673_v26, %v2674_v57  ;;  %v2810_v31 = vmul.f32 %v5632_v9, %v6173_v50 }
 0x2e5   : > { %4833 = vtanh.f32 %v3597_v39  ;;  %v2677_v4 = vsel %vm2096_vm2, %v2674_v57, %v2676_v46  ;;  %v2773_v30 = vadd.f32 %v2675_v13, %v2529_v6  ;;  %v2881_v20 = vmul.f32 %v5634_v28, %v6165_v3 }
 0x2e6   : > { %4835 = vtanh.f32 %v3598_v58  ;;  %v2774_v55 = vadd.f32 %v2677_v4, %v2530_v21  ;;  %v2882_v41 = vmul.f32 %v5634_v28, %v6173_v50  ;;  %v2883_v47 = vmul.f32 %v5634_v28, %v6180_v63 }
 0x2e7   : > { %v2841_v38 = vadd.f32 %v2809_v42, %v2773_v30  ;;  %v2985_v60 = vrot.slane %v2881_v20, 1  ;;  %v3125_v17 = vmul.f32 %v5636_v34, %v6165_v3  ;;  %v3126_v48 = vmul.f32 %v5636_v34, %v6173_v50 }
 0x2e8   : > { %v2842_v1 = vadd.f32 %v2810_v31, %v2774_v55  ;;  %v2986_v14 = vrot.slane %v2882_v41, 1  ;;  %v2988_v24 = vrot.slane %v2883_v47, 1  ;;  %v3127_v51 = vmul.f32 %v5636_v34, %v6180_v63 }
 0x2e9   : > { %v3229_v7 = vrot.slane %v3125_v17, 2  ;;  %v3230_v8 = vrot.slane %v3126_v48, 2  ;;  %v1697_v22 = vmul.f32 %v5587_v25, %v6087_v61  ;;  %v1698_v49 = vmul.f32 %v5587_v25, %v6097_v10 }
 0x2ea   : > { %v2987_v23 = vsel %vm1851_vm1, %v2985_v60, %v2986_v14  ;;  %v2989_v54 = vsel %vm1851_vm1, %v2986_v14, %v2988_v24  ;;  %v3232_v15 = vrot.slane %v3127_v51, 2  ;;  %v1770_v5 = vmul.f32 %v5580_v59, %v6087_v61 }
 0x2eb   : > { %v3085_v16 = vadd.f32 %v2987_v23, %v2841_v38  ;;  %v3086_v27 = vadd.f32 %v2989_v54, %v2842_v1  ;;  %v3231_v45 = vsel %vm2096_vm2, %v3229_v7, %v3230_v8  ;;  %v1771_v37 = vmul.f32 %v5580_v59, %v6097_v10 }
 0x2ec   : > { %v3233_v0 = vsel %vm2096_vm2, %v3230_v8, %v3232_v15  ;;  %v1772_v11 = vmul.f32 %v5580_v59, %v6105_v2  ;;  %v1877_v19 = vrot.slane %v1770_v5, 1  ;;  %v2015_v40 = vmul.f32 %v5584_v56, %v6087_v61  ;;  %v6239_v8 = vld [vmem:[#allocation2 + $0xa8] sm:$0xff] }
 0x2ed   : > { %v3329_v52 = vadd.f32 %v3231_v45, %v3085_v16  ;;  %v3330_v62 = vadd.f32 %v3233_v0, %v3086_v27  ;;  %v1878_v26 = vrot.slane %v1771_v37, 1  ;;  %v2016_v29 = vmul.f32 %v5584_v56, %v6097_v10 }
 0x2ee   : > { %v1880_v35 = vrot.slane %v1772_v11, 1  ;;  %v2017_v57 = vmul.f32 %v5584_v56, %v6105_v2  ;;  %v2122_v42 = vrot.slane %v2015_v40, 2  ;;  %v2255_v39 = vmul.f32 %v5622_v43, %v6165_v3  ;;  %v6247_v11 = vld [vmem:[#allocation2 + $0xb0] sm:$0xff] }
 0x2ef   : > { %v4834_v18 = vpop.eup %4833  ;;  %v3368_v6 = vmul.f32 %v5893_v32, %v3329_v52  ;;  %v3369_v46 = vmul.f32 %v5893_v32, %v3330_v62  ;;  %v1879_v61 = vsel %vm1851_vm1, %v1877_v19, %v1878_v26  ;;  %v2123_v58 = vrot.slane %v2016_v29, 2  ;;  %v6255_v29 = vld [vmem:[#allocation2 + $0xb8] sm:$0x3] }
 0x2f0   : > { %v4836_v21 = vpop.eup %4835  ;;  %v3661_v13 = vadd.f32 1.0, %v4834_v18  ;;  %v1881_v10 = vsel %vm1851_vm1, %v1878_v26, %v1880_v35  ;;  %v1974_v31 = vadd.f32 %v1879_v61, %v1697_v22  ;;  %v2125_v4 = vrot.slane %v2017_v57, 2 }
 0x2f1   : > { %v3662_v30 = vadd.f32 1.0, %v4836_v21  ;;  %v3407_v2 = vadd.f32 %v5904_v44, %v3368_v6  ;;  %v3408_v20 = vadd.f32 %v5904_v44, %v3369_v46  ;;  %v1975_v55 = vadd.f32 %v1881_v10, %v1698_v49 }
 0x2f2   : > { %v3693_v41 = vmul.f32 %v3661_v13, %v6153_v36  ;;  %v2124_v47 = vsel %vm2096_vm2, %v2122_v42, %v2123_v58  ;;  %v2126_v38 = vsel %vm2096_vm2, %v2123_v58, %v2125_v4  ;;  %v2256_v60 = vmul.f32 %v5622_v43, %v6173_v50 }
 0x2f3   : > { %v3694_v17 = vmul.f32 %v3662_v30, %v6156_v53  ;;  %v6233_v48 = vmul.f32 0.5, %v3407_v2  ;;  %v6235_v1 = vmul.f32 0.5, %v3408_v20  ;;  %v3471_v14 = vmul.f32 %v3407_v2, %v3407_v2 }
 0x2f4   : > { %v3472_v24 = vmul.f32 %v3408_v20, %v3408_v20  ;;  %v2219_v51 = vadd.f32 %v2124_v47, %v1974_v31  ;;  %v2220_v7 = vadd.f32 %v2126_v38, %v1975_v55  ;;  %v2328_v36 = vmul.f32 %v5627_v33, %v6165_v3 }
 0x2f5   : > { %v3722_v22 = vpack.c.bf16 %v3694_v17, %v3693_v41  ;;  %v3503_v49 = vmul.f32 %v3471_v14, %v3407_v2  ;;  %v2329_v23 = vmul.f32 %v5627_v33, %v6173_v50  ;;  %v2330_v53 = vmul.f32 %v5627_v33, %v6180_v63 }
 0x2f6   : > { %v3504_v54 = vmul.f32 %v3472_v24, %v3408_v20  ;;  %v2287_v15 = vadd.f32 %v2255_v39, %v2219_v51  ;;  %v2288_v5 = vadd.f32 %v2256_v60, %v2220_v7  ;;  %v2434_v16 = vrot.slane %v2328_v36, 1 }
 0x2f7   : > { %4631 = vmatmul.mubr.bf16.vlgmr.msra.gmra.mrb[0].mxu1 %v3722_v22  ;;  %v3535_v27 = vmul.f32 0.044715, %v3503_v49  ;;  %v2435_v45 = vrot.slane %v2329_v23, 1  ;;  %v2437_v37 = vrot.slane %v2330_v53, 1  ;;  %v2572_v0 = vmul.f32 %v5630_v12, %v6165_v3 }
 0x2f8   : > { %v3536_v19 = vmul.f32 0.044715, %v3504_v54  ;;  %v2573_v40 = vmul.f32 %v5630_v12, %v6173_v50  ;;  %v2574_v52 = vmul.f32 %v5630_v12, %v6180_v63  ;;  %v2811_v62 = vmul.f32 %v5632_v9, %v6239_v8 }
 0x2f9   : > { %v3567_v26 = vadd.f32 %v3535_v27, %v3407_v2  ;;  %v2436_v35 = vsel %vm1851_vm1, %v2434_v16, %v2435_v45  ;;  %v2438_v57 = vsel %vm1851_vm1, %v2435_v45, %v2437_v37  ;;  %v2678_v42 = vrot.slane %v2572_v0, 2 }
 0x2fa   : > { %v3568_v39 = vadd.f32 %v3536_v19, %v3408_v20  ;;  %v2531_v18 = vadd.f32 %v2436_v35, %v2287_v15  ;;  %v2532_v6 = vadd.f32 %v2438_v57, %v2288_v5  ;;  %v2679_v46 = vrot.slane %v2573_v40, 2 }
 0x2fb   : > { %v3599_v61 = vmul.f32 0.7978846, %v3567_v26  ;;  %v2681_v58 = vrot.slane %v2574_v52, 2  ;;  %v2812_v21 = vmul.f32 %v5632_v9, %v6247_v11  ;;  %v2884_v13 = vmul.f32 %v5634_v28, %v6239_v8 }
 0x2fc   : > { %v3600_v10 = vmul.f32 0.7978846, %v3568_v39  ;;  %v2680_v31 = vsel %vm2096_vm2, %v2678_v42, %v2679_v46  ;;  %v2885_v4 = vmul.f32 %v5634_v28, %v6247_v11  ;;  %v2886_v30 = vmul.f32 %v5634_v28, %v6255_v29 }
 0x2fd   : > { %4837 = vtanh.f32 %v3599_v61  ;;  %v2682_v2 = vsel %vm2096_vm2, %v2679_v46, %v2681_v58  ;;  %v2775_v20 = vadd.f32 %v2680_v31, %v2531_v18  ;;  %v2990_v55 = vrot.slane %v2884_v13, 1 }
 0x2fe   : > { %4839 = vtanh.f32 %v3600_v10  ;;  %v2776_v41 = vadd.f32 %v2682_v2, %v2532_v6  ;;  %v2991_v47 = vrot.slane %v2885_v4, 1  ;;  %v2993_v38 = vrot.slane %v2886_v30, 1 }
 0x2ff   : > { %v2843_v60 = vadd.f32 %v2811_v62, %v2775_v20  ;;  %v3128_v17 = vmul.f32 %v5636_v34, %v6239_v8  ;;  %v3129_v14 = vmul.f32 %v5636_v34, %v6247_v11  ;;  %v3130_v24 = vmul.f32 %v5636_v34, %v6255_v29 }
 0x300   : > { %v2844_v51 = vadd.f32 %v2812_v21, %v2776_v41  ;;  %v2992_v7 = vsel %vm1851_vm1, %v2990_v55, %v2991_v47  ;;  %v2994_v36 = vsel %vm1851_vm1, %v2991_v47, %v2993_v38  ;;  %v1699_v22 = vmul.f32 %v5587_v25, %v6165_v3 }
 0x301   : > { %v3087_v49 = vadd.f32 %v2992_v7, %v2843_v60  ;;  %v3234_v23 = vrot.slane %v3128_v17, 2  ;;  %v3235_v53 = vrot.slane %v3129_v14, 2  ;;  %v3237_v54 = vrot.slane %v3130_v24, 2 }
 0x302   : > { %v3088_v15 = vadd.f32 %v2994_v36, %v2844_v51  ;;  %v1700_v5 = vmul.f32 %v5587_v25, %v6173_v50  ;;  %v1773_v16 = vmul.f32 %v5580_v59, %v6165_v3  ;;  %v1774_v27 = vmul.f32 %v5580_v59, %v6173_v50 }
 0x303   : > { %v3236_v45 = vsel %vm2096_vm2, %v3234_v23, %v3235_v53  ;;  %v3238_v37 = vsel %vm2096_vm2, %v3235_v53, %v3237_v54  ;;  %v1775_v0 = vmul.f32 %v5580_v59, %v6180_v63  ;;  %v2018_v19 = vmul.f32 %v5584_v56, %v6165_v3 }
 0x304   : > { %v3331_v40 = vadd.f32 %v3236_v45, %v3087_v49  ;;  %v3332_v52 = vadd.f32 %v3238_v37, %v3088_v15  ;;  %v1882_v62 = vrot.slane %v1773_v16, 1  ;;  %v1883_v26 = vrot.slane %v1774_v27, 1  ;;  %v6321_v27 = vld [vmem:[#allocation2 + $0xc8] sm:$0xff] }
 0x305   : > { %v1885_v35 = vrot.slane %v1775_v0, 1  ;;  %v2019_v57 = vmul.f32 %v5584_v56, %v6173_v50  ;;  %v2020_v42 = vmul.f32 %v5584_v56, %v6180_v63  ;;  %v2127_v39 = vrot.slane %v2018_v19, 2 }
 0x306   : > { %v3370_v18 = vmul.f32 %v5893_v32, %v3331_v40  ;;  %v3371_v6 = vmul.f32 %v5893_v32, %v3332_v52  ;;  %v1884_v46 = vsel %vm1851_vm1, %v1882_v62, %v1883_v26  ;;  %v2257_v3 = vmul.f32 %v5622_v43, %v6239_v8  ;;  %v6329_v52 = vld [vmem:[#allocation2 + $0xd0] sm:$0x3] }
 0x307   : > { %v4838_v61 = vpop.eup %4837  ;;  %v1886_v58 = vsel %vm1851_vm1, %v1883_v26, %v1885_v35  ;;  %v1976_v21 = vadd.f32 %v1884_v46, %v1699_v22  ;;  %v2128_v13 = vrot.slane %v2019_v57, 2  ;;  %v2130_v10 = vrot.slane %v2020_v42, 2  ;;  %v6319_v22 = vld [vmem:[#allocation2 + $0xc0] sm:$0xff] }
 0x308   : > { %v4840_v50 = vpop.eup %4839  ;;  %v3663_v31 = vadd.f32 1.0, %v4838_v61  ;;  %v3409_v63 = vadd.f32 %v5904_v44, %v3370_v18  ;;  %v3410_v4 = vadd.f32 %v5904_v44, %v3371_v6  ;;  %v1977_v30 = vadd.f32 %v1886_v58, %v1700_v5 }
 0x309   : > { %v3664_v2 = vadd.f32 1.0, %v4840_v50  ;;  %v2129_v32 = vsel %vm2096_vm2, %v2127_v39, %v2128_v13  ;;  %v2131_v20 = vsel %vm2096_vm2, %v2128_v13, %v2130_v10  ;;  %v2258_v55 = vmul.f32 %v5622_v43, %v6247_v11 }
 0x30a   : > { %v3695_v41 = vmul.f32 %v3663_v31, %v6233_v48  ;;  %v6308_v47 = vmul.f32 0.5, %v3409_v63  ;;  %v6310_v38 = vmul.f32 0.5, %v3410_v4  ;;  %v3473_v60 = vmul.f32 %v3409_v63, %v3409_v63 }
 0x30b   : > { %v3696_v17 = vmul.f32 %v3664_v2, %v6235_v1  ;;  %v3474_v14 = vmul.f32 %v3410_v4, %v3410_v4  ;;  %v2221_v44 = vadd.f32 %v2129_v32, %v1976_v21  ;;  %v2222_v24 = vadd.f32 %v2131_v20, %v1977_v30 }
 0x30c   : > { %v3505_v51 = vmul.f32 %v3473_v60, %v3409_v63  ;;  %v2331_v7 = vmul.f32 %v5627_v33, %v6239_v8  ;;  %v2332_v36 = vmul.f32 %v5627_v33, %v6247_v11  ;;  %v2333_v48 = vmul.f32 %v5627_v33, %v6255_v29 }
 0x30d   : > { %v3723_v49 = vpack.c.bf16 %v3696_v17, %v3695_v41  ;;  %v3506_v23 = vmul.f32 %v3474_v14, %v3410_v4  ;;  %v2289_v53 = vadd.f32 %v2257_v3, %v2221_v44  ;;  %v2290_v54 = vadd.f32 %v2258_v55, %v2222_v24 }
 0x30e   : > { %v3537_v1 = vmul.f32 0.044715, %v3505_v51  ;;  %v2439_v15 = vrot.slane %v2331_v7, 1  ;;  %v2440_v5 = vrot.slane %v2332_v36, 1  ;;  %v2442_v16 = vrot.slane %v2333_v48, 1 }
 0x30f   : > { %4634 = vmatprep.mubr.bf16.mxu1 %v3723_v49  ;;  %v3538_v45 = vmul.f32 0.044715, %v3506_v23  ;;  %v2575_v37 = vmul.f32 %v5630_v12, %v6239_v8  ;;  %v2576_v0 = vmul.f32 %v5630_v12, %v6247_v11  ;;  %v2577_v19 = vmul.f32 %v5630_v12, %v6255_v29 }
 0x310   : > { %v3569_v40 = vadd.f32 %v3537_v1, %v3409_v63  ;;  %v2441_v62 = vsel %vm1851_vm1, %v2439_v15, %v2440_v5  ;;  %v2443_v26 = vsel %vm1851_vm1, %v2440_v5, %v2442_v16  ;;  %v2813_v35 = vmul.f32 %v5632_v9, %v6319_v22 }
 0x311   : > { %v3570_v57 = vadd.f32 %v3538_v45, %v3410_v4  ;;  %v2533_v42 = vadd.f32 %v2441_v62, %v2289_v53  ;;  %v2534_v39 = vadd.f32 %v2443_v26, %v2290_v54  ;;  %v2683_v18 = vrot.slane %v2575_v37, 2 }
 0x312   : > { %v3601_v6 = vmul.f32 0.7978846, %v3569_v40  ;;  %v2684_v46 = vrot.slane %v2576_v0, 2  ;;  %v2686_v3 = vrot.slane %v2577_v19, 2  ;;  %v2814_v61 = vmul.f32 %v5632_v9, %v6321_v27 }
 0x313   : > { %v3602_v58 = vmul.f32 0.7978846, %v3570_v57  ;;  %v2887_v21 = vmul.f32 %v5634_v28, %v6319_v22  ;;  %v2888_v13 = vmul.f32 %v5634_v28, %v6321_v27  ;;  %v2889_v10 = vmul.f32 %v5634_v28, %v6329_v52 }
 0x314   : > { %4841 = vtanh.f32 %v3601_v6  ;;  %v2685_v50 = vsel %vm2096_vm2, %v2683_v18, %v2684_v46  ;;  %v2687_v31 = vsel %vm2096_vm2, %v2684_v46, %v2686_v3  ;;  %v3131_v63 = vmul.f32 %v5636_v34, %v6319_v22 }
 0x315   : > { %4843 = vtanh.f32 %v3602_v58  ;;  %v2777_v4 = vadd.f32 %v2685_v50, %v2533_v42  ;;  %v2778_v30 = vadd.f32 %v2687_v31, %v2534_v39  ;;  %v2995_v2 = vrot.slane %v2887_v21, 1  ;;  %v6385_v58 = vld [vmem:[%s7358_s8] ss:$0 sm:$0xff] }
 0x316   : > { %v2996_v32 = vrot.slane %v2888_v13, 1  ;;  %v2998_v20 = vrot.slane %v2889_v10, 1  ;;  %v3132_v55 = vmul.f32 %v5636_v34, %v6321_v27  ;;  %v3133_v41 = vmul.f32 %v5636_v34, %v6329_v52 }
 0x317   : > { %v2845_v60 = vadd.f32 %v2813_v35, %v2777_v4  ;;  %v2846_v17 = vadd.f32 %v2814_v61, %v2778_v30  ;;  %v3239_v14 = vrot.slane %v3131_v63, 2  ;;  %v1701_v44 = vmul.f32 %v5587_v25, %v6239_v8  ;;  %v6374_v35 = vld [vmem:[%s7357_s7] ss:$0 sm:$0xff] }
 0x318   : > { %v2997_v24 = vsel %vm1851_vm1, %v2995_v2, %v2996_v32  ;;  %v2999_v51 = vsel %vm1851_vm1, %v2996_v32, %v2998_v20  ;;  %v3240_v7 = vrot.slane %v3132_v55, 2  ;;  %v3242_v36 = vrot.slane %v3133_v41, 2 }
 0x319   : > { %v3089_v48 = vadd.f32 %v2997_v24, %v2845_v60  ;;  %v3090_v49 = vadd.f32 %v2999_v51, %v2846_v17  ;;  %v1702_v23 = vmul.f32 %v5587_v25, %v6247_v11  ;;  %v1776_v53 = vmul.f32 %v5580_v59, %v6239_v8  ;;  %v6403_v51 = vld [vmem:[#allocation2 + $0xd8] sm:$0xff] }
 0x31a   : > { %v3241_v54 = vsel %vm2096_vm2, %v3239_v14, %v3240_v7  ;;  %v3243_v1 = vsel %vm2096_vm2, %v3240_v7, %v3242_v36  ;;  %v1777_v15 = vmul.f32 %v5580_v59, %v6247_v11  ;;  %v1778_v5 = vmul.f32 %v5580_v59, %v6255_v29 }
 0x31b   : > { %v3333_v16 = vadd.f32 %v3241_v54, %v3089_v48  ;;  %v3334_v45 = vadd.f32 %v3243_v1, %v3090_v49  ;;  %v1887_v37 = vrot.slane %v1776_v53, 1  ;;  %v2021_v0 = vmul.f32 %v5584_v56, %v6239_v8 }
 0x31c   : > { %v1888_v19 = vrot.slane %v1777_v15, 1  ;;  %v1890_v40 = vrot.slane %v1778_v5, 1  ;;  %v2022_v62 = vmul.f32 %v5584_v56, %v6247_v11  ;;  %v2023_v26 = vmul.f32 %v5584_v56, %v6255_v29 }
 0x31d   : > { %v3372_v57 = vmul.f32 %v6374_v35, %v3333_v16  ;;  %v3373_v42 = vmul.f32 %v6374_v35, %v3334_v45  ;;  %v2132_v39 = vrot.slane %v2021_v0, 2  ;;  %v2259_v8 = vmul.f32 %v5622_v43, %v6319_v22  ;;  %v6411_v45 = vld [vmem:[#allocation2 + $0xe0] sm:$0xff] }
 0x31e   : > { %v4842_v18 = vpop.eup %4841  ;;  %v1889_v6 = vsel %vm1851_vm1, %v1887_v37, %v1888_v19  ;;  %v1891_v11 = vsel %vm1851_vm1, %v1888_v19, %v1890_v40  ;;  %v2133_v46 = vrot.slane %v2022_v62, 2  ;;  %v2135_v29 = vrot.slane %v2023_v26, 2  ;;  %v6418_v26 = vld [vmem:[#allocation2 + $0xe8] sm:$0x3] }
 0x31f   : > { %v4844_v3 = vpop.eup %4843  ;;  %v3665_v61 = vadd.f32 1.0, %v4842_v18  ;;  %v3411_v21 = vadd.f32 %v6385_v58, %v3372_v57  ;;  %v3412_v13 = vadd.f32 %v6385_v58, %v3373_v42  ;;  %v1978_v10 = vadd.f32 %v1889_v6, %v1701_v44 }
 0x320   : > { %v3666_v50 = vadd.f32 1.0, %v4844_v3  ;;  %v1979_v31 = vadd.f32 %v1891_v11, %v1702_v23  ;;  %v2134_v63 = vsel %vm2096_vm2, %v2132_v39, %v2133_v46  ;;  %v2136_v4 = vsel %vm2096_vm2, %v2133_v46, %v2135_v29 }
 0x321   : > { %v3697_v30 = vmul.f32 %v3665_v61, %v6308_v47  ;;  %v6392_v2 = vmul.f32 0.5, %v3411_v21  ;;  %v6394_v32 = vmul.f32 0.5, %v3412_v13  ;;  %v3475_v20 = vmul.f32 %v3411_v21, %v3411_v21 }
 0x322   : > { %v3698_v55 = vmul.f32 %v3666_v50, %v6310_v38  ;;  %v3476_v41 = vmul.f32 %v3412_v13, %v3412_v13  ;;  %v2223_v60 = vadd.f32 %v2134_v63, %v1978_v10  ;;  %v2224_v17 = vadd.f32 %v2136_v4, %v1979_v31 }
 0x323   : > { %v3507_v14 = vmul.f32 %v3475_v20, %v3411_v21  ;;  %v2260_v44 = vmul.f32 %v5622_v43, %v6321_v27  ;;  %v2334_v24 = vmul.f32 %v5627_v33, %v6319_v22  ;;  %v2335_v47 = vmul.f32 %v5627_v33, %v6321_v27 }
 0x324   : > { %v3724_v7 = vpack.c.bf16 %v3698_v55, %v3697_v30  ;;  %v3508_v36 = vmul.f32 %v3476_v41, %v3412_v13  ;;  %v2291_v48 = vadd.f32 %v2259_v8, %v2223_v60  ;;  %v2336_v38 = vmul.f32 %v5627_v33, %v6329_v52 }
 0x325   : > { %v3539_v49 = vmul.f32 0.044715, %v3507_v14  ;;  %v2292_v23 = vadd.f32 %v2260_v44, %v2224_v17  ;;  %v2444_v53 = vrot.slane %v2334_v24, 1  ;;  %v2445_v54 = vrot.slane %v2335_v47, 1 }
 0x326   : > { %4635 = vmatmul.mubr.bf16.gmra.mrb[4].mxu1 %v3724_v7  ;;  %v3540_v1 = vmul.f32 0.044715, %v3508_v36  ;;  %v2447_v15 = vrot.slane %v2336_v38, 1  ;;  %v2578_v5 = vmul.f32 %v5630_v12, %v6319_v22  ;;  %v2579_v16 = vmul.f32 %v5630_v12, %v6321_v27 }
 0x327   : > { %v3571_v37 = vadd.f32 %v3539_v49, %v3411_v21  ;;  %v2446_v0 = vsel %vm1851_vm1, %v2444_v53, %v2445_v54  ;;  %v2580_v19 = vmul.f32 %v5630_v12, %v6329_v52  ;;  %v2815_v40 = vmul.f32 %v5632_v9, %v6403_v51 }
 0x328   : > { %v3572_v62 = vadd.f32 %v3540_v1, %v3412_v13  ;;  %v2448_v57 = vsel %vm1851_vm1, %v2445_v54, %v2447_v15  ;;  %v2535_v42 = vadd.f32 %v2446_v0, %v2291_v48  ;;  %v2688_v39 = vrot.slane %v2578_v5, 2 }
 0x329   : > { %v3603_v8 = vmul.f32 0.7978846, %v3571_v37  ;;  %v2536_v18 = vadd.f32 %v2448_v57, %v2292_v23  ;;  %v2689_v6 = vrot.slane %v2579_v16, 2  ;;  %v2691_v11 = vrot.slane %v2580_v19, 2 }
 0x32a   : > { %v3604_v46 = vmul.f32 0.7978846, %v3572_v62  ;;  %v2816_v29 = vmul.f32 %v5632_v9, %v6411_v45  ;;  %v2890_v3 = vmul.f32 %v5634_v28, %v6403_v51  ;;  %v2891_v61 = vmul.f32 %v5634_v28, %v6411_v45 }
 0x32b   : > { %4845 = vtanh.f32 %v3603_v8  ;;  %v2690_v21 = vsel %vm2096_vm2, %v2688_v39, %v2689_v6  ;;  %v2692_v13 = vsel %vm2096_vm2, %v2689_v6, %v2691_v11  ;;  %v2892_v10 = vmul.f32 %v5634_v28, %v6418_v26 }
 0x32c   : > { %4847 = vtanh.f32 %v3604_v46  ;;  %v2779_v50 = vadd.f32 %v2690_v21, %v2535_v42  ;;  %v2780_v31 = vadd.f32 %v2692_v13, %v2536_v18  ;;  %v3000_v63 = vrot.slane %v2890_v3, 1 }
 0x32d   : > { %v3001_v4 = vrot.slane %v2891_v61, 1  ;;  %v3003_v30 = vrot.slane %v2892_v10, 1  ;;  %v3134_v20 = vmul.f32 %v5636_v34, %v6403_v51  ;;  %v3135_v55 = vmul.f32 %v5636_v34, %v6411_v45 }
 0x32e   : > { %v2847_v41 = vadd.f32 %v2815_v40, %v2779_v50  ;;  %v2848_v60 = vadd.f32 %v2816_v29, %v2780_v31  ;;  %v3136_v17 = vmul.f32 %v5636_v34, %v6418_v26  ;;  %v1703_v14 = vmul.f32 %v5587_v25, %v6319_v22 }
 0x32f   : > { %v3002_v44 = vsel %vm1851_vm1, %v3000_v63, %v3001_v4  ;;  %v3004_v24 = vsel %vm1851_vm1, %v3001_v4, %v3003_v30  ;;  %v3244_v47 = vrot.slane %v3134_v20, 2  ;;  %v3245_v7 = vrot.slane %v3135_v55, 2 }
 0x330   : > { %v3091_v36 = vadd.f32 %v3002_v44, %v2847_v41  ;;  %v3092_v48 = vadd.f32 %v3004_v24, %v2848_v60  ;;  %v3247_v38 = vrot.slane %v3136_v17, 2  ;;  %v1704_v49 = vmul.f32 %v5587_v25, %v6321_v27 }
 0x331   : > { %v3246_v23 = vsel %vm2096_vm2, %v3244_v47, %v3245_v7  ;;  %v1779_v53 = vmul.f32 %v5580_v59, %v6319_v22  ;;  %v1780_v54 = vmul.f32 %v5580_v59, %v6321_v27  ;;  %v1781_v1 = vmul.f32 %v5580_v59, %v6329_v52 }
 0x332   : > { %v3248_v15 = vsel %vm2096_vm2, %v3245_v7, %v3247_v38  ;;  %v3335_v5 = vadd.f32 %v3246_v23, %v3091_v36  ;;  %v2024_v16 = vmul.f32 %v5584_v56, %v6319_v22  ;;  %v2025_v37 = vmul.f32 %v5584_v56, %v6321_v27 }
 0x333   : > { %v3336_v0 = vadd.f32 %v3248_v15, %v3092_v48  ;;  %v1892_v19 = vrot.slane %v1779_v53, 1  ;;  %v1893_v40 = vrot.slane %v1780_v54, 1  ;;  %v1895_v62 = vrot.slane %v1781_v1, 1 }
 0x334   : > { %v3374_v57 = vmul.f32 %v6374_v35, %v3335_v5  ;;  %v2026_v42 = vmul.f32 %v5584_v56, %v6329_v52  ;;  %v2137_v39 = vrot.slane %v2024_v16, 2  ;;  %v2138_v8 = vrot.slane %v2025_v37, 2  ;;  %v6487_v5 = vld [vmem:[#allocation2 + $0xf8] sm:$0xff] }
 0x335   : > { %v4846_v18 = vpop.eup %4845  ;;  %v3375_v6 = vmul.f32 %v6374_v35, %v3336_v0  ;;  %v1894_v11 = vsel %vm1851_vm1, %v1892_v19, %v1893_v40  ;;  %v1896_v22 = vsel %vm1851_vm1, %v1893_v40, %v1895_v62  ;;  %v2261_v27 = vmul.f32 %v5622_v43, %v6403_v51 }
 0x336   : > { %v4848_v46 = vpop.eup %4847  ;;  %v3667_v29 = vadd.f32 1.0, %v4846_v18  ;;  %v3413_v3 = vadd.f32 %v6385_v58, %v3374_v57  ;;  %v1980_v61 = vadd.f32 %v1894_v11, %v1703_v14  ;;  %v1981_v21 = vadd.f32 %v1896_v22, %v1704_v49 }
 0x337   : > { %v3668_v13 = vadd.f32 1.0, %v4848_v46  ;;  %v3414_v52 = vadd.f32 %v6385_v58, %v3375_v6  ;;  %v2139_v10 = vsel %vm2096_vm2, %v2137_v39, %v2138_v8  ;;  %v2140_v50 = vrot.slane %v2026_v42, 2 }
 0x338   : > { %v3699_v31 = vmul.f32 %v3667_v29, %v6392_v2  ;;  %v6467_v63 = vmul.f32 0.5, %v3413_v3  ;;  %v3477_v4 = vmul.f32 %v3413_v3, %v3413_v3  ;;  %v2225_v30 = vadd.f32 %v2139_v10, %v1980_v61 }
 0x339   : > { %v3700_v20 = vmul.f32 %v3668_v13, %v6394_v32  ;;  %v6470_v55 = vmul.f32 0.5, %v3414_v52  ;;  %v3478_v41 = vmul.f32 %v3414_v52, %v3414_v52  ;;  %v2141_v60 = vsel %vm2096_vm2, %v2138_v8, %v2140_v50  ;;  %v6479_v32 = vld [vmem:[#allocation2 + $0xf0] sm:$0xff]  ;;  %v6494_v8 = vld [vmem:[#allocation2 + $0x100] sm:$0x3] }
 0x33a   : > { %v3509_v17 = vmul.f32 %v3477_v4, %v3413_v3  ;;  %v2226_v14 = vadd.f32 %v2141_v60, %v1981_v21  ;;  %v2262_v44 = vmul.f32 %v5622_v43, %v6411_v45  ;;  %v2293_v24 = vadd.f32 %v2261_v27, %v2225_v30 }
 0x33b   : > { %v3725_v47 = vpack.c.bf16 %v3700_v20, %v3699_v31  ;;  %v3510_v7 = vmul.f32 %v3478_v41, %v3414_v52  ;;  %v2337_v2 = vmul.f32 %v5627_v33, %v6403_v51  ;;  %v2338_v36 = vmul.f32 %v5627_v33, %v6411_v45 }
 0x33c   : > { %v3541_v48 = vmul.f32 0.044715, %v3509_v17  ;;  %v2294_v38 = vadd.f32 %v2262_v44, %v2226_v14  ;;  %v2339_v49 = vmul.f32 %v5627_v33, %v6418_v26  ;;  %v2581_v23 = vmul.f32 %v5630_v12, %v6403_v51 }
 0x33d   : > { %4638 = vmatprep.mubr.bf16.mxu1 %v3725_v47  ;;  %v3542_v53 = vmul.f32 0.044715, %v3510_v7  ;;  %v2449_v54 = vrot.slane %v2337_v2, 1  ;;  %v2450_v1 = vrot.slane %v2338_v36, 1  ;;  %v2582_v15 = vmul.f32 %v5630_v12, %v6411_v45 }
 0x33e   : > { %v3573_v16 = vadd.f32 %v3541_v48, %v3413_v3  ;;  %v2452_v37 = vrot.slane %v2339_v49, 1  ;;  %v2583_v0 = vmul.f32 %v5630_v12, %v6418_v26  ;;  %v2693_v19 = vrot.slane %v2581_v23, 2 }
 0x33f   : > { %v3574_v40 = vadd.f32 %v3542_v53, %v3414_v52  ;;  %v2451_v62 = vsel %vm1851_vm1, %v2449_v54, %v2450_v1  ;;  %v2694_v57 = vrot.slane %v2582_v15, 2  ;;  %v2817_v42 = vmul.f32 %v5632_v9, %v6479_v32 }
 0x340   : > { %v3605_v39 = vmul.f32 0.7978846, %v3573_v16  ;;  %v2453_v18 = vsel %vm1851_vm1, %v2450_v1, %v2452_v37  ;;  %v2537_v6 = vadd.f32 %v2451_v62, %v2293_v24  ;;  %v2696_v11 = vrot.slane %v2583_v0, 2 }
 0x341   : > { %v3606_v22 = vmul.f32 0.7978846, %v3574_v40  ;;  %v2538_v27 = vadd.f32 %v2453_v18, %v2294_v38  ;;  %v2695_v46 = vsel %vm2096_vm2, %v2693_v19, %v2694_v57  ;;  %v2818_v29 = vmul.f32 %v5632_v9, %v6487_v5 }
 0x342   : > { %4849 = vtanh.f32 %v3605_v39  ;;  %v2697_v3 = vsel %vm2096_vm2, %v2694_v57, %v2696_v11  ;;  %v2781_v61 = vadd.f32 %v2695_v46, %v2537_v6  ;;  %v2893_v21 = vmul.f32 %v5634_v28, %v6479_v32 }
 0x343   : > { %4851 = vtanh.f32 %v3606_v22  ;;  %v2782_v13 = vadd.f32 %v2697_v3, %v2538_v27  ;;  %v2894_v52 = vmul.f32 %v5634_v28, %v6487_v5  ;;  %v2895_v10 = vmul.f32 %v5634_v28, %v6494_v8 }
 0x344   : > { %v2849_v50 = vadd.f32 %v2817_v42, %v2781_v61  ;;  %v3005_v31 = vrot.slane %v2893_v21, 1  ;;  %v3137_v4 = vmul.f32 %v5636_v34, %v6479_v32  ;;  %v3138_v30 = vmul.f32 %v5636_v34, %v6487_v5 }
 0x345   : > { %v2850_v20 = vadd.f32 %v2818_v29, %v2782_v13  ;;  %v3006_v41 = vrot.slane %v2894_v52, 1  ;;  %v3008_v60 = vrot.slane %v2895_v10, 1  ;;  %v3139_v17 = vmul.f32 %v5636_v34, %v6494_v8 }
 0x346   : > { %v3249_v14 = vrot.slane %v3137_v4, 2  ;;  %v3250_v44 = vrot.slane %v3138_v30, 2  ;;  %v1705_v24 = vmul.f32 %v5587_v25, %v6403_v51  ;;  %v1706_v47 = vmul.f32 %v5587_v25, %v6411_v45 }
 0x347   : > { %v3007_v7 = vsel %vm1851_vm1, %v3005_v31, %v3006_v41  ;;  %v3009_v2 = vsel %vm1851_vm1, %v3006_v41, %v3008_v60  ;;  %v3252_v36 = vrot.slane %v3139_v17, 2  ;;  %v1782_v48 = vmul.f32 %v5580_v59, %v6403_v51 }
 0x348   : > { %v3093_v38 = vadd.f32 %v3007_v7, %v2849_v50  ;;  %v3094_v49 = vadd.f32 %v3009_v2, %v2850_v20  ;;  %v3251_v23 = vsel %vm2096_vm2, %v3249_v14, %v3250_v44  ;;  %v1783_v53 = vmul.f32 %v5580_v59, %v6411_v45 }
 0x349   : > { %v3253_v54 = vsel %vm2096_vm2, %v3250_v44, %v3252_v36  ;;  %v1784_v1 = vmul.f32 %v5580_v59, %v6418_v26  ;;  %v1897_v15 = vrot.slane %v1782_v48, 1  ;;  %v2027_v16 = vmul.f32 %v5584_v56, %v6403_v51  ;;  %v6553_v44 = vld [vmem:[#allocation2 + $0x108] sm:$0xff] }
 0x34a   : > { %v3337_v37 = vadd.f32 %v3251_v23, %v3093_v38  ;;  %v3338_v0 = vadd.f32 %v3253_v54, %v3094_v49  ;;  %v1898_v19 = vrot.slane %v1783_v53, 1  ;;  %v2028_v40 = vmul.f32 %v5584_v56, %v6411_v45 }
 0x34b   : > { %v1900_v62 = vrot.slane %v1784_v1, 1  ;;  %v2029_v57 = vmul.f32 %v5584_v56, %v6418_v26  ;;  %v2142_v42 = vrot.slane %v2027_v16, 2  ;;  %v2263_v39 = vmul.f32 %v5622_v43, %v6479_v32  ;;  %v6561_v1 = vld [vmem:[#allocation2 + $0x110] sm:$0xff] }
 0x34c   : > { %v4850_v18 = vpop.eup %4849  ;;  %v3376_v6 = vmul.f32 %v6374_v35, %v3337_v37  ;;  %v3377_v11 = vmul.f32 %v6374_v35, %v3338_v0  ;;  %v1899_v51 = vsel %vm1851_vm1, %v1897_v15, %v1898_v19  ;;  %v2143_v22 = vrot.slane %v2028_v40, 2  ;;  %v6569_v40 = vld [vmem:[#allocation2 + $0x118] sm:$0x3] }
 0x34d   : > { %v4852_v27 = vpop.eup %4851  ;;  %v3669_v46 = vadd.f32 1.0, %v4850_v18  ;;  %v1901_v45 = vsel %vm1851_vm1, %v1898_v19, %v1900_v62  ;;  %v1982_v29 = vadd.f32 %v1899_v51, %v1705_v24  ;;  %v2145_v3 = vrot.slane %v2029_v57, 2 }
 0x34e   : > { %v3670_v61 = vadd.f32 1.0, %v4852_v27  ;;  %v3415_v26 = vadd.f32 %v6385_v58, %v3376_v6  ;;  %v3416_v21 = vadd.f32 %v6385_v58, %v3377_v11  ;;  %v1983_v13 = vadd.f32 %v1901_v45, %v1706_v47 }
 0x34f   : > { %v3701_v52 = vmul.f32 %v3669_v46, %v6467_v63  ;;  %v2144_v10 = vsel %vm2096_vm2, %v2142_v42, %v2143_v22  ;;  %v2146_v50 = vsel %vm2096_vm2, %v2143_v22, %v2145_v3  ;;  %v2264_v31 = vmul.f32 %v5622_v43, %v6487_v5 }
 0x350   : > { %v3702_v4 = vmul.f32 %v3670_v61, %v6470_v55  ;;  %v6547_v30 = vmul.f32 0.5, %v3415_v26  ;;  %v6549_v20 = vmul.f32 0.5, %v3416_v21  ;;  %v3479_v41 = vmul.f32 %v3415_v26, %v3415_v26 }
 0x351   : > { %v3480_v60 = vmul.f32 %v3416_v21, %v3416_v21  ;;  %v2227_v17 = vadd.f32 %v2144_v10, %v1982_v29  ;;  %v2228_v14 = vadd.f32 %v2146_v50, %v1983_v13  ;;  %v2340_v63 = vmul.f32 %v5627_v33, %v6479_v32 }
 0x352   : > { %v3726_v24 = vpack.c.bf16 %v3702_v4, %v3701_v52  ;;  %v3511_v47 = vmul.f32 %v3479_v41, %v3415_v26  ;;  %v2341_v7 = vmul.f32 %v5627_v33, %v6487_v5  ;;  %v2342_v55 = vmul.f32 %v5627_v33, %v6494_v8 }
 0x353   : > { %v3512_v2 = vmul.f32 %v3480_v60, %v3416_v21  ;;  %v2295_v36 = vadd.f32 %v2263_v39, %v2227_v17  ;;  %v2296_v48 = vadd.f32 %v2264_v31, %v2228_v14  ;;  %v2454_v38 = vrot.slane %v2340_v63, 1 }
 0x354   : > { %4639 = vmatmul.mubr.bf16.gmra.mrb[8].mxu1 %v3726_v24  ;;  %v3543_v49 = vmul.f32 0.044715, %v3511_v47  ;;  %v2455_v23 = vrot.slane %v2341_v7, 1  ;;  %v2457_v53 = vrot.slane %v2342_v55, 1  ;;  %v2584_v54 = vmul.f32 %v5630_v12, %v6479_v32 }
 0x355   : > { %v3544_v15 = vmul.f32 0.044715, %v3512_v2  ;;  %v2585_v16 = vmul.f32 %v5630_v12, %v6487_v5  ;;  %v2586_v37 = vmul.f32 %v5630_v12, %v6494_v8  ;;  %v2819_v0 = vmul.f32 %v5632_v9, %v6553_v44 }
 0x356   : > { %v3575_v19 = vadd.f32 %v3543_v49, %v3415_v26  ;;  %v2456_v62 = vsel %vm1851_vm1, %v2454_v38, %v2455_v23  ;;  %v2458_v57 = vsel %vm1851_vm1, %v2455_v23, %v2457_v53  ;;  %v2698_v42 = vrot.slane %v2584_v54, 2 }
 0x357   : > { %v3576_v39 = vadd.f32 %v3544_v15, %v3416_v21  ;;  %v2539_v18 = vadd.f32 %v2456_v62, %v2295_v36  ;;  %v2540_v6 = vadd.f32 %v2458_v57, %v2296_v48  ;;  %v2699_v11 = vrot.slane %v2585_v16, 2 }
 0x358   : > { %v3607_v51 = vmul.f32 0.7978846, %v3575_v19  ;;  %v2701_v22 = vrot.slane %v2586_v37, 2  ;;  %v2820_v27 = vmul.f32 %v5632_v9, %v6561_v1  ;;  %v2896_v46 = vmul.f32 %v5634_v28, %v6553_v44 }
 0x359   : > { %v3608_v45 = vmul.f32 0.7978846, %v3576_v39  ;;  %v2700_v29 = vsel %vm2096_vm2, %v2698_v42, %v2699_v11  ;;  %v2897_v3 = vmul.f32 %v5634_v28, %v6561_v1  ;;  %v2898_v61 = vmul.f32 %v5634_v28, %v6569_v40 }
 0x35a   : > { %4853 = vtanh.f32 %v3607_v51  ;;  %v2702_v26 = vsel %vm2096_vm2, %v2699_v11, %v2701_v22  ;;  %v2783_v21 = vadd.f32 %v2700_v29, %v2539_v18  ;;  %v3010_v13 = vrot.slane %v2896_v46, 1 }
 0x35b   : > { %4855 = vtanh.f32 %v3608_v45  ;;  %v2784_v52 = vadd.f32 %v2702_v26, %v2540_v6  ;;  %v3011_v10 = vrot.slane %v2897_v3, 1  ;;  %v3013_v50 = vrot.slane %v2898_v61, 1 }
 0x35c   : > { %v2851_v31 = vadd.f32 %v2819_v0, %v2783_v21  ;;  %v3140_v4 = vmul.f32 %v5636_v34, %v6553_v44  ;;  %v3141_v41 = vmul.f32 %v5636_v34, %v6561_v1  ;;  %v3142_v60 = vmul.f32 %v5636_v34, %v6569_v40 }
 0x35d   : > { %v2852_v17 = vadd.f32 %v2820_v27, %v2784_v52  ;;  %v3012_v14 = vsel %vm1851_vm1, %v3010_v13, %v3011_v10  ;;  %v3014_v63 = vsel %vm1851_vm1, %v3011_v10, %v3013_v50  ;;  %v1707_v24 = vmul.f32 %v5587_v25, %v6479_v32 }
 0x35e   : > { %v3095_v47 = vadd.f32 %v3012_v14, %v2851_v31  ;;  %v3254_v7 = vrot.slane %v3140_v4, 2  ;;  %v3255_v55 = vrot.slane %v3141_v41, 2  ;;  %v3257_v2 = vrot.slane %v3142_v60, 2 }
 0x35f   : > { %v3096_v36 = vadd.f32 %v3014_v63, %v2852_v17  ;;  %v1708_v48 = vmul.f32 %v5587_v25, %v6487_v5  ;;  %v1785_v38 = vmul.f32 %v5580_v59, %v6479_v32  ;;  %v1786_v49 = vmul.f32 %v5580_v59, %v6487_v5 }
 0x360   : > { %v3256_v23 = vsel %vm2096_vm2, %v3254_v7, %v3255_v55  ;;  %v3258_v53 = vsel %vm2096_vm2, %v3255_v55, %v3257_v2  ;;  %v1787_v54 = vmul.f32 %v5580_v59, %v6494_v8  ;;  %v2030_v15 = vmul.f32 %v5584_v56, %v6479_v32  ;;  %v6633_v7 = vld [vmem:[#allocation2 + $0x120] sm:$0xff] }
 0x361   : > { %v3339_v16 = vadd.f32 %v3256_v23, %v3095_v47  ;;  %v3340_v37 = vadd.f32 %v3258_v53, %v3096_v36  ;;  %v1902_v0 = vrot.slane %v1785_v38, 1  ;;  %v1903_v19 = vrot.slane %v1786_v49, 1  ;;  %v6635_v53 = vld [vmem:[#allocation2 + $0x128] sm:$0xff] }
 0x362   : > { %v1905_v62 = vrot.slane %v1787_v54, 1  ;;  %v2031_v57 = vmul.f32 %v5584_v56, %v6487_v5  ;;  %v2032_v42 = vmul.f32 %v5584_v56, %v6494_v8  ;;  %v2147_v39 = vrot.slane %v2030_v15, 2 }
 0x363   : > { %v3378_v18 = vmul.f32 %v6374_v35, %v3339_v16  ;;  %v3379_v6 = vmul.f32 %v6374_v35, %v3340_v37  ;;  %v1904_v11 = vsel %vm1851_vm1, %v1902_v0, %v1903_v19  ;;  %v2265_v32 = vmul.f32 %v5622_v43, %v6553_v44 }
 0x364   : > { %v4854_v51 = vpop.eup %4853  ;;  %v1906_v22 = vsel %vm1851_vm1, %v1903_v19, %v1905_v62  ;;  %v1984_v27 = vadd.f32 %v1904_v11, %v1707_v24  ;;  %v2148_v46 = vrot.slane %v2031_v57, 2  ;;  %v2150_v45 = vrot.slane %v2032_v42, 2  ;;  %v6643_v19 = vld [vmem:[#allocation2 + $0x130] sm:$0x3] }
 0x365   : > { %v4856_v5 = vpop.eup %4855  ;;  %v3671_v29 = vadd.f32 1.0, %v4854_v51  ;;  %v3417_v8 = vadd.f32 %v6385_v58, %v3378_v18  ;;  %v3418_v3 = vadd.f32 %v6385_v58, %v3379_v6  ;;  %v1985_v61 = vadd.f32 %v1906_v22, %v1708_v48 }
 0x366   : > { %v3672_v26 = vadd.f32 1.0, %v4856_v5  ;;  %v2149_v21 = vsel %vm2096_vm2, %v2147_v39, %v2148_v46  ;;  %v2151_v13 = vsel %vm2096_vm2, %v2148_v46, %v2150_v45  ;;  %v2266_v52 = vmul.f32 %v5622_v43, %v6561_v1 }
 0x367   : > { %v3703_v10 = vmul.f32 %v3671_v29, %v6547_v30  ;;  %v6622_v50 = vmul.f32 0.5, %v3417_v8  ;;  %v6624_v31 = vmul.f32 0.5, %v3418_v3  ;;  %v3481_v4 = vmul.f32 %v3417_v8, %v3417_v8 }
 0x368   : > { %v3704_v41 = vmul.f32 %v3672_v26, %v6549_v20  ;;  %v3482_v60 = vmul.f32 %v3418_v3, %v3418_v3  ;;  %v2229_v17 = vadd.f32 %v2149_v21, %v1984_v27  ;;  %v2230_v14 = vadd.f32 %v2151_v13, %v1985_v61 }
 0x369   : > { %v3513_v63 = vmul.f32 %v3481_v4, %v3417_v8  ;;  %v2343_v24 = vmul.f32 %v5627_v33, %v6553_v44  ;;  %v2344_v47 = vmul.f32 %v5627_v33, %v6561_v1  ;;  %v2345_v30 = vmul.f32 %v5627_v33, %v6569_v40 }
 0x36a   : > { %v3727_v55 = vpack.c.bf16 %v3704_v41, %v3703_v10  ;;  %v3514_v2 = vmul.f32 %v3482_v60, %v3418_v3  ;;  %v2297_v36 = vadd.f32 %v2265_v32, %v2229_v17  ;;  %v2298_v48 = vadd.f32 %v2266_v52, %v2230_v14 }
 0x36b   : > { %v3545_v20 = vmul.f32 0.044715, %v3513_v63  ;;  %v2459_v38 = vrot.slane %v2343_v24, 1  ;;  %v2460_v49 = vrot.slane %v2344_v47, 1  ;;  %v2462_v23 = vrot.slane %v2345_v30, 1 }
 0x36c   : > { %4642 = vmatprep.mubr.bf16.mxu1 %v3727_v55  ;;  %v3546_v54 = vmul.f32 0.044715, %v3514_v2  ;;  %v2587_v15 = vmul.f32 %v5630_v12, %v6553_v44  ;;  %v2588_v16 = vmul.f32 %v5630_v12, %v6561_v1  ;;  %v2589_v37 = vmul.f32 %v5630_v12, %v6569_v40 }
 0x36d   : > { %v3577_v0 = vadd.f32 %v3545_v20, %v3417_v8  ;;  %v2461_v62 = vsel %vm1851_vm1, %v2459_v38, %v2460_v49  ;;  %v2463_v57 = vsel %vm1851_vm1, %v2460_v49, %v2462_v23  ;;  %v2821_v42 = vmul.f32 %v5632_v9, %v6633_v7 }
 0x36e   : > { %v3578_v39 = vadd.f32 %v3546_v54, %v3418_v3  ;;  %v2541_v18 = vadd.f32 %v2461_v62, %v2297_v36  ;;  %v2542_v6 = vadd.f32 %v2463_v57, %v2298_v48  ;;  %v2703_v11 = vrot.slane %v2587_v15, 2 }
 0x36f   : > { %v3609_v32 = vmul.f32 0.7978846, %v3577_v0  ;;  %v2704_v51 = vrot.slane %v2588_v16, 2  ;;  %v2706_v22 = vrot.slane %v2589_v37, 2  ;;  %v2822_v27 = vmul.f32 %v5632_v9, %v6635_v53 }
 0x370   : > { %v3610_v46 = vmul.f32 0.7978846, %v3578_v39  ;;  %v2899_v45 = vmul.f32 %v5634_v28, %v6633_v7  ;;  %v2900_v5 = vmul.f32 %v5634_v28, %v6635_v53  ;;  %v2901_v29 = vmul.f32 %v5634_v28, %v6643_v19 }
 0x371   : > { %4857 = vtanh.f32 %v3609_v32  ;;  %v2705_v8 = vsel %vm2096_vm2, %v2703_v11, %v2704_v51  ;;  %v2707_v3 = vsel %vm2096_vm2, %v2704_v51, %v2706_v22  ;;  %v3143_v61 = vmul.f32 %v5636_v34, %v6633_v7 }
 0x372   : > { %4859 = vtanh.f32 %v3610_v46  ;;  %v2785_v26 = vadd.f32 %v2705_v8, %v2541_v18  ;;  %v2786_v21 = vadd.f32 %v2707_v3, %v2542_v6  ;;  %v3015_v13 = vrot.slane %v2899_v45, 1 }
 0x373   : > { %v3016_v52 = vrot.slane %v2900_v5, 1  ;;  %v3018_v10 = vrot.slane %v2901_v29, 1  ;;  %v3144_v4 = vmul.f32 %v5636_v34, %v6635_v53  ;;  %v3145_v41 = vmul.f32 %v5636_v34, %v6643_v19 }
 0x374   : > { %v2853_v60 = vadd.f32 %v2821_v42, %v2785_v26  ;;  %v2854_v17 = vadd.f32 %v2822_v27, %v2786_v21  ;;  %v3259_v14 = vrot.slane %v3143_v61, 2  ;;  %v1709_v63 = vmul.f32 %v5587_v25, %v6553_v44 }
 0x375   : > { %v3017_v24 = vsel %vm1851_vm1, %v3015_v13, %v3016_v52  ;;  %v3019_v47 = vsel %vm1851_vm1, %v3016_v52, %v3018_v10  ;;  %v3260_v30 = vrot.slane %v3144_v4, 2  ;;  %v3262_v55 = vrot.slane %v3145_v41, 2 }
 0x376   : > { %v3097_v2 = vadd.f32 %v3017_v24, %v2853_v60  ;;  %v3098_v36 = vadd.f32 %v3019_v47, %v2854_v17  ;;  %v1710_v48 = vmul.f32 %v5587_v25, %v6561_v1  ;;  %v1788_v20 = vmul.f32 %v5580_v59, %v6553_v44  ;;  %v6707_v47 = vld [vmem:[#allocation2 + $0x138] sm:$0xff] }
 0x377   : > { %v3261_v38 = vsel %vm2096_vm2, %v3259_v14, %v3260_v30  ;;  %v3263_v49 = vsel %vm2096_vm2, %v3260_v30, %v3262_v55  ;;  %v1789_v23 = vmul.f32 %v5580_v59, %v6561_v1  ;;  %v1790_v54 = vmul.f32 %v5580_v59, %v6569_v40 }
 0x378   : > { %v3341_v15 = vadd.f32 %v3261_v38, %v3097_v2  ;;  %v3342_v16 = vadd.f32 %v3263_v49, %v3098_v36  ;;  %v1907_v37 = vrot.slane %v1788_v20, 1  ;;  %v2033_v0 = vmul.f32 %v5584_v56, %v6553_v44 }
 0x379   : > { %v1908_v62 = vrot.slane %v1789_v23, 1  ;;  %v1910_v57 = vrot.slane %v1790_v54, 1  ;;  %v2034_v42 = vmul.f32 %v5584_v56, %v6561_v1  ;;  %v2035_v39 = vmul.f32 %v5584_v56, %v6569_v40 }
 0x37a   : > { %v3380_v18 = vmul.f32 %v6374_v35, %v3341_v15  ;;  %v3381_v6 = vmul.f32 %v6374_v35, %v3342_v16  ;;  %v2152_v11 = vrot.slane %v2033_v0, 2  ;;  %v2267_v32 = vmul.f32 %v5622_v43, %v6633_v7  ;;  %v6715_v16 = vld [vmem:[#allocation2 + $0x140] sm:$0xff] }
 0x37b   : > { %v4858_v51 = vpop.eup %4857  ;;  %v1909_v22 = vsel %vm1851_vm1, %v1907_v37, %v1908_v62  ;;  %v1911_v44 = vsel %vm1851_vm1, %v1908_v62, %v1910_v57  ;;  %v2153_v27 = vrot.slane %v2034_v42, 2  ;;  %v2155_v46 = vrot.slane %v2035_v39, 2  ;;  %v6722_v39 = vld [vmem:[#allocation2 + $0x148] sm:$0x3] }
 0x37c   : > { %v4860_v45 = vpop.eup %4859  ;;  %v3673_v1 = vadd.f32 1.0, %v4858_v51  ;;  %v3419_v5 = vadd.f32 %v6385_v58, %v3380_v18  ;;  %v3420_v40 = vadd.f32 %v6385_v58, %v3381_v6  ;;  %v1986_v29 = vadd.f32 %v1909_v22, %v1709_v63 }
 0x37d   : > { %v3674_v8 = vadd.f32 1.0, %v4860_v45  ;;  %v1987_v3 = vadd.f32 %v1911_v44, %v1710_v48  ;;  %v2154_v61 = vsel %vm2096_vm2, %v2152_v11, %v2153_v27  ;;  %v2156_v26 = vsel %vm2096_vm2, %v2153_v27, %v2155_v46 }
 0x37e   : > { %v3705_v21 = vmul.f32 %v3673_v1, %v6622_v50  ;;  %v6696_v13 = vmul.f32 0.5, %v3419_v5  ;;  %v6698_v52 = vmul.f32 0.5, %v3420_v40  ;;  %v3483_v10 = vmul.f32 %v3419_v5, %v3419_v5 }
 0x37f   : > { %v3706_v4 = vmul.f32 %v3674_v8, %v6624_v31  ;;  %v3484_v41 = vmul.f32 %v3420_v40, %v3420_v40  ;;  %v2231_v60 = vadd.f32 %v2154_v61, %v1986_v29  ;;  %v2232_v17 = vadd.f32 %v2156_v26, %v1987_v3 }
 0x380   : > { %v3515_v14 = vmul.f32 %v3483_v10, %v3419_v5  ;;  %v2268_v63 = vmul.f32 %v5622_v43, %v6635_v53  ;;  %v2346_v24 = vmul.f32 %v5627_v33, %v6633_v7  ;;  %v2347_v50 = vmul.f32 %v5627_v33, %v6635_v53 }
 0x381   : > { %v3728_v30 = vpack.c.bf16 %v3706_v4, %v3705_v21  ;;  %v3516_v55 = vmul.f32 %v3484_v41, %v3420_v40  ;;  %v2299_v2 = vadd.f32 %v2267_v32, %v2231_v60  ;;  %v2348_v31 = vmul.f32 %v5627_v33, %v6643_v19 }
 0x382   : > { %v3547_v36 = vmul.f32 0.044715, %v3515_v14  ;;  %v2300_v48 = vadd.f32 %v2268_v63, %v2232_v17  ;;  %v2464_v20 = vrot.slane %v2346_v24, 1  ;;  %v2465_v38 = vrot.slane %v2347_v50, 1 }
 0x383   : > { %4643 = vmatmul.mubr.bf16.gmra.mrb[12].mxu1 %v3728_v30  ;;  %v3548_v49 = vmul.f32 0.044715, %v3516_v55  ;;  %v2467_v23 = vrot.slane %v2348_v31, 1  ;;  %v2590_v54 = vmul.f32 %v5630_v12, %v6633_v7  ;;  %v2591_v15 = vmul.f32 %v5630_v12, %v6635_v53 }
 0x384   : > { %v3579_v37 = vadd.f32 %v3547_v36, %v3419_v5  ;;  %v2466_v0 = vsel %vm1851_vm1, %v2464_v20, %v2465_v38  ;;  %v2592_v62 = vmul.f32 %v5630_v12, %v6643_v19  ;;  %v2823_v57 = vmul.f32 %v5632_v9, %v6707_v47 }
 0x385   : > { %v3580_v42 = vadd.f32 %v3548_v49, %v3420_v40  ;;  %v2468_v18 = vsel %vm1851_vm1, %v2465_v38, %v2467_v23  ;;  %v2543_v6 = vadd.f32 %v2466_v0, %v2299_v2  ;;  %v2708_v11 = vrot.slane %v2590_v54, 2 }
 0x386   : > { %v3611_v32 = vmul.f32 0.7978846, %v3579_v37  ;;  %v2544_v51 = vadd.f32 %v2468_v18, %v2300_v48  ;;  %v2709_v22 = vrot.slane %v2591_v15, 2  ;;  %v2711_v44 = vrot.slane %v2592_v62, 2 }
 0x387   : > { %v3612_v27 = vmul.f32 0.7978846, %v3580_v42  ;;  %v2824_v46 = vmul.f32 %v5632_v9, %v6715_v16  ;;  %v2902_v45 = vmul.f32 %v5634_v28, %v6707_v47  ;;  %v2903_v1 = vmul.f32 %v5634_v28, %v6715_v16 }
 0x388   : > { %4861 = vtanh.f32 %v3611_v32  ;;  %v2710_v5 = vsel %vm2096_vm2, %v2708_v11, %v2709_v22  ;;  %v2712_v40 = vsel %vm2096_vm2, %v2709_v22, %v2711_v44  ;;  %v2904_v29 = vmul.f32 %v5634_v28, %v6722_v39 }
 0x389   : > { %4863 = vtanh.f32 %v3612_v27  ;;  %v2787_v8 = vadd.f32 %v2710_v5, %v2543_v6  ;;  %v2788_v3 = vadd.f32 %v2712_v40, %v2544_v51  ;;  %v3020_v61 = vrot.slane %v2902_v45, 1 }
 0x38a   : > { %v3021_v26 = vrot.slane %v2903_v1, 1  ;;  %v3023_v21 = vrot.slane %v2904_v29, 1  ;;  %v3146_v10 = vmul.f32 %v5636_v34, %v6707_v47  ;;  %v3147_v4 = vmul.f32 %v5636_v34, %v6715_v16 }
 0x38b   : > { %v2855_v41 = vadd.f32 %v2823_v57, %v2787_v8  ;;  %v2856_v60 = vadd.f32 %v2824_v46, %v2788_v3  ;;  %v3148_v17 = vmul.f32 %v5636_v34, %v6722_v39  ;;  %v1711_v14 = vmul.f32 %v5587_v25, %v6633_v7 }
 0x38c   : > { %v3022_v63 = vsel %vm1851_vm1, %v3020_v61, %v3021_v26  ;;  %v3024_v24 = vsel %vm1851_vm1, %v3021_v26, %v3023_v21  ;;  %v3264_v50 = vrot.slane %v3146_v10, 2  ;;  %v3265_v30 = vrot.slane %v3147_v4, 2 }
 0x38d   : > { %v3099_v55 = vadd.f32 %v3022_v63, %v2855_v41  ;;  %v3100_v2 = vadd.f32 %v3024_v24, %v2856_v60  ;;  %v3267_v31 = vrot.slane %v3148_v17, 2  ;;  %v1712_v36 = vmul.f32 %v5587_v25, %v6635_v53  ;;  %v6786_v24 = vld [vmem:[#allocation2 + $0x150] sm:$0xff] }
 0x38e   : > { %v3266_v48 = vsel %vm2096_vm2, %v3264_v50, %v3265_v30  ;;  %v1791_v20 = vmul.f32 %v5580_v59, %v6633_v7  ;;  %v1792_v38 = vmul.f32 %v5580_v59, %v6635_v53  ;;  %v1793_v49 = vmul.f32 %v5580_v59, %v6643_v19 }
 0x38f   : > { %v3268_v23 = vsel %vm2096_vm2, %v3265_v30, %v3267_v31  ;;  %v3343_v54 = vadd.f32 %v3266_v48, %v3099_v55  ;;  %v2036_v15 = vmul.f32 %v5584_v56, %v6633_v7  ;;  %v2037_v37 = vmul.f32 %v5584_v56, %v6635_v53 }
 0x390   : > { %v3344_v0 = vadd.f32 %v3268_v23, %v3100_v2  ;;  %v1912_v62 = vrot.slane %v1791_v20, 1  ;;  %v1913_v57 = vrot.slane %v1792_v38, 1  ;;  %v1915_v42 = vrot.slane %v1793_v49, 1  ;;  %v6794_v38 = vld [vmem:[#allocation2 + $0x158] sm:$0xff] }
 0x391   : > { %v3382_v18 = vmul.f32 %v6374_v35, %v3343_v54  ;;  %v2038_v6 = vmul.f32 %v5584_v56, %v6643_v19  ;;  %v2157_v11 = vrot.slane %v2036_v15, 2  ;;  %v2158_v32 = vrot.slane %v2037_v37, 2 }
 0x392   : > { %v4862_v51 = vpop.eup %4861  ;;  %v3383_v22 = vmul.f32 %v6374_v35, %v3344_v0  ;;  %v1914_v44 = vsel %vm1851_vm1, %v1912_v62, %v1913_v57  ;;  %v1916_v7 = vsel %vm1851_vm1, %v1913_v57, %v1915_v42  ;;  %v2269_v53 = vmul.f32 %v5622_v43, %v6707_v47 }
 0x393   : > { %v4864_v27 = vpop.eup %4863  ;;  %v3675_v46 = vadd.f32 1.0, %v4862_v51  ;;  %v3421_v45 = vadd.f32 %v6385_v58, %v3382_v18  ;;  %v1988_v1 = vadd.f32 %v1914_v44, %v1711_v14  ;;  %v1989_v5 = vadd.f32 %v1916_v7, %v1712_v36 }
 0x394   : > { %v3676_v40 = vadd.f32 1.0, %v4864_v27  ;;  %v6769_v19 = vadd.f32 %v6385_v58, %v3383_v22  ;;  %v2159_v29 = vsel %vm2096_vm2, %v2157_v11, %v2158_v32  ;;  %v2160_v35 = vrot.slane %v2038_v6, 2  ;;  %v6804_v6 = vld [vmem:[#allocation2 + $0x160] sm:$0x3] }
 0x395   : > { %v3707_v8 = vmul.f32 %v3675_v46, %v6696_v13  ;;  %v3485_v3 = vmul.f32 %v3421_v45, %v3421_v45  ;;  %v2233_v61 = vadd.f32 %v2159_v29, %v1988_v1  ;;  %v6774_v21 = vmul.f32 0.5, %v3421_v45 }
 0x396   : > { %v3708_v26 = vmul.f32 %v3676_v40, %v6698_v52  ;;  %v3486_v10 = vmul.f32 %v6769_v19, %v6769_v19  ;;  %v2161_v4 = vsel %vm2096_vm2, %v2158_v32, %v2160_v35  ;;  %v2270_v58 = vmul.f32 %v5622_v43, %v6715_v16 }
 0x397   : > { %v3517_v41 = vmul.f32 %v3485_v3, %v3421_v45  ;;  %v2234_v60 = vadd.f32 %v2161_v4, %v1989_v5  ;;  %v2301_v17 = vadd.f32 %v2269_v53, %v2233_v61  ;;  %v2349_v63 = vmul.f32 %v5627_v33, %v6707_v47 }
 0x398   : > { %v3729_v14 = vpack.c.bf16 %v3708_v26, %v3707_v8  ;;  %v3518_v13 = vmul.f32 %v3486_v10, %v6769_v19  ;;  %v2350_v52 = vmul.f32 %v5627_v33, %v6715_v16  ;;  %v2351_v55 = vmul.f32 %v5627_v33, %v6722_v39 }
 0x399   : > { %v3549_v50 = vmul.f32 0.044715, %v3517_v41  ;;  %v2302_v30 = vadd.f32 %v2270_v58, %v2234_v60  ;;  %v2593_v2 = vmul.f32 %v5630_v12, %v6707_v47  ;;  %v2469_v36 = vrot.slane %v2349_v63, 1 }
 0x39a   : > { %4646 = vmatprep.mubr.bf16.mxu1 %v3729_v14  ;;  %v3550_v31 = vmul.f32 0.044715, %v3518_v13  ;;  %v2470_v48 = vrot.slane %v2350_v52, 1  ;;  %v2594_v20 = vmul.f32 %v5630_v12, %v6715_v16  ;;  %v2472_v23 = vrot.slane %v2351_v55, 1 }
 0x39b   : > { %v3581_v49 = vadd.f32 %v3549_v50, %v3421_v45  ;;  %v2595_v54 = vmul.f32 %v5630_v12, %v6722_v39  ;;  %v2713_v15 = vrot.slane %v2593_v2, 2  ;;  %v2825_v57 = vmul.f32 %v5632_v9, %v6786_v24 }
 0x39c   : > { %v3582_v37 = vadd.f32 %v3550_v31, %v6769_v19  ;;  %v2471_v0 = vsel %vm1851_vm1, %v2469_v36, %v2470_v48  ;;  %v2714_v62 = vrot.slane %v2594_v20, 2  ;;  %v6802_v42 = vpop.f32.mrb[32].mxu0  ;;  %v2473_v11 = vsel %vm1851_vm1, %v2470_v48, %v2472_v23 }
 0x39d   : > { %v3613_v18 = vmul.f32 0.7978846, %v3581_v49  ;;  %v2545_v32 = vadd.f32 %v2471_v0, %v2301_v17  ;;  %v2716_v51 = vrot.slane %v2595_v54, 2  ;;  %v6807_v22 = vpop.f32.mrb[33].mxu0  ;;  %v2546_v7 = vadd.f32 %v2473_v11, %v2302_v30 }
 0x39e   : > { %v3614_v44 = vmul.f32 0.7978846, %v3582_v37  ;;  %v2715_v53 = vsel %vm2096_vm2, %v2713_v15, %v2714_v62  ;;  %v2826_v27 = vmul.f32 %v5632_v9, %v6794_v38  ;;  %v6812_v46 = vpop.f32.mrb[34].mxu0  ;;  %v2905_v5 = vmul.f32 %v5634_v28, %v6786_v24 }
 0x39f   : > { %4865 = vtanh.f32 %v3613_v18  ;;  %v2717_v45 = vsel %vm2096_vm2, %v2714_v62, %v2716_v51  ;;  %v2789_v1 = vadd.f32 %v2715_v53, %v2545_v32  ;;  %v6817_v40 = vpop.f32.mrb[35].mxu0  ;;  %v2906_v35 = vmul.f32 %v5634_v28, %v6794_v38  ;;  %v6853_v51 = vld [vmem:[%s7357_s7] ss:$0 sm:$0xff] }
 0x3a0   : > { %4867 = vtanh.f32 %v3614_v44  ;;  %v2790_v29 = vadd.f32 %v2717_v45, %v2546_v7  ;;  %v2907_v8 = vmul.f32 %v5634_v28, %v6804_v6  ;;  %v3025_v61 = vrot.slane %v2905_v5, 1 }
 0x3a1   : > { %v2857_v3 = vadd.f32 %v2825_v57, %v2789_v1  ;;  %v3149_v26 = vmul.f32 %v5636_v34, %v6786_v24  ;;  %v3150_v10 = vmul.f32 %v5636_v34, %v6794_v38  ;;  %v3026_v41 = vrot.slane %v2906_v35, 1 }
 0x3a2   : > { %v2858_v4 = vadd.f32 %v2826_v27, %v2790_v29  ;;  %v3028_v60 = vrot.slane %v2907_v8, 1  ;;  %v3151_v58 = vmul.f32 %v5636_v34, %v6804_v6  ;;  %v3454_v17 = vmul.f32 0.5, %v6769_v19  ;;  %v6862_v29 = vld [vmem:[%s7358_s8] ss:$0 sm:$0xff] }
 0x3a3   : > { %v3269_v14 = vrot.slane %v3149_v26, 2  ;;  %v3270_v13 = vrot.slane %v3150_v10, 2  ;;  %v1713_v63 = vmul.f32 %v5587_v25, %v6707_v47  ;;  %v3027_v52 = vsel %vm1851_vm1, %v3025_v61, %v3026_v41 }
 0x3a4   : > { %v3029_v50 = vsel %vm1851_vm1, %v3026_v41, %v3028_v60  ;;  %v3272_v30 = vrot.slane %v3151_v58, 2  ;;  %v1794_v55 = vmul.f32 %v5580_v59, %v6707_v47  ;;  %v3101_v2 = vadd.f32 %v3027_v52, %v2857_v3  ;;  %v6879_v52 = vld [vmem:[#allocation2 + $0x168] sm:$0xff] }
 0x3a5   : > { %v3102_v31 = vadd.f32 %v3029_v50, %v2858_v4  ;;  %v3271_v36 = vsel %vm2096_vm2, %v3269_v14, %v3270_v13  ;;  %v1795_v19 = vmul.f32 %v5580_v59, %v6715_v16  ;;  %v1796_v20 = vmul.f32 %v5580_v59, %v6722_v39 }
 0x3a6   : > { %v3273_v48 = vsel %vm2096_vm2, %v3270_v13, %v3272_v30  ;;  %v1917_v49 = vrot.slane %v1794_v55, 1  ;;  %v2039_v23 = vmul.f32 %v5584_v56, %v6707_v47  ;;  %v3345_v54 = vadd.f32 %v3271_v36, %v3101_v2 }
 0x3a7   : > { %v3346_v15 = vadd.f32 %v3273_v48, %v3102_v31  ;;  %v1918_v37 = vrot.slane %v1795_v19, 1  ;;  %v2040_v0 = vmul.f32 %v5584_v56, %v6715_v16  ;;  %v1714_v62 = vmul.f32 %v5587_v25, %v6715_v16 }
 0x3a8   : > { %v1920_v57 = vrot.slane %v1796_v20, 1  ;;  %v2041_v18 = vmul.f32 %v5584_v56, %v6722_v39  ;;  %v2162_v11 = vrot.slane %v2039_v23, 2  ;;  %v3384_v47 = vmul.f32 %v6853_v51, %v3345_v54  ;;  %v6888_v54 = vld [vmem:[#allocation2 + $0x170] sm:$0xff] }
 0x3a9   : > { %v4866_v32 = vpop.eup %4865  ;;  %v3385_v44 = vmul.f32 %v6853_v51, %v3346_v15  ;;  %v1919_v7 = vsel %vm1851_vm1, %v1917_v49, %v1918_v37  ;;  %v2163_v53 = vrot.slane %v2040_v0, 2  ;;  %v2271_v10 = vmul.f32 %v5622_v43, %v6786_v24 }
 0x3aa   : > { %v4868_v27 = vpop.eup %4867  ;;  %v3677_v16 = vadd.f32 1.0, %v4866_v32  ;;  %v1921_v45 = vsel %vm1851_vm1, %v1918_v37, %v1920_v57  ;;  %v1990_v1 = vadd.f32 %v1919_v7, %v1713_v63  ;;  %v2165_v39 = vrot.slane %v2041_v18, 2  ;;  %v6896_v18 = vld [vmem:[#allocation2 + $0x178] sm:$0x3] }
 0x3ab   : > { %v3678_v5 = vadd.f32 1.0, %v4868_v27  ;;  %v3423_v35 = vadd.f32 %v6862_v29, %v3384_v47  ;;  %v6866_v8 = vadd.f32 %v6862_v29, %v3385_v44  ;;  %v1991_v3 = vadd.f32 %v1921_v45, %v1714_v62 }
 0x3ac   : > { %v3709_v61 = vmul.f32 %v3677_v16, %v6774_v21  ;;  %v2164_v26 = vsel %vm2096_vm2, %v2162_v11, %v2163_v53  ;;  %v2166_v60 = vsel %vm2096_vm2, %v2163_v53, %v2165_v39  ;;  %v2272_v58 = vmul.f32 %v5622_v43, %v6794_v38 }
 0x3ad   : > { %v3710_v4 = vmul.f32 %v3678_v5, %v3454_v17  ;;  %v3487_v41 = vmul.f32 %v3423_v35, %v3423_v35  ;;  %v3488_v14 = vmul.f32 %v6866_v8, %v6866_v8  ;;  %v2235_v13 = vadd.f32 %v2164_v26, %v1990_v1 }
 0x3ae   : > { %v2236_v63 = vadd.f32 %v2166_v60, %v1991_v3  ;;  %v2352_v21 = vmul.f32 %v5627_v33, %v6786_v24  ;;  %v2353_v17 = vmul.f32 %v5627_v33, %v6794_v38  ;;  %v2354_v55 = vmul.f32 %v5627_v33, %v6804_v6 }
 0x3af   : > { %v3730_v50 = vpack.c.bf16 %v3710_v4, %v3709_v61  ;;  %v3519_v30 = vmul.f32 %v3487_v41, %v3423_v35  ;;  %v3520_v2 = vmul.f32 %v3488_v14, %v6866_v8  ;;  %v2303_v31 = vadd.f32 %v2271_v10, %v2235_v13 }
 0x3b0   : > { %v2304_v36 = vadd.f32 %v2272_v58, %v2236_v63  ;;  %v2474_v19 = vrot.slane %v2352_v21, 1  ;;  %v2475_v20 = vrot.slane %v2353_v17, 1  ;;  %v2477_v49 = vrot.slane %v2354_v55, 1 }
 0x3b1   : > { %4647 = vmatmul.mubr.bf16.gmra.mrb[16].mxu1 %v3730_v50  ;;  %v3551_v48 = vmul.f32 0.044715, %v3519_v30  ;;  %v2596_v23 = vmul.f32 %v5630_v12, %v6786_v24  ;;  %v3552_v15 = vmul.f32 0.044715, %v3520_v2  ;;  %v2597_v37 = vmul.f32 %v5630_v12, %v6794_v38 }
 0x3b2   : > { %v2598_v0 = vmul.f32 %v5630_v12, %v6804_v6  ;;  %v2827_v62 = vmul.f32 %v5632_v9, %v6879_v52  ;;  %v2476_v11 = vsel %vm1851_vm1, %v2474_v19, %v2475_v20  ;;  %v2478_v32 = vsel %vm1851_vm1, %v2475_v20, %v2477_v49 }
 0x3b3   : > { %v3583_v57 = vadd.f32 %v3551_v48, %v3423_v35  ;;  %v2718_v47 = vrot.slane %v2596_v23, 2  ;;  %v3584_v44 = vadd.f32 %v3552_v15, %v6866_v8  ;;  %v2547_v7 = vadd.f32 %v2476_v11, %v2303_v31 }
 0x3b4   : > { %v2548_v53 = vadd.f32 %v2478_v32, %v2304_v36  ;;  %v2719_v27 = vrot.slane %v2597_v37, 2  ;;  %v2721_v45 = vrot.slane %v2598_v0, 2  ;;  %v2828_v1 = vmul.f32 %v5632_v9, %v6888_v54 }
 0x3b5   : > { %v3615_v16 = vmul.f32 0.7978846, %v3583_v57  ;;  %v2908_v39 = vmul.f32 %v5634_v28, %v6879_v52  ;;  %v3616_v5 = vmul.f32 0.7978846, %v3584_v44  ;;  %v2909_v61 = vmul.f32 %v5634_v28, %v6888_v54 }
 0x3b6   : > { %v2720_v3 = vsel %vm2096_vm2, %v2718_v47, %v2719_v27  ;;  %v2910_v26 = vmul.f32 %v5634_v28, %v6896_v18  ;;  %v2722_v10 = vsel %vm2096_vm2, %v2719_v27, %v2721_v45  ;;  %v3152_v63 = vmul.f32 %v5636_v34, %v6879_v52 }
 0x3b7   : > { %4869 = vtanh.f32 %v3615_v16  ;;  %v2791_v4 = vadd.f32 %v2720_v3, %v2547_v7  ;;  %v3030_v41 = vrot.slane %v2908_v39, 1  ;;  %v2792_v60 = vadd.f32 %v2722_v10, %v2548_v53 }
 0x3b8   : > { %4871 = vtanh.f32 %v3616_v5  ;;  %v3031_v58 = vrot.slane %v2909_v61, 1  ;;  %v3033_v14 = vrot.slane %v2910_v26, 1  ;;  %v3153_v21 = vmul.f32 %v5636_v34, %v6888_v54 }
 0x3b9   : > { %v2859_v13 = vadd.f32 %v2827_v62, %v2791_v4  ;;  %v3154_v50 = vmul.f32 %v5636_v34, %v6896_v18  ;;  %v3455_v30 = vmul.f32 0.5, %v3423_v35  ;;  %v2860_v17 = vadd.f32 %v2828_v1, %v2792_v60 }
 0x3ba   : > { %v3032_v55 = vsel %vm1851_vm1, %v3030_v41, %v3031_v58  ;;  %v3034_v2 = vsel %vm1851_vm1, %v3031_v58, %v3033_v14  ;;  %v3274_v36 = vrot.slane %v3152_v63, 2  ;;  %v3275_v19 = vrot.slane %v3153_v21, 2 }
 0x3bb   : > { %v3103_v31 = vadd.f32 %v3032_v55, %v2859_v13  ;;  %v3277_v48 = vrot.slane %v3154_v50, 2  ;;  %v3104_v20 = vadd.f32 %v3034_v2, %v2860_v17  ;;  %v1715_v49 = vmul.f32 %v5587_v25, %v6786_v24 }
 0x3bc   : > { %v1797_v23 = vmul.f32 %v5580_v59, %v6786_v24  ;;  %v1798_v15 = vmul.f32 %v5580_v59, %v6794_v38  ;;  %v3276_v35 = vsel %vm2096_vm2, %v3274_v36, %v3275_v19  ;;  %v1799_v0 = vmul.f32 %v5580_v59, %v6804_v6 }
 0x3bd   : > { %v3278_v37 = vsel %vm2096_vm2, %v3275_v19, %v3277_v48  ;;  %v2042_v62 = vmul.f32 %v5584_v56, %v6786_v24  ;;  %v3347_v57 = vadd.f32 %v3276_v35, %v3103_v31  ;;  %v1716_v44 = vmul.f32 %v5587_v25, %v6794_v38 }
 0x3be   : > { %v3348_v11 = vadd.f32 %v3278_v37, %v3104_v20  ;;  %v1922_v32 = vrot.slane %v1797_v23, 1  ;;  %v1923_v47 = vrot.slane %v1798_v15, 1  ;;  %v1925_v7 = vrot.slane %v1799_v0, 1  ;;  %v6966_v23 = vld [vmem:[#allocation2 + $0x180] sm:$0xff] }
 0x3bf   : > { %v2043_v53 = vmul.f32 %v5584_v56, %v6794_v38  ;;  %v2044_v27 = vmul.f32 %v5584_v56, %v6804_v6  ;;  %v3386_v16 = vmul.f32 %v6853_v51, %v3347_v57  ;;  %v2167_v1 = vrot.slane %v2042_v62, 2 }
 0x3c0   : > { %v3387_v45 = vmul.f32 %v6853_v51, %v3348_v11  ;;  %v1924_v24 = vsel %vm1851_vm1, %v1922_v32, %v1923_v47  ;;  %v1926_v5 = vsel %vm1851_vm1, %v1923_v47, %v1925_v7  ;;  %v3456_v60 = vmul.f32 0.5, %v6866_v8  ;;  %v6968_v32 = vld [vmem:[#allocation2 + $0x188] sm:$0xff] }
 0x3c1   : > { %v4870_v39 = vpop.eup %4869  ;;  %v1992_v3 = vadd.f32 %v1924_v24, %v1715_v49  ;;  %v2168_v61 = vrot.slane %v2043_v53, 2  ;;  %v2170_v26 = vrot.slane %v2044_v27, 2  ;;  %v6942_v38 = vadd.f32 %v6862_v29, %v3386_v16  ;;  %v6977_v27 = vld [vmem:[#allocation2 + $0x190] sm:$0x3] }
 0x3c2   : > { %v4872_v10 = vpop.eup %4871  ;;  %v3679_v4 = vadd.f32 1.0, %v4870_v39  ;;  %v6945_v6 = vadd.f32 %v6862_v29, %v3387_v45  ;;  %v1993_v41 = vadd.f32 %v1926_v5, %v1716_v44  ;;  %v2273_v14 = vmul.f32 %v5622_v43, %v6879_v52 }
 0x3c3   : > { %v3680_v58 = vadd.f32 1.0, %v4872_v10  ;;  %v2274_v13 = vmul.f32 %v5622_v43, %v6888_v54  ;;  %v3489_v21 = vmul.f32 %v6942_v38, %v6942_v38  ;;  %v2169_v50 = vsel %vm2096_vm2, %v2167_v1, %v2168_v61 }
 0x3c4   : > { %v3711_v63 = vmul.f32 %v3679_v4, %v3455_v30  ;;  %v2171_v17 = vsel %vm2096_vm2, %v2168_v61, %v2170_v26  ;;  %v3490_v2 = vmul.f32 %v6945_v6, %v6945_v6  ;;  %v2237_v8 = vadd.f32 %v2169_v50, %v1992_v3 }
 0x3c5   : > { %v3712_v55 = vmul.f32 %v3680_v58, %v3456_v60  ;;  %v2238_v31 = vadd.f32 %v2171_v17, %v1993_v41  ;;  %v3521_v36 = vmul.f32 %v3489_v21, %v6942_v38  ;;  %v2355_v19 = vmul.f32 %v5627_v33, %v6879_v52 }
 0x3c6   : > { %v2356_v30 = vmul.f32 %v5627_v33, %v6888_v54  ;;  %v2357_v48 = vmul.f32 %v5627_v33, %v6896_v18  ;;  %v3522_v49 = vmul.f32 %v3490_v2, %v6945_v6  ;;  %v2305_v15 = vadd.f32 %v2273_v14, %v2237_v8 }
 0x3c7   : > { %v3731_v20 = vpack.c.bf16 %v3712_v55, %v3711_v63  ;;  %v2306_v35 = vadd.f32 %v2274_v13, %v2238_v31  ;;  %v3553_v37 = vmul.f32 0.044715, %v3521_v36  ;;  %v2479_v0 = vrot.slane %v2355_v19, 1 }
 0x3c8   : > { %v2480_v62 = vrot.slane %v2356_v30, 1  ;;  %v2482_v57 = vrot.slane %v2357_v48, 1  ;;  %v3554_v11 = vmul.f32 0.044715, %v3522_v49  ;;  %v2599_v47 = vmul.f32 %v5630_v12, %v6879_v52 }
 0x3c9   : > { %4650 = vmatprep.mubr.bf16.mxu1 %v3731_v20  ;;  %v2600_v44 = vmul.f32 %v5630_v12, %v6888_v54  ;;  %v2601_v7 = vmul.f32 %v5630_v12, %v6896_v18  ;;  %v3585_v53 = vadd.f32 %v3553_v37, %v6942_v38  ;;  %v2829_v24 = vmul.f32 %v5632_v9, %v6966_v23 }
 0x3ca   : > { %v2481_v16 = vsel %vm1851_vm1, %v2479_v0, %v2480_v62  ;;  %v2483_v45 = vsel %vm1851_vm1, %v2480_v62, %v2482_v57  ;;  %v6983_v1 = vpop.f32.mrb[0].mxu1  ;;  %v3586_v39 = vadd.f32 %v3554_v11, %v6945_v6  ;;  %v2723_v61 = vrot.slane %v2599_v47, 2 }
 0x3cb   : > { %v2549_v5 = vadd.f32 %v2481_v16, %v2305_v15  ;;  %v2550_v3 = vadd.f32 %v2483_v45, %v2306_v35  ;;  %v6986_v26 = vpop.f32.mrb[1].mxu1  ;;  %v3617_v10 = vmul.f32 0.7978846, %v3585_v53  ;;  %v2724_v4 = vrot.slane %v2600_v44, 2 }
 0x3cc   : > { %v2726_v41 = vrot.slane %v2601_v7, 2  ;;  %v2830_v60 = vmul.f32 %v5632_v9, %v6968_v32  ;;  %v6990_v58 = vpop.f32.mrb[2].mxu1  ;;  %v3618_v14 = vmul.f32 0.7978846, %v3586_v39  ;;  %v2911_v13 = vmul.f32 %v5634_v28, %v6966_v23 }
 0x3cd   : > { %v2912_v63 = vmul.f32 %v5634_v28, %v6968_v32  ;;  %v2913_v21 = vmul.f32 %v5634_v28, %v6977_v27  ;;  %v6998_v50 = vpop.f32.mrb[3].mxu1  ;;  %4873 = vtanh.f32 %v3617_v10  ;;  %v2725_v17 = vsel %vm2096_vm2, %v2723_v61, %v2724_v4 }
 0x3ce   : > { %v2727_v55 = vsel %vm2096_vm2, %v2724_v4, %v2726_v41  ;;  %v3155_v2 = vmul.f32 %v5636_v34, %v6966_v23  ;;  %4875 = vtanh.f32 %v3618_v14  ;;  %v2793_v8 = vadd.f32 %v2725_v17, %v2549_v5 }
 0x3cf   : > { %v2794_v31 = vadd.f32 %v2727_v55, %v2550_v3  ;;  %v3035_v36 = vrot.slane %v2911_v13, 1  ;;  %v3036_v19 = vrot.slane %v2912_v63, 1  ;;  %v3038_v30 = vrot.slane %v2913_v21, 1 }
 0x3d0   : > { %v3156_v48 = vmul.f32 %v5636_v34, %v6968_v32  ;;  %v3157_v20 = vmul.f32 %v5636_v34, %v6977_v27  ;;  %v3457_v49 = vmul.f32 0.5, %v6942_v38  ;;  %v2861_v15 = vadd.f32 %v2829_v24, %v2793_v8 }
 0x3d1   : > { %v2862_v35 = vadd.f32 %v2830_v60, %v2794_v31  ;;  %v3279_v37 = vrot.slane %v3155_v2, 2  ;;  %v3037_v0 = vsel %vm1851_vm1, %v3035_v36, %v3036_v19  ;;  %v3039_v62 = vsel %vm1851_vm1, %v3036_v19, %v3038_v30 }
 0x3d2   : > { %v3280_v57 = vrot.slane %v3156_v48, 2  ;;  %v3282_v11 = vrot.slane %v3157_v20, 2  ;;  %v3105_v47 = vadd.f32 %v3037_v0, %v2861_v15  ;;  %v1717_v7 = vmul.f32 %v5587_v25, %v6879_v52 }
 0x3d3   : > { %v3106_v44 = vadd.f32 %v3039_v62, %v2862_v35  ;;  %v1800_v53 = vmul.f32 %v5580_v59, %v6879_v52  ;;  %v1801_v45 = vmul.f32 %v5580_v59, %v6888_v54  ;;  %v1802_v24 = vmul.f32 %v5580_v59, %v6896_v18 }
 0x3d4   : > { %v3281_v16 = vsel %vm2096_vm2, %v3279_v37, %v3280_v57  ;;  %v3283_v38 = vsel %vm2096_vm2, %v3280_v57, %v3282_v11  ;;  %v2045_v61 = vmul.f32 %v5584_v56, %v6879_v52  ;;  %v2046_v41 = vmul.f32 %v5584_v56, %v6888_v54 }
 0x3d5   : > { %v3349_v39 = vadd.f32 %v3281_v16, %v3105_v47  ;;  %v3350_v5 = vadd.f32 %v3283_v38, %v3106_v44  ;;  %v1927_v3 = vrot.slane %v1800_v53, 1  ;;  %v1928_v10 = vrot.slane %v1801_v45, 1  ;;  %v1677_v53 = vld [vmem:[#allocation2 + $0x198] sm:$0xff] }
 0x3d6   : > { %v1930_v4 = vrot.slane %v1802_v24, 1  ;;  %v2047_v60 = vmul.f32 %v5584_v56, %v6896_v18  ;;  %v1718_v59 = vmul.f32 %v5587_v25, %v6888_v54  ;;  %v2172_v63 = vrot.slane %v2045_v61, 2 }
 0x3d7   : > { %v3388_v14 = vmul.f32 %v6853_v51, %v3349_v39  ;;  %v3389_v13 = vmul.f32 %v6853_v51, %v3350_v5  ;;  %v4874_v21 = vpop.eup %4873  ;;  %v1929_v17 = vsel %vm1851_vm1, %v1927_v3, %v1928_v10  ;;  %v2173_v55 = vrot.slane %v2046_v41, 2 }
 0x3d8   : > { %v1931_v52 = vsel %vm1851_vm1, %v1928_v10, %v1930_v4  ;;  %v2175_v2 = vrot.slane %v2047_v60, 2  ;;  %v4876_v8 = vpop.eup %4875  ;;  %v3681_v31 = vadd.f32 1.0, %v4874_v21  ;;  %v1994_v18 = vadd.f32 %v1929_v17, %v1717_v7 }
 0x3d9   : > { %v7034_v36 = vadd.f32 %v6862_v29, %v3388_v14  ;;  %v7037_v56 = vadd.f32 %v6862_v29, %v3389_v13  ;;  %v3458_v19 = vmul.f32 0.5, %v6945_v6  ;;  %v3682_v25 = vadd.f32 1.0, %v4876_v8  ;;  %v1679_v13 = vld [vmem:[#allocation2 + $0x1a8] sm:$0x3] }
 0x3da   : > { %v1995_v54 = vadd.f32 %v1931_v52, %v1718_v59  ;;  %v2275_v30 = vmul.f32 %v5622_v43, %v6966_v23  ;;  %v3713_v48 = vmul.f32 %v3681_v31, %v3457_v49  ;;  %v2174_v15 = vsel %vm2096_vm2, %v2172_v63, %v2173_v55 }
 0x3db   : > { %v3491_v20 = vmul.f32 %v7034_v36, %v7034_v36  ;;  %v2176_v35 = vsel %vm2096_vm2, %v2173_v55, %v2175_v2  ;;  %v3714_v37 = vmul.f32 %v3682_v25, %v3458_v19  ;;  %v3492_v0 = vmul.f32 %v7037_v56, %v7037_v56  ;;  %v4953_v2 = vld [vmem:[#allocation2 + $0x8] sm:$0xff] }
 0x3dc   : > { %v2239_v62 = vadd.f32 %v2174_v15, %v1994_v18  ;;  %v2240_v57 = vadd.f32 %v2176_v35, %v1995_v54  ;;  %v2276_v11 = vmul.f32 %v5622_v43, %v6968_v32  ;;  %v2358_v49 = vmul.f32 %v5627_v33, %v6966_v23 }
 0x3dd   : > { %v3523_v6 = vmul.f32 %v3491_v20, %v7034_v36  ;;  %v2359_v47 = vmul.f32 %v5627_v33, %v6968_v32  ;;  %v3732_v44 = vpack.c.bf16 %v3714_v37, %v3713_v48  ;;  %v3524_v7 = vmul.f32 %v3492_v0, %v7037_v56 }
 0x3de   : > { %v2307_v16 = vadd.f32 %v2275_v30, %v2239_v62  ;;  %v2360_v38 = vmul.f32 %v5627_v33, %v6977_v27  ;;  %v2308_v24 = vadd.f32 %v2276_v11, %v2240_v57  ;;  %v2484_v39 = vrot.slane %v2358_v49, 1 }
 0x3df   : > { %v3555_v45 = vmul.f32 0.044715, %v3523_v6  ;;  %v2485_v5 = vrot.slane %v2359_v47, 1  ;;  %4651 = vmatmul.mubr.bf16.gmra.mrb[20].mxu1 %v3732_v44  ;;  %v3556_v43 = vmul.f32 0.044715, %v3524_v7  ;;  %v2602_v61 = vmul.f32 %v5630_v12, %v6966_v23 }
 0x3e0   : > { %v2487_v3 = vrot.slane %v2360_v38, 1  ;;  %v2603_v10 = vmul.f32 %v5630_v12, %v6968_v32  ;;  %v2604_v33 = vmul.f32 %v5630_v12, %v6977_v27  ;;  %v2831_v60 = vmul.f32 %v5632_v9, %v1677_v53  ;;  %v7083_v44 = vld [vmem:[%s7360_s10] ss:$0 sm:$0xff] }
 0x3e1   : > { %v3587_v4 = vadd.f32 %v3555_v45, %v7034_v36  ;;  %v2486_v41 = vsel %vm1851_vm1, %v2484_v39, %v2485_v5  ;;  %v3588_v14 = vadd.f32 %v3556_v43, %v7037_v56  ;;  %v2728_v21 = vrot.slane %v2602_v61, 2  ;;  %v7092_v38 = vld [vmem:[%s7361_s11] ss:$0 sm:$0xff] }
 0x3e2   : > { %v2488_v59 = vsel %vm1851_vm1, %v2485_v5, %v2487_v3  ;;  %v2551_v63 = vadd.f32 %v2486_v41, %v2307_v16  ;;  %v2729_v52 = vrot.slane %v2603_v10, 2  ;;  %v2731_v32 = vrot.slane %v2604_v33, 2 }
 0x3e3   : > { %v3619_v23 = vmul.f32 0.7978846, %v3587_v4  ;;  %v2552_v17 = vadd.f32 %v2488_v59, %v2308_v24  ;;  %v3620_v55 = vmul.f32 0.7978846, %v3588_v14  ;;  %v2832_v8 = vmul.f32 %v4953_v2, %v5632_v9 }
 0x3e4   : > { %v2914_v31 = vmul.f32 %v5634_v28, %v1677_v53  ;;  %v2915_v12 = vmul.f32 %v4953_v2, %v5634_v28  ;;  %v2730_v27 = vsel %vm2096_vm2, %v2728_v21, %v2729_v52  ;;  %v2732_v18 = vsel %vm2096_vm2, %v2729_v52, %v2731_v32 }
 0x3e5   : > { %4877 = vtanh.f32 %v3619_v23  ;;  %v2916_v19 = vmul.f32 %v5634_v28, %v1679_v13  ;;  %v2795_v25 = vadd.f32 %v2730_v27, %v2551_v63  ;;  %v2796_v54 = vadd.f32 %v2732_v18, %v2552_v17 }
 0x3e6   : > { %4879 = vtanh.f32 %v3620_v55  ;;  %v3040_v30 = vrot.slane %v2914_v31, 1  ;;  %v3041_v48 = vrot.slane %v2915_v12, 1  ;;  %v3158_v15 = vmul.f32 %v5636_v34, %v1677_v53 }
 0x3e7   : > { %v3043_v20 = vrot.slane %v2916_v19, 1  ;;  %v3159_v9 = vmul.f32 %v4953_v2, %v5636_v34  ;;  %v2863_v35 = vadd.f32 %v2831_v60, %v2795_v25  ;;  %v2864_v37 = vadd.f32 %v2832_v8, %v2796_v54 }
 0x3e8   : > { %v3160_v0 = vmul.f32 %v5636_v34, %v1679_v13  ;;  %v3042_v62 = vsel %vm1851_vm1, %v3040_v30, %v3041_v48  ;;  %v3284_v6 = vrot.slane %v3158_v15, 2  ;;  %v3968_v53 = vmul.f32 %v7083_v44, %v6817_v40 }
 0x3e9   : > { %v3044_v57 = vsel %vm1851_vm1, %v3041_v48, %v3043_v20  ;;  %v3285_v28 = vrot.slane %v3159_v9, 2  ;;  %v3107_v11 = vadd.f32 %v3042_v62, %v2863_v35  ;;  %v3967_v24 = vmul.f32 %v7083_v44, %v6807_v22 }
 0x3ea   : > { %v3108_v49 = vadd.f32 %v3044_v57, %v2864_v37  ;;  %v3287_v47 = vrot.slane %v3160_v0, 2  ;;  %v7097_v39 = vadd.f32 %v7092_v38, %v3968_v53  ;;  %v3459_v61 = vmul.f32 0.5, %v7034_v36 }
 0x3eb   : > { %v3286_v7 = vsel %vm2096_vm2, %v3284_v6, %v3285_v28  ;;  %v3460_v33 = vmul.f32 0.5, %v7037_v56  ;;  %v4006_v14 = vadd.f32 %v7092_v38, %v3967_v24  ;;  %v3969_v55 = vmul.f32 %v6802_v42, %v7083_v44 }
 0x3ec   : > { %v3288_v34 = vsel %vm2096_vm2, %v3285_v28, %v3287_v47  ;;  %v3351_v16 = vadd.f32 %v3286_v7, %v3107_v11  ;;  %v4071_v41 = vmul.f32 %v7097_v39, %v7097_v39  ;;  %v3970_v8 = vmul.f32 %v6812_v46, %v7083_v44 }
 0x3ed   : > { %v3352_v45 = vadd.f32 %v3288_v34, %v3108_v49  ;;  %v4070_v52 = vmul.f32 %v4006_v14, %v4006_v14  ;;  %v4008_v19 = vadd.f32 %v7092_v38, %v3969_v55 }
 0x3ee   : > { %v3390_v5 = vmul.f32 %v6853_v51, %v3351_v16  ;;  %v4103_v36 = vmul.f32 %v4071_v41, %v7097_v39  ;;  %v4009_v42 = vadd.f32 %v7092_v38, %v3970_v8  ;;  %v4038_v41 = vmul.f32 0.5, %v4006_v14  ;;  %v4957_v8 = vld [vmem:[%s5074_s26 + $0x18] sm:$0xff] }
 0x3ef   : > { %v4878_v43 = vpop.eup %4877  ;;  %v3391_v40 = vmul.f32 %v6853_v51, %v3352_v45  ;;  %v4102_v12 = vmul.f32 %v4070_v52, %v4006_v14  ;;  %v4072_v15 = vmul.f32 %v4008_v19, %v4008_v19 }
 0x3f0   : > { %v4880_v3 = vpop.eup %4879  ;;  %v3683_v10 = vadd.f32 1.0, %v4878_v43  ;;  %v3429_v4 = vadd.f32 %v6862_v29, %v3390_v5  ;;  %v4135_v2 = vmul.f32 0.044715, %v4103_v36  ;;  %v4073_v35 = vmul.f32 %v4009_v42, %v4009_v42 }
 0x3f1   : > { %v3684_v22 = vadd.f32 1.0, %v4880_v3  ;;  %v3430_v60 = vadd.f32 %v6862_v29, %v3391_v40  ;;  %v4134_v20 = vmul.f32 0.044715, %v4102_v12  ;;  %v4104_v0 = vmul.f32 %v4072_v15, %v4008_v19 }
 0x3f2   : > { %v3715_v13 = vmul.f32 %v3683_v10, %v3459_v61  ;;  %v3493_v59 = vmul.f32 %v3429_v4, %v3429_v4  ;;  %v4167_v30 = vadd.f32 %v4135_v2, %v7097_v39  ;;  %v4105_v57 = vmul.f32 %v4073_v35, %v4009_v42 }
 0x3f3   : > { %v3716_v63 = vmul.f32 %v3684_v22, %v3460_v33  ;;  %v3494_v51 = vmul.f32 %v3430_v60, %v3430_v60  ;;  %v4166_v37 = vadd.f32 %v4134_v20, %v4006_v14  ;;  %v4136_v28 = vmul.f32 0.044715, %v4104_v0 }
 0x3f4   : > { %v3525_v21 = vmul.f32 %v3493_v59, %v3429_v4  ;;  %v4199_v9 = vmul.f32 0.7978846, %v4167_v30  ;;  %v3461_v49 = vmul.f32 0.5, %v3429_v4  ;;  %v3462_v7 = vmul.f32 0.5, %v3430_v60 }
 0x3f5   : > { %v3733_v23 = vpack.c.bf16 %v3716_v63, %v3715_v13  ;;  %v3526_v17 = vmul.f32 %v3494_v51, %v3430_v60  ;;  %v4198_v62 = vmul.f32 0.7978846, %v4166_v37  ;;  %v4137_v34 = vmul.f32 0.044715, %v4105_v57  ;;  %v4954_v13 = vld [vmem:[%s5074_s26] sm:$0xff]  ;;  %v4955_v51 = vld [vmem:[%s5074_s26 + $0x8] sm:$0xff] }
 0x3f6   : > { %v3557_v32 = vmul.f32 0.044715, %v3525_v21  ;;  %v4168_v24 = vadd.f32 %v4136_v28, %v4008_v19  ;;  %v3972_v12 = vmul.f32 %v7083_v44, %v6998_v50  ;;  %v3974_v50 = vmul.f32 %v6990_v58, %v7083_v44 }
 0x3f7   : > { %4654 = vmatprep.mubr.bf16.mxu1 %v3733_v23  ;;  %v3558_v56 = vmul.f32 0.044715, %v3526_v17  ;;  %v4169_v43 = vadd.f32 %v4137_v34, %v4009_v42  ;;  %v4040_v23 = vmul.f32 0.5, %v4008_v19 }
 0x3f8   : > { %v3589_v29 = vadd.f32 %v3557_v32, %v3429_v4  ;;  %v4200_v3 = vmul.f32 0.7978846, %v4168_v24  ;;  %v4041_v32 = vmul.f32 0.5, %v4009_v42  ;;  %v7137_v20 = vadd.f32 %v7092_v38, %v3972_v12 }
 0x3f9   : > { %v3590_v31 = vadd.f32 %v3558_v56, %v3430_v60  ;;  %v7113_v27 = vpop.f32.mrb[4].mxu1  ;;  %v4201_v10 = vmul.f32 0.7978846, %v4169_v43  ;;  %v4039_v60 = vmul.f32 0.5, %v7097_v39  ;;  %v4956_v56 = vld [vmem:[%s5074_s26 + $0x10] sm:$0xff]  ;;  %v7152_v0 = vadd.f32 %v7092_v38, %v3974_v50 }
 0x3fa   : > { %v3621_v18 = vmul.f32 0.7978846, %v3589_v29  ;;  %v7116_v25 = vpop.f32.mrb[5].mxu1  ;;  %v3971_v29 = vmul.f32 %v7083_v44, %v6986_v26  ;;  %v3973_v26 = vmul.f32 %v6983_v1, %v7083_v44 }
 0x3fb   : > { %v3622_v54 = vmul.f32 0.7978846, %v3590_v31  ;;  %v7120_v48 = vpop.f32.mrb[6].mxu1  ;;  %v3975_v58 = vmul.f32 %v7083_v44, %v7116_v25  ;;  %v4077_v28 = vmul.f32 %v7152_v0, %v7152_v0 }
 0x3fc   : > { %4881 = vtanh.f32 %v3621_v18  ;;  %v7122_v46 = vpop.f32.mrb[7].mxu1  ;;  %v7134_v19 = vadd.f32 %v7092_v38, %v3971_v29  ;;  %v7149_v37 = vadd.f32 %v7092_v38, %v3973_v26 }
 0x3fd   : > { %4883 = vtanh.f32 %v3622_v54  ;;  %v4109_v25 = vmul.f32 %v4077_v28, %v7152_v0  ;;  %v4958_v28 = vld [vmem:[%s5074_s26 + $0x20] sm:$0xff] }
 0x3fe   : > { %4885 = vtanh.f32 %v4199_v9  ;;  %v4074_v15 = vmul.f32 %v7134_v19, %v7134_v19  ;;  %v4075_v9 = vmul.f32 %v7137_v20, %v7137_v20  ;;  %v4076_v1 = vmul.f32 %v7149_v37, %v7149_v37 }
 0x3ff   : > { %4887 = vtanh.f32 %v4198_v62 }
 0x400   : > { %4889 = vtanh.f32 %v4200_v3  ;;  %v4106_v35 = vmul.f32 %v4074_v15, %v7134_v19  ;;  %v4107_v62 = vmul.f32 %v4075_v9, %v7137_v20 }
 0x401   : > { %4891 = vtanh.f32 %v4201_v10 }
 0x402   : > { %v4138_v57 = vmul.f32 0.044715, %v4106_v35 }
 0x406   : > { %v4882_v6 = vpop.eup %4881 }
 0x407   : > { %v4884_v11 = vpop.eup %4883  ;;  %v3685_v47 = vadd.f32 1.0, %v4882_v6  ;;  %v3977_v6 = vmul.f32 %v7113_v27, %v7083_v44 }
 0x408   : > { %v3686_v53 = vadd.f32 1.0, %v4884_v11  ;;  %v4886_v40 = vpop.eup %4885  ;;  %v4139_v11 = vmul.f32 0.044715, %v4107_v62 }
 0x409   : > { %v3717_v16 = vmul.f32 %v3685_v47, %v3461_v49  ;;  %v4888_v61 = vpop.eup %4887  ;;  %v4263_v22 = vadd.f32 1.0, %v4886_v40  ;;  %v4170_v49 = vadd.f32 %v4138_v57, %v7134_v19  ;;  %v3976_v47 = vmul.f32 %v7083_v44, %v7122_v46 }
 0x40a   : > { %v3718_v45 = vmul.f32 %v3686_v53, %v3462_v7  ;;  %v4262_v33 = vadd.f32 1.0, %v4888_v61  ;;  %v4890_v36 = vpop.eup %4889  ;;  %v4108_v7 = vmul.f32 %v4076_v1, %v7149_v37  ;;  %v7168_v53 = vadd.f32 %v7092_v38, %v3975_v58 }
 0x40b   : > { %v4295_v63 = vmul.f32 %v4263_v22, %v4039_v60  ;;  %v4264_v17 = vadd.f32 1.0, %v4890_v36  ;;  %v4892_v14 = vpop.eup %4891  ;;  %v7171_v34 = vadd.f32 %v7092_v38, %v3977_v6  ;;  %v4171_v27 = vadd.f32 %v4139_v11, %v7137_v20 }
 0x40c   : > { %v3734_v5 = vpack.c.bf16 %v3718_v45, %v3717_v16  ;;  %v4294_v4 = vmul.f32 %v4262_v33, %v4038_v41  ;;  %v4265_v55 = vadd.f32 1.0, %v4892_v14  ;;  %v4202_v16 = vmul.f32 0.7978846, %v4170_v49 }
 0x40d   : > { %v4327_v21 = vadd.f32 %v4955_v51, %v4295_v63  ;;  %v4296_v52 = vmul.f32 %v4264_v17, %v4040_v23  ;;  %v3978_v45 = vmul.f32 %v7120_v48, %v7083_v44  ;;  %v7178_v24 = vadd.f32 %v7092_v38, %v3976_v47 }
 0x40e   : > { %4655 = vmatmul.mubr.bf16.gmra.mrb[24].mxu1 %v3734_v5  ;;  %v4326_v59 = vadd.f32 %v4954_v13, %v4294_v4  ;;  %v4297_v2 = vmul.f32 %v4265_v55, %v4041_v32  ;;  %v4140_v46 = vmul.f32 0.044715, %v4108_v7  ;;  %v4078_v5 = vmul.f32 %v7168_v53, %v7168_v53 }
 0x40f   : > { %v4328_v39 = vadd.f32 %v4956_v56, %v4296_v52  ;;  %v4080_v43 = vmul.f32 %v7171_v34, %v7171_v34  ;;  %v4141_v40 = vmul.f32 0.044715, %v4109_v25  ;;  %v4203_v3 = vmul.f32 0.7978846, %v4171_v27 }
 0x410   : > { %4358 = vxpose.xlu0.b32.start [1/16] (narrow) %v4326_v59, 32  ;;  %v4329_v31 = vadd.f32 %v4957_v8, %v4297_v2  ;;  %v7186_v10 = vadd.f32 %v7092_v38, %v3978_v45  ;;  %v4079_v48 = vmul.f32 %v7178_v24, %v7178_v24  ;;  %4893 = vtanh.f32 %v4202_v16 }
 0x411   : > { %v4172_v41 = vadd.f32 %v4140_v46, %v7149_v37  ;;  %v4110_v33 = vmul.f32 %v4078_v5, %v7168_v53  ;;  %v4112_v22 = vmul.f32 %v4080_v43, %v7171_v34  ;;  %v4173_v60 = vadd.f32 %v4141_v40, %v7152_v0  ;;  %v4959_v46 = vld [vmem:[%s5074_s26 + $0x28] sm:$0xff] }
 0x412   : > { %4895 = vtanh.f32 %v4203_v3  ;;  %v4081_v59 = vmul.f32 %v7186_v10, %v7186_v10  ;;  %v4111_v63 = vmul.f32 %v4079_v48, %v7178_v24  ;;  %v4043_v57 = vmul.f32 0.5, %v7137_v20 }
 0x413   : > { %v4204_v51 = vmul.f32 0.7978846, %v4172_v41  ;;  %v4144_v36 = vmul.f32 0.044715, %v4112_v22  ;;  %v4205_v52 = vmul.f32 0.7978846, %v4173_v60 }
 0x414   : > { %4359 = vxpose.xlu0.b32.cont [2/16] (narrow) %v4327_v21, 32  ;;  %v4142_v21 = vmul.f32 0.044715, %v4110_v33  ;;  %v4113_v55 = vmul.f32 %v4081_v59, %v7186_v10  ;;  %v4143_v56 = vmul.f32 0.044715, %v4111_v63  ;;  %v4044_v40 = vmul.f32 0.5, %v7149_v37 }
 0x415   : > { %4897 = vtanh.f32 %v4204_v51  ;;  %v4176_v29 = vadd.f32 %v4144_v36, %v7171_v34  ;;  %v4045_v22 = vmul.f32 0.5, %v7152_v0 }
 0x416   : > { %4899 = vtanh.f32 %v4205_v52  ;;  %v4175_v15 = vadd.f32 %v4143_v56, %v7178_v24 }
 0x417   : > { %v4208_v58 = vmul.f32 0.7978846, %v4176_v29 }
 0x418   : > { %4360 = vxpose.xlu0.b32.cont [3/16] (narrow) %v4328_v39, 32  ;;  %v4174_v39 = vadd.f32 %v4142_v21, %v7168_v53  ;;  %v4207_v47 = vmul.f32 0.7978846, %v4175_v15 }
 0x41a   : > { %v4894_v2 = vpop.eup %4893  ;;  %v4206_v50 = vmul.f32 0.7978846, %v4174_v39 }
 0x41c   : > { %4361 = vxpose.xlu0.b32.cont [4/16] (narrow) %v4329_v31, 32  ;;  %v4896_v26 = vpop.eup %4895  ;;  %4901 = vtanh.f32 %v4206_v50 }
 0x41d   : > { %v4267_v1 = vadd.f32 1.0, %v4896_v26  ;;  %4903 = vtanh.f32 %v4208_v58  ;;  %v4961_v26 = vld [vmem:[%s5074_s26 + $0x38] sm:$0xff] }
 0x41e   : > { %4905 = vtanh.f32 %v4207_v47 }
 0x41f   : > { %v4299_v7 = vmul.f32 %v4267_v1, %v4043_v57  ;;  %v4898_v16 = vpop.eup %4897  ;;  %v4046_v57 = vmul.f32 0.5, %v7168_v53 }
 0x420   : > { %v4268_v3 = vadd.f32 1.0, %v4898_v16 }
 0x421   : > { %v4331_v5 = vadd.f32 %v4959_v46, %v4299_v7 }
 0x422   : > { %v4300_v33 = vmul.f32 %v4268_v3, %v4044_v40 }
 0x427   : > { %v4640_v18 = vpop.f32.mrb[8].mxu1 }
 0x428   : > { %v3881_v54 = vpop.f32.mrb[9].mxu1  ;;  %v3981_v4 = vmul.f32 %v4640_v18, %v7083_v44 }
 0x429   : > { %v4641_v30 = vpop.f32.mrb[10].mxu1  ;;  %v3979_v61 = vmul.f32 %v7083_v44, %v3881_v54  ;;  %v4042_v54 = vmul.f32 0.5, %v7134_v19 }
 0x42a   : > { %v3884_v42 = vpop.f32.mrb[11].mxu1  ;;  %v7202_v23 = vadd.f32 %v7092_v38, %v3981_v4  ;;  %v3982_v17 = vmul.f32 %v4641_v30, %v7083_v44  ;;  %v4266_v30 = vadd.f32 1.0, %v4894_v2 }
 0x42b   : > { %v7196_v13 = vadd.f32 %v7092_v38, %v3979_v61  ;;  %v3980_v14 = vmul.f32 %v7083_v44, %v3884_v42  ;;  %v4145_v42 = vmul.f32 0.044715, %v4113_v55  ;;  %v4900_v61 = vpop.eup %4899 }
 0x42c   : > { %v4084_v8 = vmul.f32 %v7202_v23, %v7202_v23  ;;  %v7214_v31 = vadd.f32 %v7092_v38, %v3982_v17  ;;  %v4298_v9 = vmul.f32 %v4266_v30, %v4042_v54  ;;  %v4269_v4 = vadd.f32 1.0, %v4900_v61  ;;  %v4960_v17 = vld [vmem:[%s5074_s26 + $0x30] sm:$0xff]  ;;  %v4902_v30 = vpop.eup %4901 }
 0x42d   : > { %v4082_v32 = vmul.f32 %v7196_v13, %v7196_v13  ;;  %v7217_v12 = vadd.f32 %v7092_v38, %v3980_v14  ;;  %v4177_v49 = vadd.f32 %v4145_v42, %v7186_v10  ;;  %v4332_v14 = vadd.f32 %v4960_v17, %v4300_v33  ;;  %v4964_v17 = vld [vmem:[%s5074_s26 + $0x50] sm:$0xff] }
 0x42e   : > { %v4116_v35 = vmul.f32 %v4084_v8, %v7202_v23  ;;  %v4085_v19 = vmul.f32 %v7214_v31, %v7214_v31  ;;  %v4330_v11 = vadd.f32 %v4958_v28, %v4298_v9  ;;  %v4301_v52 = vmul.f32 %v4269_v4, %v4045_v22  ;;  %v4904_v9 = vpop.eup %4903 }
 0x42f   : > { %v4114_v18 = vmul.f32 %v4082_v32, %v7196_v13  ;;  %v4083_v62 = vmul.f32 %v7217_v12, %v7217_v12  ;;  %v4209_v43 = vmul.f32 0.7978846, %v4177_v49  ;;  %v4270_v1 = vadd.f32 1.0, %v4902_v30  ;;  %v4906_v58 = vpop.eup %4905 }
 0x430   : > { %4362 = vxpose.xlu0.b32.cont [5/16] (narrow) %v4330_v11, 32  ;;  %v4148_v25 = vmul.f32 0.044715, %v4116_v35  ;;  %v4117_v45 = vmul.f32 %v4085_v19, %v7214_v31  ;;  %v4333_v50 = vadd.f32 %v4961_v26, %v4301_v52  ;;  %v4047_v11 = vmul.f32 0.5, %v7178_v24 }
 0x431   : > { %v4146_v6 = vmul.f32 0.044715, %v4114_v18  ;;  %v4115_v27 = vmul.f32 %v4083_v62, %v7217_v12  ;;  %4907 = vtanh.f32 %v4209_v43  ;;  %v4302_v7 = vmul.f32 %v4270_v1, %v4046_v57 }
 0x432   : > { %v4180_v60 = vadd.f32 %v4148_v25, %v7202_v23  ;;  %v4149_v63 = vmul.f32 0.044715, %v4117_v45  ;;  %v4271_v25 = vadd.f32 1.0, %v4906_v58 }
 0x433   : > { %v4178_v20 = vadd.f32 %v4146_v6, %v7196_v13  ;;  %v4147_v48 = vmul.f32 0.044715, %v4115_v27 }
 0x434   : > { %4363 = vxpose.xlu0.b32.cont [6/16] (narrow) %v4331_v5, 32  ;;  %v4212_v29 = vmul.f32 0.7978846, %v4180_v60  ;;  %v4181_v8 = vadd.f32 %v4149_v63, %v7214_v31  ;;  %v4962_v5 = vld [vmem:[%s5074_s26 + $0x40] sm:$0xff]  ;;  %v4303_v40 = vmul.f32 %v4271_v25, %v4047_v11  ;;  %v4963_v60 = vld [vmem:[%s5074_s26 + $0x48] sm:$0xff] }
 0x435   : > { %v4210_v59 = vmul.f32 0.7978846, %v4178_v20  ;;  %v4179_v56 = vadd.f32 %v4147_v48, %v7217_v12  ;;  %v4272_v20 = vadd.f32 1.0, %v4904_v9  ;;  %v4334_v43 = vadd.f32 %v4962_v5, %v4302_v7 }
 0x436   : > { %v4213_v27 = vmul.f32 0.7978846, %v4181_v8 }
 0x437   : > { %4909 = vtanh.f32 %v4210_v59  ;;  %v4211_v6 = vmul.f32 0.7978846, %v4179_v56  ;;  %v4335_v59 = vadd.f32 %v4963_v60, %v4303_v40 }
 0x438   : > { %4364 = vxpose.xlu0.b32.cont [7/16] (narrow) %v4332_v14, 32 }
 0x439   : > { %4911 = vtanh.f32 %v4211_v6  ;;  %v4052_v6 = vmul.f32 0.5, %v7202_v23 }
 0x43a   : > { %4913 = vtanh.f32 %v4212_v29  ;;  %v4965_v29 = vld [vmem:[%s5074_s26 + $0x58] sm:$0xff] }
 0x43b   : > { %v4908_v3 = vpop.eup %4907  ;;  %4915 = vtanh.f32 %v4213_v27  ;;  %v4968_v27 = vld [vmem:[%s5074_s26 + $0x68] sm:$0xff] }
 0x43c   : > { %4365 = vxpose.xlu0.b32.cont [8/16] (narrow) %v4333_v50, 32 }
 0x440   : > { %4366 = vxpose.xlu0.b32.cont [9/16] (narrow) %v4334_v43, 32 }
 0x444   : > { %4367 = vxpose.xlu0.b32.cont [10/16] (narrow) %v4335_v59, 32 }
 0x456   : > { %v4644_v41 = vpop.f32.mrb[12].mxu1 }
 0x457   : > { %v3985_v51 = vmul.f32 %v4644_v41, %v7083_v44  ;;  %v3897_v21 = vpop.f32.mrb[13].mxu1  ;;  %v4048_v41 = vmul.f32 0.5, %v7171_v34  ;;  %v4049_v34 = vmul.f32 0.5, %v7186_v10  ;;  %v4051_v10 = vmul.f32 0.5, %v7217_v12 }
 0x458   : > { %v3983_v37 = vmul.f32 %v7083_v44, %v3897_v21  ;;  %v4645_v36 = vpop.f32.mrb[14].mxu1  ;;  %v4910_v21 = vpop.eup %4909 }
 0x459   : > { %v7241_v32 = vadd.f32 %v7092_v38, %v3985_v51  ;;  %v3986_v0 = vmul.f32 %v4645_v36, %v7083_v44  ;;  %v3900_v55 = vpop.f32.mrb[15].mxu1  ;;  %v4304_v63 = vmul.f32 %v4272_v20, %v4048_v41  ;;  %v4273_v51 = vadd.f32 1.0, %v4908_v3  ;;  %v4912_v56 = vpop.eup %4911  ;;  %v4969_v20 = vld [vmem:[%s5074_s26 + $0x70] sm:$0xff] }
 0x45a   : > { %v7246_v39 = vadd.f32 %v7092_v38, %v3983_v37  ;;  %v3984_v2 = vmul.f32 %v7083_v44, %v3900_v55  ;;  %v4050_v55 = vmul.f32 0.5, %v7196_v13  ;;  %v4275_v30 = vadd.f32 1.0, %v4912_v56  ;;  %v4966_v13 = vld [vmem:[%s5074_s26 + $0x60] sm:$0xff] }
 0x45b   : > { %v4088_v18 = vmul.f32 %v7241_v32, %v7241_v32  ;;  %v7253_v54 = vadd.f32 %v7092_v38, %v3986_v0  ;;  %v4336_v14 = vadd.f32 %v4964_v17, %v4304_v63  ;;  %v4305_v52 = vmul.f32 %v4273_v51, %v4049_v34 }
 0x45c   : > { %v4086_v42 = vmul.f32 %v7246_v39, %v7246_v39  ;;  %v7258_v15 = vadd.f32 %v7092_v38, %v3984_v2  ;;  %v4274_v0 = vadd.f32 1.0, %v4910_v21  ;;  %v4914_v2 = vpop.eup %4913  ;;  %v4307_v1 = vmul.f32 %v4275_v30, %v4051_v10 }
 0x45d   : > { %v4120_v35 = vmul.f32 %v4088_v18, %v7241_v32  ;;  %v4089_v62 = vmul.f32 %v7253_v54, %v7253_v54  ;;  %4368 = vxpose.xlu0.b32.cont [11/16] (narrow) %v4336_v14, 32  ;;  %v4337_v8 = vadd.f32 %v4965_v29, %v4305_v52  ;;  %v4276_v50 = vadd.f32 1.0, %v4914_v2 }
 0x45e   : > { %v4118_v19 = vmul.f32 %v4086_v42, %v7246_v39  ;;  %v4087_v28 = vmul.f32 %v7258_v15, %v7258_v15  ;;  %v4306_v18 = vmul.f32 %v4274_v0, %v4050_v55  ;;  %v4916_v42 = vpop.eup %4915  ;;  %v4056_v23 = vmul.f32 0.5, %v7241_v32 }
 0x45f   : > { %v4152_v49 = vmul.f32 0.044715, %v4120_v35  ;;  %v4121_v47 = vmul.f32 %v4089_v62, %v7253_v54  ;;  %v4054_v35 = vmul.f32 0.5, %v7246_v39  ;;  %v4308_v12 = vmul.f32 %v4276_v50, %v4052_v6 }
 0x460   : > { %v4150_v16 = vmul.f32 0.044715, %v4118_v19  ;;  %v4119_v53 = vmul.f32 %v4087_v28, %v7258_v15  ;;  %v4338_v57 = vadd.f32 %v4966_v13, %v4306_v18  ;;  %v4055_v28 = vmul.f32 0.5, %v7258_v15 }
 0x461   : > { %v4184_v45 = vadd.f32 %v4152_v49, %v7241_v32  ;;  %v4153_v46 = vmul.f32 0.044715, %v4121_v47  ;;  %4369 = vxpose.xlu0.b32.cont [12/16] (narrow) %v4337_v8, 32  ;;  %v4277_v49 = vadd.f32 1.0, %v4916_v42  ;;  %v4967_v47 = vld [vmem:[%s5074_s26 + $0x80] sm:$0xff]  ;;  %v4972_v32 = vld [vmem:[%s5074_s26 + $0x78] sm:$0xff] }
 0x462   : > { %v4151_v61 = vmul.f32 0.044715, %v4119_v53  ;;  %v4182_v24 = vadd.f32 %v4150_v16, %v7246_v39  ;;  %v4339_v16 = vadd.f32 %v4968_v27, %v4307_v1 }
 0x463   : > { %v4216_v48 = vmul.f32 0.7978846, %v4184_v45  ;;  %v4185_v33 = vadd.f32 %v4153_v46, %v7253_v54  ;;  %v4340_v45 = vadd.f32 %v4969_v20, %v4308_v12  ;;  %v4970_v46 = vld [vmem:[%s5074_s26 + $0x88] sm:$0xff] }
 0x464   : > { %v4183_v22 = vadd.f32 %v4151_v61, %v7258_v15  ;;  %v4214_v4 = vmul.f32 0.7978846, %v4182_v24  ;;  %v4053_v15 = vmul.f32 0.5, %v7214_v31  ;;  %v4057_v61 = vmul.f32 0.5, %v7253_v54  ;;  %v4971_v24 = vld [vmem:[%s5074_s26 + $0x90] sm:$0xff]  ;;  %v4973_v31 = vld [vmem:[%s5074_s26 + $0x98] sm:$0xff] }
 0x465   : > { %v4217_v36 = vmul.f32 0.7978846, %v4185_v33  ;;  %4370 = vxpose.xlu0.b32.cont [13/16] (narrow) %v4338_v57, 32 }
 0x466   : > { %v4215_v37 = vmul.f32 0.7978846, %v4183_v22  ;;  %4917 = vtanh.f32 %v4214_v4  ;;  %v4309_v3 = vmul.f32 %v4277_v49, %v4053_v15  ;;  %v4975_v15 = vld [vmem:[%s5074_s26 + $0xa8] sm:$0xff] }
 0x467   : > { %4919 = vtanh.f32 %v4216_v48 }
 0x468   : > { %4921 = vtanh.f32 %v4215_v37  ;;  %v4341_v33 = vadd.f32 %v4972_v32, %v4309_v3 }
 0x469   : > { %4923 = vtanh.f32 %v4217_v36  ;;  %4371 = vxpose.xlu0.b32.cont [14/16] (narrow) %v4339_v16, 32 }
 0x46d   : > { %4372 = vxpose.xlu0.b32.cont [15/16] (narrow) %v4340_v45, 32 }
 0x470   : > { %v4918_v26 = vpop.eup %4917 }
 0x471   : > { %v4920_v9 = vpop.eup %4919  ;;  %v4278_v62 = vadd.f32 1.0, %v4918_v26  ;;  %4373 = vxpose.xlu0.b32.end [16/16] (narrow) %v4341_v33, 32 }
 0x472   : > { %v4922_v58 = vpop.eup %4921  ;;  %v4280_v25 = vadd.f32 1.0, %v4920_v9 }
 0x473   : > { %v4310_v19 = vmul.f32 %v4278_v62, %v4054_v35  ;;  %v4279_v11 = vadd.f32 1.0, %v4922_v58  ;;  %v4924_v53 = vpop.eup %4923 }
 0x474   : > { %v4312_v43 = vmul.f32 %v4280_v25, %v4056_v23  ;;  %v4281_v40 = vadd.f32 1.0, %v4924_v53 }
 0x475   : > { %v4342_v7 = vadd.f32 %v4967_v47, %v4310_v19  ;;  %v4311_v39 = vmul.f32 %v4279_v11, %v4055_v28 }
 0x476   : > { %v4344_v48 = vadd.f32 %v4971_v24, %v4312_v43  ;;  %v4313_v41 = vmul.f32 %v4281_v40, %v4057_v61  ;;  %v4976_v43 = vld [vmem:[%s5074_s26 + $0xb0] sm:$0xff]  ;;  %v4977_v61 = vld [vmem:[%s5074_s26 + $0xb8] sm:$0xff] }
 0x477   : > { %4390 = vxpose.xlu1.b32.start [1/16] (narrow) %v4342_v7, 32  ;;  %v4343_v5 = vadd.f32 %v4970_v46, %v4311_v39  ;;  %v4974_v39 = vld [vmem:[%s5074_s26 + $0xa0] sm:$0xff] }
 0x478   : > { %v4345_v22 = vadd.f32 %v4973_v31, %v4313_v41 }
 0x47b   : > { %4391 = vxpose.xlu1.b32.cont [2/16] (narrow) %v4343_v5, 32 }
 0x47f   : > { %4392 = vxpose.xlu1.b32.cont [3/16] (narrow) %v4344_v48, 32 }
 0x483   : > { %4393 = vxpose.xlu1.b32.cont [4/16] (narrow) %v4345_v22, 32 }
 0x484   : > { %v4648_v4 = vpop.f32.mrb[16].mxu1 }
 0x485   : > { %v3989_v60 = vmul.f32 %v4648_v4, %v7083_v44  ;;  %v3913_v59 = vpop.f32.mrb[17].mxu1 }
 0x486   : > { %v3987_v63 = vmul.f32 %v7083_v44, %v3913_v59  ;;  %v4649_v51 = vpop.f32.mrb[18].mxu1 }
 0x487   : > { %v4028_v54 = vadd.f32 %v7092_v38, %v3989_v60  ;;  %v3990_v21 = vmul.f32 %v4649_v51, %v7083_v44  ;;  %v3916_v37 = vpop.f32.mrb[19].mxu1 }
 0x488   : > { %v4026_v34 = vadd.f32 %v7092_v38, %v3987_v63  ;;  %v3988_v36 = vmul.f32 %v7083_v44, %v3916_v37 }
 0x489   : > { %v4092_v17 = vmul.f32 %v4028_v54, %v4028_v54  ;;  %v4029_v14 = vadd.f32 %v7092_v38, %v3990_v21  ;;  %v4060_v23 = vmul.f32 0.5, %v4028_v54 }
 0x48a   : > { %v4090_v52 = vmul.f32 %v4026_v34, %v4026_v34  ;;  %v4027_v0 = vadd.f32 %v7092_v38, %v3988_v36  ;;  %v4058_v28 = vmul.f32 0.5, %v4026_v34 }
 0x48b   : > { %v4124_v55 = vmul.f32 %v4092_v17, %v4028_v54  ;;  %v4093_v56 = vmul.f32 %v4029_v14, %v4029_v14  ;;  %v4061_v5 = vmul.f32 0.5, %v4029_v14 }
 0x48c   : > { %v4122_v2 = vmul.f32 %v4090_v52, %v4026_v34  ;;  %v4091_v29 = vmul.f32 %v4027_v0, %v4027_v0  ;;  %v4059_v47 = vmul.f32 0.5, %v4027_v0 }
 0x48d   : > { %v4156_v8 = vmul.f32 0.044715, %v4124_v55  ;;  %v4125_v18 = vmul.f32 %v4093_v56, %v4029_v14 }
 0x48e   : > { %v4154_v30 = vmul.f32 0.044715, %v4122_v2  ;;  %v4123_v42 = vmul.f32 %v4091_v29, %v4027_v0 }
 0x48f   : > { %v4188_v10 = vadd.f32 %v4156_v8, %v4028_v54  ;;  %v4157_v26 = vmul.f32 0.044715, %v4125_v18 }
 0x490   : > { %v4186_v50 = vadd.f32 %v4154_v30, %v4026_v34  ;;  %v4155_v9 = vmul.f32 0.044715, %v4123_v42 }
 0x491   : > { %v4220_v35 = vmul.f32 0.7978846, %v4188_v10  ;;  %v4189_v13 = vadd.f32 %v4157_v26, %v4029_v14 }
 0x492   : > { %v4218_v62 = vmul.f32 0.7978846, %v4186_v50  ;;  %v4187_v57 = vadd.f32 %v4155_v9, %v4027_v0 }
 0x493   : > { %v4221_v58 = vmul.f32 0.7978846, %v4189_v13 }
 0x494   : > { %v4219_v1 = vmul.f32 0.7978846, %v4187_v57  ;;  %4925 = vtanh.f32 %v4218_v62 }
 0x495   : > { %4927 = vtanh.f32 %v4220_v35 }
 0x496   : > { %4929 = vtanh.f32 %v4219_v1 }
 0x497   : > { %4931 = vtanh.f32 %v4221_v58 }
 0x49e   : > { %v4926_v6 = vpop.eup %4925 }
 0x49f   : > { %v4928_v19 = vpop.eup %4927  ;;  %v4282_v11 = vadd.f32 1.0, %v4926_v6 }
 0x4a0   : > { %v4930_v12 = vpop.eup %4929  ;;  %v4284_v16 = vadd.f32 1.0, %v4928_v19 }
 0x4a1   : > { %v4314_v49 = vmul.f32 %v4282_v11, %v4058_v28  ;;  %v4283_v7 = vadd.f32 1.0, %v4930_v12  ;;  %v4932_v53 = vpop.eup %4931  ;;  %v4978_v11 = vld [vmem:[%s5074_s26 + $0xc0] sm:$0xff] }
 0x4a2   : > { %v4316_v45 = vmul.f32 %v4284_v16, %v4060_v23  ;;  %v4285_v46 = vadd.f32 1.0, %v4932_v53 }
 0x4a3   : > { %v4346_v25 = vadd.f32 %v4974_v39, %v4314_v49  ;;  %v4315_v27 = vmul.f32 %v4283_v7, %v4059_v47 }
 0x4a4   : > { %v4348_v40 = vadd.f32 %v4976_v43, %v4316_v45  ;;  %v4317_v3 = vmul.f32 %v4285_v46, %v4061_v5  ;;  %v4980_v45 = vld [vmem:[%s5074_s26 + $0xd0] sm:$0xff] }
 0x4a5   : > { %4394 = vxpose.xlu1.b32.cont [5/16] (narrow) %v4346_v25, 32  ;;  %v4347_v20 = vadd.f32 %v4975_v15, %v4315_v27  ;;  %v4979_v27 = vld [vmem:[%s5074_s26 + $0xc8] sm:$0xff] }
 0x4a6   : > { %v4349_v24 = vadd.f32 %v4977_v61, %v4317_v3 }
 0x4a9   : > { %4395 = vxpose.xlu1.b32.cont [6/16] (narrow) %v4347_v20, 32 }
 0x4ad   : > { %4396 = vxpose.xlu1.b32.cont [7/16] (narrow) %v4348_v40, 32  ;;  %v4981_v40 = vld [vmem:[%s5074_s26 + $0xd8] sm:$0xff] }
 0x4b1   : > { %4397 = vxpose.xlu1.b32.cont [8/16] (narrow) %v4349_v24, 32 }
 0x4b2   : > { %v4652_v48 = vpop.f32.mrb[20].mxu1 }
 0x4b3   : > { %v3993_v41 = vmul.f32 %v4652_v48, %v7083_v44  ;;  %v3929_v32 = vpop.f32.mrb[21].mxu1 }
 0x4b4   : > { %v3991_v33 = vmul.f32 %v7083_v44, %v3929_v32  ;;  %v4653_v31 = vpop.f32.mrb[22].mxu1 }
 0x4b5   : > { %v4032_v22 = vadd.f32 %v7092_v38, %v3993_v41  ;;  %v3994_v4 = vmul.f32 %v4653_v31, %v7083_v44  ;;  %v3932_v60 = vpop.f32.mrb[23].mxu1  ;;  %v4374_v9 = vpop.trf.xlu0 }
 0x4b6   : > { %v4030_v59 = vadd.f32 %v7092_v38, %v3991_v33  ;;  %v3992_v63 = vmul.f32 %v7083_v44, %v3932_v60  ;;  %4422 = vst [vmem:[%s7321_s17] sm:$0xff] %v4374_v9 }
 0x4b7   : > { %v4096_v51 = vmul.f32 %v4032_v22, %v4032_v22  ;;  %v4033_v54 = vadd.f32 %v7092_v38, %v3994_v4  ;;  %v4064_v25 = vmul.f32 0.5, %v4032_v22 }
 0x4b8   : > { %v4094_v21 = vmul.f32 %v4030_v59, %v4030_v59  ;;  %v4031_v37 = vadd.f32 %v7092_v38, %v3992_v63  ;;  %v4062_v57 = vmul.f32 0.5, %v4030_v59 }
 0x4b9   : > { %v4128_v34 = vmul.f32 %v4096_v51, %v4032_v22  ;;  %v4097_v36 = vmul.f32 %v4033_v54, %v4033_v54  ;;  %v4375_v39 = vpop.trf.xlu0  ;;  %v4065_v20 = vmul.f32 0.5, %v4033_v54 }
 0x4ba   : > { %v4126_v17 = vmul.f32 %v4094_v21, %v4030_v59  ;;  %v4095_v14 = vmul.f32 %v4031_v37, %v4031_v37  ;;  %v4063_v19 = vmul.f32 0.5, %v4031_v37  ;;  %4424 = vst [vmem:[%s7321_s17 + $0x10] sm:$0xff] %v4375_v39 }
 0x4bb   : > { %v4160_v52 = vmul.f32 0.044715, %v4128_v34  ;;  %v4129_v0 = vmul.f32 %v4097_v36, %v4033_v54 }
 0x4bc   : > { %v4158_v55 = vmul.f32 0.044715, %v4126_v17  ;;  %v4127_v56 = vmul.f32 %v4095_v14, %v4031_v37 }
 0x4bd   : > { %v4192_v2 = vadd.f32 %v4160_v52, %v4032_v22  ;;  %v4161_v29 = vmul.f32 0.044715, %v4129_v0  ;;  %v4376_v15 = vpop.trf.xlu0 }
 0x4be   : > { %v4190_v8 = vadd.f32 %v4158_v55, %v4030_v59  ;;  %v4159_v18 = vmul.f32 0.044715, %v4127_v56  ;;  %4426 = vst [vmem:[%s7321_s17 + $0x20] sm:$0xff] %v4376_v15 }
 0x4bf   : > { %v4224_v30 = vmul.f32 0.7978846, %v4192_v2  ;;  %v4193_v10 = vadd.f32 %v4161_v29, %v4033_v54 }
 0x4c0   : > { %v4222_v42 = vmul.f32 0.7978846, %v4190_v8  ;;  %v4191_v26 = vadd.f32 %v4159_v18, %v4031_v37 }
 0x4c1   : > { %v4225_v35 = vmul.f32 0.7978846, %v4193_v10  ;;  %v4377_v43 = vpop.trf.xlu0 }
 0x4c2   : > { %v4223_v50 = vmul.f32 0.7978846, %v4191_v26  ;;  %4933 = vtanh.f32 %v4222_v42  ;;  %4428 = vst [vmem:[%s7321_s17 + $0x30] sm:$0xff] %v4377_v43 }
 0x4c3   : > { %4935 = vtanh.f32 %v4224_v30 }
 0x4c4   : > { %4937 = vtanh.f32 %v4223_v50 }
 0x4c5   : > { %4939 = vtanh.f32 %v4225_v35 }
 0x4cc   : > { %v4934_v62 = vpop.eup %4933 }
 0x4cd   : > { %v4936_v13 = vpop.eup %4935  ;;  %v4286_v1 = vadd.f32 1.0, %v4934_v62 }
 0x4ce   : > { %v4938_v58 = vpop.eup %4937  ;;  %v4288_v47 = vadd.f32 1.0, %v4936_v13 }
 0x4cf   : > { %v4318_v6 = vmul.f32 %v4286_v1, %v4062_v57  ;;  %v4287_v28 = vadd.f32 1.0, %v4938_v58  ;;  %v4940_v7 = vpop.eup %4939  ;;  %v4982_v1 = vld [vmem:[%s5074_s26 + $0xe0] sm:$0xff] }
 0x4d0   : > { %v4320_v53 = vmul.f32 %v4288_v47, %v4064_v25  ;;  %v4289_v23 = vadd.f32 1.0, %v4940_v7  ;;  %v4984_v25 = vld [vmem:[%s5074_s26 + $0xf0] sm:$0xff] }
 0x4d1   : > { %v4350_v12 = vadd.f32 %v4978_v11, %v4318_v6  ;;  %v4319_v49 = vmul.f32 %v4287_v28, %v4063_v19 }
 0x4d2   : > { %v4352_v46 = vadd.f32 %v4980_v45, %v4320_v53  ;;  %v4321_v5 = vmul.f32 %v4289_v23, %v4065_v20  ;;  %v4985_v53 = vld [vmem:[%s5074_s26 + $0xf8] sm:$0xff] }
 0x4d3   : > { %4398 = vxpose.xlu1.b32.cont [9/16] (narrow) %v4350_v12, 32  ;;  %v4351_v16 = vadd.f32 %v4979_v27, %v4319_v49  ;;  %v4983_v12 = vld [vmem:[%s5074_s26 + $0xe8] sm:$0xff] }
 0x4d4   : > { %v4353_v3 = vadd.f32 %v4981_v40, %v4321_v5 }
 0x4d7   : > { %4399 = vxpose.xlu1.b32.cont [10/16] (narrow) %v4351_v16, 32 }
 0x4db   : > { %4400 = vxpose.xlu1.b32.cont [11/16] (narrow) %v4352_v46, 32 }
 0x4df   : > { %4401 = vxpose.xlu1.b32.cont [12/16] (narrow) %v4353_v3, 32 }
 0x4e1   : > { %v4656_v61 = vpop.f32.mrb[24].mxu1 }
 0x4e2   : > { %v3997_v24 = vmul.f32 %v4656_v61, %v7083_v44  ;;  %v3945_v48 = vpop.f32.mrb[25].mxu1 }
 0x4e3   : > { %v3995_v41 = vmul.f32 %v7083_v44, %v3945_v48  ;;  %v4657_v32 = vpop.f32.mrb[26].mxu1 }
 0x4e4   : > { %v4036_v33 = vadd.f32 %v7092_v38, %v3997_v24  ;;  %v3998_v31 = vmul.f32 %v4657_v32, %v7083_v44  ;;  %v3948_v22 = vpop.f32.mrb[27].mxu1 }
 0x4e5   : > { %v4034_v4 = vadd.f32 %v7092_v38, %v3995_v41  ;;  %v3996_v60 = vmul.f32 %v7083_v44, %v3948_v22 }
 0x4e6   : > { %v4100_v59 = vmul.f32 %v4036_v33, %v4036_v33  ;;  %v4037_v63 = vadd.f32 %v7092_v38, %v3998_v31  ;;  %v4068_v11 = vmul.f32 0.5, %v4036_v33 }
 0x4e7   : > { %v4098_v51 = vmul.f32 %v4034_v4, %v4034_v4  ;;  %v4035_v54 = vadd.f32 %v7092_v38, %v3996_v60  ;;  %v4066_v50 = vmul.f32 0.5, %v4034_v4 }
 0x4e8   : > { %v4132_v21 = vmul.f32 %v4100_v59, %v4036_v33  ;;  %v4101_v37 = vmul.f32 %v4037_v63, %v4037_v63  ;;  %v4069_v39 = vmul.f32 0.5, %v4037_v63 }
 0x4e9   : > { %v4130_v34 = vmul.f32 %v4098_v51, %v4034_v4  ;;  %v4099_v36 = vmul.f32 %v4035_v54, %v4035_v54  ;;  %v4067_v13 = vmul.f32 0.5, %v4035_v54 }
 0x4ea   : > { %v4164_v17 = vmul.f32 0.044715, %v4132_v21  ;;  %v4133_v14 = vmul.f32 %v4101_v37, %v4037_v63 }
 0x4eb   : > { %v4162_v52 = vmul.f32 0.044715, %v4130_v34  ;;  %v4131_v0 = vmul.f32 %v4099_v36, %v4035_v54 }
 0x4ec   : > { %v4196_v55 = vadd.f32 %v4164_v17, %v4036_v33  ;;  %v4165_v56 = vmul.f32 0.044715, %v4133_v14 }
 0x4ed   : > { %v4194_v2 = vadd.f32 %v4162_v52, %v4034_v4  ;;  %v4163_v29 = vmul.f32 0.044715, %v4131_v0 }
 0x4ee   : > { %v4228_v8 = vmul.f32 0.7978846, %v4196_v55  ;;  %v4197_v18 = vadd.f32 %v4165_v56, %v4037_v63 }
 0x4ef   : > { %v4226_v44 = vmul.f32 0.7978846, %v4194_v2  ;;  %v4195_v30 = vadd.f32 %v4163_v29, %v4035_v54 }
 0x4f0   : > { %v4229_v38 = vmul.f32 0.7978846, %v4197_v18 }
 0x4f1   : > { %v4227_v42 = vmul.f32 0.7978846, %v4195_v30  ;;  %4941 = vtanh.f32 %v4226_v44 }
 0x4f2   : > { %4943 = vtanh.f32 %v4228_v8 }
 0x4f3   : > { %4945 = vtanh.f32 %v4227_v42 }
 0x4f4   : > { %4947 = vtanh.f32 %v4229_v38 }
 0x4fb   : > { %v4942_v10 = vpop.eup %4941 }
 0x4fc   : > { %v4944_v26 = vpop.eup %4943  ;;  %v4290_v9 = vadd.f32 1.0, %v4942_v10 }
 0x4fd   : > { %v4946_v35 = vpop.eup %4945  ;;  %v4292_v19 = vadd.f32 1.0, %v4944_v26 }
 0x4fe   : > { %v4322_v62 = vmul.f32 %v4290_v9, %v4066_v50  ;;  %v4291_v57 = vadd.f32 1.0, %v4946_v35  ;;  %v4948_v28 = vpop.eup %4947 }
 0x4ff   : > { %v4324_v47 = vmul.f32 %v4292_v19, %v4068_v11  ;;  %v4293_v7 = vadd.f32 1.0, %v4948_v28 }
 0x500   : > { %v4354_v58 = vadd.f32 %v4982_v1, %v4322_v62  ;;  %v4323_v6 = vmul.f32 %v4291_v57, %v4067_v13 }
 0x501   : > { %v4356_v27 = vadd.f32 %v4984_v25, %v4324_v47  ;;  %v4325_v16 = vmul.f32 %v4293_v7, %v4069_v39 }
 0x502   : > { %4402 = vxpose.xlu1.b32.cont [13/16] (narrow) %v4354_v58, 32  ;;  %v4355_v49 = vadd.f32 %v4983_v12, %v4323_v6 }
 0x503   : > { %v4357_v23 = vadd.f32 %v4985_v53, %v4325_v16 }
 0x506   : > { %4403 = vxpose.xlu1.b32.cont [14/16] (narrow) %v4355_v49, 32 }
 0x50a   : > { %4404 = vxpose.xlu1.b32.cont [15/16] (narrow) %v4356_v27, 32 }
 0x50e   : > { %4405 = vxpose.xlu1.b32.end [16/16] (narrow) %v4357_v23, 32 }
 0x552   : > { %v4406_v15 = vpop.trf.xlu1 }
 0x553   : > { %4423 = vst [vmem:[%s7321_s17 + $0x8] sm:$0xff] %v4406_v15 }
 0x556   : > { %v4407_v20 = vpop.trf.xlu1 }
 0x557   : > { %4425 = vst [vmem:[%s7321_s17 + $0x18] sm:$0xff] %v4407_v20 }
 0x55a   : > { %v4408_v45 = vpop.trf.xlu1 }
 0x55b   : > { %4427 = vst [vmem:[%s7321_s17 + $0x28] sm:$0xff] %v4408_v45 }
 0x55e   : > { %v4409_v46 = vpop.trf.xlu1 }
 0x55f   : > { %4429 = vst [vmem:[%s7321_s17 + $0x38] sm:$0xff] %v4409_v46 }
 0x560 PF: > { %s22_s21 = sadd.s32 1, %s4992_s21  }
 0x561   : > { %p19_p4 = scmp.ge.s32.totalorder %s22_s21, 4  }
 0x563   :  { %21 = sbr.rel (!%p19_p4) target bundleno = 1 (0x1), region = 100 }

</bundles_post_ra>
